<compile_context>
chip_gen: v5e
topology: v5e:2x2
jax: 0.10.0
libtpu: 0.0.40
codegen_flags: <defaults>
</compile_context>

<pallas_src>
import functools

import numpy as np
import jax
import jax.numpy as jnp
from jax.experimental import pallas as pl
from jax.experimental.pallas import tpu as pltpu


# ------------------------------------ helpers -------------------------------------

_SUBLANE = 8
_LANE = 128


def _round_up(x, m):
    return ((x + m - 1) // m) * m


def _vmem_capacity_bytes():
    """Best-effort VMEM capacity query; conservative (v7x per-core) fallback."""
    cap = 64 * 1024 * 1024
    try:
        info = pltpu.get_tpu_info()
        cap = int(getattr(info, "vmem_capacity_bytes", cap) or cap)
    except Exception:
        pass
    return cap


def _layer_vmem_bytes(Tc, Bp, Din, Hp, num_dirs, pool, in_bytes):
    """Rough per-pallas_call VMEM footprint (double-buffered blocks + scratch)."""
    x_blk = 2 * num_dirs * Tc * Bp * Din * in_bytes
    m_blk = (2 * num_dirs * Tc * Bp * 4) if pool else 0
    w_blk = 2 * num_dirs * ((Din + Hp) * 4 * Hp * in_bytes + 4 * Hp * 4)
    out_blk = (2 * num_dirs * Bp * Hp * 4) if pool else (2 * num_dirs * Tc * Bp * Hp * in_bytes)
    scratch = num_dirs * (Tc * Bp * 4 * Hp * 4 + 2 * Bp * Hp * 4) + (Bp * 4 if pool else 0)
    return x_blk + m_blk + w_blk + out_blk + scratch


def _choose_time_chunk(T, Bp, Hp, max_din, num_dirs, in_bytes, budget, cap=32):
    """Largest time chunk <= cap whose VMEM footprint fits the budget."""
    tc = max(1, min(cap, T))

    def need(t):
        return max(_layer_vmem_bytes(t, Bp, max_din, Hp, num_dirs, True, in_bytes),
                   _layer_vmem_bytes(t, Bp, max_din, Hp, num_dirs, False, in_bytes))

    while tc > 1 and need(tc) > budget:
        tc //= 2
    return tc


def _lstm_cell_step(gx_t, h, c, whh, Hp):
    """One LSTM cell update.  gx_t already holds x @ W_ih^T + (b_ih + b_hh) in f32."""
    gates = gx_t + jnp.dot(h.astype(whh.dtype), whh,
                           preferred_element_type=jnp.float32)       # (Bp, 4Hp) f32
    i = jax.nn.sigmoid(gates[:, 0 * Hp:1 * Hp])
    f = jax.nn.sigmoid(gates[:, 1 * Hp:2 * Hp])
    g = jnp.tanh(gates[:, 2 * Hp:3 * Hp])
    o = jax.nn.sigmoid(gates[:, 3 * Hp:4 * Hp])
    c_new = f * c + i * g
    h_new = o * jnp.tanh(c_new)
    return h_new, c_new


# --------------------------- fused recurrence kernel -------------------------------

def _make_lstm_kernel(*, Tc, nc, T_real, Bp, Hp, num_dirs, pool, out_dtype, unroll):
    """One kernel handles 1 or 2 directions; pool=True fuses masked-mean pooling."""
    T_pad = nc * Tc
    has_tail = (T_pad != T_real)

    def kernel(*refs):
        i = 0
        x_refs = refs[i:i + num_dirs]; i += num_dirs
        m_refs = ()
        if pool:
            m_refs = refs[i:i + num_dirs]; i += num_dirs
        w_refs = refs[i:i + 3 * num_dirs]; i += 3 * num_dirs
        if pool:
            pooled_ref = refs[i]; i += 1
            out_refs = ()
        else:
            out_refs = refs[i:i + num_dirs]; i += num_dirs
        gx_sc = refs[i:i + num_dirs]; i += num_dirs
        h_sc = refs[i:i + num_dirs]; i += num_dirs
        c_sc = refs[i:i + num_dirs]; i += num_dirs
        len_sc = refs[i] if pool else None

        c_idx = pl.program_id(0)

        @pl.when(c_idx == 0)
        def _():
            for d in range(num_dirs):
                h_sc[d][...] = jnp.zeros_like(h_sc[d])
                c_sc[d][...] = jnp.zeros_like(c_sc[d])
            if pool:
                pooled_ref[...] = jnp.zeros_like(pooled_ref)
                len_sc[...] = jnp.zeros_like(len_sc)

        # Hoisted per-chunk input projection: one big MXU matmul per direction,
        # hidden under the serial recurrence's MXU slack.  Result stays in VMEM.
        whh = []
        for d in range(num_dirs):
            wih_ref, whh_ref, b_ref = w_refs[3 * d], w_refs[3 * d + 1], w_refs[3 * d + 2]
            gx_sc[d][...] = (jnp.dot(x_refs[d][...], wih_ref[...],
                                     preferred_element_type=jnp.float32)
                             + b_ref[...])
            whh.append(whh_ref[...])

        def step(s, carry):
            hs, cs, accs, ln = carry
            new_hs, new_cs, new_accs = [], [], []
            new_ln = ln
            for d in range(num_dirs):
                reverse = (d == 1)
                t = (Tc - 1 - s) if reverse else s
                row = pl.multiple_of(t * Bp, Bp)
                gx_t = gx_sc[d][pl.ds(row, Bp), :]                      # (Bp, 4Hp)
                h, c = _lstm_cell_step(gx_t, hs[d], cs[d], whh[d], Hp)
                if reverse and has_tail:
                    # Padded (t >= T_real) steps must be true no-ops for the backward
                    # direction, otherwise they perturb the state entering real data.
                    keep = ((nc - 1 - c_idx) * Tc + t) < T_real
                    h = jnp.where(keep, h, hs[d])
                    c = jnp.where(keep, c, cs[d])
                new_hs.append(h)
                new_cs.append(c)
                if pool:
                    m = m_refs[d][pl.ds(row, Bp), :]                    # (Bp, 1)
                    new_accs.append(accs[d] + h * m)
                    if d == 0:
                        new_ln = ln + m
                else:
                    out_refs[d][pl.ds(row, Bp), :] = h.astype(out_dtype)
                    new_accs.append(accs[d])
            return tuple(new_hs), tuple(new_cs), tuple(new_accs), new_ln

        init = (tuple(h_sc[d][...] for d in range(num_dirs)),
                tuple(c_sc[d][...] for d in range(num_dirs)),
                tuple(jnp.zeros((Bp, Hp), jnp.float32) for _ in range(num_dirs)),
                jnp.zeros((Bp, 1), jnp.float32))
        hs, cs, accs, ln = jax.lax.fori_loop(0, Tc, step, init, unroll=unroll)

        for d in range(num_dirs):
            h_sc[d][...] = hs[d]
            c_sc[d][...] = cs[d]

        if pool:
            for d in range(num_dirs):
                pooled_ref[d] += accs[d]
            len_sc[...] += ln

            @pl.when(c_idx == pl.num_programs(0) - 1)
            def _():
                inv = 1.0 / jnp.maximum(len_sc[...], 1e-8)   # matches .clamp(min=1e-8)
                for d in range(num_dirs):
                    pooled_ref[d] = pooled_ref[d] * inv

    return kernel


def _lstm_layer_call(x2d, mask2d, dir_params, *, pool, T_real, Tc, Bp, Hp, vmem_limit):
    """Run one LSTM layer (1 or 2 directions fused).

    x2d:    (T_pad*Bp, Din) time-major activations (matmul dtype).
    mask2d: (T_pad*Bp, 1) f32 mask, only used when pool=True.
    dir_params: per-direction (W_ih^T (Din,4Hp), W_hh^T (Hp,4Hp), b (1,4Hp)).
    """
    TBp, Din = x2d.shape
    T_pad = TBp // Bp
    nc = T_pad // Tc
    num_dirs = len(dir_params)
    out_dtype = x2d.dtype

    def t_map(d):
        if d == 0:
            return lambda c: (c, 0)
        return lambda c: (nc - 1 - c, 0)         # backward dir: reversed chunk order

    args, in_specs = [], []
    for d in range(num_dirs):
        args.append(x2d)
        in_specs.append(pl.BlockSpec((Tc * Bp, Din), t_map(d)))
    if pool:
        for d in range(num_dirs):
            args.append(mask2d)
            in_specs.append(pl.BlockSpec((Tc * Bp, 1), t_map(d)))
    for (wih, whh, b) in dir_params:
        args += [wih, whh, b]
        in_specs += [pl.BlockSpec(wih.shape, lambda c: (0, 0)),   # VMEM-resident
                     pl.BlockSpec(whh.shape, lambda c: (0, 0)),
                     pl.BlockSpec(b.shape, lambda c: (0, 0))]

    if pool:
        out_shape = jax.ShapeDtypeStruct((num_dirs, Bp, Hp), jnp.float32)
        out_specs = pl.BlockSpec((num_dirs, Bp, Hp), lambda c: (0, 0, 0))
    else:
        out_shape = tuple(jax.ShapeDtypeStruct((T_pad * Bp, Hp), out_dtype)
                          for _ in range(num_dirs))
        out_specs = tuple(pl.BlockSpec((Tc * Bp, Hp), t_map(d)) for d in range(num_dirs))

    scratch = ([pltpu.VMEM((Tc * Bp, 4 * Hp), jnp.float32) for _ in range(num_dirs)]
               + [pltpu.VMEM((Bp, Hp), jnp.float32) for _ in range(num_dirs)]
               + [pltpu.VMEM((Bp, Hp), jnp.float32) for _ in range(num_dirs)])
    if pool:
        scratch.append(pltpu.VMEM((Bp, 1), jnp.float32))

    kernel = _make_lstm_kernel(Tc=Tc, nc=nc, T_real=T_real, Bp=Bp, Hp=Hp,
                               num_dirs=num_dirs, pool=pool, out_dtype=out_dtype,
                               unroll=min(Tc, 8))
    return pl.pallas_call(
        kernel,
        out_shape=out_shape,
        grid=(nc,),
        in_specs=in_specs,
        out_specs=out_specs,
        scratch_shapes=scratch,
        compiler_params=pltpu.CompilerParams(
            dimension_semantics=("arbitrary",),   # sequential recurrence over time
            vmem_limit_bytes=vmem_limit),
    )(*args)

    # TODO(synk): on v7x, map the fwd/bwd directions onto the two TensorCores
    # (leading "parallel" grid axis / core_map) instead of fusing them on one core.
    # TODO(synk): wavefront-pipeline stacked unidirectional layers (layer l at time t
    # overlapped with layer l+1 at time t-1) for deeper stacks.


# ----------------------- parameter preparation (padding) ---------------------------

def _prep_direction(w_ih, w_hh, b_ih, b_hh, *, H, Hp, in_pad_spec, matmul_dtype):
    """PyTorch-layout raw weights -> padded, transposed kernel weights.

    Gate blocks are padded individually so gate slicing lands on Hp(=128)-aligned
    lanes; padded hidden/input dims are zero so results are unchanged.
    """
    def pad_gates(w):                              # (4H, X) -> (4, Hp, X)
        w = w.reshape(4, H, w.shape[-1])
        return jnp.pad(w, ((0, 0), (0, Hp - H), (0, 0)))

    w_ih4 = pad_gates(w_ih)                        # (4, Hp, in_size)
    w_hh4 = pad_gates(w_hh)                        # (4, Hp, H)
    w_hh4 = jnp.pad(w_hh4, ((0, 0), (0, 0), (0, Hp - H)))            # (4, Hp, Hp)

    if in_pad_spec[0] == "flat":                   # layer 0: embed dim -> Ep
        _, in_size, in_pad = in_pad_spec
        w_ih4 = jnp.pad(w_ih4, ((0, 0), (0, 0), (0, in_pad - in_size)))
    else:                                          # layers > 0: per-direction H -> Hp
        _, nd, hin, hin_p = in_pad_spec
        w_ih4 = w_ih4.reshape(4, Hp, nd, hin)
        w_ih4 = jnp.pad(w_ih4, ((0, 0), (0, 0), (0, 0), (0, hin_p - hin)))
        w_ih4 = w_ih4.reshape(4, Hp, nd * hin_p)
        in_pad = nd * hin_p

    wih_t = jnp.transpose(w_ih4, (2, 0, 1)).reshape(in_pad, 4 * Hp)
    whh_t = jnp.transpose(w_hh4, (2, 0, 1)).reshape(Hp, 4 * Hp)
    b = jnp.pad((b_ih + b_hh).reshape(4, H), ((0, 0), (0, Hp - H))).reshape(1, 4 * Hp)
    return (wih_t.astype(matmul_dtype), whh_t.astype(matmul_dtype),
            b.astype(jnp.float32))


# ----------------------------------- forward ---------------------------------------

def lstm_encoder_forward(tokens, params, mask=None, pad_idx=1,
                         matmul_dtype=jnp.bfloat16, time_chunk_cap=32):
    """tokens: (B, T) int32 -> pooled (B, H * num_directions) float32.

    matmul_dtype controls MXU-operand / activation-storage width only; gate math,
    (h, c) state, biases and the pooled accumulator are always float32.
    """
    emb_tab = params["embedding"]
    layers = params["layers"]
    B, T = tokens.shape
    E = emb_tab.shape[1]
    H = layers[0]["fwd"][1].shape[1]
    n_layers = len(layers)
    num_dirs = 2 if "bwd" in layers[0] else 1

    Bp = _round_up(B, _SUBLANE)
    Hp = _round_up(H, _LANE)
    Ep = _round_up(E, _LANE)
    in_bytes = jnp.dtype(matmul_dtype).itemsize

    # VMEM-budget-aware time chunk + explicit scoped-VMEM limit.
    max_din = Ep if n_layers == 1 else max(Ep, num_dirs * Hp)
    cap = _vmem_capacity_bytes()
    Tc = _choose_time_chunk(T, Bp, Hp, max_din, num_dirs, in_bytes,
                            budget=int(0.45 * cap), cap=time_chunk_cap)
    nc = -(-T // Tc)
    T_pad = nc * Tc
    est = max(_layer_vmem_bytes(Tc, Bp, max_din, Hp, num_dirs, True, in_bytes),
              _layer_vmem_bytes(Tc, Bp, max_din, Hp, num_dirs, False, in_bytes))
    vmem_limit = int(min(0.9 * cap, max(32 << 20, 2 * est)))

    # Pad batch (with pad_idx rows) and time (with pad_idx steps); pooling masks both.
    tok_p = jnp.pad(tokens, ((0, Bp - B), (0, T_pad - T)), constant_values=pad_idx)
    if mask is None:
        mask_p = (tok_p != pad_idx).astype(jnp.float32)
    else:
        mask_p = jnp.pad(mask.astype(jnp.float32), ((0, Bp - B), (0, T_pad - T)))
    mask2d = jnp.transpose(mask_p).reshape(T_pad * Bp, 1)            # time-major

    # Embedding gather kept as XLA glue; table columns padded to Ep, stored in
    # matmul_dtype so the layer-0 activation stream is already narrow.
    emb_tab_p = jnp.pad(emb_tab, ((0, 0), (0, Ep - E))).astype(matmul_dtype)
    x = jnp.take(emb_tab_p, jnp.transpose(tok_p).reshape(-1), axis=0)  # (T_pad*Bp, Ep)

    for l, layer in enumerate(layers):
        is_last = (l == n_layers - 1)
        dir_names = ["fwd", "bwd"] if "bwd" in layer else ["fwd"]
        in_pad_spec = ("flat", E, Ep) if l == 0 else ("dirs", num_dirs, H, Hp)
        dir_params = [_prep_direction(*layer[d], H=H, Hp=Hp,
                                      in_pad_spec=in_pad_spec,
                                      matmul_dtype=matmul_dtype)
                      for d in dir_names]
        out = _lstm_layer_call(x, mask2d if is_last else None, dir_params,
                               pool=is_last, T_real=T, Tc=Tc, Bp=Bp, Hp=Hp,
                               vmem_limit=vmem_limit)
        if is_last:
            parts = [out[d, :B, :H].astype(jnp.float32) for d in range(len(dir_names))]
            return parts[0] if len(parts) == 1 else jnp.concatenate(parts, axis=-1)
        x = out[0] if len(dir_names) == 1 else jnp.concatenate(out, axis=-1)


# --------------------------- params (deterministic init) ---------------------------

def init_params(key, vocab_size, embed_size, hidden_size, num_layers,
                bidirectional, pad_idx):
    """Raw PyTorch-layout parameters (w_ih (4H,in), w_hh (4H,H), b_ih, b_hh)."""
    key, k_emb = jax.random.split(key)
    emb = 0.1 * jax.random.normal(k_emb, (vocab_size, embed_size), jnp.float32)
    emb = emb.at[pad_idx].set(0.0)                 # nn.Embedding padding_idx row

    num_dirs = 2 if bidirectional else 1
    scale = 1.0 / float(np.sqrt(hidden_size))
    layers = []
    for l in range(num_layers):
        in_size = embed_size if l == 0 else hidden_size * num_dirs
        layer = {}
        for d in (["fwd", "bwd"] if bidirectional else ["fwd"]):
            key, k1, k2, k3, k4 = jax.random.split(key, 5)
            w_ih = jax.random.uniform(k1, (4 * hidden_size, in_size),
                                      jnp.float32, -scale, scale)
            w_hh = jax.random.uniform(k2, (4 * hidden_size, hidden_size),
                                      jnp.float32, -scale, scale)
            b_ih = jax.random.uniform(k3, (4 * hidden_size,), jnp.float32, -scale, scale)
            b_hh = jax.random.uniform(k4, (4 * hidden_size,), jnp.float32, -scale, scale)
            layer[d] = (w_ih, w_hh, b_ih, b_hh)
        layers.append(layer)
    return {"embedding": emb, "layers": layers}


# ------------------------------- pure-JAX reference --------------------------------

def _ref_lstm_layer(x_seq, w_ih, w_hh, b_ih, b_hh):
    T, B, _ = x_seq.shape
    H = w_hh.shape[1]

    def step(carry, x_t):
        h, c = carry
        gates = x_t @ w_ih.T + h @ w_hh.T + b_ih + b_hh
        i, f, g, o = jnp.split(gates, 4, axis=-1)
        c = jax.nn.sigmoid(f) * c + jax.nn.sigmoid(i) * jnp.tanh(g)
        h = jax.nn.sigmoid(o) * jnp.tanh(c)
        return (h, c), h

    init = (jnp.zeros((B, H), jnp.float32), jnp.zeros((B, H), jnp.float32))
    _, outs = jax.lax.scan(step, init, x_seq)
    return outs


def lstm_encoder_ref(tokens, params, pad_idx=1):
    mask = (tokens != pad_idx).astype(jnp.float32)
    emb = jnp.take(params["embedding"], tokens, axis=0)
    h = jnp.transpose(emb, (1, 0, 2))
    for layer in params["layers"]:
        fwd = _ref_lstm_layer(h, *layer["fwd"])
        if "bwd" in layer:
            bwd = _ref_lstm_layer(h[::-1], *layer["bwd"])[::-1]
            h = jnp.concatenate([fwd, bwd], axis=-1)
        else:
            h = fwd
    mask_tb1 = jnp.transpose(mask)[:, :, None]
    summed = jnp.sum(h * mask_tb1, axis=0)
    lengths = jnp.maximum(jnp.sum(mask_tb1, axis=0), 1e-8)
    return summed / lengths


# --------------------------------------- main ---------------------------------------

if __name__ == "__main__":
    vocab_size, embed_size, hidden_size, num_layers = 50, 32, 32, 2
    batch, seq_len, pad_idx = 2, 8, 1

    key = jax.random.PRNGKey(0)
    k_tok, k_par_u, k_par_b = jax.random.split(key, 3)

    tokens = jax.random.randint(k_tok, (batch, seq_len), 0, vocab_size, dtype=jnp.int32)
    tokens = tokens.at[0, 6:].set(pad_idx)   # introduce some padding
    tokens = tokens.at[1, 5:].set(pad_idx)

    fwd_f32 = jax.jit(functools.partial(lstm_encoder_forward, pad_idx=pad_idx,
                                        matmul_dtype=jnp.float32))
    fwd_bf16 = jax.jit(functools.partial(lstm_encoder_forward, pad_idx=pad_idx,
                                         matmul_dtype=jnp.bfloat16))

    # --- unidirectional (module default), strict f32 check ---
    params_u = init_params(k_par_u, vocab_size, embed_size, hidden_size,
                           num_layers, bidirectional=False, pad_idx=pad_idx)
    pooled_u = jax.block_until_ready(fwd_f32(tokens, params_u))
    ref_u = lstm_encoder_ref(tokens, params_u, pad_idx=pad_idx)
    assert pooled_u.shape == (batch, hidden_size)
    np.testing.assert_allclose(np.asarray(pooled_u), np.asarray(ref_u),
                               rtol=1e-4, atol=1e-5)

    # --- bidirectional (fused fwd+bwd kernel), strict f32 check ---
    params_b = init_params(k_par_b, vocab_size, embed_size, hidden_size,
                           num_layers, bidirectional=True, pad_idx=pad_idx)
    pooled_b = jax.block_until_ready(fwd_f32(tokens, params_b))
    ref_b = lstm_encoder_ref(tokens, params_b, pad_idx=pad_idx)
    assert pooled_b.shape == (batch, 2 * hidden_size)
    np.testing.assert_allclose(np.asarray(pooled_b), np.asarray(ref_b),
                               rtol=1e-4, atol=1e-5)

    # --- default bf16-operand fast path (perf config), loose check ---
    pooled_bf = jax.block_until_ready(fwd_bf16(tokens, params_b))
    assert pooled_bf.shape == (batch, 2 * hidden_size)
    np.testing.assert_allclose(np.asarray(pooled_bf), np.asarray(ref_b),
                               rtol=1e-1, atol=2e-2)

    print("KERNEL_OK")
</pallas_src>

<mosaic_0001>
module attributes {stable_mosaic.version = 11 : i64} {
  func.func @kernel(%arg0: i32, %arg1: memref<64x128xf32, #tpu.memory_space<vmem>>, %arg2: memref<128x512xf32, #tpu.memory_space<vmem>>, %arg3: memref<128x512xf32, #tpu.memory_space<vmem>>, %arg4: memref<1x512xf32, #tpu.memory_space<vmem>>, %arg5: memref<64x128xf32, #tpu.memory_space<vmem>>, %arg6: memref<64x512xf32, #tpu.memory_space<vmem>>, %arg7: memref<8x128xf32, #tpu.memory_space<vmem>>, %arg8: memref<8x128xf32, #tpu.memory_space<vmem>>) attributes {dimension_semantics = [#tpu.dimension_semantics<arbitrary>], iteration_bounds = array<i64: 1>, scalar_prefetch = 0 : i64, scratch_operands = 3 : i64, tpu.core_type = #tpu.core_type<tc>, window_params = [{transform_indices = @transform_0, window_bounds = array<i64: 64, 128>}, {pipeline_mode = #tpu.pipeline_mode<synchronous>, transform_indices = @transform_1, window_bounds = array<i64: 128, 512>}, {pipeline_mode = #tpu.pipeline_mode<synchronous>, transform_indices = @transform_2, window_bounds = array<i64: 128, 512>}, {pipeline_mode = #tpu.pipeline_mode<synchronous>, transform_indices = @transform_3, window_bounds = array<i64: 1, 512>}, {transform_indices = @transform_4, window_bounds = array<i64: 64, 128>}]} {
    %c0_i32 = arith.constant 0 : i32
    %0 = arith.cmpi eq, %arg0, %c0_i32 : i32
    %1 = arith.extui %0 : i1 to i32
    %c0_i32_0 = arith.constant 0 : i32
    %2 = arith.cmpi ne, %1, %c0_i32_0 : i32
    scf.if %2 {
      %cst_75 = arith.constant 0.000000e+00 : f32
      %279 = vector.broadcast %cst_75 : f32 to vector<8x128xf32>
      %c0_76 = arith.constant 0 : index
      %c0_77 = arith.constant 0 : index
      %280 = vector.load %arg7[%c0_76, %c0_77] : memref<8x128xf32, #tpu.memory_space<vmem>>, vector<8x128xf32>
      tpu.vector_store %arg7[%c0_76, %c0_77], %279 {strides = array<i32>} : memref<8x128xf32, #tpu.memory_space<vmem>>, vector<8x128xf32>,
      %cst_78 = arith.constant 0.000000e+00 : f32
      %281 = vector.broadcast %cst_78 : f32 to vector<8x128xf32>
      %c0_79 = arith.constant 0 : index
      %c0_80 = arith.constant 0 : index
      %282 = vector.load %arg8[%c0_79, %c0_80] : memref<8x128xf32, #tpu.memory_space<vmem>>, vector<8x128xf32>
      tpu.vector_store %arg8[%c0_79, %c0_80], %281 {strides = array<i32>} : memref<8x128xf32, #tpu.memory_space<vmem>>, vector<8x128xf32>,
    } else {
    }
    %c0 = arith.constant 0 : index
    %c0_1 = arith.constant 0 : index
    %3 = vector.load %arg1[%c0, %c0_1] : memref<64x128xf32, #tpu.memory_space<vmem>>, vector<64x128xf32>
    %c0_2 = arith.constant 0 : index
    %c0_3 = arith.constant 0 : index
    %4 = vector.load %arg2[%c0_2, %c0_3] : memref<128x512xf32, #tpu.memory_space<vmem>>, vector<128x512xf32>
    %cst = arith.constant dense<0.000000e+00> : vector<64x512xf32>
    %5 = tpu.matmul %3, %4, %cst {dimension_numbers = #tpu.dot_dimension_numbers<[1], [0], [0], [1], [0, 0, 1, 1], [], []>} : vector<64x128xf32>, vector<128x512xf32>, vector<64x512xf32> -> vector<64x512xf32>
    %c0_4 = arith.constant 0 : index
    %c0_5 = arith.constant 0 : index
    %6 = vector.load %arg4[%c0_4, %c0_5] : memref<1x512xf32, #tpu.memory_space<vmem>>, vector<1x512xf32>
    %7 = vector.broadcast %6 : vector<1x512xf32> to vector<64x512xf32>
    %8 = arith.addf %5, %7 : vector<64x512xf32>
    %c0_6 = arith.constant 0 : index
    %c0_7 = arith.constant 0 : index
    %9 = vector.load %arg6[%c0_6, %c0_7] : memref<64x512xf32, #tpu.memory_space<vmem>>, vector<64x512xf32>
    tpu.vector_store %arg6[%c0_6, %c0_7], %8 {strides = array<i32>} : memref<64x512xf32, #tpu.memory_space<vmem>>, vector<64x512xf32>,
    %c0_8 = arith.constant 0 : index
    %c0_9 = arith.constant 0 : index
    %10 = vector.load %arg3[%c0_8, %c0_9] : memref<128x512xf32, #tpu.memory_space<vmem>>, vector<128x512xf32>
    %c0_10 = arith.constant 0 : index
    %c0_11 = arith.constant 0 : index
    %11 = vector.load %arg7[%c0_10, %c0_11] : memref<8x128xf32, #tpu.memory_space<vmem>>, vector<8x128xf32>
    %c0_12 = arith.constant 0 : index
    %c0_13 = arith.constant 0 : index
    %12 = vector.load %arg8[%c0_12, %c0_13] : memref<8x128xf32, #tpu.memory_space<vmem>>, vector<8x128xf32>
    %c0_i32_14 = arith.constant 0 : i32
    %c8_i32 = arith.constant 8 : i32
    %13 = arith.muli %c0_i32_14, %c8_i32 : i32
    %14 = tpu.assume_multiple %13, 8 : i32
    %15 = arith.index_cast %14 : i32 to index
    %c0_15 = arith.constant 0 : index
    %16 = vector.load %arg6[%15, %c0_15] : memref<64x512xf32, #tpu.memory_space<vmem>>, vector<8x512xf32>
    %cst_16 = arith.constant dense<0.000000e+00> : vector<8x512xf32>
    %17 = tpu.matmul %11, %10, %cst_16 {dimension_numbers = #tpu.dot_dimension_numbers<[1], [0], [0], [1], [0, 0, 1, 1], [], []>} : vector<8x128xf32>, vector<128x512xf32>, vector<8x512xf32> -> vector<8x512xf32>
    %18 = arith.addf %16, %17 : vector<8x512xf32>
    %19 = vector.extract_strided_slice %18 {offsets = [0, 0], sizes = [8, 128], strides = [1, 1]} : vector<8x512xf32> to vector<8x128xf32>
    %20 = arith.negf %19 : vector<8x128xf32>
    %21 = math.exp %20 : vector<8x128xf32>
    %cst_17 = arith.constant 1.000000e+00 : f32
    %22 = vector.broadcast %cst_17 : f32 to vector<8x128xf32>
    %23 = arith.addf %22, %21 : vector<8x128xf32>
    %24 = arith.divf %22, %23 : vector<8x128xf32>
    %25 = vector.extract_strided_slice %18 {offsets = [0, 128], sizes = [8, 128], strides = [1, 1]} : vector<8x512xf32> to vector<8x128xf32>
    %26 = arith.negf %25 : vector<8x128xf32>
    %27 = math.exp %26 : vector<8x128xf32>
    %cst_18 = arith.constant 1.000000e+00 : f32
    %28 = vector.broadcast %cst_18 : f32 to vector<8x128xf32>
    %29 = arith.addf %28, %27 : vector<8x128xf32>
    %30 = arith.divf %28, %29 : vector<8x128xf32>
    %31 = vector.extract_strided_slice %18 {offsets = [0, 256], sizes = [8, 128], strides = [1, 1]} : vector<8x512xf32> to vector<8x128xf32>
    %32 = math.tanh %31 : vector<8x128xf32>
    %33 = vector.extract_strided_slice %18 {offsets = [0, 384], sizes = [8, 128], strides = [1, 1]} : vector<8x512xf32> to vector<8x128xf32>
    %34 = arith.negf %33 : vector<8x128xf32>
    %35 = math.exp %34 : vector<8x128xf32>
    %cst_19 = arith.constant 1.000000e+00 : f32
    %36 = vector.broadcast %cst_19 : f32 to vector<8x128xf32>
    %37 = arith.addf %36, %35 : vector<8x128xf32>
    %38 = arith.divf %36, %37 : vector<8x128xf32>
    %39 = arith.mulf %30, %12 : vector<8x128xf32>
    %40 = arith.mulf %24, %32 : vector<8x128xf32>
    %41 = arith.addf %39, %40 : vector<8x128xf32>
    %42 = math.tanh %41 : vector<8x128xf32>
    %43 = arith.mulf %38, %42 : vector<8x128xf32>
    %44 = arith.index_cast %14 : i32 to index
    %c0_20 = arith.constant 0 : index
    %45 = vector.load %arg5[%44, %c0_20] : memref<64x128xf32, #tpu.memory_space<vmem>>, vector<8x128xf32>
    tpu.vector_store %arg5[%44, %c0_20], %43 {strides = array<i32>} : memref<64x128xf32, #tpu.memory_space<vmem>>, vector<8x128xf32>,
    %c1_i32 = arith.constant 1 : i32
    %c8_i32_21 = arith.constant 8 : i32
    %46 = arith.muli %c1_i32, %c8_i32_21 : i32
    %47 = tpu.assume_multiple %46, 8 : i32
    %48 = arith.index_cast %47 : i32 to index
    %c0_22 = arith.constant 0 : index
    %49 = vector.load %arg6[%48, %c0_22] : memref<64x512xf32, #tpu.memory_space<vmem>>, vector<8x512xf32>
    %cst_23 = arith.constant dense<0.000000e+00> : vector<8x512xf32>
    %50 = tpu.matmul %43, %10, %cst_23 {dimension_numbers = #tpu.dot_dimension_numbers<[1], [0], [0], [1], [0, 0, 1, 1], [], []>} : vector<8x128xf32>, vector<128x512xf32>, vector<8x512xf32> -> vector<8x512xf32>
    %51 = arith.addf %49, %50 : vector<8x512xf32>
    %52 = vector.extract_strided_slice %51 {offsets = [0, 0], sizes = [8, 128], strides = [1, 1]} : vector<8x512xf32> to vector<8x128xf32>
    %53 = arith.negf %52 : vector<8x128xf32>
    %54 = math.exp %53 : vector<8x128xf32>
    %cst_24 = arith.constant 1.000000e+00 : f32
    %55 = vector.broadcast %cst_24 : f32 to vector<8x128xf32>
    %56 = arith.addf %55, %54 : vector<8x128xf32>
    %57 = arith.divf %55, %56 : vector<8x128xf32>
    %58 = vector.extract_strided_slice %51 {offsets = [0, 128], sizes = [8, 128], strides = [1, 1]} : vector<8x512xf32> to vector<8x128xf32>
    %59 = arith.negf %58 : vector<8x128xf32>
    %60 = math.exp %59 : vector<8x128xf32>
    %cst_25 = arith.constant 1.000000e+00 : f32
    %61 = vector.broadcast %cst_25 : f32 to vector<8x128xf32>
    %62 = arith.addf %61, %60 : vector<8x128xf32>
    %63 = arith.divf %61, %62 : vector<8x128xf32>
    %64 = vector.extract_strided_slice %51 {offsets = [0, 256], sizes = [8, 128], strides = [1, 1]} : vector<8x512xf32> to vector<8x128xf32>
    %65 = math.tanh %64 : vector<8x128xf32>
    %66 = vector.extract_strided_slice %51 {offsets = [0, 384], sizes = [8, 128], strides = [1, 1]} : vector<8x512xf32> to vector<8x128xf32>
    %67 = arith.negf %66 : vector<8x128xf32>
    %68 = math.exp %67 : vector<8x128xf32>
    %cst_26 = arith.constant 1.000000e+00 : f32
    %69 = vector.broadcast %cst_26 : f32 to vector<8x128xf32>
    %70 = arith.addf %69, %68 : vector<8x128xf32>
    %71 = arith.divf %69, %70 : vector<8x128xf32>
    %72 = arith.mulf %63, %41 : vector<8x128xf32>
    %73 = arith.mulf %57, %65 : vector<8x128xf32>
    %74 = arith.addf %72, %73 : vector<8x128xf32>
    %75 = math.tanh %74 : vector<8x128xf32>
    %76 = arith.mulf %71, %75 : vector<8x128xf32>
    %77 = arith.index_cast %47 : i32 to index
    %c0_27 = arith.constant 0 : index
    %78 = vector.load %arg5[%77, %c0_27] : memref<64x128xf32, #tpu.memory_space<vmem>>, vector<8x128xf32>
    tpu.vector_store %arg5[%77, %c0_27], %76 {strides = array<i32>} : memref<64x128xf32, #tpu.memory_space<vmem>>, vector<8x128xf32>,
    %c2_i32 = arith.constant 2 : i32
    %c8_i32_28 = arith.constant 8 : i32
    %79 = arith.muli %c2_i32, %c8_i32_28 : i32
    %80 = tpu.assume_multiple %79, 8 : i32
    %81 = arith.index_cast %80 : i32 to index
    %c0_29 = arith.constant 0 : index
    %82 = vector.load %arg6[%81, %c0_29] : memref<64x512xf32, #tpu.memory_space<vmem>>, vector<8x512xf32>
    %cst_30 = arith.constant dense<0.000000e+00> : vector<8x512xf32>
    %83 = tpu.matmul %76, %10, %cst_30 {dimension_numbers = #tpu.dot_dimension_numbers<[1], [0], [0], [1], [0, 0, 1, 1], [], []>} : vector<8x128xf32>, vector<128x512xf32>, vector<8x512xf32> -> vector<8x512xf32>
    %84 = arith.addf %82, %83 : vector<8x512xf32>
    %85 = vector.extract_strided_slice %84 {offsets = [0, 0], sizes = [8, 128], strides = [1, 1]} : vector<8x512xf32> to vector<8x128xf32>
    %86 = arith.negf %85 : vector<8x128xf32>
    %87 = math.exp %86 : vector<8x128xf32>
    %cst_31 = arith.constant 1.000000e+00 : f32
    %88 = vector.broadcast %cst_31 : f32 to vector<8x128xf32>
    %89 = arith.addf %88, %87 : vector<8x128xf32>
    %90 = arith.divf %88, %89 : vector<8x128xf32>
    %91 = vector.extract_strided_slice %84 {offsets = [0, 128], sizes = [8, 128], strides = [1, 1]} : vector<8x512xf32> to vector<8x128xf32>
    %92 = arith.negf %91 : vector<8x128xf32>
    %93 = math.exp %92 : vector<8x128xf32>
    %cst_32 = arith.constant 1.000000e+00 : f32
    %94 = vector.broadcast %cst_32 : f32 to vector<8x128xf32>
    %95 = arith.addf %94, %93 : vector<8x128xf32>
    %96 = arith.divf %94, %95 : vector<8x128xf32>
    %97 = vector.extract_strided_slice %84 {offsets = [0, 256], sizes = [8, 128], strides = [1, 1]} : vector<8x512xf32> to vector<8x128xf32>
    %98 = math.tanh %97 : vector<8x128xf32>
    %99 = vector.extract_strided_slice %84 {offsets = [0, 384], sizes = [8, 128], strides = [1, 1]} : vector<8x512xf32> to vector<8x128xf32>
    %100 = arith.negf %99 : vector<8x128xf32>
    %101 = math.exp %100 : vector<8x128xf32>
    %cst_33 = arith.constant 1.000000e+00 : f32
    %102 = vector.broadcast %cst_33 : f32 to vector<8x128xf32>
    %103 = arith.addf %102, %101 : vector<8x128xf32>
    %104 = arith.divf %102, %103 : vector<8x128xf32>
    %105 = arith.mulf %96, %74 : vector<8x128xf32>
    %106 = arith.mulf %90, %98 : vector<8x128xf32>
    %107 = arith.addf %105, %106 : vector<8x128xf32>
    %108 = math.tanh %107 : vector<8x128xf32>
    %109 = arith.mulf %104, %108 : vector<8x128xf32>
    %110 = arith.index_cast %80 : i32 to index
    %c0_34 = arith.constant 0 : index
    %111 = vector.load %arg5[%110, %c0_34] : memref<64x128xf32, #tpu.memory_space<vmem>>, vector<8x128xf32>
    tpu.vector_store %arg5[%110, %c0_34], %109 {strides = array<i32>} : memref<64x128xf32, #tpu.memory_space<vmem>>, vector<8x128xf32>,
    %c3_i32 = arith.constant 3 : i32
    %c8_i32_35 = arith.constant 8 : i32
    %112 = arith.muli %c3_i32, %c8_i32_35 : i32
    %113 = tpu.assume_multiple %112, 8 : i32
    %114 = arith.index_cast %113 : i32 to index
    %c0_36 = arith.constant 0 : index
    %115 = vector.load %arg6[%114, %c0_36] : memref<64x512xf32, #tpu.memory_space<vmem>>, vector<8x512xf32>
    %cst_37 = arith.constant dense<0.000000e+00> : vector<8x512xf32>
    %116 = tpu.matmul %109, %10, %cst_37 {dimension_numbers = #tpu.dot_dimension_numbers<[1], [0], [0], [1], [0, 0, 1, 1], [], []>} : vector<8x128xf32>, vector<128x512xf32>, vector<8x512xf32> -> vector<8x512xf32>
    %117 = arith.addf %115, %116 : vector<8x512xf32>
    %118 = vector.extract_strided_slice %117 {offsets = [0, 0], sizes = [8, 128], strides = [1, 1]} : vector<8x512xf32> to vector<8x128xf32>
    %119 = arith.negf %118 : vector<8x128xf32>
    %120 = math.exp %119 : vector<8x128xf32>
    %cst_38 = arith.constant 1.000000e+00 : f32
    %121 = vector.broadcast %cst_38 : f32 to vector<8x128xf32>
    %122 = arith.addf %121, %120 : vector<8x128xf32>
    %123 = arith.divf %121, %122 : vector<8x128xf32>
    %124 = vector.extract_strided_slice %117 {offsets = [0, 128], sizes = [8, 128], strides = [1, 1]} : vector<8x512xf32> to vector<8x128xf32>
    %125 = arith.negf %124 : vector<8x128xf32>
    %126 = math.exp %125 : vector<8x128xf32>
    %cst_39 = arith.constant 1.000000e+00 : f32
    %127 = vector.broadcast %cst_39 : f32 to vector<8x128xf32>
    %128 = arith.addf %127, %126 : vector<8x128xf32>
    %129 = arith.divf %127, %128 : vector<8x128xf32>
    %130 = vector.extract_strided_slice %117 {offsets = [0, 256], sizes = [8, 128], strides = [1, 1]} : vector<8x512xf32> to vector<8x128xf32>
    %131 = math.tanh %130 : vector<8x128xf32>
    %132 = vector.extract_strided_slice %117 {offsets = [0, 384], sizes = [8, 128], strides = [1, 1]} : vector<8x512xf32> to vector<8x128xf32>
    %133 = arith.negf %132 : vector<8x128xf32>
    %134 = math.exp %133 : vector<8x128xf32>
    %cst_40 = arith.constant 1.000000e+00 : f32
    %135 = vector.broadcast %cst_40 : f32 to vector<8x128xf32>
    %136 = arith.addf %135, %134 : vector<8x128xf32>
    %137 = arith.divf %135, %136 : vector<8x128xf32>
    %138 = arith.mulf %129, %107 : vector<8x128xf32>
    %139 = arith.mulf %123, %131 : vector<8x128xf32>
    %140 = arith.addf %138, %139 : vector<8x128xf32>
    %141 = math.tanh %140 : vector<8x128xf32>
    %142 = arith.mulf %137, %141 : vector<8x128xf32>
    %143 = arith.index_cast %113 : i32 to index
    %c0_41 = arith.constant 0 : index
    %144 = vector.load %arg5[%143, %c0_41] : memref<64x128xf32, #tpu.memory_space<vmem>>, vector<8x128xf32>
    tpu.vector_store %arg5[%143, %c0_41], %142 {strides = array<i32>} : memref<64x128xf32, #tpu.memory_space<vmem>>, vector<8x128xf32>,
    %c4_i32 = arith.constant 4 : i32
    %c8_i32_42 = arith.constant 8 : i32
    %145 = arith.muli %c4_i32, %c8_i32_42 : i32
    %146 = tpu.assume_multiple %145, 8 : i32
    %147 = arith.index_cast %146 : i32 to index
    %c0_43 = arith.constant 0 : index
    %148 = vector.load %arg6[%147, %c0_43] : memref<64x512xf32, #tpu.memory_space<vmem>>, vector<8x512xf32>
    %cst_44 = arith.constant dense<0.000000e+00> : vector<8x512xf32>
    %149 = tpu.matmul %142, %10, %cst_44 {dimension_numbers = #tpu.dot_dimension_numbers<[1], [0], [0], [1], [0, 0, 1, 1], [], []>} : vector<8x128xf32>, vector<128x512xf32>, vector<8x512xf32> -> vector<8x512xf32>
    %150 = arith.addf %148, %149 : vector<8x512xf32>
    %151 = vector.extract_strided_slice %150 {offsets = [0, 0], sizes = [8, 128], strides = [1, 1]} : vector<8x512xf32> to vector<8x128xf32>
    %152 = arith.negf %151 : vector<8x128xf32>
    %153 = math.exp %152 : vector<8x128xf32>
    %cst_45 = arith.constant 1.000000e+00 : f32
    %154 = vector.broadcast %cst_45 : f32 to vector<8x128xf32>
    %155 = arith.addf %154, %153 : vector<8x128xf32>
    %156 = arith.divf %154, %155 : vector<8x128xf32>
    %157 = vector.extract_strided_slice %150 {offsets = [0, 128], sizes = [8, 128], strides = [1, 1]} : vector<8x512xf32> to vector<8x128xf32>
    %158 = arith.negf %157 : vector<8x128xf32>
    %159 = math.exp %158 : vector<8x128xf32>
    %cst_46 = arith.constant 1.000000e+00 : f32
    %160 = vector.broadcast %cst_46 : f32 to vector<8x128xf32>
    %161 = arith.addf %160, %159 : vector<8x128xf32>
    %162 = arith.divf %160, %161 : vector<8x128xf32>
    %163 = vector.extract_strided_slice %150 {offsets = [0, 256], sizes = [8, 128], strides = [1, 1]} : vector<8x512xf32> to vector<8x128xf32>
    %164 = math.tanh %163 : vector<8x128xf32>
    %165 = vector.extract_strided_slice %150 {offsets = [0, 384], sizes = [8, 128], strides = [1, 1]} : vector<8x512xf32> to vector<8x128xf32>
    %166 = arith.negf %165 : vector<8x128xf32>
    %167 = math.exp %166 : vector<8x128xf32>
    %cst_47 = arith.constant 1.000000e+00 : f32
    %168 = vector.broadcast %cst_47 : f32 to vector<8x128xf32>
    %169 = arith.addf %168, %167 : vector<8x128xf32>
    %170 = arith.divf %168, %169 : vector<8x128xf32>
    %171 = arith.mulf %162, %140 : vector<8x128xf32>
    %172 = arith.mulf %156, %164 : vector<8x128xf32>
    %173 = arith.addf %171, %172 : vector<8x128xf32>
    %174 = math.tanh %173 : vector<8x128xf32>
    %175 = arith.mulf %170, %174 : vector<8x128xf32>
    %176 = arith.index_cast %146 : i32 to index
    %c0_48 = arith.constant 0 : index
    %177 = vector.load %arg5[%176, %c0_48] : memref<64x128xf32, #tpu.memory_space<vmem>>, vector<8x128xf32>
    tpu.vector_store %arg5[%176, %c0_48], %175 {strides = array<i32>} : memref<64x128xf32, #tpu.memory_space<vmem>>, vector<8x128xf32>,
    %c5_i32 = arith.constant 5 : i32
    %c8_i32_49 = arith.constant 8 : i32
    %178 = arith.muli %c5_i32, %c8_i32_49 : i32
    %179 = tpu.assume_multiple %178, 8 : i32
    %180 = arith.index_cast %179 : i32 to index
    %c0_50 = arith.constant 0 : index
    %181 = vector.load %arg6[%180, %c0_50] : memref<64x512xf32, #tpu.memory_space<vmem>>, vector<8x512xf32>
    %cst_51 = arith.constant dense<0.000000e+00> : vector<8x512xf32>
    %182 = tpu.matmul %175, %10, %cst_51 {dimension_numbers = #tpu.dot_dimension_numbers<[1], [0], [0], [1], [0, 0, 1, 1], [], []>} : vector<8x128xf32>, vector<128x512xf32>, vector<8x512xf32> -> vector<8x512xf32>
    %183 = arith.addf %181, %182 : vector<8x512xf32>
    %184 = vector.extract_strided_slice %183 {offsets = [0, 0], sizes = [8, 128], strides = [1, 1]} : vector<8x512xf32> to vector<8x128xf32>
    %185 = arith.negf %184 : vector<8x128xf32>
    %186 = math.exp %185 : vector<8x128xf32>
    %cst_52 = arith.constant 1.000000e+00 : f32
    %187 = vector.broadcast %cst_52 : f32 to vector<8x128xf32>
    %188 = arith.addf %187, %186 : vector<8x128xf32>
    %189 = arith.divf %187, %188 : vector<8x128xf32>
    %190 = vector.extract_strided_slice %183 {offsets = [0, 128], sizes = [8, 128], strides = [1, 1]} : vector<8x512xf32> to vector<8x128xf32>
    %191 = arith.negf %190 : vector<8x128xf32>
    %192 = math.exp %191 : vector<8x128xf32>
    %cst_53 = arith.constant 1.000000e+00 : f32
    %193 = vector.broadcast %cst_53 : f32 to vector<8x128xf32>
    %194 = arith.addf %193, %192 : vector<8x128xf32>
    %195 = arith.divf %193, %194 : vector<8x128xf32>
    %196 = vector.extract_strided_slice %183 {offsets = [0, 256], sizes = [8, 128], strides = [1, 1]} : vector<8x512xf32> to vector<8x128xf32>
    %197 = math.tanh %196 : vector<8x128xf32>
    %198 = vector.extract_strided_slice %183 {offsets = [0, 384], sizes = [8, 128], strides = [1, 1]} : vector<8x512xf32> to vector<8x128xf32>
    %199 = arith.negf %198 : vector<8x128xf32>
    %200 = math.exp %199 : vector<8x128xf32>
    %cst_54 = arith.constant 1.000000e+00 : f32
    %201 = vector.broadcast %cst_54 : f32 to vector<8x128xf32>
    %202 = arith.addf %201, %200 : vector<8x128xf32>
    %203 = arith.divf %201, %202 : vector<8x128xf32>
    %204 = arith.mulf %195, %173 : vector<8x128xf32>
    %205 = arith.mulf %189, %197 : vector<8x128xf32>
    %206 = arith.addf %204, %205 : vector<8x128xf32>
    %207 = math.tanh %206 : vector<8x128xf32>
    %208 = arith.mulf %203, %207 : vector<8x128xf32>
    %209 = arith.index_cast %179 : i32 to index
    %c0_55 = arith.constant 0 : index
    %210 = vector.load %arg5[%209, %c0_55] : memref<64x128xf32, #tpu.memory_space<vmem>>, vector<8x128xf32>
    tpu.vector_store %arg5[%209, %c0_55], %208 {strides = array<i32>} : memref<64x128xf32, #tpu.memory_space<vmem>>, vector<8x128xf32>,
    %c6_i32 = arith.constant 6 : i32
    %c8_i32_56 = arith.constant 8 : i32
    %211 = arith.muli %c6_i32, %c8_i32_56 : i32
    %212 = tpu.assume_multiple %211, 8 : i32
    %213 = arith.index_cast %212 : i32 to index
    %c0_57 = arith.constant 0 : index
    %214 = vector.load %arg6[%213, %c0_57] : memref<64x512xf32, #tpu.memory_space<vmem>>, vector<8x512xf32>
    %cst_58 = arith.constant dense<0.000000e+00> : vector<8x512xf32>
    %215 = tpu.matmul %208, %10, %cst_58 {dimension_numbers = #tpu.dot_dimension_numbers<[1], [0], [0], [1], [0, 0, 1, 1], [], []>} : vector<8x128xf32>, vector<128x512xf32>, vector<8x512xf32> -> vector<8x512xf32>
    %216 = arith.addf %214, %215 : vector<8x512xf32>
    %217 = vector.extract_strided_slice %216 {offsets = [0, 0], sizes = [8, 128], strides = [1, 1]} : vector<8x512xf32> to vector<8x128xf32>
    %218 = arith.negf %217 : vector<8x128xf32>
    %219 = math.exp %218 : vector<8x128xf32>
    %cst_59 = arith.constant 1.000000e+00 : f32
    %220 = vector.broadcast %cst_59 : f32 to vector<8x128xf32>
    %221 = arith.addf %220, %219 : vector<8x128xf32>
    %222 = arith.divf %220, %221 : vector<8x128xf32>
    %223 = vector.extract_strided_slice %216 {offsets = [0, 128], sizes = [8, 128], strides = [1, 1]} : vector<8x512xf32> to vector<8x128xf32>
    %224 = arith.negf %223 : vector<8x128xf32>
    %225 = math.exp %224 : vector<8x128xf32>
    %cst_60 = arith.constant 1.000000e+00 : f32
    %226 = vector.broadcast %cst_60 : f32 to vector<8x128xf32>
    %227 = arith.addf %226, %225 : vector<8x128xf32>
    %228 = arith.divf %226, %227 : vector<8x128xf32>
    %229 = vector.extract_strided_slice %216 {offsets = [0, 256], sizes = [8, 128], strides = [1, 1]} : vector<8x512xf32> to vector<8x128xf32>
    %230 = math.tanh %229 : vector<8x128xf32>
    %231 = vector.extract_strided_slice %216 {offsets = [0, 384], sizes = [8, 128], strides = [1, 1]} : vector<8x512xf32> to vector<8x128xf32>
    %232 = arith.negf %231 : vector<8x128xf32>
    %233 = math.exp %232 : vector<8x128xf32>
    %cst_61 = arith.constant 1.000000e+00 : f32
    %234 = vector.broadcast %cst_61 : f32 to vector<8x128xf32>
    %235 = arith.addf %234, %233 : vector<8x128xf32>
    %236 = arith.divf %234, %235 : vector<8x128xf32>
    %237 = arith.mulf %228, %206 : vector<8x128xf32>
    %238 = arith.mulf %222, %230 : vector<8x128xf32>
    %239 = arith.addf %237, %238 : vector<8x128xf32>
    %240 = math.tanh %239 : vector<8x128xf32>
    %241 = arith.mulf %236, %240 : vector<8x128xf32>
    %242 = arith.index_cast %212 : i32 to index
    %c0_62 = arith.constant 0 : index
    %243 = vector.load %arg5[%242, %c0_62] : memref<64x128xf32, #tpu.memory_space<vmem>>, vector<8x128xf32>
    tpu.vector_store %arg5[%242, %c0_62], %241 {strides = array<i32>} : memref<64x128xf32, #tpu.memory_space<vmem>>, vector<8x128xf32>,
    %c7_i32 = arith.constant 7 : i32
    %c8_i32_63 = arith.constant 8 : i32
    %244 = arith.muli %c7_i32, %c8_i32_63 : i32
    %245 = tpu.assume_multiple %244, 8 : i32
    %246 = arith.index_cast %245 : i32 to index
    %c0_64 = arith.constant 0 : index
    %247 = vector.load %arg6[%246, %c0_64] : memref<64x512xf32, #tpu.memory_space<vmem>>, vector<8x512xf32>
    %cst_65 = arith.constant dense<0.000000e+00> : vector<8x512xf32>
    %248 = tpu.matmul %241, %10, %cst_65 {dimension_numbers = #tpu.dot_dimension_numbers<[1], [0], [0], [1], [0, 0, 1, 1], [], []>} : vector<8x128xf32>, vector<128x512xf32>, vector<8x512xf32> -> vector<8x512xf32>
    %249 = arith.addf %247, %248 : vector<8x512xf32>
    %250 = vector.extract_strided_slice %249 {offsets = [0, 0], sizes = [8, 128], strides = [1, 1]} : vector<8x512xf32> to vector<8x128xf32>
    %251 = arith.negf %250 : vector<8x128xf32>
    %252 = math.exp %251 : vector<8x128xf32>
    %cst_66 = arith.constant 1.000000e+00 : f32
    %253 = vector.broadcast %cst_66 : f32 to vector<8x128xf32>
    %254 = arith.addf %253, %252 : vector<8x128xf32>
    %255 = arith.divf %253, %254 : vector<8x128xf32>
    %256 = vector.extract_strided_slice %249 {offsets = [0, 128], sizes = [8, 128], strides = [1, 1]} : vector<8x512xf32> to vector<8x128xf32>
    %257 = arith.negf %256 : vector<8x128xf32>
    %258 = math.exp %257 : vector<8x128xf32>
    %cst_67 = arith.constant 1.000000e+00 : f32
    %259 = vector.broadcast %cst_67 : f32 to vector<8x128xf32>
    %260 = arith.addf %259, %258 : vector<8x128xf32>
    %261 = arith.divf %259, %260 : vector<8x128xf32>
    %262 = vector.extract_strided_slice %249 {offsets = [0, 256], sizes = [8, 128], strides = [1, 1]} : vector<8x512xf32> to vector<8x128xf32>
    %263 = math.tanh %262 : vector<8x128xf32>
    %264 = vector.extract_strided_slice %249 {offsets = [0, 384], sizes = [8, 128], strides = [1, 1]} : vector<8x512xf32> to vector<8x128xf32>
    %265 = arith.negf %264 : vector<8x128xf32>
    %266 = math.exp %265 : vector<8x128xf32>
    %cst_68 = arith.constant 1.000000e+00 : f32
    %267 = vector.broadcast %cst_68 : f32 to vector<8x128xf32>
    %268 = arith.addf %267, %266 : vector<8x128xf32>
    %269 = arith.divf %267, %268 : vector<8x128xf32>
    %270 = arith.mulf %261, %239 : vector<8x128xf32>
    %271 = arith.mulf %255, %263 : vector<8x128xf32>
    %272 = arith.addf %270, %271 : vector<8x128xf32>
    %273 = math.tanh %272 : vector<8x128xf32>
    %274 = arith.mulf %269, %273 : vector<8x128xf32>
    %275 = arith.index_cast %245 : i32 to index
    %c0_69 = arith.constant 0 : index
    %276 = vector.load %arg5[%275, %c0_69] : memref<64x128xf32, #tpu.memory_space<vmem>>, vector<8x128xf32>
    tpu.vector_store %arg5[%275, %c0_69], %274 {strides = array<i32>} : memref<64x128xf32, #tpu.memory_space<vmem>>, vector<8x128xf32>,
    %c8_i32_70 = arith.constant 8 : i32
    %c0_71 = arith.constant 0 : index
    %c0_72 = arith.constant 0 : index
    %277 = vector.load %arg7[%c0_71, %c0_72] : memref<8x128xf32, #tpu.memory_space<vmem>>, vector<8x128xf32>
    tpu.vector_store %arg7[%c0_71, %c0_72], %274 {strides = array<i32>} : memref<8x128xf32, #tpu.memory_space<vmem>>, vector<8x128xf32>,
    %c0_73 = arith.constant 0 : index
    %c0_74 = arith.constant 0 : index
    %278 = vector.load %arg8[%c0_73, %c0_74] : memref<8x128xf32, #tpu.memory_space<vmem>>, vector<8x128xf32>
    tpu.vector_store %arg8[%c0_73, %c0_74], %272 {strides = array<i32>} : memref<8x128xf32, #tpu.memory_space<vmem>>, vector<8x128xf32>,
    return
  }
  func.func @transform_0(%arg0: i32) -> (i32, i32) {
    %c0_i32 = arith.constant 0 : i32
    %c0_i32_0 = arith.constant 0 : i32
    return %arg0, %c0_i32 : i32, i32
  }
  func.func @transform_1(%arg0: i32) -> (i32, i32) {
    %c0_i32 = arith.constant 0 : i32
    %c0_i32_0 = arith.constant 0 : i32
    %c0_i32_1 = arith.constant 0 : i32
    return %c0_i32, %c0_i32_0 : i32, i32
  }
  func.func @transform_2(%arg0: i32) -> (i32, i32) {
    %c0_i32 = arith.constant 0 : i32
    %c0_i32_0 = arith.constant 0 : i32
    %c0_i32_1 = arith.constant 0 : i32
    return %c0_i32, %c0_i32_0 : i32, i32
  }
  func.func @transform_3(%arg0: i32) -> (i32, i32) {
    %c0_i32 = arith.constant 0 : i32
    %c0_i32_0 = arith.constant 0 : i32
    %c0_i32_1 = arith.constant 0 : i32
    return %c0_i32, %c0_i32_0 : i32, i32
  }
  func.func @transform_4(%arg0: i32) -> (i32, i32) {
    %c0_i32 = arith.constant 0 : i32
    %c0_i32_0 = arith.constant 0 : i32
    return %arg0, %c0_i32 : i32, i32
  }
}

module attributes {stable_mosaic.version = 11 : i64} {
  func.func @kernel(%arg0: i32, %arg1: memref<64x128xf32, #tpu.memory_space<vmem>>, %arg2: memref<64x1xf32, #tpu.memory_space<vmem>>, %arg3: memref<128x512xf32, #tpu.memory_space<vmem>>, %arg4: memref<128x512xf32, #tpu.memory_space<vmem>>, %arg5: memref<1x512xf32, #tpu.memory_space<vmem>>, %arg6: memref<1x8x128xf32, #tpu.memory_space<vmem>>, %arg7: memref<64x512xf32, #tpu.memory_space<vmem>>, %arg8: memref<8x128xf32, #tpu.memory_space<vmem>>, %arg9: memref<8x128xf32, #tpu.memory_space<vmem>>, %arg10: memref<8x1xf32, #tpu.memory_space<vmem>>) attributes {dimension_semantics = [#tpu.dimension_semantics<arbitrary>], iteration_bounds = array<i64: 1>, scalar_prefetch = 0 : i64, scratch_operands = 4 : i64, tpu.core_type = #tpu.core_type<tc>, window_params = [{transform_indices = @transform_0, window_bounds = array<i64: 64, 128>}, {transform_indices = @transform_1, window_bounds = array<i64: 64, 1>}, {pipeline_mode = #tpu.pipeline_mode<synchronous>, transform_indices = @transform_2, window_bounds = array<i64: 128, 512>}, {pipeline_mode = #tpu.pipeline_mode<synchronous>, transform_indices = @transform_3, window_bounds = array<i64: 128, 512>}, {pipeline_mode = #tpu.pipeline_mode<synchronous>, transform_indices = @transform_4, window_bounds = array<i64: 1, 512>}, {pipeline_mode = #tpu.pipeline_mode<synchronous>, transform_indices = @transform_5, window_bounds = array<i64: 1, 8, 128>}]} {
    %c0_i32 = arith.constant 0 : i32
    %0 = arith.cmpi eq, %arg0, %c0_i32 : i32
    %1 = arith.extui %0 : i1 to i32
    %c0_i32_0 = arith.constant 0 : i32
    %2 = arith.cmpi ne, %1, %c0_i32_0 : i32
    scf.if %2 {
      %cst_89 = arith.constant 0.000000e+00 : f32
      %325 = vector.broadcast %cst_89 : f32 to vector<8x128xf32>
      %c0_90 = arith.constant 0 : index
      %c0_91 = arith.constant 0 : index
      %326 = vector.load %arg8[%c0_90, %c0_91] : memref<8x128xf32, #tpu.memory_space<vmem>>, vector<8x128xf32>
      tpu.vector_store %arg8[%c0_90, %c0_91], %325 {strides = array<i32>} : memref<8x128xf32, #tpu.memory_space<vmem>>, vector<8x128xf32>,
      %cst_92 = arith.constant 0.000000e+00 : f32
      %327 = vector.broadcast %cst_92 : f32 to vector<8x128xf32>
      %c0_93 = arith.constant 0 : index
      %c0_94 = arith.constant 0 : index
      %328 = vector.load %arg9[%c0_93, %c0_94] : memref<8x128xf32, #tpu.memory_space<vmem>>, vector<8x128xf32>
      tpu.vector_store %arg9[%c0_93, %c0_94], %327 {strides = array<i32>} : memref<8x128xf32, #tpu.memory_space<vmem>>, vector<8x128xf32>,
      %cst_95 = arith.constant 0.000000e+00 : f32
      %329 = vector.broadcast %cst_95 : f32 to vector<1x8x128xf32>
      %c0_96 = arith.constant 0 : index
      %c0_97 = arith.constant 0 : index
      %c0_98 = arith.constant 0 : index
      %330 = vector.load %arg6[%c0_96, %c0_97, %c0_98] : memref<1x8x128xf32, #tpu.memory_space<vmem>>, vector<1x8x128xf32>
      tpu.vector_store %arg6[%c0_96, %c0_97, %c0_98], %329 {strides = array<i32>} : memref<1x8x128xf32, #tpu.memory_space<vmem>>, vector<1x8x128xf32>,
      %cst_99 = arith.constant 0.000000e+00 : f32
      %331 = vector.broadcast %cst_99 : f32 to vector<8x1xf32>
      %c0_100 = arith.constant 0 : index
      %c0_101 = arith.constant 0 : index
      %332 = vector.load %arg10[%c0_100, %c0_101] : memref<8x1xf32, #tpu.memory_space<vmem>>, vector<8x1xf32>
      tpu.vector_store %arg10[%c0_100, %c0_101], %331 {strides = array<i32>} : memref<8x1xf32, #tpu.memory_space<vmem>>, vector<8x1xf32>,
    } else {
    }
    %c0 = arith.constant 0 : index
    %c0_1 = arith.constant 0 : index
    %3 = vector.load %arg1[%c0, %c0_1] : memref<64x128xf32, #tpu.memory_space<vmem>>, vector<64x128xf32>
    %c0_2 = arith.constant 0 : index
    %c0_3 = arith.constant 0 : index
    %4 = vector.load %arg3[%c0_2, %c0_3] : memref<128x512xf32, #tpu.memory_space<vmem>>, vector<128x512xf32>
    %cst = arith.constant dense<0.000000e+00> : vector<64x512xf32>
    %5 = tpu.matmul %3, %4, %cst {dimension_numbers = #tpu.dot_dimension_numbers<[1], [0], [0], [1], [0, 0, 1, 1], [], []>} : vector<64x128xf32>, vector<128x512xf32>, vector<64x512xf32> -> vector<64x512xf32>
    %c0_4 = arith.constant 0 : index
    %c0_5 = arith.constant 0 : index
    %6 = vector.load %arg5[%c0_4, %c0_5] : memref<1x512xf32, #tpu.memory_space<vmem>>, vector<1x512xf32>
    %7 = vector.broadcast %6 : vector<1x512xf32> to vector<64x512xf32>
    %8 = arith.addf %5, %7 : vector<64x512xf32>
    %c0_6 = arith.constant 0 : index
    %c0_7 = arith.constant 0 : index
    %9 = vector.load %arg7[%c0_6, %c0_7] : memref<64x512xf32, #tpu.memory_space<vmem>>, vector<64x512xf32>
    tpu.vector_store %arg7[%c0_6, %c0_7], %8 {strides = array<i32>} : memref<64x512xf32, #tpu.memory_space<vmem>>, vector<64x512xf32>,
    %c0_8 = arith.constant 0 : index
    %c0_9 = arith.constant 0 : index
    %10 = vector.load %arg4[%c0_8, %c0_9] : memref<128x512xf32, #tpu.memory_space<vmem>>, vector<128x512xf32>
    %c0_10 = arith.constant 0 : index
    %c0_11 = arith.constant 0 : index
    %11 = vector.load %arg8[%c0_10, %c0_11] : memref<8x128xf32, #tpu.memory_space<vmem>>, vector<8x128xf32>
    %c0_12 = arith.constant 0 : index
    %c0_13 = arith.constant 0 : index
    %12 = vector.load %arg9[%c0_12, %c0_13] : memref<8x128xf32, #tpu.memory_space<vmem>>, vector<8x128xf32>
    %cst_14 = arith.constant 0.000000e+00 : f32
    %13 = vector.broadcast %cst_14 : f32 to vector<8x128xf32>
    %cst_15 = arith.constant 0.000000e+00 : f32
    %14 = vector.broadcast %cst_15 : f32 to vector<8x1xf32>
    %c0_i32_16 = arith.constant 0 : i32
    %c8_i32 = arith.constant 8 : i32
    %15 = arith.muli %c0_i32_16, %c8_i32 : i32
    %16 = tpu.assume_multiple %15, 8 : i32
    %17 = arith.index_cast %16 : i32 to index
    %c0_17 = arith.constant 0 : index
    %18 = vector.load %arg7[%17, %c0_17] : memref<64x512xf32, #tpu.memory_space<vmem>>, vector<8x512xf32>
    %cst_18 = arith.constant dense<0.000000e+00> : vector<8x512xf32>
    %19 = tpu.matmul %11, %10, %cst_18 {dimension_numbers = #tpu.dot_dimension_numbers<[1], [0], [0], [1], [0, 0, 1, 1], [], []>} : vector<8x128xf32>, vector<128x512xf32>, vector<8x512xf32> -> vector<8x512xf32>
    %20 = arith.addf %18, %19 : vector<8x512xf32>
    %21 = vector.extract_strided_slice %20 {offsets = [0, 0], sizes = [8, 128], strides = [1, 1]} : vector<8x512xf32> to vector<8x128xf32>
    %22 = arith.negf %21 : vector<8x128xf32>
    %23 = math.exp %22 : vector<8x128xf32>
    %cst_19 = arith.constant 1.000000e+00 : f32
    %24 = vector.broadcast %cst_19 : f32 to vector<8x128xf32>
    %25 = arith.addf %24, %23 : vector<8x128xf32>
    %26 = arith.divf %24, %25 : vector<8x128xf32>
    %27 = vector.extract_strided_slice %20 {offsets = [0, 128], sizes = [8, 128], strides = [1, 1]} : vector<8x512xf32> to vector<8x128xf32>
    %28 = arith.negf %27 : vector<8x128xf32>
    %29 = math.exp %28 : vector<8x128xf32>
    %cst_20 = arith.constant 1.000000e+00 : f32
    %30 = vector.broadcast %cst_20 : f32 to vector<8x128xf32>
    %31 = arith.addf %30, %29 : vector<8x128xf32>
    %32 = arith.divf %30, %31 : vector<8x128xf32>
    %33 = vector.extract_strided_slice %20 {offsets = [0, 256], sizes = [8, 128], strides = [1, 1]} : vector<8x512xf32> to vector<8x128xf32>
    %34 = math.tanh %33 : vector<8x128xf32>
    %35 = vector.extract_strided_slice %20 {offsets = [0, 384], sizes = [8, 128], strides = [1, 1]} : vector<8x512xf32> to vector<8x128xf32>
    %36 = arith.negf %35 : vector<8x128xf32>
    %37 = math.exp %36 : vector<8x128xf32>
    %cst_21 = arith.constant 1.000000e+00 : f32
    %38 = vector.broadcast %cst_21 : f32 to vector<8x128xf32>
    %39 = arith.addf %38, %37 : vector<8x128xf32>
    %40 = arith.divf %38, %39 : vector<8x128xf32>
    %41 = arith.mulf %32, %12 : vector<8x128xf32>
    %42 = arith.mulf %26, %34 : vector<8x128xf32>
    %43 = arith.addf %41, %42 : vector<8x128xf32>
    %44 = math.tanh %43 : vector<8x128xf32>
    %45 = arith.mulf %40, %44 : vector<8x128xf32>
    %46 = arith.index_cast %16 : i32 to index
    %c0_22 = arith.constant 0 : index
    %47 = vector.load %arg2[%46, %c0_22] : memref<64x1xf32, #tpu.memory_space<vmem>>, vector<8x1xf32>
    %48 = vector.broadcast %47 : vector<8x1xf32> to vector<8x128xf32>
    %49 = arith.mulf %45, %48 : vector<8x128xf32>
    %50 = arith.addf %13, %49 : vector<8x128xf32>
    %51 = arith.addf %14, %47 : vector<8x1xf32>
    %c1_i32 = arith.constant 1 : i32
    %c8_i32_23 = arith.constant 8 : i32
    %52 = arith.muli %c1_i32, %c8_i32_23 : i32
    %53 = tpu.assume_multiple %52, 8 : i32
    %54 = arith.index_cast %53 : i32 to index
    %c0_24 = arith.constant 0 : index
    %55 = vector.load %arg7[%54, %c0_24] : memref<64x512xf32, #tpu.memory_space<vmem>>, vector<8x512xf32>
    %cst_25 = arith.constant dense<0.000000e+00> : vector<8x512xf32>
    %56 = tpu.matmul %45, %10, %cst_25 {dimension_numbers = #tpu.dot_dimension_numbers<[1], [0], [0], [1], [0, 0, 1, 1], [], []>} : vector<8x128xf32>, vector<128x512xf32>, vector<8x512xf32> -> vector<8x512xf32>
    %57 = arith.addf %55, %56 : vector<8x512xf32>
    %58 = vector.extract_strided_slice %57 {offsets = [0, 0], sizes = [8, 128], strides = [1, 1]} : vector<8x512xf32> to vector<8x128xf32>
    %59 = arith.negf %58 : vector<8x128xf32>
    %60 = math.exp %59 : vector<8x128xf32>
    %cst_26 = arith.constant 1.000000e+00 : f32
    %61 = vector.broadcast %cst_26 : f32 to vector<8x128xf32>
    %62 = arith.addf %61, %60 : vector<8x128xf32>
    %63 = arith.divf %61, %62 : vector<8x128xf32>
    %64 = vector.extract_strided_slice %57 {offsets = [0, 128], sizes = [8, 128], strides = [1, 1]} : vector<8x512xf32> to vector<8x128xf32>
    %65 = arith.negf %64 : vector<8x128xf32>
    %66 = math.exp %65 : vector<8x128xf32>
    %cst_27 = arith.constant 1.000000e+00 : f32
    %67 = vector.broadcast %cst_27 : f32 to vector<8x128xf32>
    %68 = arith.addf %67, %66 : vector<8x128xf32>
    %69 = arith.divf %67, %68 : vector<8x128xf32>
    %70 = vector.extract_strided_slice %57 {offsets = [0, 256], sizes = [8, 128], strides = [1, 1]} : vector<8x512xf32> to vector<8x128xf32>
    %71 = math.tanh %70 : vector<8x128xf32>
    %72 = vector.extract_strided_slice %57 {offsets = [0, 384], sizes = [8, 128], strides = [1, 1]} : vector<8x512xf32> to vector<8x128xf32>
    %73 = arith.negf %72 : vector<8x128xf32>
    %74 = math.exp %73 : vector<8x128xf32>
    %cst_28 = arith.constant 1.000000e+00 : f32
    %75 = vector.broadcast %cst_28 : f32 to vector<8x128xf32>
    %76 = arith.addf %75, %74 : vector<8x128xf32>
    %77 = arith.divf %75, %76 : vector<8x128xf32>
    %78 = arith.mulf %69, %43 : vector<8x128xf32>
    %79 = arith.mulf %63, %71 : vector<8x128xf32>
    %80 = arith.addf %78, %79 : vector<8x128xf32>
    %81 = math.tanh %80 : vector<8x128xf32>
    %82 = arith.mulf %77, %81 : vector<8x128xf32>
    %83 = arith.index_cast %53 : i32 to index
    %c0_29 = arith.constant 0 : index
    %84 = vector.load %arg2[%83, %c0_29] : memref<64x1xf32, #tpu.memory_space<vmem>>, vector<8x1xf32>
    %85 = vector.broadcast %84 : vector<8x1xf32> to vector<8x128xf32>
    %86 = arith.mulf %82, %85 : vector<8x128xf32>
    %87 = arith.addf %50, %86 : vector<8x128xf32>
    %88 = arith.addf %51, %84 : vector<8x1xf32>
    %c2_i32 = arith.constant 2 : i32
    %c8_i32_30 = arith.constant 8 : i32
    %89 = arith.muli %c2_i32, %c8_i32_30 : i32
    %90 = tpu.assume_multiple %89, 8 : i32
    %91 = arith.index_cast %90 : i32 to index
    %c0_31 = arith.constant 0 : index
    %92 = vector.load %arg7[%91, %c0_31] : memref<64x512xf32, #tpu.memory_space<vmem>>, vector<8x512xf32>
    %cst_32 = arith.constant dense<0.000000e+00> : vector<8x512xf32>
    %93 = tpu.matmul %82, %10, %cst_32 {dimension_numbers = #tpu.dot_dimension_numbers<[1], [0], [0], [1], [0, 0, 1, 1], [], []>} : vector<8x128xf32>, vector<128x512xf32>, vector<8x512xf32> -> vector<8x512xf32>
    %94 = arith.addf %92, %93 : vector<8x512xf32>
    %95 = vector.extract_strided_slice %94 {offsets = [0, 0], sizes = [8, 128], strides = [1, 1]} : vector<8x512xf32> to vector<8x128xf32>
    %96 = arith.negf %95 : vector<8x128xf32>
    %97 = math.exp %96 : vector<8x128xf32>
    %cst_33 = arith.constant 1.000000e+00 : f32
    %98 = vector.broadcast %cst_33 : f32 to vector<8x128xf32>
    %99 = arith.addf %98, %97 : vector<8x128xf32>
    %100 = arith.divf %98, %99 : vector<8x128xf32>
    %101 = vector.extract_strided_slice %94 {offsets = [0, 128], sizes = [8, 128], strides = [1, 1]} : vector<8x512xf32> to vector<8x128xf32>
    %102 = arith.negf %101 : vector<8x128xf32>
    %103 = math.exp %102 : vector<8x128xf32>
    %cst_34 = arith.constant 1.000000e+00 : f32
    %104 = vector.broadcast %cst_34 : f32 to vector<8x128xf32>
    %105 = arith.addf %104, %103 : vector<8x128xf32>
    %106 = arith.divf %104, %105 : vector<8x128xf32>
    %107 = vector.extract_strided_slice %94 {offsets = [0, 256], sizes = [8, 128], strides = [1, 1]} : vector<8x512xf32> to vector<8x128xf32>
    %108 = math.tanh %107 : vector<8x128xf32>
    %109 = vector.extract_strided_slice %94 {offsets = [0, 384], sizes = [8, 128], strides = [1, 1]} : vector<8x512xf32> to vector<8x128xf32>
    %110 = arith.negf %109 : vector<8x128xf32>
    %111 = math.exp %110 : vector<8x128xf32>
    %cst_35 = arith.constant 1.000000e+00 : f32
    %112 = vector.broadcast %cst_35 : f32 to vector<8x128xf32>
    %113 = arith.addf %112, %111 : vector<8x128xf32>
    %114 = arith.divf %112, %113 : vector<8x128xf32>
    %115 = arith.mulf %106, %80 : vector<8x128xf32>
    %116 = arith.mulf %100, %108 : vector<8x128xf32>
    %117 = arith.addf %115, %116 : vector<8x128xf32>
    %118 = math.tanh %117 : vector<8x128xf32>
    %119 = arith.mulf %114, %118 : vector<8x128xf32>
    %120 = arith.index_cast %90 : i32 to index
    %c0_36 = arith.constant 0 : index
    %121 = vector.load %arg2[%120, %c0_36] : memref<64x1xf32, #tpu.memory_space<vmem>>, vector<8x1xf32>
    %122 = vector.broadcast %121 : vector<8x1xf32> to vector<8x128xf32>
    %123 = arith.mulf %119, %122 : vector<8x128xf32>
    %124 = arith.addf %87, %123 : vector<8x128xf32>
    %125 = arith.addf %88, %121 : vector<8x1xf32>
    %c3_i32 = arith.constant 3 : i32
    %c8_i32_37 = arith.constant 8 : i32
    %126 = arith.muli %c3_i32, %c8_i32_37 : i32
    %127 = tpu.assume_multiple %126, 8 : i32
    %128 = arith.index_cast %127 : i32 to index
    %c0_38 = arith.constant 0 : index
    %129 = vector.load %arg7[%128, %c0_38] : memref<64x512xf32, #tpu.memory_space<vmem>>, vector<8x512xf32>
    %cst_39 = arith.constant dense<0.000000e+00> : vector<8x512xf32>
    %130 = tpu.matmul %119, %10, %cst_39 {dimension_numbers = #tpu.dot_dimension_numbers<[1], [0], [0], [1], [0, 0, 1, 1], [], []>} : vector<8x128xf32>, vector<128x512xf32>, vector<8x512xf32> -> vector<8x512xf32>
    %131 = arith.addf %129, %130 : vector<8x512xf32>
    %132 = vector.extract_strided_slice %131 {offsets = [0, 0], sizes = [8, 128], strides = [1, 1]} : vector<8x512xf32> to vector<8x128xf32>
    %133 = arith.negf %132 : vector<8x128xf32>
    %134 = math.exp %133 : vector<8x128xf32>
    %cst_40 = arith.constant 1.000000e+00 : f32
    %135 = vector.broadcast %cst_40 : f32 to vector<8x128xf32>
    %136 = arith.addf %135, %134 : vector<8x128xf32>
    %137 = arith.divf %135, %136 : vector<8x128xf32>
    %138 = vector.extract_strided_slice %131 {offsets = [0, 128], sizes = [8, 128], strides = [1, 1]} : vector<8x512xf32> to vector<8x128xf32>
    %139 = arith.negf %138 : vector<8x128xf32>
    %140 = math.exp %139 : vector<8x128xf32>
    %cst_41 = arith.constant 1.000000e+00 : f32
    %141 = vector.broadcast %cst_41 : f32 to vector<8x128xf32>
    %142 = arith.addf %141, %140 : vector<8x128xf32>
    %143 = arith.divf %141, %142 : vector<8x128xf32>
    %144 = vector.extract_strided_slice %131 {offsets = [0, 256], sizes = [8, 128], strides = [1, 1]} : vector<8x512xf32> to vector<8x128xf32>
    %145 = math.tanh %144 : vector<8x128xf32>
    %146 = vector.extract_strided_slice %131 {offsets = [0, 384], sizes = [8, 128], strides = [1, 1]} : vector<8x512xf32> to vector<8x128xf32>
    %147 = arith.negf %146 : vector<8x128xf32>
    %148 = math.exp %147 : vector<8x128xf32>
    %cst_42 = arith.constant 1.000000e+00 : f32
    %149 = vector.broadcast %cst_42 : f32 to vector<8x128xf32>
    %150 = arith.addf %149, %148 : vector<8x128xf32>
    %151 = arith.divf %149, %150 : vector<8x128xf32>
    %152 = arith.mulf %143, %117 : vector<8x128xf32>
    %153 = arith.mulf %137, %145 : vector<8x128xf32>
    %154 = arith.addf %152, %153 : vector<8x128xf32>
    %155 = math.tanh %154 : vector<8x128xf32>
    %156 = arith.mulf %151, %155 : vector<8x128xf32>
    %157 = arith.index_cast %127 : i32 to index
    %c0_43 = arith.constant 0 : index
    %158 = vector.load %arg2[%157, %c0_43] : memref<64x1xf32, #tpu.memory_space<vmem>>, vector<8x1xf32>
    %159 = vector.broadcast %158 : vector<8x1xf32> to vector<8x128xf32>
    %160 = arith.mulf %156, %159 : vector<8x128xf32>
    %161 = arith.addf %124, %160 : vector<8x128xf32>
    %162 = arith.addf %125, %158 : vector<8x1xf32>
    %c4_i32 = arith.constant 4 : i32
    %c8_i32_44 = arith.constant 8 : i32
    %163 = arith.muli %c4_i32, %c8_i32_44 : i32
    %164 = tpu.assume_multiple %163, 8 : i32
    %165 = arith.index_cast %164 : i32 to index
    %c0_45 = arith.constant 0 : index
    %166 = vector.load %arg7[%165, %c0_45] : memref<64x512xf32, #tpu.memory_space<vmem>>, vector<8x512xf32>
    %cst_46 = arith.constant dense<0.000000e+00> : vector<8x512xf32>
    %167 = tpu.matmul %156, %10, %cst_46 {dimension_numbers = #tpu.dot_dimension_numbers<[1], [0], [0], [1], [0, 0, 1, 1], [], []>} : vector<8x128xf32>, vector<128x512xf32>, vector<8x512xf32> -> vector<8x512xf32>
    %168 = arith.addf %166, %167 : vector<8x512xf32>
    %169 = vector.extract_strided_slice %168 {offsets = [0, 0], sizes = [8, 128], strides = [1, 1]} : vector<8x512xf32> to vector<8x128xf32>
    %170 = arith.negf %169 : vector<8x128xf32>
    %171 = math.exp %170 : vector<8x128xf32>
    %cst_47 = arith.constant 1.000000e+00 : f32
    %172 = vector.broadcast %cst_47 : f32 to vector<8x128xf32>
    %173 = arith.addf %172, %171 : vector<8x128xf32>
    %174 = arith.divf %172, %173 : vector<8x128xf32>
    %175 = vector.extract_strided_slice %168 {offsets = [0, 128], sizes = [8, 128], strides = [1, 1]} : vector<8x512xf32> to vector<8x128xf32>
    %176 = arith.negf %175 : vector<8x128xf32>
    %177 = math.exp %176 : vector<8x128xf32>
    %cst_48 = arith.constant 1.000000e+00 : f32
    %178 = vector.broadcast %cst_48 : f32 to vector<8x128xf32>
    %179 = arith.addf %178, %177 : vector<8x128xf32>
    %180 = arith.divf %178, %179 : vector<8x128xf32>
    %181 = vector.extract_strided_slice %168 {offsets = [0, 256], sizes = [8, 128], strides = [1, 1]} : vector<8x512xf32> to vector<8x128xf32>
    %182 = math.tanh %181 : vector<8x128xf32>
    %183 = vector.extract_strided_slice %168 {offsets = [0, 384], sizes = [8, 128], strides = [1, 1]} : vector<8x512xf32> to vector<8x128xf32>
    %184 = arith.negf %183 : vector<8x128xf32>
    %185 = math.exp %184 : vector<8x128xf32>
    %cst_49 = arith.constant 1.000000e+00 : f32
    %186 = vector.broadcast %cst_49 : f32 to vector<8x128xf32>
    %187 = arith.addf %186, %185 : vector<8x128xf32>
    %188 = arith.divf %186, %187 : vector<8x128xf32>
    %189 = arith.mulf %180, %154 : vector<8x128xf32>
    %190 = arith.mulf %174, %182 : vector<8x128xf32>
    %191 = arith.addf %189, %190 : vector<8x128xf32>
    %192 = math.tanh %191 : vector<8x128xf32>
    %193 = arith.mulf %188, %192 : vector<8x128xf32>
    %194 = arith.index_cast %164 : i32 to index
    %c0_50 = arith.constant 0 : index
    %195 = vector.load %arg2[%194, %c0_50] : memref<64x1xf32, #tpu.memory_space<vmem>>, vector<8x1xf32>
    %196 = vector.broadcast %195 : vector<8x1xf32> to vector<8x128xf32>
    %197 = arith.mulf %193, %196 : vector<8x128xf32>
    %198 = arith.addf %161, %197 : vector<8x128xf32>
    %199 = arith.addf %162, %195 : vector<8x1xf32>
    %c5_i32 = arith.constant 5 : i32
    %c8_i32_51 = arith.constant 8 : i32
    %200 = arith.muli %c5_i32, %c8_i32_51 : i32
    %201 = tpu.assume_multiple %200, 8 : i32
    %202 = arith.index_cast %201 : i32 to index
    %c0_52 = arith.constant 0 : index
    %203 = vector.load %arg7[%202, %c0_52] : memref<64x512xf32, #tpu.memory_space<vmem>>, vector<8x512xf32>
    %cst_53 = arith.constant dense<0.000000e+00> : vector<8x512xf32>
    %204 = tpu.matmul %193, %10, %cst_53 {dimension_numbers = #tpu.dot_dimension_numbers<[1], [0], [0], [1], [0, 0, 1, 1], [], []>} : vector<8x128xf32>, vector<128x512xf32>, vector<8x512xf32> -> vector<8x512xf32>
    %205 = arith.addf %203, %204 : vector<8x512xf32>
    %206 = vector.extract_strided_slice %205 {offsets = [0, 0], sizes = [8, 128], strides = [1, 1]} : vector<8x512xf32> to vector<8x128xf32>
    %207 = arith.negf %206 : vector<8x128xf32>
    %208 = math.exp %207 : vector<8x128xf32>
    %cst_54 = arith.constant 1.000000e+00 : f32
    %209 = vector.broadcast %cst_54 : f32 to vector<8x128xf32>
    %210 = arith.addf %209, %208 : vector<8x128xf32>
    %211 = arith.divf %209, %210 : vector<8x128xf32>
    %212 = vector.extract_strided_slice %205 {offsets = [0, 128], sizes = [8, 128], strides = [1, 1]} : vector<8x512xf32> to vector<8x128xf32>
    %213 = arith.negf %212 : vector<8x128xf32>
    %214 = math.exp %213 : vector<8x128xf32>
    %cst_55 = arith.constant 1.000000e+00 : f32
    %215 = vector.broadcast %cst_55 : f32 to vector<8x128xf32>
    %216 = arith.addf %215, %214 : vector<8x128xf32>
    %217 = arith.divf %215, %216 : vector<8x128xf32>
    %218 = vector.extract_strided_slice %205 {offsets = [0, 256], sizes = [8, 128], strides = [1, 1]} : vector<8x512xf32> to vector<8x128xf32>
    %219 = math.tanh %218 : vector<8x128xf32>
    %220 = vector.extract_strided_slice %205 {offsets = [0, 384], sizes = [8, 128], strides = [1, 1]} : vector<8x512xf32> to vector<8x128xf32>
    %221 = arith.negf %220 : vector<8x128xf32>
    %222 = math.exp %221 : vector<8x128xf32>
    %cst_56 = arith.constant 1.000000e+00 : f32
    %223 = vector.broadcast %cst_56 : f32 to vector<8x128xf32>
    %224 = arith.addf %223, %222 : vector<8x128xf32>
    %225 = arith.divf %223, %224 : vector<8x128xf32>
    %226 = arith.mulf %217, %191 : vector<8x128xf32>
    %227 = arith.mulf %211, %219 : vector<8x128xf32>
    %228 = arith.addf %226, %227 : vector<8x128xf32>
    %229 = math.tanh %228 : vector<8x128xf32>
    %230 = arith.mulf %225, %229 : vector<8x128xf32>
    %231 = arith.index_cast %201 : i32 to index
    %c0_57 = arith.constant 0 : index
    %232 = vector.load %arg2[%231, %c0_57] : memref<64x1xf32, #tpu.memory_space<vmem>>, vector<8x1xf32>
    %233 = vector.broadcast %232 : vector<8x1xf32> to vector<8x128xf32>
    %234 = arith.mulf %230, %233 : vector<8x128xf32>
    %235 = arith.addf %198, %234 : vector<8x128xf32>
    %236 = arith.addf %199, %232 : vector<8x1xf32>
    %c6_i32 = arith.constant 6 : i32
    %c8_i32_58 = arith.constant 8 : i32
    %237 = arith.muli %c6_i32, %c8_i32_58 : i32
    %238 = tpu.assume_multiple %237, 8 : i32
    %239 = arith.index_cast %238 : i32 to index
    %c0_59 = arith.constant 0 : index
    %240 = vector.load %arg7[%239, %c0_59] : memref<64x512xf32, #tpu.memory_space<vmem>>, vector<8x512xf32>
    %cst_60 = arith.constant dense<0.000000e+00> : vector<8x512xf32>
    %241 = tpu.matmul %230, %10, %cst_60 {dimension_numbers = #tpu.dot_dimension_numbers<[1], [0], [0], [1], [0, 0, 1, 1], [], []>} : vector<8x128xf32>, vector<128x512xf32>, vector<8x512xf32> -> vector<8x512xf32>
    %242 = arith.addf %240, %241 : vector<8x512xf32>
    %243 = vector.extract_strided_slice %242 {offsets = [0, 0], sizes = [8, 128], strides = [1, 1]} : vector<8x512xf32> to vector<8x128xf32>
    %244 = arith.negf %243 : vector<8x128xf32>
    %245 = math.exp %244 : vector<8x128xf32>
    %cst_61 = arith.constant 1.000000e+00 : f32
    %246 = vector.broadcast %cst_61 : f32 to vector<8x128xf32>
    %247 = arith.addf %246, %245 : vector<8x128xf32>
    %248 = arith.divf %246, %247 : vector<8x128xf32>
    %249 = vector.extract_strided_slice %242 {offsets = [0, 128], sizes = [8, 128], strides = [1, 1]} : vector<8x512xf32> to vector<8x128xf32>
    %250 = arith.negf %249 : vector<8x128xf32>
    %251 = math.exp %250 : vector<8x128xf32>
    %cst_62 = arith.constant 1.000000e+00 : f32
    %252 = vector.broadcast %cst_62 : f32 to vector<8x128xf32>
    %253 = arith.addf %252, %251 : vector<8x128xf32>
    %254 = arith.divf %252, %253 : vector<8x128xf32>
    %255 = vector.extract_strided_slice %242 {offsets = [0, 256], sizes = [8, 128], strides = [1, 1]} : vector<8x512xf32> to vector<8x128xf32>
    %256 = math.tanh %255 : vector<8x128xf32>
    %257 = vector.extract_strided_slice %242 {offsets = [0, 384], sizes = [8, 128], strides = [1, 1]} : vector<8x512xf32> to vector<8x128xf32>
    %258 = arith.negf %257 : vector<8x128xf32>
    %259 = math.exp %258 : vector<8x128xf32>
    %cst_63 = arith.constant 1.000000e+00 : f32
    %260 = vector.broadcast %cst_63 : f32 to vector<8x128xf32>
    %261 = arith.addf %260, %259 : vector<8x128xf32>
    %262 = arith.divf %260, %261 : vector<8x128xf32>
    %263 = arith.mulf %254, %228 : vector<8x128xf32>
    %264 = arith.mulf %248, %256 : vector<8x128xf32>
    %265 = arith.addf %263, %264 : vector<8x128xf32>
    %266 = math.tanh %265 : vector<8x128xf32>
    %267 = arith.mulf %262, %266 : vector<8x128xf32>
    %268 = arith.index_cast %238 : i32 to index
    %c0_64 = arith.constant 0 : index
    %269 = vector.load %arg2[%268, %c0_64] : memref<64x1xf32, #tpu.memory_space<vmem>>, vector<8x1xf32>
    %270 = vector.broadcast %269 : vector<8x1xf32> to vector<8x128xf32>
    %271 = arith.mulf %267, %270 : vector<8x128xf32>
    %272 = arith.addf %235, %271 : vector<8x128xf32>
    %273 = arith.addf %236, %269 : vector<8x1xf32>
    %c7_i32 = arith.constant 7 : i32
    %c8_i32_65 = arith.constant 8 : i32
    %274 = arith.muli %c7_i32, %c8_i32_65 : i32
    %275 = tpu.assume_multiple %274, 8 : i32
    %276 = arith.index_cast %275 : i32 to index
    %c0_66 = arith.constant 0 : index
    %277 = vector.load %arg7[%276, %c0_66] : memref<64x512xf32, #tpu.memory_space<vmem>>, vector<8x512xf32>
    %cst_67 = arith.constant dense<0.000000e+00> : vector<8x512xf32>
    %278 = tpu.matmul %267, %10, %cst_67 {dimension_numbers = #tpu.dot_dimension_numbers<[1], [0], [0], [1], [0, 0, 1, 1], [], []>} : vector<8x128xf32>, vector<128x512xf32>, vector<8x512xf32> -> vector<8x512xf32>
    %279 = arith.addf %277, %278 : vector<8x512xf32>
    %280 = vector.extract_strided_slice %279 {offsets = [0, 0], sizes = [8, 128], strides = [1, 1]} : vector<8x512xf32> to vector<8x128xf32>
    %281 = arith.negf %280 : vector<8x128xf32>
    %282 = math.exp %281 : vector<8x128xf32>
    %cst_68 = arith.constant 1.000000e+00 : f32
    %283 = vector.broadcast %cst_68 : f32 to vector<8x128xf32>
    %284 = arith.addf %283, %282 : vector<8x128xf32>
    %285 = arith.divf %283, %284 : vector<8x128xf32>
    %286 = vector.extract_strided_slice %279 {offsets = [0, 128], sizes = [8, 128], strides = [1, 1]} : vector<8x512xf32> to vector<8x128xf32>
    %287 = arith.negf %286 : vector<8x128xf32>
    %288 = math.exp %287 : vector<8x128xf32>
    %cst_69 = arith.constant 1.000000e+00 : f32
    %289 = vector.broadcast %cst_69 : f32 to vector<8x128xf32>
    %290 = arith.addf %289, %288 : vector<8x128xf32>
    %291 = arith.divf %289, %290 : vector<8x128xf32>
    %292 = vector.extract_strided_slice %279 {offsets = [0, 256], sizes = [8, 128], strides = [1, 1]} : vector<8x512xf32> to vector<8x128xf32>
    %293 = math.tanh %292 : vector<8x128xf32>
    %294 = vector.extract_strided_slice %279 {offsets = [0, 384], sizes = [8, 128], strides = [1, 1]} : vector<8x512xf32> to vector<8x128xf32>
    %295 = arith.negf %294 : vector<8x128xf32>
    %296 = math.exp %295 : vector<8x128xf32>
    %cst_70 = arith.constant 1.000000e+00 : f32
    %297 = vector.broadcast %cst_70 : f32 to vector<8x128xf32>
    %298 = arith.addf %297, %296 : vector<8x128xf32>
    %299 = arith.divf %297, %298 : vector<8x128xf32>
    %300 = arith.mulf %291, %265 : vector<8x128xf32>
    %301 = arith.mulf %285, %293 : vector<8x128xf32>
    %302 = arith.addf %300, %301 : vector<8x128xf32>
    %303 = math.tanh %302 : vector<8x128xf32>
    %304 = arith.mulf %299, %303 : vector<8x128xf32>
    %305 = arith.index_cast %275 : i32 to index
    %c0_71 = arith.constant 0 : index
    %306 = vector.load %arg2[%305, %c0_71] : memref<64x1xf32, #tpu.memory_space<vmem>>, vector<8x1xf32>
    %307 = vector.broadcast %306 : vector<8x1xf32> to vector<8x128xf32>
    %308 = arith.mulf %304, %307 : vector<8x128xf32>
    %309 = arith.addf %272, %308 : vector<8x128xf32>
    %310 = arith.addf %273, %306 : vector<8x1xf32>
    %c8_i32_72 = arith.constant 8 : i32
    %c0_73 = arith.constant 0 : index
    %c0_74 = arith.constant 0 : index
    %311 = vector.load %arg8[%c0_73, %c0_74] : memref<8x128xf32, #tpu.memory_space<vmem>>, vector<8x128xf32>
    tpu.vector_store %arg8[%c0_73, %c0_74], %304 {strides = array<i32>} : memref<8x128xf32, #tpu.memory_space<vmem>>, vector<8x128xf32>,
    %c0_75 = arith.constant 0 : index
    %c0_76 = arith.constant 0 : index
    %312 = vector.load %arg9[%c0_75, %c0_76] : memref<8x128xf32, #tpu.memory_space<vmem>>, vector<8x128xf32>
    tpu.vector_store %arg9[%c0_75, %c0_76], %302 {strides = array<i32>} : memref<8x128xf32, #tpu.memory_space<vmem>>, vector<8x128xf32>,
    %c0_77 = arith.constant 0 : index
    %c0_78 = arith.constant 0 : index
    %c0_79 = arith.constant 0 : index
    %313 = vector.load %arg6[%c0_77, %c0_78, %c0_79] : memref<1x8x128xf32, #tpu.memory_space<vmem>>, vector<1x8x128xf32>
    %314 = vector.shape_cast %313 : vector<1x8x128xf32> to vector<8x128xf32>
    %315 = arith.addf %314, %309 : vector<8x128xf32>
    %c0_80 = arith.constant 0 : index
    %c0_81 = arith.constant 0 : index
    %c0_82 = arith.constant 0 : index
    %316 = vector.load %arg6[%c0_80, %c0_81, %c0_82] : memref<1x8x128xf32, #tpu.memory_space<vmem>>, vector<1x8x128xf32>
    %317 = vector.shape_cast %316 : vector<1x8x128xf32> to vector<8x128xf32>
    %318 = vector.shape_cast %315 : vector<8x128xf32> to vector<1x8x128xf32>
    tpu.vector_store %arg6[%c0_80, %c0_81, %c0_82], %318 {strides = array<i32>} : memref<1x8x128xf32, #tpu.memory_space<vmem>>, vector<1x8x128xf32>,
    %c0_83 = arith.constant 0 : index
    %c0_84 = arith.constant 0 : index
    %319 = vector.load %arg10[%c0_83, %c0_84] : memref<8x1xf32, #tpu.memory_space<vmem>>, vector<8x1xf32>
    %320 = arith.addf %319, %310 : vector<8x1xf32>
    %c0_85 = arith.constant 0 : index
    %c0_86 = arith.constant 0 : index
    %321 = vector.load %arg10[%c0_85, %c0_86] : memref<8x1xf32, #tpu.memory_space<vmem>>, vector<8x1xf32>
    tpu.vector_store %arg10[%c0_85, %c0_86], %320 {strides = array<i32>} : memref<8x1xf32, #tpu.memory_space<vmem>>, vector<8x1xf32>,
    %c0_i32_87 = arith.constant 0 : i32
    %322 = arith.cmpi eq, %arg0, %c0_i32_87 : i32
    %323 = arith.extui %322 : i1 to i32
    %c0_i32_88 = arith.constant 0 : i32
    %324 = arith.cmpi ne, %323, %c0_i32_88 : i32
    scf.if %324 {
      %c0_89 = arith.constant 0 : index
      %c0_90 = arith.constant 0 : index
      %325 = vector.load %arg10[%c0_89, %c0_90] : memref<8x1xf32, #tpu.memory_space<vmem>>, vector<8x1xf32>
      %cst_91 = arith.constant 9.99999993E-9 : f32
      %326 = vector.broadcast %cst_91 : f32 to vector<8x1xf32>
      %327 = arith.maximumf %325, %326 : vector<8x1xf32>
      %cst_92 = arith.constant 1.000000e+00 : f32
      %328 = vector.broadcast %cst_92 : f32 to vector<8x1xf32>
      %329 = arith.divf %328, %327 : vector<8x1xf32>
      %c0_93 = arith.constant 0 : index
      %c0_94 = arith.constant 0 : index
      %c0_95 = arith.constant 0 : index
      %330 = vector.load %arg6[%c0_93, %c0_94, %c0_95] : memref<1x8x128xf32, #tpu.memory_space<vmem>>, vector<1x8x128xf32>
      %331 = vector.shape_cast %330 : vector<1x8x128xf32> to vector<8x128xf32>
      %332 = vector.broadcast %329 : vector<8x1xf32> to vector<8x128xf32>
      %333 = arith.mulf %331, %332 : vector<8x128xf32>
      %c0_96 = arith.constant 0 : index
      %c0_97 = arith.constant 0 : index
      %c0_98 = arith.constant 0 : index
      %334 = vector.load %arg6[%c0_96, %c0_97, %c0_98] : memref<1x8x128xf32, #tpu.memory_space<vmem>>, vector<1x8x128xf32>
      %335 = vector.shape_cast %334 : vector<1x8x128xf32> to vector<8x128xf32>
      %336 = vector.shape_cast %333 : vector<8x128xf32> to vector<1x8x128xf32>
      tpu.vector_store %arg6[%c0_96, %c0_97, %c0_98], %336 {strides = array<i32>} : memref<1x8x128xf32, #tpu.memory_space<vmem>>, vector<1x8x128xf32>,
    } else {
    }
    return
  }
  func.func @transform_0(%arg0: i32) -> (i32, i32) {
    %c0_i32 = arith.constant 0 : i32
    %c0_i32_0 = arith.constant 0 : i32
    return %arg0, %c0_i32 : i32, i32
  }
  func.func @transform_1(%arg0: i32) -> (i32, i32) {
    %c0_i32 = arith.constant 0 : i32
    %c0_i32_0 = arith.constant 0 : i32
    return %arg0, %c0_i32 : i32, i32
  }
  func.func @transform_2(%arg0: i32) -> (i32, i32) {
    %c0_i32 = arith.constant 0 : i32
    %c0_i32_0 = arith.constant 0 : i32
    %c0_i32_1 = arith.constant 0 : i32
    return %c0_i32, %c0_i32_0 : i32, i32
  }
  func.func @transform_3(%arg0: i32) -> (i32, i32) {
    %c0_i32 = arith.constant 0 : i32
    %c0_i32_0 = arith.constant 0 : i32
    %c0_i32_1 = arith.constant 0 : i32
    return %c0_i32, %c0_i32_0 : i32, i32
  }
  func.func @transform_4(%arg0: i32) -> (i32, i32) {
    %c0_i32 = arith.constant 0 : i32
    %c0_i32_0 = arith.constant 0 : i32
    %c0_i32_1 = arith.constant 0 : i32
    return %c0_i32, %c0_i32_0 : i32, i32
  }
  func.func @transform_5(%arg0: i32) -> (i32, i32, i32) {
    %c0_i32 = arith.constant 0 : i32
    %c0_i32_0 = arith.constant 0 : i32
    %c0_i32_1 = arith.constant 0 : i32
    %c0_i32_2 = arith.constant 0 : i32
    return %c0_i32, %c0_i32_0, %c0_i32_1 : i32, i32, i32
  }
}

</mosaic_0001>

<bundles_post_ra>
// kernel: lstm_encoder_forward.2
= control target key start
LH: loop header
LB: loop body
LE: loop exit
PB: predicated region body
PF: predicated region fallthrough
CT: control target
= control target key end

     0   :  { %s3400_s1 = inlined_call_operand.vmem [shape: f32[128,512], index: 1, kind: input, shape index: {}]   ;;  %s3401_s0 = inlined_call_operand.vmem [shape: f32[64,128], index: 0, kind: input, shape index: {}]   ;;  %s3402_s2 = inlined_call_operand.vmem [shape: f32[128,512], index: 2, kind: input, shape index: {}]   ;;  %s3403_s3 = inlined_call_operand.vmem [shape: f32[1,512], index: 3, kind: input, shape index: {}]   ;;  %s3404_s4 = inlined_call_operand.vmem [shape: f32[64,128], index: 4, kind: output, shape index: {}]  }
   0x1   :  { %v91_v0 = vld [vmem:[%s3400_s1 + $0x1e0] sm:$0xff]  ;;  %v92_v1 = vld [vmem:[%s3400_s1 + $0x1e8] sm:$0xff]  ;;  %v93_v2 = vld [vmem:[%s3400_s1 + $0x1f0] sm:$0xff] }
   0x2   :  { %105 = vmatpush.msra.mxu0 %v91_v0  ;;  %146 = vmatpush.msra.mxu1 %v92_v1  ;;  %v94_v3 = vld [vmem:[%s3400_s1 + $0x1f8] sm:$0xff]  ;;  %v87_v4 = vld [vmem:[%s3400_s1 + $0x1c0] sm:$0xff]  ;;  %v88_v5 = vld [vmem:[%s3400_s1 + $0x1c8] sm:$0xff] }
   0x3   :  { %187 = vmatpush.msra.mxu2 %v93_v2  ;;  %228 = vmatpush.msra.mxu3 %v94_v3  ;;  %v89_v6 = vld [vmem:[%s3400_s1 + $0x1d0] sm:$0xff]  ;;  %v90_v7 = vld [vmem:[%s3400_s1 + $0x1d8] sm:$0xff]  ;;  %v83_v8 = vld [vmem:[%s3400_s1 + $0x1a0] sm:$0xff] }
   0x4   :  { %106 = vmatpush.msra.mxu0 %v87_v4  ;;  %147 = vmatpush.msra.mxu1 %v88_v5  ;;  %v84_v9 = vld [vmem:[%s3400_s1 + $0x1a8] sm:$0xff]  ;;  %v85_v10 = vld [vmem:[%s3400_s1 + $0x1b0] sm:$0xff]  ;;  %v86_v11 = vld [vmem:[%s3400_s1 + $0x1b8] sm:$0xff] }
   0x5   :  { %188 = vmatpush.msra.mxu2 %v89_v6  ;;  %229 = vmatpush.msra.mxu3 %v90_v7  ;;  %v79_v12 = vld [vmem:[%s3400_s1 + $0x180] sm:$0xff]  ;;  %v80_v13 = vld [vmem:[%s3400_s1 + $0x188] sm:$0xff]  ;;  %v81_v14 = vld [vmem:[%s3400_s1 + $0x190] sm:$0xff] }
   0x6   :  { %107 = vmatpush.msra.mxu0 %v83_v8  ;;  %148 = vmatpush.msra.mxu1 %v84_v9  ;;  %v82_v15 = vld [vmem:[%s3400_s1 + $0x198] sm:$0xff]  ;;  %v75_v16 = vld [vmem:[%s3400_s1 + $0x160] sm:$0xff]  ;;  %v76_v17 = vld [vmem:[%s3400_s1 + $0x168] sm:$0xff] }
   0x7   :  { %189 = vmatpush.msra.mxu2 %v85_v10  ;;  %230 = vmatpush.msra.mxu3 %v86_v11  ;;  %v77_v18 = vld [vmem:[%s3400_s1 + $0x170] sm:$0xff]  ;;  %v78_v19 = vld [vmem:[%s3400_s1 + $0x178] sm:$0xff]  ;;  %v71_v20 = vld [vmem:[%s3400_s1 + $0x140] sm:$0xff] }
   0x8   :  { %108 = vmatpush.msra.mxu0 %v79_v12  ;;  %149 = vmatpush.msra.mxu1 %v80_v13  ;;  %v72_v21 = vld [vmem:[%s3400_s1 + $0x148] sm:$0xff]  ;;  %v73_v22 = vld [vmem:[%s3400_s1 + $0x150] sm:$0xff]  ;;  %v74_v23 = vld [vmem:[%s3400_s1 + $0x158] sm:$0xff] }
   0x9   :  { %190 = vmatpush.msra.mxu2 %v81_v14  ;;  %231 = vmatpush.msra.mxu3 %v82_v15  ;;  %v67_v24 = vld [vmem:[%s3400_s1 + $0x120] sm:$0xff]  ;;  %v68_v25 = vld [vmem:[%s3400_s1 + $0x128] sm:$0xff]  ;;  %v69_v26 = vld [vmem:[%s3400_s1 + $0x130] sm:$0xff] }
   0xa   :  { %109 = vmatpush.msra.mxu0 %v75_v16  ;;  %150 = vmatpush.msra.mxu1 %v76_v17  ;;  %v70_v27 = vld [vmem:[%s3400_s1 + $0x138] sm:$0xff]  ;;  %v63_v28 = vld [vmem:[%s3400_s1 + $0x100] sm:$0xff]  ;;  %v64_v29 = vld [vmem:[%s3400_s1 + $0x108] sm:$0xff] }
   0xb   :  { %191 = vmatpush.msra.mxu2 %v77_v18  ;;  %232 = vmatpush.msra.mxu3 %v78_v19  ;;  %v65_v30 = vld [vmem:[%s3400_s1 + $0x110] sm:$0xff]  ;;  %v66_v31 = vld [vmem:[%s3400_s1 + $0x118] sm:$0xff]  ;;  %v59_v32 = vld [vmem:[%s3400_s1 + $0xe0] sm:$0xff] }
   0xc   :  { %110 = vmatpush.msra.mxu0 %v71_v20  ;;  %151 = vmatpush.msra.mxu1 %v72_v21  ;;  %v60_v33 = vld [vmem:[%s3400_s1 + $0xe8] sm:$0xff]  ;;  %v61_v34 = vld [vmem:[%s3400_s1 + $0xf0] sm:$0xff]  ;;  %v62_v35 = vld [vmem:[%s3400_s1 + $0xf8] sm:$0xff] }
   0xd   :  { %192 = vmatpush.msra.mxu2 %v73_v22  ;;  %233 = vmatpush.msra.mxu3 %v74_v23  ;;  %v55_v36 = vld [vmem:[%s3400_s1 + $0xc0] sm:$0xff]  ;;  %v56_v37 = vld [vmem:[%s3400_s1 + $0xc8] sm:$0xff]  ;;  %v57_v38 = vld [vmem:[%s3400_s1 + $0xd0] sm:$0xff] }
   0xe   :  { %111 = vmatpush.msra.mxu0 %v67_v24  ;;  %152 = vmatpush.msra.mxu1 %v68_v25  ;;  %v58_v39 = vld [vmem:[%s3400_s1 + $0xd8] sm:$0xff]  ;;  %v51_v40 = vld [vmem:[%s3400_s1 + $0xa0] sm:$0xff]  ;;  %v52_v41 = vld [vmem:[%s3400_s1 + $0xa8] sm:$0xff] }
   0xf   :  { %193 = vmatpush.msra.mxu2 %v69_v26  ;;  %234 = vmatpush.msra.mxu3 %v70_v27  ;;  %v53_v42 = vld [vmem:[%s3400_s1 + $0xb0] sm:$0xff]  ;;  %v54_v43 = vld [vmem:[%s3400_s1 + $0xb8] sm:$0xff]  ;;  %v47_v44 = vld [vmem:[%s3400_s1 + $0x80] sm:$0xff] }
  0x10   :  { %112 = vmatpush.msra.mxu0 %v63_v28  ;;  %153 = vmatpush.msra.mxu1 %v64_v29  ;;  %v48_v45 = vld [vmem:[%s3400_s1 + $0x88] sm:$0xff]  ;;  %v49_v46 = vld [vmem:[%s3400_s1 + $0x90] sm:$0xff]  ;;  %v50_v47 = vld [vmem:[%s3400_s1 + $0x98] sm:$0xff] }
  0x11   :  { %194 = vmatpush.msra.mxu2 %v65_v30  ;;  %235 = vmatpush.msra.mxu3 %v66_v31  ;;  %v43_v48 = vld [vmem:[%s3400_s1 + $0x60] sm:$0xff]  ;;  %v44_v49 = vld [vmem:[%s3400_s1 + $0x68] sm:$0xff]  ;;  %v45_v50 = vld [vmem:[%s3400_s1 + $0x70] sm:$0xff] }
  0x12   :  { %113 = vmatpush.msra.mxu0 %v59_v32  ;;  %154 = vmatpush.msra.mxu1 %v60_v33  ;;  %v46_v51 = vld [vmem:[%s3400_s1 + $0x78] sm:$0xff]  ;;  %v39_v52 = vld [vmem:[%s3400_s1 + $0x40] sm:$0xff]  ;;  %v40_v53 = vld [vmem:[%s3400_s1 + $0x48] sm:$0xff] }
  0x13   :  { %195 = vmatpush.msra.mxu2 %v61_v34  ;;  %236 = vmatpush.msra.mxu3 %v62_v35  ;;  %v41_v54 = vld [vmem:[%s3400_s1 + $0x50] sm:$0xff]  ;;  %v42_v55 = vld [vmem:[%s3400_s1 + $0x58] sm:$0xff]  ;;  %v35_v56 = vld [vmem:[%s3400_s1 + $0x20] sm:$0xff] }
  0x14   :  { %114 = vmatpush.msra.mxu0 %v55_v36  ;;  %155 = vmatpush.msra.mxu1 %v56_v37  ;;  %v36_v57 = vld [vmem:[%s3400_s1 + $0x28] sm:$0xff]  ;;  %v37_v58 = vld [vmem:[%s3400_s1 + $0x30] sm:$0xff]  ;;  %v38_v59 = vld [vmem:[%s3400_s1 + $0x38] sm:$0xff] }
  0x15   :  { %196 = vmatpush.msra.mxu2 %v57_v38  ;;  %237 = vmatpush.msra.mxu3 %v58_v39  ;;  %v31_v60 = vld [vmem:[%s3400_s1] sm:$0xff]  ;;  %v32_v61 = vld [vmem:[%s3400_s1 + $0x8] sm:$0xff]  ;;  %v33_v62 = vld [vmem:[%s3400_s1 + $0x10] sm:$0xff] }
  0x16   :  { %115 = vmatpush.msra.mxu0 %v51_v40  ;;  %156 = vmatpush.msra.mxu1 %v52_v41  ;;  %v34_v63 = vld [vmem:[%s3400_s1 + $0x18] sm:$0xff]  ;;  %v23_v0 = vld [vmem:[%s3401_s0] sm:$0xff]  ;;  %v2080_v2 = vld [vmem:[%s3402_s2 + $0x1e8] sm:$0xff] }
  0x17   :  { %197 = vmatpush.msra.mxu2 %v53_v42  ;;  %238 = vmatpush.msra.mxu3 %v54_v43  ;;  %v2075_v1 = vld [vmem:[%s3402_s2 + $0x1e0] sm:$0xff]  ;;  %v2085_v3 = vld [vmem:[%s3402_s2 + $0x1f8] sm:$0xff]  ;;  %v2090_v4 = vld [vmem:[%s3402_s2 + $0x1f0] sm:$0xff] }
  0x18   :  { %116 = vmatpush.msra.mxu0 %v47_v44  ;;  %157 = vmatpush.msra.mxu1 %v48_v45  ;;  %v2095_v5 = vld [vmem:[%s3402_s2 + $0x1c0] sm:$0xff]  ;;  %v2100_v6 = vld [vmem:[%s3402_s2 + $0x1c8] sm:$0xff]  ;;  %v2107_v7 = vld [vmem:[%s3402_s2 + $0x1d8] sm:$0xff] }
  0x19   :  { %198 = vmatpush.msra.mxu2 %v49_v46  ;;  %239 = vmatpush.msra.mxu3 %v50_v47  ;;  %v2112_v8 = vld [vmem:[%s3402_s2 + $0x1d0] sm:$0xff]  ;;  %v2118_v9 = vld [vmem:[%s3402_s2 + $0x1a0] sm:$0xff]  ;;  %v2123_v10 = vld [vmem:[%s3402_s2 + $0x1a8] sm:$0xff] }
  0x1a   :  { %117 = vmatpush.msra.mxu0 %v43_v48  ;;  %158 = vmatpush.msra.mxu1 %v44_v49  ;;  %v2131_v11 = vld [vmem:[%s3402_s2 + $0x1b8] sm:$0xff]  ;;  %v2136_v12 = vld [vmem:[%s3402_s2 + $0x1b0] sm:$0xff]  ;;  %v24_v13 = vld [vmem:[%s3401_s0 + $0x8] sm:$0xff] }
  0x1b   :  { %199 = vmatpush.msra.mxu2 %v45_v50  ;;  %240 = vmatpush.msra.mxu3 %v46_v51  ;;  %v2148_v14 = vld [vmem:[%s3402_s2 + $0x180] sm:$0xff]  ;;  %v2153_v15 = vld [vmem:[%s3402_s2 + $0x188] sm:$0xff]  ;;  %v2160_v16 = vld [vmem:[%s3402_s2 + $0x198] sm:$0xff] }
  0x1c   :  { %118 = vmatpush.msra.mxu0 %v39_v52  ;;  %159 = vmatpush.msra.mxu1 %v40_v53  ;;  %v2165_v17 = vld [vmem:[%s3402_s2 + $0x190] sm:$0xff]  ;;  %v2170_v18 = vld [vmem:[%s3402_s2 + $0x160] sm:$0xff]  ;;  %v2175_v19 = vld [vmem:[%s3402_s2 + $0x168] sm:$0xff] }
  0x1d   :  { %200 = vmatpush.msra.mxu2 %v41_v54  ;;  %241 = vmatpush.msra.mxu3 %v42_v55  ;;  %v2182_v20 = vld [vmem:[%s3402_s2 + $0x178] sm:$0xff]  ;;  %v2187_v21 = vld [vmem:[%s3402_s2 + $0x170] sm:$0xff]  ;;  %v2193_v22 = vld [vmem:[%s3402_s2 + $0x140] sm:$0xff] }
  0x1e   :  { %119 = vmatpush.msra.mxu0 %v35_v56  ;;  %160 = vmatpush.msra.mxu1 %v36_v57  ;;  %v2198_v23 = vld [vmem:[%s3402_s2 + $0x148] sm:$0xff]  ;;  %v2206_v24 = vld [vmem:[%s3402_s2 + $0x158] sm:$0xff]  ;;  %v2211_v25 = vld [vmem:[%s3402_s2 + $0x150] sm:$0xff] }
  0x1f   :  { %201 = vmatpush.msra.mxu2 %v37_v58  ;;  %242 = vmatpush.msra.mxu3 %v38_v59  ;;  %v25_v26 = vld [vmem:[%s3401_s0 + $0x10] sm:$0xff]  ;;  %v2223_v27 = vld [vmem:[%s3402_s2 + $0x120] sm:$0xff]  ;;  %v2228_v28 = vld [vmem:[%s3402_s2 + $0x128] sm:$0xff] }
  0x20   :  { %120 = vmatpush.msra.mxu0 %v31_v60  ;;  %161 = vmatpush.msra.mxu1 %v32_v61  ;;  %v2235_v29 = vld [vmem:[%s3402_s2 + $0x138] sm:$0xff]  ;;  %v2240_v30 = vld [vmem:[%s3402_s2 + $0x130] sm:$0xff]  ;;  %v2245_v31 = vld [vmem:[%s3402_s2 + $0x100] sm:$0xff] }
  0x21   :  { %202 = vmatpush.msra.mxu2 %v33_v62  ;;  %243 = vmatpush.msra.mxu3 %v34_v63  ;;  %v2250_v32 = vld [vmem:[%s3402_s2 + $0x108] sm:$0xff]  ;;  %v2257_v33 = vld [vmem:[%s3402_s2 + $0x118] sm:$0xff]  ;;  %v2262_v34 = vld [vmem:[%s3402_s2 + $0x110] sm:$0xff] }
  0x22   :  { %121 = vmatmul.f32.vlgmr.msra.gmra.mxu0 %v23_v0  ;;  %162 = vmatmul.f32.vlgmr.msra.gmra.mxu1 %v23_v0  ;;  %v2268_v35 = vld [vmem:[%s3402_s2 + $0xe0] sm:$0xff]  ;;  %v2273_v36 = vld [vmem:[%s3402_s2 + $0xe8] sm:$0xff]  ;;  %v2281_v37 = vld [vmem:[%s3402_s2 + $0xf8] sm:$0xff] }
  0x23   :  { %203 = vmatmul.f32.vlgmr.msra.gmra.mxu2 %v23_v0  ;;  %244 = vmatmul.f32.vlgmr.msra.gmra.mxu3 %v23_v0  ;;  %v2286_v38 = vld [vmem:[%s3402_s2 + $0xf0] sm:$0xff]  ;;  %v26_v39 = vld [vmem:[%s3401_s0 + $0x18] sm:$0xff]  ;;  %v2298_v40 = vld [vmem:[%s3402_s2 + $0xc0] sm:$0xff] }
  0x24   :  { %374 = vmatpush.msrb.mxu0 %v2075_v1  ;;  %394 = vmatpush.msrb.mxu1 %v2080_v2  ;;  %v2303_v41 = vld [vmem:[%s3402_s2 + $0xc8] sm:$0xff]  ;;  %v2310_v42 = vld [vmem:[%s3402_s2 + $0xd8] sm:$0xff]  ;;  %v2315_v43 = vld [vmem:[%s3402_s2 + $0xd0] sm:$0xff] }
  0x25   :  { %434 = vmatpush.msrb.mxu3 %v2085_v3  ;;  %414 = vmatpush.msrb.mxu2 %v2090_v4  ;;  %3491 = vst [vmem:[#allocation5_spill] sm:$0xff] %v2310_v42  ;;  %v2320_v44 = vld [vmem:[%s3402_s2 + $0xa0] sm:$0xff]  ;;  %v2325_v45 = vld [vmem:[%s3402_s2 + $0xa8] sm:$0xff]  ;;  %v2332_v46 = vld [vmem:[%s3402_s2 + $0xb8] sm:$0xff] }
  0x26   :  { %375 = vmatpush.msrb.mxu0 %v2095_v5  ;;  %395 = vmatpush.msrb.mxu1 %v2100_v6  ;;  %3492 = vst [vmem:[#allocation6_spill] sm:$0xff] %v2315_v43  ;;  %v2337_v47 = vld [vmem:[%s3402_s2 + $0xb0] sm:$0xff]  ;;  %v2343_v48 = vld [vmem:[%s3402_s2 + $0x80] sm:$0xff]  ;;  %v2348_v49 = vld [vmem:[%s3402_s2 + $0x88] sm:$0xff] }
  0x27   :  { %435 = vmatpush.msrb.mxu3 %v2107_v7  ;;  %415 = vmatpush.msrb.mxu2 %v2112_v8  ;;  %3493 = vst [vmem:[#allocation7_spill] sm:$0xff] %v2320_v44  ;;  %v2356_v50 = vld [vmem:[%s3402_s2 + $0x98] sm:$0xff]  ;;  %v2361_v51 = vld [vmem:[%s3402_s2 + $0x90] sm:$0xff]  ;;  %v27_v52 = vld [vmem:[%s3401_s0 + $0x20] sm:$0xff] }
  0x28   :  { %376 = vmatpush.msrb.mxu0 %v2118_v9  ;;  %396 = vmatpush.msrb.mxu1 %v2123_v10  ;;  %3494 = vst [vmem:[#allocation8_spill] sm:$0xff] %v2325_v45  ;;  %v2373_v53 = vld [vmem:[%s3402_s2 + $0x60] sm:$0xff]  ;;  %v2378_v54 = vld [vmem:[%s3402_s2 + $0x68] sm:$0xff]  ;;  %v2385_v55 = vld [vmem:[%s3402_s2 + $0x78] sm:$0xff] }
  0x29   :  { %436 = vmatpush.msrb.mxu3 %v2131_v11  ;;  %416 = vmatpush.msrb.mxu2 %v2136_v12  ;;  %3495 = vst [vmem:[#allocation9_spill] sm:$0xff] %v2332_v46  ;;  %v2390_v56 = vld [vmem:[%s3402_s2 + $0x70] sm:$0xff]  ;;  %v2395_v57 = vld [vmem:[%s3402_s2 + $0x40] sm:$0xff]  ;;  %v2400_v58 = vld [vmem:[%s3402_s2 + $0x48] sm:$0xff] }
  0x2a   :  { %124 = vmatmul.f32.gmra.mxu0 %v24_v13  ;;  %165 = vmatmul.f32.gmra.mxu1 %v24_v13  ;;  %3496 = vst [vmem:[#allocation10_spill] sm:$0xff] %v2337_v47  ;;  %v2407_v59 = vld [vmem:[%s3402_s2 + $0x58] sm:$0xff]  ;;  %v2412_v60 = vld [vmem:[%s3402_s2 + $0x50] sm:$0xff]  ;;  %v2418_v61 = vld [vmem:[%s3402_s2 + $0x20] sm:$0xff] }
  0x2b   :  { %206 = vmatmul.f32.gmra.mxu2 %v24_v13  ;;  %247 = vmatmul.f32.gmra.mxu3 %v24_v13  ;;  %3497 = vst [vmem:[#allocation11_spill] sm:$0xff] %v2343_v48  ;;  %v2423_v62 = vld [vmem:[%s3402_s2 + $0x28] sm:$0xff]  ;;  %v2431_v63 = vld [vmem:[%s3402_s2 + $0x30] sm:$0xff]  ;;  %v2436_v0 = vld [vmem:[%s3402_s2 + $0x38] sm:$0xff] }
  0x2c   :  { %377 = vmatpush.msrb.mxu0 %v2148_v14  ;;  %397 = vmatpush.msrb.mxu1 %v2153_v15  ;;  %3498 = vst [vmem:[#allocation12_spill] sm:$0xff] %v2348_v49  ;;  %v28_v13 = vld [vmem:[%s3401_s0 + $0x28] sm:$0xff] }
  0x2d   :  { %437 = vmatpush.msrb.mxu3 %v2160_v16  ;;  %417 = vmatpush.msrb.mxu2 %v2165_v17  ;;  %3499 = vst [vmem:[#allocation13_spill] sm:$0xff] %v2356_v50 }
  0x2e   :  { %378 = vmatpush.msrb.mxu0 %v2170_v18  ;;  %398 = vmatpush.msrb.mxu1 %v2175_v19  ;;  %3500 = vst [vmem:[#allocation14_spill] sm:$0xff] %v2361_v51 }
  0x2f   :  { %438 = vmatpush.msrb.mxu3 %v2182_v20  ;;  %418 = vmatpush.msrb.mxu2 %v2187_v21  ;;  %3501 = vst [vmem:[#allocation15_spill] sm:$0xff] %v2373_v53 }
  0x30   :  { %379 = vmatpush.msrb.mxu0 %v2193_v22  ;;  %399 = vmatpush.msrb.mxu1 %v2198_v23  ;;  %3502 = vst [vmem:[#allocation16_spill] sm:$0xff] %v2378_v54 }
  0x31   :  { %439 = vmatpush.msrb.mxu3 %v2206_v24  ;;  %419 = vmatpush.msrb.mxu2 %v2211_v25  ;;  %3503 = vst [vmem:[#allocation17_spill] sm:$0xff] %v2385_v55 }
  0x32   :  { %127 = vmatmul.f32.gmra.mxu0 %v25_v26  ;;  %168 = vmatmul.f32.gmra.mxu1 %v25_v26  ;;  %3504 = vst [vmem:[#allocation18_spill] sm:$0xff] %v2390_v56 }
  0x33   :  { %209 = vmatmul.f32.gmra.mxu2 %v25_v26  ;;  %250 = vmatmul.f32.gmra.mxu3 %v25_v26  ;;  %3505 = vst [vmem:[#allocation19_spill] sm:$0xff] %v2395_v57  ;;  %v2448_v26 = vld [vmem:[%s3402_s2] sm:$0xff] }
  0x34   :  { %380 = vmatpush.msrb.mxu0 %v2223_v27  ;;  %400 = vmatpush.msrb.mxu1 %v2228_v28  ;;  %3506 = vst [vmem:[#allocation20_spill] sm:$0xff] %v2400_v58 }
  0x35   :  { %440 = vmatpush.msrb.mxu3 %v2235_v29  ;;  %420 = vmatpush.msrb.mxu2 %v2240_v30  ;;  %3507 = vst [vmem:[#allocation21_spill] sm:$0xff] %v2407_v59 }
  0x36   :  { %381 = vmatpush.msrb.mxu0 %v2245_v31  ;;  %401 = vmatpush.msrb.mxu1 %v2250_v32  ;;  %3508 = vst [vmem:[#allocation22_spill] sm:$0xff] %v2412_v60 }
  0x37   :  { %441 = vmatpush.msrb.mxu3 %v2257_v33  ;;  %421 = vmatpush.msrb.mxu2 %v2262_v34  ;;  %3509 = vst [vmem:[#allocation23_spill] sm:$0xff] %v2418_v61 }
  0x38   :  { %382 = vmatpush.msrb.mxu0 %v2268_v35  ;;  %402 = vmatpush.msrb.mxu1 %v2273_v36  ;;  %3510 = vst [vmem:[#allocation24_spill] sm:$0xff] %v2423_v62 }
  0x39   :  { %442 = vmatpush.msrb.mxu3 %v2281_v37  ;;  %422 = vmatpush.msrb.mxu2 %v2286_v38  ;;  %3511 = vst [vmem:[#allocation25_spill] sm:$0xff] %v2431_v63 }
  0x3a   :  { %130 = vmatmul.f32.gmra.mxu0 %v26_v39  ;;  %171 = vmatmul.f32.gmra.mxu1 %v26_v39  ;;  %3512 = vst [vmem:[#allocation26_spill] sm:$0xff] %v2436_v0 }
  0x3b   :  { %212 = vmatmul.f32.gmra.mxu2 %v26_v39  ;;  %253 = vmatmul.f32.gmra.mxu3 %v26_v39  ;;  %3513 = vst [vmem:[#allocation27_spill] sm:$0xff] %v2448_v26  ;;  %v2453_v39 = vld [vmem:[%s3402_s2 + $0x8] sm:$0xff] }
  0x3c   :  { %383 = vmatpush.msrb.mxu0 %v2298_v40  ;;  %403 = vmatpush.msrb.mxu1 %v2303_v41  ;;  %3514 = vst [vmem:[#allocation28_spill] sm:$0xff] %v2453_v39 }
  0x3d   :  { %443 = vmatpush.msrb.mxu3 %v2310_v42  ;;  %423 = vmatpush.msrb.mxu2 %v2315_v43 }
  0x3e   :  { %384 = vmatpush.msrb.mxu0 %v2320_v44  ;;  %404 = vmatpush.msrb.mxu1 %v2325_v45 }
  0x3f   :  { %444 = vmatpush.msrb.mxu3 %v2332_v46  ;;  %424 = vmatpush.msrb.mxu2 %v2337_v47 }
  0x40   :  { %385 = vmatpush.msrb.mxu0 %v2343_v48  ;;  %405 = vmatpush.msrb.mxu1 %v2348_v49 }
  0x41   :  { %445 = vmatpush.msrb.mxu3 %v2356_v50  ;;  %425 = vmatpush.msrb.mxu2 %v2361_v51 }
  0x42   :  { %133 = vmatmul.f32.gmra.mxu0 %v27_v52  ;;  %174 = vmatmul.f32.gmra.mxu1 %v27_v52 }
  0x43   :  { %215 = vmatmul.f32.gmra.mxu2 %v27_v52  ;;  %256 = vmatmul.f32.gmra.mxu3 %v27_v52  ;;  %v2460_v52 = vld [vmem:[%s3402_s2 + $0x10] sm:$0xff] }
  0x44   :  { %386 = vmatpush.msrb.mxu0 %v2373_v53  ;;  %406 = vmatpush.msrb.mxu1 %v2378_v54  ;;  %3515 = vst [vmem:[#allocation29_spill] sm:$0xff] %v2460_v52 }
  0x45   :  { %446 = vmatpush.msrb.mxu3 %v2385_v55  ;;  %426 = vmatpush.msrb.mxu2 %v2390_v56 }
  0x46   :  { %387 = vmatpush.msrb.mxu0 %v2395_v57  ;;  %407 = vmatpush.msrb.mxu1 %v2400_v58 }
  0x47   :  { %447 = vmatpush.msrb.mxu3 %v2407_v59  ;;  %427 = vmatpush.msrb.mxu2 %v2412_v60 }
  0x48   :  { %388 = vmatpush.msrb.mxu0 %v2418_v61  ;;  %408 = vmatpush.msrb.mxu1 %v2423_v62  ;;  %v2465_v62 = vld [vmem:[%s3402_s2 + $0x18] sm:$0xff] }
  0x49   :  { %428 = vmatpush.msrb.mxu2 %v2431_v63  ;;  %448 = vmatpush.msrb.mxu3 %v2436_v0  ;;  %3516 = vst [vmem:[#allocation30_spill] sm:$0xff] %v2465_v62  ;;  %v29_v0 = vld [vmem:[%s3401_s0 + $0x30] sm:$0xff] }
  0x4a   :  { %136 = vmatmul.f32.gmra.mxu0 %v28_v13  ;;  %177 = vmatmul.f32.gmra.mxu1 %v28_v13 }
  0x4b   :  { %218 = vmatmul.f32.gmra.mxu2 %v28_v13  ;;  %259 = vmatmul.f32.gmra.mxu3 %v28_v13  ;;  %v30_v13 = vld [vmem:[%s3401_s0 + $0x38] sm:$0xff] }
  0x4c   :  { %389 = vmatpush.msrb.mxu0 %v2448_v26  ;;  %409 = vmatpush.msrb.mxu1 %v2453_v39 }
  0x4d   :  { %429 = vmatpush.msrb.mxu2 %v2460_v52  ;;  %449 = vmatpush.msrb.mxu3 %v2465_v62 }
  0x4e   :  { %529 = vmatpush.msra.mxu0 %v2075_v1  ;;  %549 = vmatpush.msra.mxu1 %v2080_v2 }
  0x4f   :  { %569 = vmatpush.msra.mxu2 %v2090_v4  ;;  %589 = vmatpush.msra.mxu3 %v2085_v3 }
  0x50   :  { %530 = vmatpush.msra.mxu0 %v2095_v5  ;;  %550 = vmatpush.msra.mxu1 %v2100_v6 }
  0x51   :  { %570 = vmatpush.msra.mxu2 %v2112_v8  ;;  %590 = vmatpush.msra.mxu3 %v2107_v7 }
  0x52   :  { %139 = vmatmul.f32.gmra.mxu0 %v29_v0  ;;  %180 = vmatmul.f32.gmra.mxu1 %v29_v0 }
  0x53   :  { %221 = vmatmul.f32.gmra.mxu2 %v29_v0  ;;  %262 = vmatmul.f32.gmra.mxu3 %v29_v0  ;;  %v1851_v0 = vmov 0.0  }
  0x54   :  { %531 = vmatpush.msra.mxu0 %v2118_v9  ;;  %551 = vmatpush.msra.mxu1 %v2123_v10 }
  0x55   :  { %571 = vmatpush.msra.mxu2 %v2136_v12  ;;  %591 = vmatpush.msra.mxu3 %v2131_v11 }
  0x56   :  { %532 = vmatpush.msra.mxu0 %v2148_v14  ;;  %552 = vmatpush.msra.mxu1 %v2153_v15 }
  0x57   :  { %572 = vmatpush.msra.mxu2 %v2165_v17  ;;  %592 = vmatpush.msra.mxu3 %v2160_v16 }
  0x58   :  { %533 = vmatpush.msra.mxu0 %v2170_v18  ;;  %553 = vmatpush.msra.mxu1 %v2175_v19 }
  0x59   :  { %573 = vmatpush.msra.mxu2 %v2187_v21  ;;  %593 = vmatpush.msra.mxu3 %v2182_v20 }
  0x5a   :  { %142 = vmatmul.f32.gmra.mxu0 %v30_v13  ;;  %183 = vmatmul.f32.gmra.mxu1 %v30_v13 }
  0x5b   :  { %224 = vmatmul.f32.gmra.mxu2 %v30_v13  ;;  %265 = vmatmul.f32.gmra.mxu3 %v30_v13  ;;  %v3517_v13 = vld [vmem:[#allocation24_spill] sm:$0xff] }
  0x5c   :  { %534 = vmatpush.msra.mxu0 %v2193_v22  ;;  %554 = vmatpush.msra.mxu1 %v2198_v23 }
  0x5d   :  { %574 = vmatpush.msra.mxu2 %v2211_v25  ;;  %594 = vmatpush.msra.mxu3 %v2206_v24 }
  0x5e   :  { %535 = vmatpush.msra.mxu0 %v2223_v27  ;;  %555 = vmatpush.msra.mxu1 %v2228_v28 }
  0x5f   :  { %575 = vmatpush.msra.mxu2 %v2240_v30  ;;  %595 = vmatpush.msra.mxu3 %v2235_v29 }
  0x60   :  { %536 = vmatpush.msra.mxu0 %v2245_v31  ;;  %556 = vmatpush.msra.mxu1 %v2250_v32 }
  0x61   :  { %576 = vmatpush.msra.mxu2 %v2262_v34  ;;  %596 = vmatpush.msra.mxu3 %v2257_v33 }
  0x62   :  { %390 = vmatmul.f32.vlgmr.msrb.gmra.mxu0 %v1851_v0  ;;  %410 = vmatmul.f32.vlgmr.msrb.gmra.mxu1 %v1851_v0 }
  0x63   :  { %430 = vmatmul.f32.vlgmr.msrb.gmra.mxu2 %v1851_v0  ;;  %450 = vmatmul.f32.vlgmr.msrb.gmra.mxu3 %v1851_v0  ;;  %v3518_v0 = vld [vmem:[#allocation26_spill] sm:$0xff] }
  0x64   :  { %537 = vmatpush.msra.mxu0 %v2268_v35  ;;  %557 = vmatpush.msra.mxu1 %v2273_v36 }
  0x65   :  { %577 = vmatpush.msra.mxu2 %v2286_v38  ;;  %597 = vmatpush.msra.mxu3 %v2281_v37 }
  0x66   :  { %538 = vmatpush.msra.mxu0 %v2298_v40  ;;  %558 = vmatpush.msra.mxu1 %v2303_v41 }
  0x67   :  { %578 = vmatpush.msra.mxu2 %v2315_v43  ;;  %598 = vmatpush.msra.mxu3 %v2310_v42 }
  0x68   :  { %539 = vmatpush.msra.mxu0 %v2320_v44  ;;  %559 = vmatpush.msra.mxu1 %v2325_v45 }
  0x69   :  { %579 = vmatpush.msra.mxu2 %v2337_v47  ;;  %599 = vmatpush.msra.mxu3 %v2332_v46 }
  0x6a   :  { %540 = vmatpush.msra.mxu0 %v2343_v48  ;;  %560 = vmatpush.msra.mxu1 %v2348_v49 }
  0x6b   :  { %580 = vmatpush.msra.mxu2 %v2361_v51  ;;  %600 = vmatpush.msra.mxu3 %v2356_v50 }
  0x6c   :  { %541 = vmatpush.msra.mxu0 %v2373_v53  ;;  %561 = vmatpush.msra.mxu1 %v2378_v54 }
  0x6d   :  { %581 = vmatpush.msra.mxu2 %v2390_v56  ;;  %601 = vmatpush.msra.mxu3 %v2385_v55 }
  0x6e   :  { %542 = vmatpush.msra.mxu0 %v2395_v57  ;;  %562 = vmatpush.msra.mxu1 %v2400_v58 }
  0x6f   :  { %582 = vmatpush.msra.mxu2 %v2412_v60  ;;  %602 = vmatpush.msra.mxu3 %v2407_v59 }
  0x70   :  { %543 = vmatpush.msra.mxu0 %v2418_v61  ;;  %563 = vmatpush.msra.mxu1 %v3517_v13 }
  0x71   :  { %583 = vmatpush.msra.mxu2 %v2431_v63  ;;  %603 = vmatpush.msra.mxu3 %v3518_v0 }
  0x72   :  { %544 = vmatpush.msra.mxu0 %v2448_v26  ;;  %564 = vmatpush.msra.mxu1 %v2453_v39 }
  0x73   :  { %584 = vmatpush.msra.mxu2 %v2460_v52  ;;  %604 = vmatpush.msra.mxu3 %v2465_v62 }
  0x74   :  { %685 = vmatpush.msrb.mxu0 %v2075_v1  ;;  %705 = vmatpush.msrb.mxu1 %v2080_v2 }
  0x75   :  { %725 = vmatpush.msrb.mxu2 %v2090_v4  ;;  %745 = vmatpush.msrb.mxu3 %v2085_v3 }
  0x76   :  { %686 = vmatpush.msrb.mxu0 %v2095_v5  ;;  %706 = vmatpush.msrb.mxu1 %v2100_v6 }
  0x77   :  { %726 = vmatpush.msrb.mxu2 %v2112_v8  ;;  %746 = vmatpush.msrb.mxu3 %v2107_v7 }
  0x78   :  { %687 = vmatpush.msrb.mxu0 %v2118_v9  ;;  %707 = vmatpush.msrb.mxu1 %v2123_v10 }
  0x79   :  { %727 = vmatpush.msrb.mxu2 %v2136_v12  ;;  %747 = vmatpush.msrb.mxu3 %v2131_v11 }
  0x7a   :  { %688 = vmatpush.msrb.mxu0 %v2148_v14  ;;  %708 = vmatpush.msrb.mxu1 %v2153_v15 }
  0x7b   :  { %728 = vmatpush.msrb.mxu2 %v2165_v17  ;;  %748 = vmatpush.msrb.mxu3 %v2160_v16 }
  0x7c   :  { %689 = vmatpush.msrb.mxu0 %v2170_v18  ;;  %709 = vmatpush.msrb.mxu1 %v2175_v19 }
  0x7d   :  { %729 = vmatpush.msrb.mxu2 %v2187_v21  ;;  %749 = vmatpush.msrb.mxu3 %v2182_v20 }
  0x7e   :  { %690 = vmatpush.msrb.mxu0 %v2193_v22  ;;  %710 = vmatpush.msrb.mxu1 %v2198_v23 }
  0x7f   :  { %730 = vmatpush.msrb.mxu2 %v2211_v25  ;;  %750 = vmatpush.msrb.mxu3 %v2206_v24 }
  0x80   :  { %691 = vmatpush.msrb.mxu0 %v2223_v27  ;;  %711 = vmatpush.msrb.mxu1 %v2228_v28 }
  0x81   :  { %731 = vmatpush.msrb.mxu2 %v2240_v30  ;;  %751 = vmatpush.msrb.mxu3 %v2235_v29 }
  0x82   :  { %692 = vmatpush.msrb.mxu0 %v2245_v31  ;;  %712 = vmatpush.msrb.mxu1 %v2250_v32 }
  0x83   :  { %732 = vmatpush.msrb.mxu2 %v2262_v34  ;;  %752 = vmatpush.msrb.mxu3 %v2257_v33 }
  0x84   :  { %693 = vmatpush.msrb.mxu0 %v2268_v35  ;;  %713 = vmatpush.msrb.mxu1 %v2273_v36 }
  0x85   :  { %733 = vmatpush.msrb.mxu2 %v2286_v38  ;;  %753 = vmatpush.msrb.mxu3 %v2281_v37 }
  0x86   :  { %694 = vmatpush.msrb.mxu0 %v2298_v40  ;;  %714 = vmatpush.msrb.mxu1 %v2303_v41 }
  0x87   :  { %734 = vmatpush.msrb.mxu2 %v2315_v43  ;;  %754 = vmatpush.msrb.mxu3 %v2310_v42 }
  0x88   :  { %695 = vmatpush.msrb.mxu0 %v2320_v44  ;;  %715 = vmatpush.msrb.mxu1 %v2325_v45 }
  0x89   :  { %735 = vmatpush.msrb.mxu2 %v2337_v47  ;;  %755 = vmatpush.msrb.mxu3 %v2332_v46 }
  0x8a   :  { %696 = vmatpush.msrb.mxu0 %v2343_v48  ;;  %716 = vmatpush.msrb.mxu1 %v2348_v49 }
  0x8b   :  { %736 = vmatpush.msrb.mxu2 %v2361_v51  ;;  %756 = vmatpush.msrb.mxu3 %v2356_v50 }
  0x8c   :  { %697 = vmatpush.msrb.mxu0 %v2373_v53  ;;  %717 = vmatpush.msrb.mxu1 %v2378_v54 }
  0x8d   :  { %737 = vmatpush.msrb.mxu2 %v2390_v56  ;;  %757 = vmatpush.msrb.mxu3 %v2385_v55 }
  0x8e   :  { %698 = vmatpush.msrb.mxu0 %v2395_v57  ;;  %718 = vmatpush.msrb.mxu1 %v2400_v58 }
  0x8f   :  { %738 = vmatpush.msrb.mxu2 %v2412_v60  ;;  %758 = vmatpush.msrb.mxu3 %v2407_v59 }
  0x90   :  { %699 = vmatpush.msrb.mxu0 %v2418_v61  ;;  %719 = vmatpush.msrb.mxu1 %v3517_v13  ;;  %v95_v61 = vld [vmem:[%s3403_s3] sm:$0xf] }
  0x91   :  { %739 = vmatpush.msrb.mxu2 %v2431_v63  ;;  %759 = vmatpush.msrb.mxu3 %v3518_v0  ;;  %v97_v59 = vperm.slane %v95_v61, 0  ;;  %v98_v13 = vperm.slane %v95_v61, 1 }
  0x92   :  { %700 = vmatpush.msrb.mxu0 %v2448_v26  ;;  %720 = vmatpush.msrb.mxu1 %v2453_v39 }
  0x93   :  { %740 = vmatpush.msrb.mxu2 %v2460_v52  ;;  %760 = vmatpush.msrb.mxu3 %v2465_v62  ;;  %v2616_v52 = vperm.slane %v95_v61, 2  ;;  %v100_v62 = vperm.slane %v95_v61, 3 }
  0x9f   :  { %v122_v58 = vpop.f32.mrf.mxu0  ;;  %v163_v60 = vpop.f32.mrf.mxu1 }
  0xa6   :  { %v2608_v57 = vpop.f32.mrf.mxu2  ;;  %v2610_v63 = vpop.f32.mrf.mxu3 }
  0xa7   :  { %v125_v0 = vpop.f32.mrf.mxu0  ;;  %v166_v26 = vpop.f32.mrf.mxu1 }
  0xa8   :  { %v2612_v55 = vadd.f32 %v125_v0, %v97_v59  ;;  %v2614_v39 = vadd.f32 %v166_v26, %v98_v13 }
  0xaa   :  { %3519 = vst [vmem:[#allocation31_spill] sm:$0xff] %v2612_v55 }
  0xab   :  { %3520 = vst [vmem:[#allocation32_spill] sm:$0xff] %v2614_v39 }
  0xae   :  { %v207_v56 = vpop.f32.mrf.mxu2  ;;  %v248_v54 = vpop.f32.mrf.mxu3 }
  0xaf   :  { %v2619_v53 = vadd.f32 %v207_v56, %v2616_v52  ;;  %v2621_v50 = vadd.f32 %v248_v54, %v100_v62  ;;  %v128_v51 = vpop.f32.mrf.mxu0  ;;  %v169_v49 = vpop.f32.mrf.mxu1 }
  0xb0   :  { %v2623_v48 = vadd.f32 %v128_v51, %v97_v59  ;;  %v2625_v46 = vadd.f32 %v169_v49, %v98_v13 }
  0xb1   :  { %3521 = vst [vmem:[#allocation33_spill] sm:$0xff] %v2619_v53 }
  0xb2   :  { %3522 = vst [vmem:[#allocation34_spill] sm:$0xff] %v2621_v50 }
  0xb3   :  { %3523 = vst [vmem:[#allocation35_spill] sm:$0xff] %v2623_v48 }
  0xb4   :  { %3524 = vst [vmem:[#allocation36_spill] sm:$0xff] %v2625_v46 }
  0xb6   :  { %v210_v0 = vpop.f32.mrf.mxu2  ;;  %v251_v55 = vpop.f32.mrf.mxu3 }
  0xb7   :  { %v2628_v26 = vadd.f32 %v210_v0, %v2616_v52  ;;  %v2630_v39 = vadd.f32 %v251_v55, %v100_v62  ;;  %v131_v61 = vpop.f32.mrf.mxu0  ;;  %v172_v47 = vpop.f32.mrf.mxu1 }
  0xb8   :  { %v2632_v45 = vadd.f32 %v131_v61, %v97_v59  ;;  %v2634_v56 = vadd.f32 %v172_v47, %v98_v13 }
  0xb9   :  { %3525 = vst [vmem:[#allocation37_spill] sm:$0xff] %v2628_v26 }
  0xba   :  { %3526 = vst [vmem:[#allocation38_spill] sm:$0xff] %v2630_v39 }
  0xbb   :  { %3527 = vst [vmem:[#allocation39_spill] sm:$0xff] %v2632_v45 }
  0xbc   :  { %3528 = vst [vmem:[#allocation40_spill] sm:$0xff] %v2634_v56 }
  0xbe   :  { %v213_v54 = vpop.f32.mrf.mxu2  ;;  %v254_v53 = vpop.f32.mrf.mxu3 }
  0xbf   :  { %v2637_v51 = vadd.f32 %v213_v54, %v2616_v52  ;;  %v2639_v49 = vadd.f32 %v254_v53, %v100_v62  ;;  %v134_v46 = vpop.f32.mrf.mxu0  ;;  %v175_v48 = vpop.f32.mrf.mxu1 }
  0xc0   :  { %v2641_v50 = vadd.f32 %v134_v46, %v97_v59  ;;  %v2643_v0 = vadd.f32 %v175_v48, %v98_v13 }
  0xc1   :  { %3529 = vst [vmem:[#allocation41_spill] sm:$0xff] %v2637_v51 }
  0xc2   :  { %3530 = vst [vmem:[#allocation42_spill] sm:$0xff] %v2639_v49 }
  0xc3   :  { %3531 = vst [vmem:[#allocation43_spill] sm:$0xff] %v2641_v50 }
  0xc4   :  { %3532 = vst [vmem:[#allocation44_spill] sm:$0xff] %v2643_v0 }
  0xc6   :  { %v216_v55 = vpop.f32.mrf.mxu2  ;;  %v257_v26 = vpop.f32.mrf.mxu3 }
  0xc7   :  { %v2646_v61 = vadd.f32 %v216_v55, %v2616_v52  ;;  %v2648_v47 = vadd.f32 %v257_v26, %v100_v62  ;;  %v137_v56 = vpop.f32.mrf.mxu0  ;;  %v178_v45 = vpop.f32.mrf.mxu1 }
  0xc8   :  { %v2650_v39 = vadd.f32 %v137_v56, %v97_v59  ;;  %v2652_v54 = vadd.f32 %v178_v45, %v98_v13 }
  0xc9   :  { %3533 = vst [vmem:[#allocation45_spill] sm:$0xff] %v2646_v61 }
  0xca   :  { %3534 = vst [vmem:[#allocation46_spill] sm:$0xff] %v2648_v47 }
  0xcb   :  { %3535 = vst [vmem:[#allocation47_spill] sm:$0xff] %v2650_v39 }
  0xcc   :  { %3536 = vst [vmem:[#allocation48_spill] sm:$0xff] %v2652_v54 }
  0xce   :  { %v219_v53 = vpop.f32.mrf.mxu2  ;;  %v260_v51 = vpop.f32.mrf.mxu3 }
  0xcf   :  { %v2655_v46 = vadd.f32 %v219_v53, %v2616_v52  ;;  %v2657_v48 = vadd.f32 %v260_v51, %v100_v62  ;;  %v140_v0 = vpop.f32.mrf.mxu0  ;;  %v181_v50 = vpop.f32.mrf.mxu1  ;;  %v123_v51 = vadd.f32 %v122_v58, %v97_v59 }
  0xd0   :  { %v2659_v49 = vadd.f32 %v140_v0, %v97_v59  ;;  %v2661_v55 = vadd.f32 %v181_v50, %v98_v13 }
  0xd1   :  { %3537 = vst [vmem:[#allocation49_spill] sm:$0xff] %v2655_v46  ;;  %v164_v46 = vadd.f32 %v163_v60, %v98_v13 }
  0xd2   :  { %3538 = vst [vmem:[#allocation50_spill] sm:$0xff] %v2657_v48 }
  0xd3   :  { %3539 = vst [vmem:[#allocation51_spill] sm:$0xff] %v2659_v49 }
  0xd4   :  { %3540 = vst [vmem:[#allocation52_spill] sm:$0xff] %v2661_v55 }
  0xd6   :  { %v222_v26 = vpop.f32.mrf.mxu2  ;;  %v263_v61 = vpop.f32.mrf.mxu3 }
  0xd7   :  { %v2664_v56 = vadd.f32 %v222_v26, %v2616_v52  ;;  %v2666_v45 = vadd.f32 %v263_v61, %v100_v62  ;;  %v143_v54 = vpop.f32.mrf.mxu0  ;;  %v184_v39 = vpop.f32.mrf.mxu1 }
  0xd8   :  { %v2668_v47 = vadd.f32 %v143_v54, %v97_v59  ;;  %v2670_v53 = vadd.f32 %v184_v39, %v98_v13  ;;  %v246_v54 = vadd.f32 %v2610_v63, %v100_v62 }
  0xd9   :  { %3541 = vst [vmem:[#allocation53_spill] sm:$0xff] %v2664_v56 }
  0xda   :  { %3542 = vst [vmem:[#allocation54_spill] sm:$0xff] %v2666_v45 }
  0xdb   :  { %3543 = vst [vmem:[#allocation55_spill] sm:$0xff] %v2668_v47 }
  0xdc   :  { %3544 = vst [vmem:[#allocation56_spill] sm:$0xff] %v2670_v53 }
  0xde   :  { %v225_v48 = vpop.f32.mrf.mxu2  ;;  %v266_v0 = vpop.f32.mrf.mxu3 }
  0xdf   :  { %v2673_v50 = vadd.f32 %v225_v48, %v2616_v52  ;;  %v2675_v55 = vadd.f32 %v266_v0, %v100_v62  ;;  %v391_v49 = vpop.f32.mrf.mxu0  ;;  %v411_v26 = vpop.f32.mrf.mxu1 }
  0xe0   :  { %v454_v56 = vadd.f32 %v391_v49, %v123_v51  ;;  %v455_v61 = vadd.f32 %v411_v26, %v164_v46  ;;  %v205_v49 = vadd.f32 %v2608_v57, %v2616_v52 }
  0xe1   :  { %3545 = vst [vmem:[#allocation57_spill] sm:$0xff] %v2673_v50 }
  0xe2   :  { %3546 = vst [vmem:[#allocation58_spill] sm:$0xff] %v2675_v55  ;;  %v1627_v45 = vmul.f32 -1.442695, %v454_v56  ;;  %v1628_v44 = vmul.f32 -1.442695, %v455_v61 }
  0xe4   :  { %1659 = vpow2.f32 %v1627_v45 }
  0xe5   :  { %1661 = vpow2.f32 %v1628_v44 }
  0xe6   :  { %v451_v39 = vpop.f32.mrf.mxu3  ;;  %v431_v0 = vpop.f32.mrf.mxu2 }
  0xe7   :  { %v457_v58 = vadd.f32 %v451_v39, %v246_v54  ;;  %v456_v45 = vadd.f32 %v431_v0, %v205_v49 }
  0xe9   :  { %v1629_v59 = vmul.f32 -1.442695, %v457_v58 }
  0xea   :  { %v1660_v60 = vpop.eup %1659 }
  0xeb   :  { %v1662_v13 = vpop.eup %1661  ;;  %v461_v53 = vadd.f32 1.0, %v1660_v60  ;;  %1663 = vpow2.f32 %v1629_v59 }
  0xec   :  { %v480_v48 = vadd.f32 1.0, %v1662_v13 }
  0xed   :  { %1665 = vrcp.f32 %v461_v53  ;;  %v473_v61 = vand.u32 2147483648, %v461_v53  ;;  %v471_v58 = vand.u32 2147483647, %v461_v53  ;;  %vm467_vm2 = vweird.f32 %v461_v53 }
  0xee   :  { %1667 = vrcp.f32 %v480_v48  ;;  %v492_v54 = vand.u32 2147483648, %v480_v48  ;;  %v490_v60 = vand.u32 2147483647, %v480_v48  ;;  %vm486_vm3 = vweird.f32 %v480_v48 }
  0xef   :  { %v474_v52 = vor.u32 1.1754944e-38, %v473_v61  ;;  %vm472_vm5 = vcmp.eq.f32.partialorder %v471_v58, 8.507059e+37 }
  0xf0   :  { %v493_v49 = vor.u32 1.1754944e-38, %v492_v54  ;;  %vm491_vm7 = vcmp.eq.f32.partialorder %v490_v60, 8.507059e+37 }
  0xf1   :  { %v1664_v50 = vpop.eup %1663 }
  0xf2   :  { %v500_v46 = vadd.f32 1.0, %v1664_v50 }
  0xf3   :  { %v1666_v56 = vpop.eup %1665 }
  0xf4   :  { %v1668_v62 = vpop.eup %1667  ;;  %v463_v44 = vmul.f32 %v1666_v56, %v461_v53  ;;  %1669 = vrcp.f32 %v500_v46  ;;  %vm468_vm0 = vweird.f32 %v1666_v56  ;;  %vm506_vm9 = vweird.f32 %v500_v46 }
  0xf5   :  { %v482_v63 = vmul.f32 %v1668_v62, %v480_v48  ;;  %1671 = vtanh.f32 %v456_v45  ;;  %vm487_vm1 = vweird.f32 %v1668_v62  ;;  %vm469_vm4 = vmor %vm467_vm2, %vm468_vm0  ;;  %v512_v48 = vand.u32 2147483648, %v500_v46 }
  0xf6   :  { %v464_v51 = vsub.f32 1.0, %v463_v44  ;;  %vm488_vm6 = vmor %vm486_vm3, %vm487_vm1 }
  0xf7   :  { %v483_v26 = vsub.f32 1.0, %v482_v63  ;;  %v513_v54 = vor.u32 1.1754944e-38, %v512_v48 }
  0xf8   :  { %v465_v39 = vmul.f32 %v1666_v56, %v464_v51 }
  0xf9   :  { %v484_v59 = vmul.f32 %v1668_v62, %v483_v26 }
  0xfa   :  { %v1670_v13 = vpop.eup %1669  ;;  %v466_v57 = vadd.f32 %v1666_v56, %v465_v39 }
  0xfb   :  { %v485_v50 = vadd.f32 %v1668_v62, %v484_v59  ;;  %v502_v0 = vmul.f32 %v1670_v13, %v500_v46  ;;  %v1672_v45 = vpop.eup %1671  ;;  %vm507_vm8 = vweird.f32 %v1670_v13 }
  0xfc   :  { %v470_v44 = vsel %vm469_vm4, %v1666_v56, %v466_v57  ;;  %v510_v56 = vand.u32 2147483647, %v500_v46  ;;  %vm508_vm10 = vmor %vm506_vm9, %vm507_vm8 }
  0xfd   :  { %v475_v63 = vsel %vm472_vm5, %v474_v52, %v470_v44  ;;  %v489_v51 = vsel %vm488_vm6, %v1668_v62, %v485_v50  ;;  %v503_v55 = vsub.f32 1.0, %v502_v0  ;;  %v3576_v52 = vld [vmem:[#allocation33_spill] sm:$0xff] }
  0xfe   :  { %v494_v26 = vsel %vm491_vm7, %v493_v49, %v489_v51  ;;  %v517_v47 = vmul.f32 %v1672_v45, %v475_v63  ;;  %vm511_vm11 = vcmp.eq.f32.partialorder %v510_v56, 8.507059e+37 }
  0xff   :  { %v516_v42 = vmul.f32 0.0, %v494_v26  ;;  %v504_v43 = vmul.f32 %v1670_v13, %v503_v55 }
 0x101   :  { %v2680_v39 = vadd.f32 %v517_v47, %v516_v42  ;;  %v505_v53 = vadd.f32 %v1670_v13, %v504_v43 }
 0x103   :  { %1673 = vtanh.f32 %v2680_v39  ;;  %v509_v61 = vsel %vm508_vm10, %v1670_v13, %v505_v53 }
 0x104   :  { %v514_v58 = vsel %vm511_vm11, %v513_v54, %v509_v61 }
 0x109   :  { %v1674_v62 = vpop.eup %1673 }
 0x10a   :  { %v520_v59 = vmul.f32 %v1674_v62, %v514_v58 }
 0x10c   :  { %521 = vst [vmem:[%s3404_s4] sm:$0xff] %v520_v59  ;;  %545 = vmatmul.f32.vlgmr.msra.gmra.mxu0 %v520_v59  ;;  %565 = vmatmul.f32.vlgmr.msra.gmra.mxu1 %v520_v59 }
 0x10d   :  { %585 = vmatmul.f32.vlgmr.msra.gmra.mxu2 %v520_v59  ;;  %605 = vmatmul.f32.vlgmr.msra.gmra.mxu3 %v520_v59 }
 0x10e   :  { %841 = vmatpush.msra.mxu0 %v2075_v1  ;;  %861 = vmatpush.msra.mxu1 %v2080_v2  ;;  %v3547_v1 = vld [vmem:[#allocation6_spill] sm:$0xff]  ;;  %v3548_v2 = vld [vmem:[#allocation5_spill] sm:$0xff] }
 0x10f   :  { %881 = vmatpush.msra.mxu2 %v2090_v4  ;;  %901 = vmatpush.msra.mxu3 %v2085_v3  ;;  %v3549_v3 = vld [vmem:[#allocation7_spill] sm:$0xff]  ;;  %v3550_v4 = vld [vmem:[#allocation8_spill] sm:$0xff] }
 0x110   :  { %842 = vmatpush.msra.mxu0 %v2095_v5  ;;  %862 = vmatpush.msra.mxu1 %v2100_v6  ;;  %v3551_v5 = vld [vmem:[#allocation10_spill] sm:$0xff]  ;;  %v3552_v6 = vld [vmem:[#allocation9_spill] sm:$0xff] }
 0x111   :  { %882 = vmatpush.msra.mxu2 %v2112_v8  ;;  %902 = vmatpush.msra.mxu3 %v2107_v7  ;;  %v3553_v7 = vld [vmem:[#allocation11_spill] sm:$0xff]  ;;  %v3554_v8 = vld [vmem:[#allocation12_spill] sm:$0xff] }
 0x112   :  { %843 = vmatpush.msra.mxu0 %v2118_v9  ;;  %863 = vmatpush.msra.mxu1 %v2123_v10  ;;  %v3555_v9 = vld [vmem:[#allocation14_spill] sm:$0xff]  ;;  %v3556_v10 = vld [vmem:[#allocation13_spill] sm:$0xff] }
 0x113   :  { %883 = vmatpush.msra.mxu2 %v2136_v12  ;;  %903 = vmatpush.msra.mxu3 %v2131_v11  ;;  %v3557_v11 = vld [vmem:[#allocation15_spill] sm:$0xff]  ;;  %v3558_v12 = vld [vmem:[#allocation16_spill] sm:$0xff] }
 0x114   :  { %844 = vmatpush.msra.mxu0 %v2148_v14  ;;  %864 = vmatpush.msra.mxu1 %v2153_v15  ;;  %v3559_v14 = vld [vmem:[#allocation18_spill] sm:$0xff]  ;;  %v3560_v15 = vld [vmem:[#allocation17_spill] sm:$0xff] }
 0x115   :  { %884 = vmatpush.msra.mxu2 %v2165_v17  ;;  %904 = vmatpush.msra.mxu3 %v2160_v16  ;;  %v3561_v16 = vld [vmem:[#allocation19_spill] sm:$0xff]  ;;  %v3562_v17 = vld [vmem:[#allocation20_spill] sm:$0xff] }
 0x116   :  { %845 = vmatpush.msra.mxu0 %v2170_v18  ;;  %865 = vmatpush.msra.mxu1 %v2175_v19  ;;  %v3563_v18 = vld [vmem:[#allocation22_spill] sm:$0xff]  ;;  %v3564_v19 = vld [vmem:[#allocation21_spill] sm:$0xff] }
 0x117   :  { %885 = vmatpush.msra.mxu2 %v2187_v21  ;;  %905 = vmatpush.msra.mxu3 %v2182_v20  ;;  %v3565_v20 = vld [vmem:[#allocation23_spill] sm:$0xff]  ;;  %v3566_v21 = vld [vmem:[#allocation24_spill] sm:$0xff] }
 0x118   :  { %846 = vmatpush.msra.mxu0 %v2193_v22  ;;  %866 = vmatpush.msra.mxu1 %v2198_v23  ;;  %v3567_v22 = vld [vmem:[#allocation25_spill] sm:$0xff]  ;;  %v3568_v23 = vld [vmem:[#allocation26_spill] sm:$0xff] }
 0x119   :  { %886 = vmatpush.msra.mxu2 %v2211_v25  ;;  %906 = vmatpush.msra.mxu3 %v2206_v24  ;;  %v3569_v24 = vld [vmem:[#allocation27_spill] sm:$0xff]  ;;  %v3570_v25 = vld [vmem:[#allocation28_spill] sm:$0xff] }
 0x11a   :  { %847 = vmatpush.msra.mxu0 %v2223_v27  ;;  %867 = vmatpush.msra.mxu1 %v2228_v28  ;;  %v3571_v27 = vld [vmem:[#allocation29_spill] sm:$0xff]  ;;  %v3572_v28 = vld [vmem:[#allocation30_spill] sm:$0xff] }
 0x11b   :  { %887 = vmatpush.msra.mxu2 %v2240_v30  ;;  %907 = vmatpush.msra.mxu3 %v2235_v29 }
 0x11c   :  { %848 = vmatpush.msra.mxu0 %v2245_v31  ;;  %868 = vmatpush.msra.mxu1 %v2250_v32  ;;  %v3573_v31 = vld [vmem:[#allocation31_spill] sm:$0xff] }
 0x11d   :  { %888 = vmatpush.msra.mxu2 %v2262_v34  ;;  %908 = vmatpush.msra.mxu3 %v2257_v33  ;;  %v3574_v33 = vld [vmem:[#allocation32_spill] sm:$0xff] }
 0x11e   :  { %849 = vmatpush.msra.mxu0 %v2268_v35  ;;  %869 = vmatpush.msra.mxu1 %v2273_v36 }
 0x11f   :  { %889 = vmatpush.msra.mxu2 %v2286_v38  ;;  %909 = vmatpush.msra.mxu3 %v2281_v37  ;;  %v3575_v38 = vld [vmem:[#allocation34_spill] sm:$0xff] }
 0x120   :  { %850 = vmatpush.msra.mxu0 %v2298_v40  ;;  %870 = vmatpush.msra.mxu1 %v2303_v41 }
 0x121   :  { %890 = vmatpush.msra.mxu2 %v3547_v1  ;;  %910 = vmatpush.msra.mxu3 %v3548_v2 }
 0x122   :  { %851 = vmatpush.msra.mxu0 %v3549_v3  ;;  %871 = vmatpush.msra.mxu1 %v3550_v4 }
 0x123   :  { %891 = vmatpush.msra.mxu2 %v3551_v5  ;;  %911 = vmatpush.msra.mxu3 %v3552_v6 }
 0x124   :  { %852 = vmatpush.msra.mxu0 %v3553_v7  ;;  %872 = vmatpush.msra.mxu1 %v3554_v8 }
 0x125   :  { %892 = vmatpush.msra.mxu2 %v3555_v9  ;;  %912 = vmatpush.msra.mxu3 %v3556_v10 }
 0x126   :  { %853 = vmatpush.msra.mxu0 %v3557_v11  ;;  %873 = vmatpush.msra.mxu1 %v3558_v12 }
 0x127   :  { %893 = vmatpush.msra.mxu2 %v3559_v14  ;;  %913 = vmatpush.msra.mxu3 %v3560_v15 }
 0x128   :  { %854 = vmatpush.msra.mxu0 %v3561_v16  ;;  %874 = vmatpush.msra.mxu1 %v3562_v17 }
 0x129   :  { %894 = vmatpush.msra.mxu2 %v3563_v18  ;;  %914 = vmatpush.msra.mxu3 %v3564_v19 }
 0x12a   :  { %855 = vmatpush.msra.mxu0 %v3565_v20  ;;  %875 = vmatpush.msra.mxu1 %v3566_v21 }
 0x12b   :  { %895 = vmatpush.msra.mxu2 %v3567_v22  ;;  %915 = vmatpush.msra.mxu3 %v3568_v23  ;;  %v2770_v22 = vld [vmem:[%s3402_s2 + $0x1e8] sm:$0xff]  ;;  %v2776_v23 = vld [vmem:[%s3402_s2 + $0x1f0] sm:$0xff] }
 0x12c   :  { %856 = vmatpush.msra.mxu0 %v3569_v24  ;;  %876 = vmatpush.msra.mxu1 %v3570_v25 }
 0x12d   :  { %896 = vmatpush.msra.mxu2 %v3571_v27  ;;  %916 = vmatpush.msra.mxu3 %v3572_v28 }
 0x189   :  { %v546_v29 = vpop.f32.mrf.mxu0  ;;  %v566_v30 = vpop.f32.mrf.mxu1 }
 0x18a   :  { %v609_v32 = vadd.f32 %v546_v29, %v3573_v31  ;;  %v610_v34 = vadd.f32 %v566_v30, %v3574_v33  ;;  %v2782_v29 = vld [vmem:[%s3402_s2 + $0x1f8] sm:$0xff]  ;;  %v2788_v30 = vld [vmem:[%s3402_s2 + $0x1c0] sm:$0xff]  ;;  %v2794_v31 = vld [vmem:[%s3402_s2 + $0x1c8] sm:$0xff] }
 0x18b   :  { %v2806_v33 = vld [vmem:[%s3402_s2 + $0x1d8] sm:$0xff] }
 0x18c   :  { %v1630_v35 = vmul.f32 -1.442695, %v609_v32  ;;  %v1631_v36 = vmul.f32 -1.442695, %v610_v34  ;;  %v2800_v32 = vld [vmem:[%s3402_s2 + $0x1d0] sm:$0xff]  ;;  %v2812_v34 = vld [vmem:[%s3402_s2 + $0x1a0] sm:$0xff] }
 0x18e   :  { %1675 = vpow2.f32 %v1630_v35  ;;  %v2818_v35 = vld [vmem:[%s3402_s2 + $0x1a8] sm:$0xff] }
 0x18f   :  { %1677 = vpow2.f32 %v1631_v36  ;;  %v2824_v36 = vld [vmem:[%s3402_s2 + $0x1b0] sm:$0xff] }
 0x190   :  { %v606_v37 = vpop.f32.mrf.mxu3  ;;  %v586_v46 = vpop.f32.mrf.mxu2 }
 0x191   :  { %v612_v40 = vadd.f32 %v606_v37, %v3575_v38  ;;  %v611_v50 = vadd.f32 %v586_v46, %v3576_v52  ;;  %v2830_v37 = vld [vmem:[%s3402_s2 + $0x1b8] sm:$0xff]  ;;  %v2836_v38 = vld [vmem:[%s3402_s2 + $0x180] sm:$0xff] }
 0x192   :  { %v2878_v46 = vld [vmem:[%s3402_s2 + $0x178] sm:$0xff] }
 0x193   :  { %v1632_v41 = vmul.f32 -1.442695, %v612_v40  ;;  %v2842_v40 = vld [vmem:[%s3402_s2 + $0x188] sm:$0xff]  ;;  %v2902_v52 = vld [vmem:[%s3402_s2 + $0x158] sm:$0xff] }
 0x194   :  { %v1676_v42 = vpop.eup %1675 }
 0x195   :  { %v1678_v43 = vpop.eup %1677  ;;  %v616_v47 = vadd.f32 1.0, %v1676_v42  ;;  %1679 = vpow2.f32 %v1632_v41  ;;  %v2848_v41 = vld [vmem:[%s3402_s2 + $0x190] sm:$0xff]  ;;  %v2854_v42 = vld [vmem:[%s3402_s2 + $0x198] sm:$0xff] }
 0x196   :  { %v635_v55 = vadd.f32 1.0, %v1678_v43  ;;  %v2860_v43 = vld [vmem:[%s3402_s2 + $0x160] sm:$0xff] }
 0x197   :  { %1681 = vrcp.f32 %v616_v47  ;;  %v628_v51 = vand.u32 2147483648, %v616_v47  ;;  %v626_v48 = vand.u32 2147483647, %v616_v47  ;;  %vm622_vm14 = vweird.f32 %v616_v47 }
 0x198   :  { %1683 = vrcp.f32 %v635_v55  ;;  %v647_v26 = vand.u32 2147483648, %v635_v55  ;;  %v645_v61 = vand.u32 2147483647, %v635_v55  ;;  %vm641_vm15 = vweird.f32 %v635_v55 }
 0x199   :  { %v629_v58 = vor.u32 1.1754944e-38, %v628_v51  ;;  %vm627_vm2 = vcmp.eq.f32.partialorder %v626_v48, 8.507059e+37  ;;  %v2944_v51 = vld [vmem:[%s3402_s2 + $0x110] sm:$0xff]  ;;  %v2962_v48 = vld [vmem:[%s3402_s2 + $0xe8] sm:$0xff] }
 0x19a   :  { %v648_v2 = vor.u32 1.1754944e-38, %v647_v26  ;;  %vm646_vm3 = vcmp.eq.f32.partialorder %v645_v61, 8.507059e+37  ;;  %v2950_v26 = vld [vmem:[%s3402_s2 + $0x118] sm:$0xff] }
 0x19b   :  { %v1680_v60 = vpop.eup %1679  ;;  %v2974_v61 = vld [vmem:[%s3402_s2 + $0xf8] sm:$0xff] }
 0x19c   :  { %v655_v13 = vadd.f32 1.0, %v1680_v60  ;;  %v2884_v60 = vld [vmem:[%s3402_s2 + $0x140] sm:$0xff] }
 0x19d   :  { %v1682_v57 = vpop.eup %1681 }
 0x19e   :  { %v1684_v0 = vpop.eup %1683  ;;  %v618_v49 = vmul.f32 %v1682_v57, %v616_v47  ;;  %1685 = vrcp.f32 %v655_v13  ;;  %vm623_vm12 = vweird.f32 %v1682_v57  ;;  %v667_v15 = vand.u32 2147483648, %v655_v13  ;;  %v2866_v47 = vld [vmem:[%s3402_s2 + $0x168] sm:$0xff] }
 0x19f   :  { %v637_v44 = vmul.f32 %v1684_v0, %v635_v55  ;;  %1687 = vtanh.f32 %v611_v50  ;;  %vm642_vm13 = vweird.f32 %v1684_v0  ;;  %vm624_vm0 = vmor %vm622_vm14, %vm623_vm12  ;;  %vm661_vm5 = vweird.f32 %v655_v13  ;;  %v2872_v55 = vld [vmem:[%s3402_s2 + $0x170] sm:$0xff]  ;;  %v2908_v50 = vld [vmem:[%s3402_s2 + $0x120] sm:$0xff] }
 0x1a0   :  { %v619_v45 = vsub.f32 1.0, %v618_v49  ;;  %vm643_vm1 = vmor %vm641_vm15, %vm642_vm13  ;;  %v665_v16 = vand.u32 2147483647, %v655_v13  ;;  %v668_v18 = vor.u32 1.1754944e-38, %v667_v15  ;;  %v2920_v49 = vld [vmem:[%s3402_s2 + $0x130] sm:$0xff]  ;;  %v3076_v15 = vld [vmem:[%s3402_s2 + $0x40] sm:$0xff] }
 0x1a1   :  { %v638_v63 = vsub.f32 1.0, %v637_v44  ;;  %v2926_v44 = vld [vmem:[%s3402_s2 + $0x138] sm:$0xff]  ;;  %3591 = vst [vmem:[#allocation19_spill] sm:$0xff] %v3076_v15 }
 0x1a2   :  { %v620_v53 = vmul.f32 %v1682_v57, %v619_v45  ;;  %vm666_vm7 = vcmp.eq.f32.partialorder %v665_v16, 8.507059e+37  ;;  %v2932_v45 = vld [vmem:[%s3402_s2 + $0x100] sm:$0xff]  ;;  %v3082_v16 = vld [vmem:[%s3402_s2 + $0x48] sm:$0xff] }
 0x1a3   :  { %v639_v56 = vmul.f32 %v1684_v0, %v638_v63  ;;  %v2938_v63 = vld [vmem:[%s3402_s2 + $0x108] sm:$0xff]  ;;  %3592 = vst [vmem:[#allocation20_spill] sm:$0xff] %v3082_v16 }
 0x1a4   :  { %v1686_v54 = vpop.eup %1685  ;;  %v621_v62 = vadd.f32 %v1682_v57, %v620_v53  ;;  %v2956_v53 = vld [vmem:[%s3402_s2 + $0xe0] sm:$0xff] }
 0x1a5   :  { %v640_v59 = vadd.f32 %v1684_v0, %v639_v56  ;;  %v657_v1 = vmul.f32 %v1686_v54, %v655_v13  ;;  %v1688_v4 = vpop.eup %1687  ;;  %vm662_vm4 = vweird.f32 %v1686_v54  ;;  %v2890_v13 = vld [vmem:[%s3402_s2 + $0x148] sm:$0xff]  ;;  %v2968_v56 = vld [vmem:[%s3402_s2 + $0xf0] sm:$0xff] }
 0x1a6   :  { %v625_v3 = vsel %vm624_vm0, %v1682_v57, %v621_v62  ;;  %vm663_vm6 = vmor %vm661_vm5, %vm662_vm4  ;;  %v2896_v57 = vld [vmem:[%s3402_s2 + $0x150] sm:$0xff]  ;;  %v2986_v62 = vld [vmem:[%s3402_s2 + $0xc8] sm:$0xff] }
 0x1a7   :  { %v630_v5 = vsel %vm627_vm2, %v629_v58, %v625_v3  ;;  %v644_v6 = vsel %vm643_vm1, %v1684_v0, %v640_v59  ;;  %v658_v7 = vsub.f32 1.0, %v657_v1  ;;  %v2914_v0 = vld [vmem:[%s3402_s2 + $0x128] sm:$0xff]  ;;  %v2992_v58 = vld [vmem:[%s3402_s2 + $0xd0] sm:$0xff]  ;;  %v2998_v59 = vld [vmem:[%s3402_s2 + $0xd8] sm:$0xff] }
 0x1a8   :  { %v649_v8 = vsel %vm646_vm3, %v648_v2, %v644_v6  ;;  %v672_v9 = vmul.f32 %v1688_v4, %v630_v5  ;;  %3577 = vst [vmem:[#allocation6_spill] sm:$0xff] %v2992_v58  ;;  %v3004_v1 = vld [vmem:[%s3402_s2 + $0xa0] sm:$0xff]  ;;  %v3010_v2 = vld [vmem:[%s3402_s2 + $0xa8] sm:$0xff]  ;;  %v3016_v3 = vld [vmem:[%s3402_s2 + $0xb0] sm:$0xff] }
 0x1a9   :  { %v671_v10 = vmul.f32 %v649_v8, %v2680_v39  ;;  %v659_v11 = vmul.f32 %v1686_v54, %v658_v7  ;;  %v2764_v39 = vld [vmem:[%s3402_s2 + $0x1e0] sm:$0xff]  ;;  %3578 = vst [vmem:[#allocation5_spill] sm:$0xff] %v2998_v59  ;;  %v3022_v4 = vld [vmem:[%s3402_s2 + $0xb8] sm:$0xff]  ;;  %v3034_v6 = vld [vmem:[%s3402_s2 + $0x88] sm:$0xff] }
 0x1aa   :  { %3579 = vst [vmem:[#allocation7_spill] sm:$0xff] %v3004_v1  ;;  %v3028_v5 = vld [vmem:[%s3402_s2 + $0x80] sm:$0xff]  ;;  %v3040_v7 = vld [vmem:[%s3402_s2 + $0x90] sm:$0xff]  ;;  %v3046_v8 = vld [vmem:[%s3402_s2 + $0x98] sm:$0xff] }
 0x1ab   :  { %v2755_v12 = vadd.f32 %v672_v9, %v671_v10  ;;  %v660_v14 = vadd.f32 %v1686_v54, %v659_v11  ;;  %3580 = vst [vmem:[#allocation8_spill] sm:$0xff] %v3010_v2  ;;  %v3052_v9 = vld [vmem:[%s3402_s2 + $0x60] sm:$0xff]  ;;  %v3058_v10 = vld [vmem:[%s3402_s2 + $0x68] sm:$0xff]  ;;  %v3064_v11 = vld [vmem:[%s3402_s2 + $0x70] sm:$0xff] }
 0x1ac   :  { %3581 = vst [vmem:[#allocation10_spill] sm:$0xff] %v3016_v3 }
 0x1ad   :  { %1689 = vtanh.f32 %v2755_v12  ;;  %v664_v17 = vsel %vm663_vm6, %v1686_v54, %v660_v14  ;;  %v2980_v54 = vld [vmem:[%s3402_s2 + $0xc0] sm:$0xff]  ;;  %3582 = vst [vmem:[#allocation9_spill] sm:$0xff] %v3022_v4  ;;  %v3070_v14 = vld [vmem:[%s3402_s2 + $0x78] sm:$0xff] }
 0x1ae   :  { %v669_v20 = vsel %vm666_vm7, %v668_v18, %v664_v17  ;;  %3583 = vst [vmem:[#allocation11_spill] sm:$0xff] %v3028_v5  ;;  %v3088_v17 = vld [vmem:[%s3402_s2 + $0x50] sm:$0xff]  ;;  %v3094_v18 = vld [vmem:[%s3402_s2 + $0x58] sm:$0xff] }
 0x1af   :  { %3584 = vst [vmem:[#allocation12_spill] sm:$0xff] %v3034_v6 }
 0x1b0   :  { %3585 = vst [vmem:[#allocation14_spill] sm:$0xff] %v3040_v7 }
 0x1b1   :  { %3586 = vst [vmem:[#allocation13_spill] sm:$0xff] %v3046_v8 }
 0x1b2   :  { %3587 = vst [vmem:[#allocation15_spill] sm:$0xff] %v3052_v9 }
 0x1b3   :  { %v1690_v19 = vpop.eup %1689  ;;  %3588 = vst [vmem:[#allocation16_spill] sm:$0xff] %v3058_v10 }
 0x1b4   :  { %v675_v21 = vmul.f32 %v1690_v19, %v669_v20  ;;  %3589 = vst [vmem:[#allocation18_spill] sm:$0xff] %v3064_v11  ;;  %v3100_v19 = vld [vmem:[%s3402_s2 + $0x20] sm:$0xff]  ;;  %v3106_v20 = vld [vmem:[%s3402_s2 + $0x28] sm:$0xff] }
 0x1b5   :  { %3590 = vst [vmem:[#allocation17_spill] sm:$0xff] %v3070_v14 }
 0x1b6   :  { %1633 = vst [vmem:[%s3404_s4 + $0x8] sm:$0xff] %v675_v21  ;;  %701 = vmatmul.f32.vlgmr.msrb.gmra.mxu0 %v675_v21  ;;  %721 = vmatmul.f32.vlgmr.msrb.gmra.mxu1 %v675_v21 }
 0x1b7   :  { %741 = vmatmul.f32.vlgmr.msrb.gmra.mxu2 %v675_v21  ;;  %761 = vmatmul.f32.vlgmr.msrb.gmra.mxu3 %v675_v21  ;;  %3593 = vst [vmem:[#allocation22_spill] sm:$0xff] %v3088_v17  ;;  %v3112_v21 = vld [vmem:[%s3402_s2 + $0x30] sm:$0xff] }
 0x1b8   :  { %997 = vmatpush.msrb.mxu0 %v2764_v39  ;;  %1017 = vmatpush.msrb.mxu1 %v2770_v22  ;;  %3594 = vst [vmem:[#allocation21_spill] sm:$0xff] %v3094_v18 }
 0x1b9   :  { %1037 = vmatpush.msrb.mxu2 %v2776_v23  ;;  %1057 = vmatpush.msrb.mxu3 %v2782_v29  ;;  %3595 = vst [vmem:[#allocation23_spill] sm:$0xff] %v3100_v19 }
 0x1ba   :  { %998 = vmatpush.msrb.mxu0 %v2788_v30  ;;  %1018 = vmatpush.msrb.mxu1 %v2794_v31  ;;  %3596 = vst [vmem:[#allocation24_spill] sm:$0xff] %v3106_v20 }
 0x1bb   :  { %1038 = vmatpush.msrb.mxu2 %v2800_v32  ;;  %1058 = vmatpush.msrb.mxu3 %v2806_v33  ;;  %3597 = vst [vmem:[#allocation25_spill] sm:$0xff] %v3112_v21 }
 0x1bc   :  { %999 = vmatpush.msrb.mxu0 %v2812_v34  ;;  %1019 = vmatpush.msrb.mxu1 %v2818_v35 }
 0x1bd   :  { %1039 = vmatpush.msrb.mxu2 %v2824_v36  ;;  %1059 = vmatpush.msrb.mxu3 %v2830_v37 }
 0x1be   :  { %1000 = vmatpush.msrb.mxu0 %v2836_v38  ;;  %1020 = vmatpush.msrb.mxu1 %v2842_v40 }
 0x1bf   :  { %1040 = vmatpush.msrb.mxu2 %v2848_v41  ;;  %1060 = vmatpush.msrb.mxu3 %v2854_v42 }
 0x1c0   :  { %1001 = vmatpush.msrb.mxu0 %v2860_v43  ;;  %1021 = vmatpush.msrb.mxu1 %v2866_v47 }
 0x1c1   :  { %1041 = vmatpush.msrb.mxu2 %v2872_v55  ;;  %1061 = vmatpush.msrb.mxu3 %v2878_v46 }
 0x1c2   :  { %1002 = vmatpush.msrb.mxu0 %v2884_v60  ;;  %1022 = vmatpush.msrb.mxu1 %v2890_v13 }
 0x1c3   :  { %1042 = vmatpush.msrb.mxu2 %v2896_v57  ;;  %1062 = vmatpush.msrb.mxu3 %v2902_v52 }
 0x1c4   :  { %1003 = vmatpush.msrb.mxu0 %v2908_v50  ;;  %1023 = vmatpush.msrb.mxu1 %v2914_v0 }
 0x1c5   :  { %1043 = vmatpush.msrb.mxu2 %v2920_v49  ;;  %1063 = vmatpush.msrb.mxu3 %v2926_v44 }
 0x1c6   :  { %1004 = vmatpush.msrb.mxu0 %v2932_v45  ;;  %1024 = vmatpush.msrb.mxu1 %v2938_v63 }
 0x1c7   :  { %1044 = vmatpush.msrb.mxu2 %v2944_v51  ;;  %1064 = vmatpush.msrb.mxu3 %v2950_v26 }
 0x1c8   :  { %1005 = vmatpush.msrb.mxu0 %v2956_v53  ;;  %1025 = vmatpush.msrb.mxu1 %v2962_v48 }
 0x1c9   :  { %1045 = vmatpush.msrb.mxu2 %v2968_v56  ;;  %1065 = vmatpush.msrb.mxu3 %v2974_v61 }
 0x1ca   :  { %1006 = vmatpush.msrb.mxu0 %v2980_v54  ;;  %1026 = vmatpush.msrb.mxu1 %v2986_v62 }
 0x1cb   :  { %1046 = vmatpush.msrb.mxu2 %v2992_v58  ;;  %1066 = vmatpush.msrb.mxu3 %v2998_v59 }
 0x1cc   :  { %1007 = vmatpush.msrb.mxu0 %v3004_v1  ;;  %1027 = vmatpush.msrb.mxu1 %v3010_v2 }
 0x1cd   :  { %1047 = vmatpush.msrb.mxu2 %v3016_v3  ;;  %1067 = vmatpush.msrb.mxu3 %v3022_v4 }
 0x1ce   :  { %1008 = vmatpush.msrb.mxu0 %v3028_v5  ;;  %1028 = vmatpush.msrb.mxu1 %v3034_v6 }
 0x1cf   :  { %1048 = vmatpush.msrb.mxu2 %v3040_v7  ;;  %1068 = vmatpush.msrb.mxu3 %v3046_v8 }
 0x1d0   :  { %1009 = vmatpush.msrb.mxu0 %v3052_v9  ;;  %1029 = vmatpush.msrb.mxu1 %v3058_v10 }
 0x1d1   :  { %1049 = vmatpush.msrb.mxu2 %v3064_v11  ;;  %1069 = vmatpush.msrb.mxu3 %v3070_v14 }
 0x1d2   :  { %1010 = vmatpush.msrb.mxu0 %v3076_v15  ;;  %1030 = vmatpush.msrb.mxu1 %v3082_v16 }
 0x1d3   :  { %1050 = vmatpush.msrb.mxu2 %v3088_v17  ;;  %1070 = vmatpush.msrb.mxu3 %v3094_v18  ;;  %v3118_v18 = vld [vmem:[%s3402_s2 + $0x38] sm:$0xff]  ;;  %v3599_v17 = vld [vmem:[#allocation35_spill] sm:$0xff] }
 0x1d4   :  { %1011 = vmatpush.msrb.mxu0 %v3100_v19  ;;  %1031 = vmatpush.msrb.mxu1 %v3106_v20  ;;  %3598 = vst [vmem:[#allocation26_spill] sm:$0xff] %v3118_v18 }
 0x1d5   :  { %1051 = vmatpush.msrb.mxu2 %v3112_v21  ;;  %1071 = vmatpush.msrb.mxu3 %v3118_v18  ;;  %v3600_v21 = vld [vmem:[#allocation36_spill] sm:$0xff]  ;;  %v3601_v18 = vld [vmem:[#allocation38_spill] sm:$0xff] }
 0x1d6   :  { %1012 = vmatpush.msrb.mxu0 %v3569_v24  ;;  %1032 = vmatpush.msrb.mxu1 %v3570_v25 }
 0x1d7   :  { %1052 = vmatpush.msrb.mxu2 %v3571_v27  ;;  %1072 = vmatpush.msrb.mxu3 %v3572_v28 }
 0x233   :  { %v702_v20 = vpop.f32.mrf.mxu0  ;;  %v722_v19 = vpop.f32.mrf.mxu1 }
 0x234   :  { %v765_v16 = vadd.f32 %v702_v20, %v3599_v17  ;;  %v766_v15 = vadd.f32 %v722_v19, %v3600_v21  ;;  %v3602_v19 = vld [vmem:[#allocation37_spill] sm:$0xff] }
 0x236   :  { %v1634_v14 = vmul.f32 -1.442695, %v765_v16  ;;  %v1635_v11 = vmul.f32 -1.442695, %v766_v15 }
 0x238   :  { %1691 = vpow2.f32 %v1634_v14 }
 0x239   :  { %1693 = vpow2.f32 %v1635_v11 }
 0x23a   :  { %v762_v10 = vpop.f32.mrf.mxu3  ;;  %v742_v28 = vpop.f32.mrf.mxu2 }
 0x23b   :  { %v768_v9 = vadd.f32 %v762_v10, %v3601_v18  ;;  %v767_v16 = vadd.f32 %v742_v28, %v3602_v19 }
 0x23d   :  { %v1636_v24 = vmul.f32 -1.442695, %v768_v9 }
 0x23e   :  { %v1692_v8 = vpop.eup %1691 }
 0x23f   :  { %v1694_v25 = vpop.eup %1693  ;;  %v772_v7 = vadd.f32 1.0, %v1692_v8  ;;  %1695 = vpow2.f32 %v1636_v24 }
 0x240   :  { %v791_v27 = vadd.f32 1.0, %v1694_v25 }
 0x241   :  { %1697 = vrcp.f32 %v772_v7  ;;  %v784_v9 = vand.u32 2147483648, %v772_v7  ;;  %v782_v24 = vand.u32 2147483647, %v772_v7  ;;  %vm778_vm10 = vweird.f32 %v772_v7 }
 0x242   :  { %1699 = vrcp.f32 %v791_v27  ;;  %v803_v18 = vand.u32 2147483648, %v791_v27  ;;  %v801_v5 = vand.u32 2147483647, %v791_v27  ;;  %vm797_vm11 = vweird.f32 %v791_v27 }
 0x243   :  { %v785_v28 = vor.u32 1.1754944e-38, %v784_v9  ;;  %vm783_vm14 = vcmp.eq.f32.partialorder %v782_v24, 8.507059e+37 }
 0x244   :  { %vm802_vm15 = vcmp.eq.f32.partialorder %v801_v5, 8.507059e+37 }
 0x245   :  { %v1696_v6 = vpop.eup %1695 }
 0x246   :  { %v811_v17 = vadd.f32 1.0, %v1696_v6 }
 0x247   :  { %v1698_v20 = vpop.eup %1697 }
 0x248   :  { %v1700_v15 = vpop.eup %1699  ;;  %v774_v14 = vmul.f32 %v1698_v20, %v772_v7  ;;  %1701 = vrcp.f32 %v811_v17  ;;  %vm779_vm8 = vweird.f32 %v1698_v20  ;;  %v823_v9 = vand.u32 2147483648, %v811_v17 }
 0x249   :  { %v793_v11 = vmul.f32 %v1700_v15, %v791_v27  ;;  %1703 = vtanh.f32 %v767_v16  ;;  %vm798_vm9 = vweird.f32 %v1700_v15  ;;  %vm780_vm12 = vmor %vm778_vm10, %vm779_vm8  ;;  %vm817_vm1 = vweird.f32 %v811_v17 }
 0x24a   :  { %v775_v21 = vsub.f32 1.0, %v774_v14  ;;  %vm799_vm13 = vmor %vm797_vm11, %vm798_vm9  ;;  %v804_v14 = vor.u32 1.1754944e-38, %v803_v18  ;;  %v824_v24 = vor.u32 1.1754944e-38, %v823_v9  ;;  %v3621_v9 = vld [vmem:[#allocation23_spill] sm:$0xff] }
 0x24b   :  { %v794_v10 = vsub.f32 1.0, %v793_v11 }
 0x24c   :  { %v776_v8 = vmul.f32 %v1698_v20, %v775_v21 }
 0x24d   :  { %v795_v25 = vmul.f32 %v1700_v15, %v794_v10 }
 0x24e   :  { %v1702_v4 = vpop.eup %1701  ;;  %v777_v6 = vadd.f32 %v1698_v20, %v776_v8 }
 0x24f   :  { %v796_v19 = vadd.f32 %v1700_v15, %v795_v25  ;;  %v813_v3 = vmul.f32 %v1702_v4, %v811_v17  ;;  %v1704_v16 = vpop.eup %1703  ;;  %vm818_vm0 = vweird.f32 %v1702_v4  ;;  %v3610_v25 = vld [vmem:[#allocation12_spill] sm:$0xff] }
 0x250   :  { %v781_v11 = vsel %vm780_vm12, %v1698_v20, %v777_v6  ;;  %v821_v20 = vand.u32 2147483647, %v811_v17  ;;  %vm819_vm2 = vmor %vm817_vm1, %vm818_vm0  ;;  %v3609_v17 = vld [vmem:[#allocation11_spill] sm:$0xff]  ;;  %v3611_v6 = vld [vmem:[#allocation14_spill] sm:$0xff] }
 0x251   :  { %v786_v2 = vsel %vm783_vm14, %v785_v28, %v781_v11  ;;  %v800_v21 = vsel %vm799_vm13, %v1700_v15, %v796_v19  ;;  %v814_v1 = vsub.f32 1.0, %v813_v3  ;;  %v3612_v28 = vld [vmem:[#allocation13_spill] sm:$0xff]  ;;  %v3613_v19 = vld [vmem:[#allocation15_spill] sm:$0xff]  ;;  %v3615_v11 = vld [vmem:[#allocation18_spill] sm:$0xff] }
 0x252   :  { %v805_v10 = vsel %vm802_vm15, %v804_v14, %v800_v21  ;;  %v828_v59 = vmul.f32 %v1704_v16, %v786_v2  ;;  %vm822_vm3 = vcmp.eq.f32.partialorder %v821_v20, 8.507059e+37  ;;  %v3607_v2 = vld [vmem:[#allocation10_spill] sm:$0xff]  ;;  %v3614_v14 = vld [vmem:[#allocation16_spill] sm:$0xff]  ;;  %v3616_v16 = vld [vmem:[#allocation17_spill] sm:$0xff] }
 0x253   :  { %v827_v58 = vmul.f32 %v805_v10, %v2755_v12  ;;  %v815_v8 = vmul.f32 %v1702_v4, %v814_v1  ;;  %v3603_v12 = vld [vmem:[#allocation6_spill] sm:$0xff]  ;;  %v3606_v1 = vld [vmem:[#allocation8_spill] sm:$0xff]  ;;  %v3617_v21 = vld [vmem:[#allocation19_spill] sm:$0xff] }
 0x254   :  { %v3618_v10 = vld [vmem:[#allocation20_spill] sm:$0xff] }
 0x255   :  { %v3130_v7 = vadd.f32 %v828_v59, %v827_v58  ;;  %v816_v27 = vadd.f32 %v1702_v4, %v815_v8  ;;  %v3604_v58 = vld [vmem:[#allocation5_spill] sm:$0xff]  ;;  %v3605_v59 = vld [vmem:[#allocation7_spill] sm:$0xff]  ;;  %v3619_v8 = vld [vmem:[#allocation22_spill] sm:$0xff] }
 0x256   :  { %v3622_v20 = vld [vmem:[#allocation24_spill] sm:$0xff] }
 0x257   :  { %1705 = vtanh.f32 %v3130_v7  ;;  %v820_v18 = vsel %vm819_vm2, %v1702_v4, %v816_v27  ;;  %v3608_v4 = vld [vmem:[#allocation9_spill] sm:$0xff] }
 0x258   :  { %v825_v3 = vsel %vm822_vm3, %v824_v24, %v820_v18  ;;  %v3620_v27 = vld [vmem:[#allocation21_spill] sm:$0xff]  ;;  %v3624_v24 = vld [vmem:[#allocation26_spill] sm:$0xff] }
 0x259   :  { %v3623_v18 = vld [vmem:[#allocation25_spill] sm:$0xff] }
 0x25d   :  { %v1706_v5 = vpop.eup %1705 }
 0x25e   :  { %v831_v15 = vmul.f32 %v1706_v5, %v825_v3  ;;  %v3199_v5 = vld [vmem:[%s3402_s2] sm:$0xff]  ;;  %v3205_v3 = vld [vmem:[%s3402_s2 + $0x8] sm:$0xff] }
 0x25f   :  { %3625 = vst [vmem:[#allocation27_spill] sm:$0xff] %v3199_v5 }
 0x260   :  { %1637 = vst [vmem:[%s3404_s4 + $0x10] sm:$0xff] %v831_v15  ;;  %857 = vmatmul.f32.vlgmr.msra.gmra.mxu0 %v831_v15  ;;  %877 = vmatmul.f32.vlgmr.msra.gmra.mxu1 %v831_v15 }
 0x261   :  { %897 = vmatmul.f32.vlgmr.msra.gmra.mxu2 %v831_v15  ;;  %917 = vmatmul.f32.vlgmr.msra.gmra.mxu3 %v831_v15  ;;  %3626 = vst [vmem:[#allocation28_spill] sm:$0xff] %v3205_v3  ;;  %v3211_v15 = vld [vmem:[%s3402_s2 + $0x10] sm:$0xff] }
 0x262   :  { %1153 = vmatpush.msra.mxu0 %v2764_v39  ;;  %1173 = vmatpush.msra.mxu1 %v2770_v22  ;;  %3627 = vst [vmem:[#allocation29_spill] sm:$0xff] %v3211_v15 }
 0x263   :  { %1193 = vmatpush.msra.mxu2 %v2776_v23  ;;  %1213 = vmatpush.msra.mxu3 %v2782_v29 }
 0x264   :  { %1154 = vmatpush.msra.mxu0 %v2788_v30  ;;  %1174 = vmatpush.msra.mxu1 %v2794_v31 }
 0x265   :  { %1194 = vmatpush.msra.mxu2 %v2800_v32  ;;  %1214 = vmatpush.msra.mxu3 %v2806_v33 }
 0x266   :  { %1155 = vmatpush.msra.mxu0 %v2812_v34  ;;  %1175 = vmatpush.msra.mxu1 %v2818_v35 }
 0x267   :  { %1195 = vmatpush.msra.mxu2 %v2824_v36  ;;  %1215 = vmatpush.msra.mxu3 %v2830_v37 }
 0x268   :  { %1156 = vmatpush.msra.mxu0 %v2836_v38  ;;  %1176 = vmatpush.msra.mxu1 %v2842_v40 }
 0x269   :  { %1196 = vmatpush.msra.mxu2 %v2848_v41  ;;  %1216 = vmatpush.msra.mxu3 %v2854_v42 }
 0x26a   :  { %1157 = vmatpush.msra.mxu0 %v2860_v43  ;;  %1177 = vmatpush.msra.mxu1 %v2866_v47 }
 0x26b   :  { %1197 = vmatpush.msra.mxu2 %v2872_v55  ;;  %1217 = vmatpush.msra.mxu3 %v2878_v46 }
 0x26c   :  { %1158 = vmatpush.msra.mxu0 %v2884_v60  ;;  %1178 = vmatpush.msra.mxu1 %v2890_v13 }
 0x26d   :  { %1198 = vmatpush.msra.mxu2 %v2896_v57  ;;  %1218 = vmatpush.msra.mxu3 %v2902_v52 }
 0x26e   :  { %1159 = vmatpush.msra.mxu0 %v2908_v50  ;;  %1179 = vmatpush.msra.mxu1 %v2914_v0 }
 0x26f   :  { %1199 = vmatpush.msra.mxu2 %v2920_v49  ;;  %1219 = vmatpush.msra.mxu3 %v2926_v44 }
 0x270   :  { %1160 = vmatpush.msra.mxu0 %v2932_v45  ;;  %1180 = vmatpush.msra.mxu1 %v2938_v63 }
 0x271   :  { %1200 = vmatpush.msra.mxu2 %v2944_v51  ;;  %1220 = vmatpush.msra.mxu3 %v2950_v26 }
 0x272   :  { %1161 = vmatpush.msra.mxu0 %v2956_v53  ;;  %1181 = vmatpush.msra.mxu1 %v2962_v48 }
 0x273   :  { %1201 = vmatpush.msra.mxu2 %v2968_v56  ;;  %1221 = vmatpush.msra.mxu3 %v2974_v61 }
 0x274   :  { %1162 = vmatpush.msra.mxu0 %v2980_v54  ;;  %1182 = vmatpush.msra.mxu1 %v2986_v62 }
 0x275   :  { %1202 = vmatpush.msra.mxu2 %v3603_v12  ;;  %1222 = vmatpush.msra.mxu3 %v3604_v58 }
 0x276   :  { %1163 = vmatpush.msra.mxu0 %v3605_v59  ;;  %1183 = vmatpush.msra.mxu1 %v3606_v1 }
 0x277   :  { %1203 = vmatpush.msra.mxu2 %v3607_v2  ;;  %1223 = vmatpush.msra.mxu3 %v3608_v4 }
 0x278   :  { %1164 = vmatpush.msra.mxu0 %v3609_v17  ;;  %1184 = vmatpush.msra.mxu1 %v3610_v25 }
 0x279   :  { %1204 = vmatpush.msra.mxu2 %v3611_v6  ;;  %1224 = vmatpush.msra.mxu3 %v3612_v28 }
 0x27a   :  { %1165 = vmatpush.msra.mxu0 %v3613_v19  ;;  %1185 = vmatpush.msra.mxu1 %v3614_v14 }
 0x27b   :  { %1205 = vmatpush.msra.mxu2 %v3615_v11  ;;  %1225 = vmatpush.msra.mxu3 %v3616_v16  ;;  %v3631_v16 = vld [vmem:[#allocation42_spill] sm:$0xff] }
 0x27c   :  { %1166 = vmatpush.msra.mxu0 %v3617_v21  ;;  %1186 = vmatpush.msra.mxu1 %v3618_v10 }
 0x27d   :  { %1206 = vmatpush.msra.mxu2 %v3619_v8  ;;  %1226 = vmatpush.msra.mxu3 %v3620_v27  ;;  %v3630_v27 = vld [vmem:[#allocation40_spill] sm:$0xff] }
 0x27e   :  { %1167 = vmatpush.msra.mxu0 %v3621_v9  ;;  %1187 = vmatpush.msra.mxu1 %v3622_v20  ;;  %v3629_v20 = vld [vmem:[#allocation39_spill] sm:$0xff] }
 0x27f   :  { %1207 = vmatpush.msra.mxu2 %v3623_v18  ;;  %1227 = vmatpush.msra.mxu3 %v3624_v24  ;;  %v3217_v24 = vld [vmem:[%s3402_s2 + $0x18] sm:$0xff] }
 0x280   :  { %1168 = vmatpush.msra.mxu0 %v3199_v5  ;;  %1188 = vmatpush.msra.mxu1 %v3205_v3  ;;  %3628 = vst [vmem:[#allocation30_spill] sm:$0xff] %v3217_v24 }
 0x281   :  { %1208 = vmatpush.msra.mxu2 %v3211_v15  ;;  %1228 = vmatpush.msra.mxu3 %v3217_v24 }
 0x2dd   :  { %v858_v5 = vpop.f32.mrf.mxu0  ;;  %v878_v18 = vpop.f32.mrf.mxu1 }
 0x2de   :  { %v921_v9 = vadd.f32 %v858_v5, %v3629_v20  ;;  %v922_v3 = vadd.f32 %v878_v18, %v3630_v27  ;;  %v3632_v27 = vld [vmem:[#allocation41_spill] sm:$0xff] }
 0x2e0   :  { %v1638_v8 = vmul.f32 -1.442695, %v921_v9  ;;  %v1639_v10 = vmul.f32 -1.442695, %v922_v3 }
 0x2e2   :  { %1707 = vpow2.f32 %v1638_v8 }
 0x2e3   :  { %1709 = vpow2.f32 %v1639_v10 }
 0x2e4   :  { %v918_v21 = vpop.f32.mrf.mxu3  ;;  %v898_v24 = vpop.f32.mrf.mxu2 }
 0x2e5   :  { %v924_v15 = vadd.f32 %v918_v21, %v3631_v16  ;;  %v923_v9 = vadd.f32 %v898_v24, %v3632_v27 }
 0x2e7   :  { %v1640_v11 = vmul.f32 -1.442695, %v924_v15 }
 0x2e8   :  { %v1708_v14 = vpop.eup %1707 }
 0x2e9   :  { %v1710_v19 = vpop.eup %1709  ;;  %v928_v28 = vadd.f32 1.0, %v1708_v14  ;;  %1711 = vpow2.f32 %v1640_v11 }
 0x2ea   :  { %v947_v6 = vadd.f32 1.0, %v1710_v19 }
 0x2eb   :  { %1713 = vrcp.f32 %v928_v28  ;;  %v940_v21 = vand.u32 2147483648, %v928_v28  ;;  %v938_v19 = vand.u32 2147483647, %v928_v28  ;;  %vm934_vm6 = vweird.f32 %v928_v28 }
 0x2ec   :  { %1715 = vrcp.f32 %v947_v6  ;;  %v959_v15 = vand.u32 2147483648, %v947_v6  ;;  %v957_v17 = vand.u32 2147483647, %v947_v6  ;;  %vm953_vm7 = vweird.f32 %v947_v6 }
 0x2ed   :  { %v941_v24 = vor.u32 1.1754944e-38, %v940_v21  ;;  %vm939_vm10 = vcmp.eq.f32.partialorder %v938_v19, 8.507059e+37 }
 0x2ee   :  { %vm958_vm11 = vcmp.eq.f32.partialorder %v957_v17, 8.507059e+37 }
 0x2ef   :  { %v1712_v25 = vpop.eup %1711 }
 0x2f0   :  { %v967_v20 = vadd.f32 1.0, %v1712_v25 }
 0x2f1   :  { %v1714_v5 = vpop.eup %1713 }
 0x2f2   :  { %v1716_v18 = vpop.eup %1715  ;;  %v930_v8 = vmul.f32 %v1714_v5, %v928_v28  ;;  %1717 = vrcp.f32 %v967_v20  ;;  %vm935_vm4 = vweird.f32 %v1714_v5  ;;  %v979_v21 = vand.u32 2147483648, %v967_v20 }
 0x2f3   :  { %v949_v10 = vmul.f32 %v1716_v18, %v947_v6  ;;  %1719 = vtanh.f32 %v923_v9  ;;  %vm954_vm5 = vweird.f32 %v1716_v18  ;;  %vm936_vm8 = vmor %vm934_vm6, %vm935_vm4  ;;  %vm973_vm13 = vweird.f32 %v967_v20 }
 0x2f4   :  { %v931_v3 = vsub.f32 1.0, %v930_v8  ;;  %vm955_vm9 = vmor %vm953_vm7, %vm954_vm5  ;;  %v960_v8 = vor.u32 1.1754944e-38, %v959_v15  ;;  %v980_v19 = vor.u32 1.1754944e-38, %v979_v21  ;;  %v3651_v21 = vld [vmem:[#allocation23_spill] sm:$0xff] }
 0x2f5   :  { %v950_v16 = vsub.f32 1.0, %v949_v10 }
 0x2f6   :  { %v932_v14 = vmul.f32 %v1714_v5, %v931_v3 }
 0x2f7   :  { %v951_v11 = vmul.f32 %v1716_v18, %v950_v16 }
 0x2f8   :  { %v1718_v4 = vpop.eup %1717  ;;  %v933_v25 = vadd.f32 %v1714_v5, %v932_v14 }
 0x2f9   :  { %v952_v27 = vadd.f32 %v1716_v18, %v951_v11  ;;  %v969_v2 = vmul.f32 %v1718_v4, %v967_v20  ;;  %v1720_v9 = vpop.eup %1719  ;;  %vm974_vm12 = vweird.f32 %v1718_v4  ;;  %v3640_v11 = vld [vmem:[#allocation12_spill] sm:$0xff] }
 0x2fa   :  { %v937_v10 = vsel %vm936_vm8, %v1714_v5, %v933_v25  ;;  %v977_v5 = vand.u32 2147483647, %v967_v20  ;;  %vm975_vm14 = vmor %vm973_vm13, %vm974_vm12  ;;  %v3639_v20 = vld [vmem:[#allocation11_spill] sm:$0xff]  ;;  %v3641_v25 = vld [vmem:[#allocation14_spill] sm:$0xff] }
 0x2fb   :  { %v942_v1 = vsel %vm939_vm10, %v941_v24, %v937_v10  ;;  %v956_v3 = vsel %vm955_vm9, %v1716_v18, %v952_v27  ;;  %v970_v59 = vsub.f32 1.0, %v969_v2  ;;  %v3642_v24 = vld [vmem:[#allocation13_spill] sm:$0xff]  ;;  %v3643_v27 = vld [vmem:[#allocation15_spill] sm:$0xff]  ;;  %v3645_v10 = vld [vmem:[#allocation18_spill] sm:$0xff] }
 0x2fc   :  { %v961_v16 = vsel %vm958_vm11, %v960_v8, %v956_v3  ;;  %v984_v58 = vmul.f32 %v1720_v9, %v942_v1  ;;  %vm978_vm15 = vcmp.eq.f32.partialorder %v977_v5, 8.507059e+37  ;;  %v3637_v1 = vld [vmem:[#allocation10_spill] sm:$0xff]  ;;  %v3644_v8 = vld [vmem:[#allocation16_spill] sm:$0xff]  ;;  %v3646_v9 = vld [vmem:[#allocation17_spill] sm:$0xff] }
 0x2fd   :  { %v983_v12 = vmul.f32 %v961_v16, %v3130_v7  ;;  %v971_v14 = vmul.f32 %v1718_v4, %v970_v59  ;;  %v3633_v7 = vld [vmem:[#allocation6_spill] sm:$0xff]  ;;  %v3636_v59 = vld [vmem:[#allocation8_spill] sm:$0xff]  ;;  %v3647_v3 = vld [vmem:[#allocation19_spill] sm:$0xff] }
 0x2fe   :  { %v3648_v16 = vld [vmem:[#allocation20_spill] sm:$0xff] }
 0x2ff   :  { %v3225_v28 = vadd.f32 %v984_v58, %v983_v12  ;;  %v972_v6 = vadd.f32 %v1718_v4, %v971_v14  ;;  %v3634_v12 = vld [vmem:[#allocation5_spill] sm:$0xff]  ;;  %v3635_v58 = vld [vmem:[#allocation7_spill] sm:$0xff]  ;;  %v3649_v14 = vld [vmem:[#allocation22_spill] sm:$0xff] }
 0x300   :  { %v3652_v5 = vld [vmem:[#allocation24_spill] sm:$0xff] }
 0x301   :  { %1721 = vtanh.f32 %v3225_v28  ;;  %v976_v15 = vsel %vm975_vm14, %v1718_v4, %v972_v6  ;;  %v3638_v4 = vld [vmem:[#allocation9_spill] sm:$0xff] }
 0x302   :  { %v981_v2 = vsel %vm978_vm15, %v980_v19, %v976_v15  ;;  %v3650_v6 = vld [vmem:[#allocation21_spill] sm:$0xff]  ;;  %v3654_v19 = vld [vmem:[#allocation26_spill] sm:$0xff] }
 0x303   :  { %v3653_v15 = vld [vmem:[#allocation25_spill] sm:$0xff] }
 0x307   :  { %v1722_v17 = vpop.eup %1721 }
 0x308   :  { %v987_v18 = vmul.f32 %v1722_v17, %v981_v2  ;;  %v3655_v17 = vld [vmem:[#allocation27_spill] sm:$0xff]  ;;  %v3656_v2 = vld [vmem:[#allocation28_spill] sm:$0xff] }
 0x30a   :  { %1641 = vst [vmem:[%s3404_s4 + $0x18] sm:$0xff] %v987_v18  ;;  %1013 = vmatmul.f32.vlgmr.msrb.gmra.mxu0 %v987_v18  ;;  %1033 = vmatmul.f32.vlgmr.msrb.gmra.mxu1 %v987_v18 }
 0x30b   :  { %1053 = vmatmul.f32.vlgmr.msrb.gmra.mxu2 %v987_v18  ;;  %1073 = vmatmul.f32.vlgmr.msrb.gmra.mxu3 %v987_v18  ;;  %v3657_v18 = vld [vmem:[#allocation29_spill] sm:$0xff] }
 0x30c   :  { %1309 = vmatpush.msrb.mxu0 %v2764_v39  ;;  %1329 = vmatpush.msrb.mxu1 %v2770_v22 }
 0x30d   :  { %1349 = vmatpush.msrb.mxu2 %v2776_v23  ;;  %1369 = vmatpush.msrb.mxu3 %v2782_v29 }
 0x30e   :  { %1310 = vmatpush.msrb.mxu0 %v2788_v30  ;;  %1330 = vmatpush.msrb.mxu1 %v2794_v31 }
 0x30f   :  { %1350 = vmatpush.msrb.mxu2 %v2800_v32  ;;  %1370 = vmatpush.msrb.mxu3 %v2806_v33 }
 0x310   :  { %1311 = vmatpush.msrb.mxu0 %v2812_v34  ;;  %1331 = vmatpush.msrb.mxu1 %v2818_v35 }
 0x311   :  { %1351 = vmatpush.msrb.mxu2 %v2824_v36  ;;  %1371 = vmatpush.msrb.mxu3 %v2830_v37 }
 0x312   :  { %1312 = vmatpush.msrb.mxu0 %v2836_v38  ;;  %1332 = vmatpush.msrb.mxu1 %v2842_v40 }
 0x313   :  { %1352 = vmatpush.msrb.mxu2 %v2848_v41  ;;  %1372 = vmatpush.msrb.mxu3 %v2854_v42 }
 0x314   :  { %1313 = vmatpush.msrb.mxu0 %v2860_v43  ;;  %1333 = vmatpush.msrb.mxu1 %v2866_v47 }
 0x315   :  { %1353 = vmatpush.msrb.mxu2 %v2872_v55  ;;  %1373 = vmatpush.msrb.mxu3 %v2878_v46 }
 0x316   :  { %1314 = vmatpush.msrb.mxu0 %v2884_v60  ;;  %1334 = vmatpush.msrb.mxu1 %v2890_v13 }
 0x317   :  { %1354 = vmatpush.msrb.mxu2 %v2896_v57  ;;  %1374 = vmatpush.msrb.mxu3 %v2902_v52 }
 0x318   :  { %1315 = vmatpush.msrb.mxu0 %v2908_v50  ;;  %1335 = vmatpush.msrb.mxu1 %v2914_v0 }
 0x319   :  { %1355 = vmatpush.msrb.mxu2 %v2920_v49  ;;  %1375 = vmatpush.msrb.mxu3 %v2926_v44 }
 0x31a   :  { %1316 = vmatpush.msrb.mxu0 %v2932_v45  ;;  %1336 = vmatpush.msrb.mxu1 %v2938_v63 }
 0x31b   :  { %1356 = vmatpush.msrb.mxu2 %v2944_v51  ;;  %1376 = vmatpush.msrb.mxu3 %v2950_v26 }
 0x31c   :  { %1317 = vmatpush.msrb.mxu0 %v2956_v53  ;;  %1337 = vmatpush.msrb.mxu1 %v2962_v48 }
 0x31d   :  { %1357 = vmatpush.msrb.mxu2 %v2968_v56  ;;  %1377 = vmatpush.msrb.mxu3 %v2974_v61 }
 0x31e   :  { %1318 = vmatpush.msrb.mxu0 %v2980_v54  ;;  %1338 = vmatpush.msrb.mxu1 %v2986_v62 }
 0x31f   :  { %1358 = vmatpush.msrb.mxu2 %v3633_v7  ;;  %1378 = vmatpush.msrb.mxu3 %v3634_v12 }
 0x320   :  { %1319 = vmatpush.msrb.mxu0 %v3635_v58  ;;  %1339 = vmatpush.msrb.mxu1 %v3636_v59 }
 0x321   :  { %1359 = vmatpush.msrb.mxu2 %v3637_v1  ;;  %1379 = vmatpush.msrb.mxu3 %v3638_v4 }
 0x322   :  { %1320 = vmatpush.msrb.mxu0 %v3639_v20  ;;  %1340 = vmatpush.msrb.mxu1 %v3640_v11 }
 0x323   :  { %1360 = vmatpush.msrb.mxu2 %v3641_v25  ;;  %1380 = vmatpush.msrb.mxu3 %v3642_v24 }
 0x324   :  { %1321 = vmatpush.msrb.mxu0 %v3643_v27  ;;  %1341 = vmatpush.msrb.mxu1 %v3644_v8 }
 0x325   :  { %1361 = vmatpush.msrb.mxu2 %v3645_v10  ;;  %1381 = vmatpush.msrb.mxu3 %v3646_v9  ;;  %v3659_v9 = vld [vmem:[#allocation43_spill] sm:$0xff]  ;;  %v3660_v10 = vld [vmem:[#allocation44_spill] sm:$0xff] }
 0x326   :  { %1322 = vmatpush.msrb.mxu0 %v3647_v3  ;;  %1342 = vmatpush.msrb.mxu1 %v3648_v16  ;;  %v3658_v3 = vld [vmem:[#allocation30_spill] sm:$0xff] }
 0x327   :  { %1362 = vmatpush.msrb.mxu2 %v3649_v14  ;;  %1382 = vmatpush.msrb.mxu3 %v3650_v6 }
 0x328   :  { %1323 = vmatpush.msrb.mxu0 %v3651_v21  ;;  %1343 = vmatpush.msrb.mxu1 %v3652_v5 }
 0x329   :  { %1363 = vmatpush.msrb.mxu2 %v3653_v15  ;;  %1383 = vmatpush.msrb.mxu3 %v3654_v19  ;;  %v3661_v19 = vld [vmem:[#allocation46_spill] sm:$0xff] }
 0x32a   :  { %1324 = vmatpush.msrb.mxu0 %v3655_v17  ;;  %1344 = vmatpush.msrb.mxu1 %v3656_v2 }
 0x32b   :  { %1364 = vmatpush.msrb.mxu2 %v3657_v18  ;;  %1384 = vmatpush.msrb.mxu3 %v3658_v3 }
 0x387   :  { %v1014_v16 = vpop.f32.mrf.mxu0  ;;  %v1034_v14 = vpop.f32.mrf.mxu1 }
 0x388   :  { %v1077_v6 = vadd.f32 %v1014_v16, %v3659_v9  ;;  %v1078_v21 = vadd.f32 %v1034_v14, %v3660_v10  ;;  %v3662_v10 = vld [vmem:[#allocation45_spill] sm:$0xff] }
 0x38a   :  { %v1642_v8 = vmul.f32 -1.442695, %v1077_v6  ;;  %v1643_v5 = vmul.f32 -1.442695, %v1078_v21 }
 0x38c   :  { %1723 = vpow2.f32 %v1642_v8 }
 0x38d   :  { %1725 = vpow2.f32 %v1643_v5 }
 0x38e   :  { %v1074_v15 = vpop.f32.mrf.mxu3  ;;  %v1054_v3 = vpop.f32.mrf.mxu2 }
 0x38f   :  { %v1080_v27 = vadd.f32 %v1074_v15, %v3661_v19  ;;  %v1079_v14 = vadd.f32 %v1054_v3, %v3662_v10 }
 0x391   :  { %v1644_v17 = vmul.f32 -1.442695, %v1080_v27 }
 0x392   :  { %v1724_v24 = vpop.eup %1723 }
 0x393   :  { %v1726_v2 = vpop.eup %1725  ;;  %v1084_v25 = vadd.f32 1.0, %v1724_v24  ;;  %1727 = vpow2.f32 %v1644_v17 }
 0x394   :  { %v1103_v18 = vadd.f32 1.0, %v1726_v2 }
 0x395   :  { %1729 = vrcp.f32 %v1084_v25  ;;  %v1096_v27 = vand.u32 2147483648, %v1084_v25  ;;  %v1094_v17 = vand.u32 2147483647, %v1084_v25  ;;  %vm1090_vm2 = vweird.f32 %v1084_v25 }
 0x396   :  { %1731 = vrcp.f32 %v1103_v18  ;;  %v1115_v19 = vand.u32 2147483648, %v1103_v18  ;;  %v1113_v20 = vand.u32 2147483647, %v1103_v18  ;;  %vm1109_vm3 = vweird.f32 %v1103_v18 }
 0x397   :  { %v1097_v3 = vor.u32 1.1754944e-38, %v1096_v27  ;;  %vm1095_vm6 = vcmp.eq.f32.partialorder %v1094_v17, 8.507059e+37 }
 0x398   :  { %vm1114_vm7 = vcmp.eq.f32.partialorder %v1113_v20, 8.507059e+37 }
 0x399   :  { %v1728_v11 = vpop.eup %1727 }
 0x39a   :  { %v1123_v9 = vadd.f32 1.0, %v1728_v11 }
 0x39b   :  { %v1730_v16 = vpop.eup %1729 }
 0x39c   :  { %v1732_v6 = vpop.eup %1731  ;;  %v1086_v8 = vmul.f32 %v1730_v16, %v1084_v25  ;;  %1733 = vrcp.f32 %v1123_v9  ;;  %vm1091_vm0 = vweird.f32 %v1730_v16  ;;  %v1135_v27 = vand.u32 2147483648, %v1123_v9 }
 0x39d   :  { %v1105_v21 = vmul.f32 %v1732_v6, %v1103_v18  ;;  %1735 = vtanh.f32 %v1079_v14  ;;  %vm1110_vm1 = vweird.f32 %v1732_v6  ;;  %vm1092_vm4 = vmor %vm1090_vm2, %vm1091_vm0  ;;  %vm1129_vm9 = vweird.f32 %v1123_v9 }
 0x39e   :  { %v1087_v5 = vsub.f32 1.0, %v1086_v8  ;;  %vm1111_vm5 = vmor %vm1109_vm3, %vm1110_vm1  ;;  %v1116_v8 = vor.u32 1.1754944e-38, %v1115_v19  ;;  %v1136_v17 = vor.u32 1.1754944e-38, %v1135_v27 }
 0x39f   :  { %v1106_v15 = vsub.f32 1.0, %v1105_v21 }
 0x3a0   :  { %v1088_v24 = vmul.f32 %v1730_v16, %v1087_v5 }
 0x3a1   :  { %v1107_v2 = vmul.f32 %v1732_v6, %v1106_v15 }
 0x3a2   :  { %v1734_v4 = vpop.eup %1733  ;;  %v1089_v11 = vadd.f32 %v1730_v16, %v1088_v24 }
 0x3a3   :  { %v1108_v10 = vadd.f32 %v1732_v6, %v1107_v2  ;;  %v1125_v1 = vmul.f32 %v1734_v4, %v1123_v9  ;;  %v1736_v14 = vpop.eup %1735  ;;  %vm1130_vm8 = vweird.f32 %v1734_v4 }
 0x3a4   :  { %v1093_v21 = vsel %vm1092_vm4, %v1730_v16, %v1089_v11  ;;  %v1133_v16 = vand.u32 2147483647, %v1123_v9  ;;  %vm1131_vm10 = vmor %vm1129_vm9, %vm1130_vm8  ;;  %v3692_v11 = vld [vmem:[#allocation49_spill] sm:$0xff] }
 0x3a5   :  { %v1098_v59 = vsel %vm1095_vm6, %v1097_v3, %v1093_v21  ;;  %v1112_v5 = vsel %vm1111_vm5, %v1732_v6, %v1108_v10  ;;  %v1126_v58 = vsub.f32 1.0, %v1125_v1 }
 0x3a6   :  { %v1117_v15 = vsel %vm1114_vm7, %v1116_v8, %v1112_v5  ;;  %v1140_v12 = vmul.f32 %v1736_v14, %v1098_v59  ;;  %vm1134_vm11 = vcmp.eq.f32.partialorder %v1133_v16, 8.507059e+37 }
 0x3a7   :  { %v1139_v7 = vmul.f32 %v1117_v15, %v3225_v28  ;;  %v1127_v24 = vmul.f32 %v1734_v4, %v1126_v58 }
 0x3a9   :  { %v3300_v25 = vadd.f32 %v1140_v12, %v1139_v7  ;;  %v1128_v18 = vadd.f32 %v1734_v4, %v1127_v24 }
 0x3ab   :  { %1737 = vtanh.f32 %v3300_v25  ;;  %v1132_v19 = vsel %vm1131_vm10, %v1734_v4, %v1128_v18 }
 0x3ac   :  { %v1137_v1 = vsel %vm1134_vm11, %v1136_v17, %v1132_v19 }
 0x3b1   :  { %v1738_v20 = vpop.eup %1737 }
 0x3b2   :  { %v1143_v6 = vmul.f32 %v1738_v20, %v1137_v1 }
 0x3b4   :  { %1645 = vst [vmem:[%s3404_s4 + $0x20] sm:$0xff] %v1143_v6  ;;  %1169 = vmatmul.f32.vlgmr.msra.gmra.mxu0 %v1143_v6  ;;  %1189 = vmatmul.f32.vlgmr.msra.gmra.mxu1 %v1143_v6 }
 0x3b5   :  { %1209 = vmatmul.f32.vlgmr.msra.gmra.mxu2 %v1143_v6  ;;  %1229 = vmatmul.f32.vlgmr.msra.gmra.mxu3 %v1143_v6 }
 0x3b6   :  { %1465 = vmatpush.msra.mxu0 %v2764_v39  ;;  %1485 = vmatpush.msra.mxu1 %v2770_v22  ;;  %v3663_v39 = vld [vmem:[#allocation6_spill] sm:$0xff]  ;;  %v3664_v22 = vld [vmem:[#allocation5_spill] sm:$0xff] }
 0x3b7   :  { %1505 = vmatpush.msra.mxu2 %v2776_v23  ;;  %1525 = vmatpush.msra.mxu3 %v2782_v29  ;;  %v3665_v23 = vld [vmem:[#allocation7_spill] sm:$0xff]  ;;  %v3666_v29 = vld [vmem:[#allocation8_spill] sm:$0xff] }
 0x3b8   :  { %1466 = vmatpush.msra.mxu0 %v2788_v30  ;;  %1486 = vmatpush.msra.mxu1 %v2794_v31  ;;  %v3667_v30 = vld [vmem:[#allocation10_spill] sm:$0xff]  ;;  %v3668_v31 = vld [vmem:[#allocation9_spill] sm:$0xff] }
 0x3b9   :  { %1506 = vmatpush.msra.mxu2 %v2800_v32  ;;  %1526 = vmatpush.msra.mxu3 %v2806_v33  ;;  %v3669_v32 = vld [vmem:[#allocation11_spill] sm:$0xff]  ;;  %v3670_v33 = vld [vmem:[#allocation12_spill] sm:$0xff] }
 0x3ba   :  { %1467 = vmatpush.msra.mxu0 %v2812_v34  ;;  %1487 = vmatpush.msra.mxu1 %v2818_v35  ;;  %v3671_v34 = vld [vmem:[#allocation14_spill] sm:$0xff]  ;;  %v3672_v35 = vld [vmem:[#allocation13_spill] sm:$0xff] }
 0x3bb   :  { %1507 = vmatpush.msra.mxu2 %v2824_v36  ;;  %1527 = vmatpush.msra.mxu3 %v2830_v37  ;;  %v3673_v36 = vld [vmem:[#allocation15_spill] sm:$0xff]  ;;  %v3674_v37 = vld [vmem:[#allocation16_spill] sm:$0xff] }
 0x3bc   :  { %1468 = vmatpush.msra.mxu0 %v2836_v38  ;;  %1488 = vmatpush.msra.mxu1 %v2842_v40  ;;  %v3675_v38 = vld [vmem:[#allocation18_spill] sm:$0xff]  ;;  %v3676_v40 = vld [vmem:[#allocation17_spill] sm:$0xff] }
 0x3bd   :  { %1508 = vmatpush.msra.mxu2 %v2848_v41  ;;  %1528 = vmatpush.msra.mxu3 %v2854_v42  ;;  %v3677_v41 = vld [vmem:[#allocation19_spill] sm:$0xff]  ;;  %v3678_v42 = vld [vmem:[#allocation20_spill] sm:$0xff] }
 0x3be   :  { %1469 = vmatpush.msra.mxu0 %v2860_v43  ;;  %1489 = vmatpush.msra.mxu1 %v2866_v47  ;;  %v3679_v43 = vld [vmem:[#allocation22_spill] sm:$0xff]  ;;  %v3680_v47 = vld [vmem:[#allocation21_spill] sm:$0xff] }
 0x3bf   :  { %1509 = vmatpush.msra.mxu2 %v2872_v55  ;;  %1529 = vmatpush.msra.mxu3 %v2878_v46  ;;  %v3681_v55 = vld [vmem:[#allocation23_spill] sm:$0xff]  ;;  %v3682_v46 = vld [vmem:[#allocation24_spill] sm:$0xff] }
 0x3c0   :  { %1470 = vmatpush.msra.mxu0 %v2884_v60  ;;  %1490 = vmatpush.msra.mxu1 %v2890_v13  ;;  %v3683_v60 = vld [vmem:[#allocation25_spill] sm:$0xff]  ;;  %v3684_v13 = vld [vmem:[#allocation26_spill] sm:$0xff] }
 0x3c1   :  { %1510 = vmatpush.msra.mxu2 %v2896_v57  ;;  %1530 = vmatpush.msra.mxu3 %v2902_v52  ;;  %v3685_v57 = vld [vmem:[#allocation27_spill] sm:$0xff]  ;;  %v3686_v52 = vld [vmem:[#allocation28_spill] sm:$0xff] }
 0x3c2   :  { %1471 = vmatpush.msra.mxu0 %v2908_v50  ;;  %1491 = vmatpush.msra.mxu1 %v2914_v0  ;;  %v3687_v50 = vld [vmem:[#allocation29_spill] sm:$0xff]  ;;  %v3688_v0 = vld [vmem:[#allocation30_spill] sm:$0xff] }
 0x3c3   :  { %1511 = vmatpush.msra.mxu2 %v2920_v49  ;;  %1531 = vmatpush.msra.mxu3 %v2926_v44 }
 0x3c4   :  { %1472 = vmatpush.msra.mxu0 %v2932_v45  ;;  %1492 = vmatpush.msra.mxu1 %v2938_v63  ;;  %v3689_v45 = vld [vmem:[#allocation47_spill] sm:$0xff] }
 0x3c5   :  { %1512 = vmatpush.msra.mxu2 %v2944_v51  ;;  %1532 = vmatpush.msra.mxu3 %v2950_v26  ;;  %v3690_v51 = vld [vmem:[#allocation48_spill] sm:$0xff] }
 0x3c6   :  { %1473 = vmatpush.msra.mxu0 %v2956_v53  ;;  %1493 = vmatpush.msra.mxu1 %v2962_v48 }
 0x3c7   :  { %1513 = vmatpush.msra.mxu2 %v2968_v56  ;;  %1533 = vmatpush.msra.mxu3 %v2974_v61  ;;  %v3691_v61 = vld [vmem:[#allocation50_spill] sm:$0xff] }
 0x3c8   :  { %1474 = vmatpush.msra.mxu0 %v2980_v54  ;;  %1494 = vmatpush.msra.mxu1 %v2986_v62 }
 0x3c9   :  { %1514 = vmatpush.msra.mxu2 %v3663_v39  ;;  %1534 = vmatpush.msra.mxu3 %v3664_v22 }
 0x3ca   :  { %1475 = vmatpush.msra.mxu0 %v3665_v23  ;;  %1495 = vmatpush.msra.mxu1 %v3666_v29 }
 0x3cb   :  { %1515 = vmatpush.msra.mxu2 %v3667_v30  ;;  %1535 = vmatpush.msra.mxu3 %v3668_v31 }
 0x3cc   :  { %1476 = vmatpush.msra.mxu0 %v3669_v32  ;;  %1496 = vmatpush.msra.mxu1 %v3670_v33 }
 0x3cd   :  { %1516 = vmatpush.msra.mxu2 %v3671_v34  ;;  %1536 = vmatpush.msra.mxu3 %v3672_v35 }
 0x3ce   :  { %1477 = vmatpush.msra.mxu0 %v3673_v36  ;;  %1497 = vmatpush.msra.mxu1 %v3674_v37 }
 0x3cf   :  { %1517 = vmatpush.msra.mxu2 %v3675_v38  ;;  %1537 = vmatpush.msra.mxu3 %v3676_v40 }
 0x3d0   :  { %1478 = vmatpush.msra.mxu0 %v3677_v41  ;;  %1498 = vmatpush.msra.mxu1 %v3678_v42 }
 0x3d1   :  { %1518 = vmatpush.msra.mxu2 %v3679_v43  ;;  %1538 = vmatpush.msra.mxu3 %v3680_v47 }
 0x3d2   :  { %1479 = vmatpush.msra.mxu0 %v3681_v55  ;;  %1499 = vmatpush.msra.mxu1 %v3682_v46 }
 0x3d3   :  { %1519 = vmatpush.msra.mxu2 %v3683_v60  ;;  %1539 = vmatpush.msra.mxu3 %v3684_v13  ;;  %v3693_v13 = vld [vmem:[#allocation51_spill] sm:$0xff] }
 0x3d4   :  { %1480 = vmatpush.msra.mxu0 %v3685_v57  ;;  %1500 = vmatpush.msra.mxu1 %v3686_v52  ;;  %v3694_v52 = vld [vmem:[#allocation52_spill] sm:$0xff] }
 0x3d5   :  { %1520 = vmatpush.msra.mxu2 %v3687_v50  ;;  %1540 = vmatpush.msra.mxu3 %v3688_v0 }
 0x431   :  { %v1170_v49 = vpop.f32.mrf.mxu0  ;;  %v1190_v44 = vpop.f32.mrf.mxu1 }
 0x432   :  { %v1233_v63 = vadd.f32 %v1170_v49, %v3689_v45  ;;  %v1234_v26 = vadd.f32 %v1190_v44, %v3690_v51  ;;  %v3695_v45 = vld [vmem:[#allocation54_spill] sm:$0xff] }
 0x434   :  { %v1646_v53 = vmul.f32 -1.442695, %v1233_v63  ;;  %v1647_v48 = vmul.f32 -1.442695, %v1234_v26 }
 0x436   :  { %1739 = vpow2.f32 %v1646_v53 }
 0x437   :  { %1741 = vpow2.f32 %v1647_v48 }
 0x438   :  { %v1230_v56 = vpop.f32.mrf.mxu3  ;;  %v1210_v59 = vpop.f32.mrf.mxu2 }
 0x439   :  { %v1236_v54 = vadd.f32 %v1230_v56, %v3691_v61  ;;  %v1235_v3 = vadd.f32 %v1210_v59, %v3692_v11 }
 0x43b   :  { %v1648_v62 = vmul.f32 -1.442695, %v1236_v54 }
 0x43c   :  { %v1740_v28 = vpop.eup %1739 }
 0x43d   :  { %v1742_v7 = vpop.eup %1741  ;;  %v1240_v12 = vadd.f32 1.0, %v1740_v28  ;;  %1743 = vpow2.f32 %v1648_v62 }
 0x43e   :  { %v1259_v58 = vadd.f32 1.0, %v1742_v7  ;;  %v3696_v7 = vld [vmem:[#allocation53_spill] sm:$0xff] }
 0x43f   :  { %1745 = vrcp.f32 %v1240_v12  ;;  %v1252_v15 = vand.u32 2147483648, %v1240_v12  ;;  %v1250_v27 = vand.u32 2147483647, %v1240_v12  ;;  %vm1246_vm14 = vweird.f32 %v1240_v12 }
 0x440   :  { %1747 = vrcp.f32 %v1259_v58  ;;  %v1271_v24 = vand.u32 2147483648, %v1259_v58  ;;  %v1269_v19 = vand.u32 2147483647, %v1259_v58  ;;  %vm1265_vm15 = vweird.f32 %v1259_v58 }
 0x441   :  { %v1253_v1 = vor.u32 1.1754944e-38, %v1252_v15  ;;  %vm1251_vm2 = vcmp.eq.f32.partialorder %v1250_v27, 8.507059e+37 }
 0x442   :  { %v1272_v22 = vor.u32 1.1754944e-38, %v1271_v24  ;;  %vm1270_vm3 = vcmp.eq.f32.partialorder %v1269_v19, 8.507059e+37 }
 0x443   :  { %v1744_v4 = vpop.eup %1743 }
 0x444   :  { %v1279_v9 = vadd.f32 1.0, %v1744_v4 }
 0x445   :  { %v1746_v2 = vpop.eup %1745 }
 0x446   :  { %v1748_v10 = vpop.eup %1747  ;;  %v1242_v8 = vmul.f32 %v1746_v2, %v1240_v12  ;;  %1749 = vrcp.f32 %v1279_v9  ;;  %vm1247_vm12 = vweird.f32 %v1746_v2  ;;  %v1291_v40 = vand.u32 2147483648, %v1279_v9 }
 0x447   :  { %v1261_v21 = vmul.f32 %v1748_v10, %v1259_v58  ;;  %1751 = vtanh.f32 %v1235_v3  ;;  %vm1266_vm13 = vweird.f32 %v1748_v10  ;;  %vm1248_vm0 = vmor %vm1246_vm14, %vm1247_vm12  ;;  %vm1285_vm5 = vweird.f32 %v1279_v9 }
 0x448   :  { %v1243_v14 = vsub.f32 1.0, %v1242_v8  ;;  %vm1267_vm1 = vmor %vm1265_vm15, %vm1266_vm13  ;;  %v1289_v41 = vand.u32 2147483647, %v1279_v9  ;;  %v1292_v43 = vor.u32 1.1754944e-38, %v1291_v40 }
 0x449   :  { %v1262_v5 = vsub.f32 1.0, %v1261_v21 }
 0x44a   :  { %v1244_v18 = vmul.f32 %v1746_v2, %v1243_v14  ;;  %vm1290_vm7 = vcmp.eq.f32.partialorder %v1289_v41, 8.507059e+37 }
 0x44b   :  { %v1263_v16 = vmul.f32 %v1748_v10, %v1262_v5 }
 0x44c   :  { %v1750_v17 = vpop.eup %1749  ;;  %v1245_v20 = vadd.f32 %v1746_v2, %v1244_v18 }
 0x44d   :  { %v1264_v6 = vadd.f32 %v1748_v10, %v1263_v16  ;;  %v1281_v39 = vmul.f32 %v1750_v17, %v1279_v9  ;;  %v1752_v29 = vpop.eup %1751  ;;  %vm1286_vm4 = vweird.f32 %v1750_v17 }
 0x44e   :  { %v1249_v23 = vsel %vm1248_vm0, %v1746_v2, %v1245_v20  ;;  %vm1287_vm6 = vmor %vm1285_vm5, %vm1286_vm4 }
 0x44f   :  { %v1254_v30 = vsel %vm1251_vm2, %v1253_v1, %v1249_v23  ;;  %v1268_v31 = vsel %vm1267_vm1, %v1748_v10, %v1264_v6  ;;  %v1282_v32 = vsub.f32 1.0, %v1281_v39 }
 0x450   :  { %v1273_v33 = vsel %vm1270_vm3, %v1272_v22, %v1268_v31  ;;  %v1296_v34 = vmul.f32 %v1752_v29, %v1254_v30 }
 0x451   :  { %v1295_v35 = vmul.f32 %v1273_v33, %v3300_v25  ;;  %v1283_v36 = vmul.f32 %v1750_v17, %v1282_v32 }
 0x453   :  { %v3375_v37 = vadd.f32 %v1296_v34, %v1295_v35  ;;  %v1284_v38 = vadd.f32 %v1750_v17, %v1283_v36 }
 0x455   :  { %1753 = vtanh.f32 %v3375_v37  ;;  %v1288_v42 = vsel %vm1287_vm6, %v1750_v17, %v1284_v38 }
 0x456   :  { %v1293_v55 = vsel %vm1290_vm7, %v1292_v43, %v1288_v42  ;;  %v3697_v42 = vld [vmem:[#allocation55_spill] sm:$0xff] }
 0x45b   :  { %v1754_v47 = vpop.eup %1753 }
 0x45c   :  { %v1299_v46 = vmul.f32 %v1754_v47, %v1293_v55  ;;  %v3698_v47 = vld [vmem:[#allocation56_spill] sm:$0xff] }
 0x45e   :  { %1649 = vst [vmem:[%s3404_s4 + $0x28] sm:$0xff] %v1299_v46  ;;  %1325 = vmatmul.f32.vlgmr.msrb.gmra.mxu0 %v1299_v46  ;;  %1345 = vmatmul.f32.vlgmr.msrb.gmra.mxu1 %v1299_v46 }
 0x45f   :  { %1365 = vmatmul.f32.vlgmr.msrb.gmra.mxu2 %v1299_v46  ;;  %1385 = vmatmul.f32.vlgmr.msrb.gmra.mxu3 %v1299_v46 }
 0x4db   :  { %v1326_v25 = vpop.f32.mrf.mxu0  ;;  %v1346_v60 = vpop.f32.mrf.mxu1 }
 0x4dc   :  { %v1389_v57 = vadd.f32 %v1326_v25, %v3693_v13  ;;  %v1390_v50 = vadd.f32 %v1346_v60, %v3694_v52  ;;  %v3699_v13 = vld [vmem:[#allocation58_spill] sm:$0xff] }
 0x4de   :  { %v1650_v0 = vmul.f32 -1.442695, %v1389_v57  ;;  %v1651_v49 = vmul.f32 -1.442695, %v1390_v50 }
 0x4e0   :  { %1755 = vpow2.f32 %v1650_v0 }
 0x4e1   :  { %1757 = vpow2.f32 %v1651_v49 }
 0x4e2   :  { %v1386_v44 = vpop.f32.mrf.mxu3  ;;  %v1366_v61 = vpop.f32.mrf.mxu2 }
 0x4e3   :  { %v1392_v63 = vadd.f32 %v1386_v44, %v3695_v45  ;;  %v1391_v12 = vadd.f32 %v1366_v61, %v3696_v7 }
 0x4e5   :  { %v1652_v51 = vmul.f32 -1.442695, %v1392_v63 }
 0x4e6   :  { %v1756_v26 = vpop.eup %1755 }
 0x4e7   :  { %v1758_v53 = vpop.eup %1757  ;;  %v1396_v48 = vadd.f32 1.0, %v1756_v26  ;;  %1759 = vpow2.f32 %v1652_v51 }
 0x4e8   :  { %v1415_v56 = vadd.f32 1.0, %v1758_v53  ;;  %v3700_v53 = vld [vmem:[#allocation57_spill] sm:$0xff] }
 0x4e9   :  { %1761 = vrcp.f32 %v1396_v48  ;;  %v1408_v11 = vand.u32 2147483648, %v1396_v48  ;;  %v1406_v8 = vand.u32 2147483647, %v1396_v48  ;;  %vm1402_vm10 = vweird.f32 %v1396_v48 }
 0x4ea   :  { %1763 = vrcp.f32 %v1415_v56  ;;  %v1427_v3 = vand.u32 2147483648, %v1415_v56  ;;  %v1425_v14 = vand.u32 2147483647, %v1415_v56  ;;  %vm1421_vm11 = vweird.f32 %v1415_v56 }
 0x4eb   :  { %v1409_v24 = vor.u32 1.1754944e-38, %v1408_v11  ;;  %vm1407_vm14 = vcmp.eq.f32.partialorder %v1406_v8, 8.507059e+37 }
 0x4ec   :  { %v1428_v16 = vor.u32 1.1754944e-38, %v1427_v3  ;;  %vm1426_vm15 = vcmp.eq.f32.partialorder %v1425_v14, 8.507059e+37 }
 0x4ed   :  { %v1760_v54 = vpop.eup %1759 }
 0x4ee   :  { %v1435_v62 = vadd.f32 1.0, %v1760_v54 }
 0x4ef   :  { %v1762_v28 = vpop.eup %1761 }
 0x4f0   :  { %v1764_v58 = vpop.eup %1763  ;;  %v1398_v59 = vmul.f32 %v1762_v28, %v1396_v48  ;;  %1765 = vrcp.f32 %v1435_v62  ;;  %vm1403_vm8 = vweird.f32 %v1762_v28  ;;  %v1447_v32 = vand.u32 2147483648, %v1435_v62 }
 0x4f1   :  { %v1417_v4 = vmul.f32 %v1764_v58, %v1415_v56  ;;  %1767 = vtanh.f32 %v1391_v12  ;;  %vm1422_vm9 = vweird.f32 %v1764_v58  ;;  %vm1404_vm12 = vmor %vm1402_vm10, %vm1403_vm8  ;;  %vm1441_vm1 = vweird.f32 %v1435_v62 }
 0x4f2   :  { %v1399_v9 = vsub.f32 1.0, %v1398_v59  ;;  %vm1423_vm13 = vmor %vm1421_vm11, %vm1422_vm9  ;;  %v1445_v33 = vand.u32 2147483647, %v1435_v62  ;;  %v1448_v35 = vor.u32 1.1754944e-38, %v1447_v32 }
 0x4f3   :  { %v1418_v2 = vsub.f32 1.0, %v1417_v4 }
 0x4f4   :  { %v1400_v10 = vmul.f32 %v1762_v28, %v1399_v9  ;;  %vm1446_vm3 = vcmp.eq.f32.partialorder %v1445_v33, 8.507059e+37 }
 0x4f5   :  { %v1419_v21 = vmul.f32 %v1764_v58, %v1418_v2 }
 0x4f6   :  { %v1766_v5 = vpop.eup %1765  ;;  %v1401_v15 = vadd.f32 %v1762_v28, %v1400_v10 }
 0x4f7   :  { %v1420_v18 = vadd.f32 %v1764_v58, %v1419_v21  ;;  %v1437_v27 = vmul.f32 %v1766_v5, %v1435_v62  ;;  %v1768_v17 = vpop.eup %1767  ;;  %vm1442_vm0 = vweird.f32 %v1766_v5 }
 0x4f8   :  { %v1405_v19 = vsel %vm1404_vm12, %v1762_v28, %v1401_v15  ;;  %vm1443_vm2 = vmor %vm1441_vm1, %vm1442_vm0 }
 0x4f9   :  { %v1410_v20 = vsel %vm1407_vm14, %v1409_v24, %v1405_v19  ;;  %v1424_v1 = vsel %vm1423_vm13, %v1764_v58, %v1420_v18  ;;  %v1438_v6 = vsub.f32 1.0, %v1437_v27 }
 0x4fa   :  { %v1429_v39 = vsel %vm1426_vm15, %v1428_v16, %v1424_v1  ;;  %v1452_v22 = vmul.f32 %v1768_v17, %v1410_v20 }
 0x4fb   :  { %v1451_v23 = vmul.f32 %v1429_v39, %v3375_v37  ;;  %v1439_v29 = vmul.f32 %v1766_v5, %v1438_v6 }
 0x4fd   :  { %v3386_v30 = vadd.f32 %v1452_v22, %v1451_v23  ;;  %v1440_v31 = vadd.f32 %v1766_v5, %v1439_v29 }
 0x4ff   :  { %1769 = vtanh.f32 %v3386_v30  ;;  %v1444_v34 = vsel %vm1443_vm2, %v1766_v5, %v1440_v31 }
 0x500   :  { %v1449_v38 = vsel %vm1446_vm3, %v1448_v35, %v1444_v34 }
 0x505   :  { %v1770_v36 = vpop.eup %1769 }
 0x506   :  { %v1455_v40 = vmul.f32 %v1770_v36, %v1449_v38 }
 0x508   :  { %1653 = vst [vmem:[%s3404_s4 + $0x30] sm:$0xff] %v1455_v40  ;;  %1481 = vmatmul.f32.vlgmr.msra.gmra.mxu0 %v1455_v40  ;;  %1501 = vmatmul.f32.vlgmr.msra.gmra.mxu1 %v1455_v40 }
 0x509   :  { %1521 = vmatmul.f32.vlgmr.msra.gmra.mxu2 %v1455_v40  ;;  %1541 = vmatmul.f32.vlgmr.msra.gmra.mxu3 %v1455_v40 }
 0x585   :  { %v1482_v37 = vpop.f32.mrf.mxu0  ;;  %v1502_v41 = vpop.f32.mrf.mxu1 }
 0x586   :  { %v1545_v43 = vadd.f32 %v1482_v37, %v3697_v42  ;;  %v1546_v55 = vadd.f32 %v1502_v41, %v3698_v47 }
 0x588   :  { %v1654_v46 = vmul.f32 -1.442695, %v1545_v43  ;;  %v1655_v25 = vmul.f32 -1.442695, %v1546_v55 }
 0x58a   :  { %1771 = vpow2.f32 %v1654_v46 }
 0x58b   :  { %1773 = vpow2.f32 %v1655_v25 }
 0x58c   :  { %v1542_v60 = vpop.f32.mrf.mxu3  ;;  %v1522_v45 = vpop.f32.mrf.mxu2 }
 0x58d   :  { %v1548_v57 = vadd.f32 %v1542_v60, %v3699_v13  ;;  %v1547_v48 = vadd.f32 %v1522_v45, %v3700_v53 }
 0x58f   :  { %v1656_v52 = vmul.f32 -1.442695, %v1548_v57 }
 0x590   :  { %v1772_v50 = vpop.eup %1771 }
 0x591   :  { %v1774_v0 = vpop.eup %1773  ;;  %v1552_v49 = vadd.f32 1.0, %v1772_v50  ;;  %1775 = vpow2.f32 %v1656_v52 }
 0x592   :  { %v1571_v44 = vadd.f32 1.0, %v1774_v0 }
 0x593   :  { %1777 = vrcp.f32 %v1552_v49  ;;  %v1564_v7 = vand.u32 2147483648, %v1552_v49  ;;  %v1562_v59 = vand.u32 2147483647, %v1552_v49  ;;  %vm1558_vm6 = vweird.f32 %v1552_v49 }
 0x594   :  { %1779 = vrcp.f32 %v1571_v44  ;;  %v1583_v12 = vand.u32 2147483648, %v1571_v44  ;;  %v1581_v9 = vand.u32 2147483647, %v1571_v44  ;;  %vm1577_vm7 = vweird.f32 %v1571_v44 }
 0x595   :  { %v1565_v3 = vor.u32 1.1754944e-38, %v1564_v7  ;;  %vm1563_vm10 = vcmp.eq.f32.partialorder %v1562_v59, 8.507059e+37 }
 0x596   :  { %v1584_v21 = vor.u32 1.1754944e-38, %v1583_v12  ;;  %vm1582_vm11 = vcmp.eq.f32.partialorder %v1581_v9, 8.507059e+37 }
 0x597   :  { %v1776_v63 = vpop.eup %1775 }
 0x598   :  { %v1591_v51 = vadd.f32 1.0, %v1776_v63 }
 0x599   :  { %v1778_v26 = vpop.eup %1777 }
 0x59a   :  { %v1780_v56 = vpop.eup %1779  ;;  %v1554_v61 = vmul.f32 %v1778_v26, %v1552_v49  ;;  %1781 = vrcp.f32 %v1591_v51  ;;  %vm1559_vm4 = vweird.f32 %v1778_v26  ;;  %v1603_v6 = vand.u32 2147483648, %v1591_v51 }
 0x59b   :  { %v1573_v54 = vmul.f32 %v1780_v56, %v1571_v44  ;;  %1783 = vtanh.f32 %v1547_v48  ;;  %vm1578_vm5 = vweird.f32 %v1780_v56  ;;  %vm1560_vm8 = vmor %vm1558_vm6, %vm1559_vm4  ;;  %vm1597_vm13 = vweird.f32 %v1591_v51 }
 0x59c   :  { %v1555_v62 = vsub.f32 1.0, %v1554_v61  ;;  %vm1579_vm9 = vmor %vm1577_vm7, %vm1578_vm5  ;;  %v1601_v39 = vand.u32 2147483647, %v1591_v51  ;;  %v1604_v23 = vor.u32 1.1754944e-38, %v1603_v6 }
 0x59d   :  { %v1574_v28 = vsub.f32 1.0, %v1573_v54 }
 0x59e   :  { %v1556_v58 = vmul.f32 %v1778_v26, %v1555_v62  ;;  %vm1602_vm15 = vcmp.eq.f32.partialorder %v1601_v39, 8.507059e+37 }
 0x59f   :  { %v1575_v4 = vmul.f32 %v1780_v56, %v1574_v28 }
 0x5a0   :  { %v1782_v2 = vpop.eup %1781  ;;  %v1557_v11 = vadd.f32 %v1778_v26, %v1556_v58 }
 0x5a1   :  { %v1576_v10 = vadd.f32 %v1780_v56, %v1575_v4  ;;  %v1593_v8 = vmul.f32 %v1782_v2, %v1591_v51  ;;  %v1784_v5 = vpop.eup %1783  ;;  %vm1598_vm12 = vweird.f32 %v1782_v2 }
 0x5a2   :  { %v1561_v14 = vsel %vm1560_vm8, %v1778_v26, %v1557_v11  ;;  %vm1599_vm14 = vmor %vm1597_vm13, %vm1598_vm12 }
 0x5a3   :  { %v1566_v15 = vsel %vm1563_vm10, %v1565_v3, %v1561_v14  ;;  %v1580_v24 = vsel %vm1579_vm9, %v1780_v56, %v1576_v10  ;;  %v1594_v18 = vsub.f32 1.0, %v1593_v8 }
 0x5a4   :  { %v1585_v27 = vsel %vm1582_vm11, %v1584_v21, %v1580_v24  ;;  %v1608_v16 = vmul.f32 %v1784_v5, %v1566_v15 }
 0x5a5   :  { %v1607_v19 = vmul.f32 %v1585_v27, %v3386_v30  ;;  %v1595_v17 = vmul.f32 %v1782_v2, %v1594_v18 }
 0x5a7   :  { %v1609_v20 = vadd.f32 %v1608_v16, %v1607_v19  ;;  %v1596_v1 = vadd.f32 %v1782_v2, %v1595_v17 }
 0x5a9   :  { %1785 = vtanh.f32 %v1609_v20  ;;  %v1600_v22 = vsel %vm1599_vm14, %v1782_v2, %v1596_v1 }
 0x5aa   :  { %v1605_v31 = vsel %vm1602_vm15, %v1604_v23, %v1600_v22 }
 0x5af   :  { %v1786_v29 = vpop.eup %1785 }
 0x5b0   :  { %v1611_v32 = vmul.f32 %v1786_v29, %v1605_v31 }
 0x5b2   :  { %1657 = vst [vmem:[%s3404_s4 + $0x38] sm:$0xff] %v1611_v32 }

// kernel: lstm_encoder_forward.3
= control target key start
LH: loop header
LB: loop body
LE: loop exit
PB: predicated region body
PF: predicated region fallthrough
CT: control target
= control target key end

     0   :  { %s3577_s2 = inlined_call_operand.vmem [shape: f32[128,512], index: 2, kind: input, shape index: {}]   ;;  %s3578_s0 = inlined_call_operand.vmem [shape: f32[64,128], index: 0, kind: input, shape index: {}]   ;;  %s3579_s3 = inlined_call_operand.vmem [shape: f32[128,512], index: 3, kind: input, shape index: {}]   ;;  %s3580_s1 = inlined_call_operand.vmem [shape: f32[64,1], index: 1, kind: input, shape index: {}]   ;;  %s3581_s4 = inlined_call_operand.vmem [shape: f32[1,512], index: 4, kind: input, shape index: {}]   ;;  %s3582_s5 = inlined_call_operand.vmem [shape: f32[1,8,128], index: 5, kind: output, shape index: {}]  }
   0x1   :  { %v97_v0 = vld [vmem:[%s3577_s2 + $0x1e0] sm:$0xff]  ;;  %v98_v1 = vld [vmem:[%s3577_s2 + $0x1e8] sm:$0xff]  ;;  %v99_v2 = vld [vmem:[%s3577_s2 + $0x1f0] sm:$0xff] }
   0x2   :  { %111 = vmatpush.msra.mxu0 %v97_v0  ;;  %152 = vmatpush.msra.mxu1 %v98_v1  ;;  %v100_v3 = vld [vmem:[%s3577_s2 + $0x1f8] sm:$0xff]  ;;  %v93_v4 = vld [vmem:[%s3577_s2 + $0x1c0] sm:$0xff]  ;;  %v94_v5 = vld [vmem:[%s3577_s2 + $0x1c8] sm:$0xff] }
   0x3   :  { %193 = vmatpush.msra.mxu2 %v99_v2  ;;  %234 = vmatpush.msra.mxu3 %v100_v3  ;;  %v95_v6 = vld [vmem:[%s3577_s2 + $0x1d0] sm:$0xff]  ;;  %v96_v7 = vld [vmem:[%s3577_s2 + $0x1d8] sm:$0xff]  ;;  %v89_v8 = vld [vmem:[%s3577_s2 + $0x1a0] sm:$0xff] }
   0x4   :  { %112 = vmatpush.msra.mxu0 %v93_v4  ;;  %153 = vmatpush.msra.mxu1 %v94_v5  ;;  %v90_v9 = vld [vmem:[%s3577_s2 + $0x1a8] sm:$0xff]  ;;  %v91_v10 = vld [vmem:[%s3577_s2 + $0x1b0] sm:$0xff]  ;;  %v92_v11 = vld [vmem:[%s3577_s2 + $0x1b8] sm:$0xff] }
   0x5   :  { %194 = vmatpush.msra.mxu2 %v95_v6  ;;  %235 = vmatpush.msra.mxu3 %v96_v7  ;;  %v85_v12 = vld [vmem:[%s3577_s2 + $0x180] sm:$0xff]  ;;  %v86_v13 = vld [vmem:[%s3577_s2 + $0x188] sm:$0xff]  ;;  %v87_v14 = vld [vmem:[%s3577_s2 + $0x190] sm:$0xff] }
   0x6   :  { %113 = vmatpush.msra.mxu0 %v89_v8  ;;  %154 = vmatpush.msra.mxu1 %v90_v9  ;;  %v88_v15 = vld [vmem:[%s3577_s2 + $0x198] sm:$0xff]  ;;  %v81_v16 = vld [vmem:[%s3577_s2 + $0x160] sm:$0xff]  ;;  %v82_v17 = vld [vmem:[%s3577_s2 + $0x168] sm:$0xff] }
   0x7   :  { %195 = vmatpush.msra.mxu2 %v91_v10  ;;  %236 = vmatpush.msra.mxu3 %v92_v11  ;;  %v83_v18 = vld [vmem:[%s3577_s2 + $0x170] sm:$0xff]  ;;  %v84_v19 = vld [vmem:[%s3577_s2 + $0x178] sm:$0xff]  ;;  %v77_v20 = vld [vmem:[%s3577_s2 + $0x140] sm:$0xff] }
   0x8   :  { %114 = vmatpush.msra.mxu0 %v85_v12  ;;  %155 = vmatpush.msra.mxu1 %v86_v13  ;;  %v78_v21 = vld [vmem:[%s3577_s2 + $0x148] sm:$0xff]  ;;  %v79_v22 = vld [vmem:[%s3577_s2 + $0x150] sm:$0xff]  ;;  %v80_v23 = vld [vmem:[%s3577_s2 + $0x158] sm:$0xff] }
   0x9   :  { %196 = vmatpush.msra.mxu2 %v87_v14  ;;  %237 = vmatpush.msra.mxu3 %v88_v15  ;;  %v73_v24 = vld [vmem:[%s3577_s2 + $0x120] sm:$0xff]  ;;  %v74_v25 = vld [vmem:[%s3577_s2 + $0x128] sm:$0xff]  ;;  %v75_v26 = vld [vmem:[%s3577_s2 + $0x130] sm:$0xff] }
   0xa   :  { %115 = vmatpush.msra.mxu0 %v81_v16  ;;  %156 = vmatpush.msra.mxu1 %v82_v17  ;;  %v76_v27 = vld [vmem:[%s3577_s2 + $0x138] sm:$0xff]  ;;  %v69_v28 = vld [vmem:[%s3577_s2 + $0x100] sm:$0xff]  ;;  %v70_v29 = vld [vmem:[%s3577_s2 + $0x108] sm:$0xff] }
   0xb   :  { %197 = vmatpush.msra.mxu2 %v83_v18  ;;  %238 = vmatpush.msra.mxu3 %v84_v19  ;;  %v71_v30 = vld [vmem:[%s3577_s2 + $0x110] sm:$0xff]  ;;  %v72_v31 = vld [vmem:[%s3577_s2 + $0x118] sm:$0xff]  ;;  %v65_v32 = vld [vmem:[%s3577_s2 + $0xe0] sm:$0xff] }
   0xc   :  { %116 = vmatpush.msra.mxu0 %v77_v20  ;;  %157 = vmatpush.msra.mxu1 %v78_v21  ;;  %v66_v33 = vld [vmem:[%s3577_s2 + $0xe8] sm:$0xff]  ;;  %v67_v34 = vld [vmem:[%s3577_s2 + $0xf0] sm:$0xff]  ;;  %v68_v35 = vld [vmem:[%s3577_s2 + $0xf8] sm:$0xff] }
   0xd   :  { %198 = vmatpush.msra.mxu2 %v79_v22  ;;  %239 = vmatpush.msra.mxu3 %v80_v23  ;;  %v61_v36 = vld [vmem:[%s3577_s2 + $0xc0] sm:$0xff]  ;;  %v62_v37 = vld [vmem:[%s3577_s2 + $0xc8] sm:$0xff]  ;;  %v63_v38 = vld [vmem:[%s3577_s2 + $0xd0] sm:$0xff] }
   0xe   :  { %117 = vmatpush.msra.mxu0 %v73_v24  ;;  %158 = vmatpush.msra.mxu1 %v74_v25  ;;  %v64_v39 = vld [vmem:[%s3577_s2 + $0xd8] sm:$0xff]  ;;  %v57_v40 = vld [vmem:[%s3577_s2 + $0xa0] sm:$0xff]  ;;  %v58_v41 = vld [vmem:[%s3577_s2 + $0xa8] sm:$0xff] }
   0xf   :  { %199 = vmatpush.msra.mxu2 %v75_v26  ;;  %240 = vmatpush.msra.mxu3 %v76_v27  ;;  %v59_v42 = vld [vmem:[%s3577_s2 + $0xb0] sm:$0xff]  ;;  %v60_v43 = vld [vmem:[%s3577_s2 + $0xb8] sm:$0xff]  ;;  %v53_v44 = vld [vmem:[%s3577_s2 + $0x80] sm:$0xff] }
  0x10   :  { %118 = vmatpush.msra.mxu0 %v69_v28  ;;  %159 = vmatpush.msra.mxu1 %v70_v29  ;;  %v54_v45 = vld [vmem:[%s3577_s2 + $0x88] sm:$0xff]  ;;  %v55_v46 = vld [vmem:[%s3577_s2 + $0x90] sm:$0xff]  ;;  %v56_v47 = vld [vmem:[%s3577_s2 + $0x98] sm:$0xff] }
  0x11   :  { %200 = vmatpush.msra.mxu2 %v71_v30  ;;  %241 = vmatpush.msra.mxu3 %v72_v31  ;;  %v49_v48 = vld [vmem:[%s3577_s2 + $0x60] sm:$0xff]  ;;  %v50_v49 = vld [vmem:[%s3577_s2 + $0x68] sm:$0xff]  ;;  %v51_v50 = vld [vmem:[%s3577_s2 + $0x70] sm:$0xff] }
  0x12   :  { %119 = vmatpush.msra.mxu0 %v65_v32  ;;  %160 = vmatpush.msra.mxu1 %v66_v33  ;;  %v52_v51 = vld [vmem:[%s3577_s2 + $0x78] sm:$0xff]  ;;  %v45_v52 = vld [vmem:[%s3577_s2 + $0x40] sm:$0xff]  ;;  %v46_v53 = vld [vmem:[%s3577_s2 + $0x48] sm:$0xff] }
  0x13   :  { %201 = vmatpush.msra.mxu2 %v67_v34  ;;  %242 = vmatpush.msra.mxu3 %v68_v35  ;;  %v47_v54 = vld [vmem:[%s3577_s2 + $0x50] sm:$0xff]  ;;  %v48_v55 = vld [vmem:[%s3577_s2 + $0x58] sm:$0xff]  ;;  %v41_v56 = vld [vmem:[%s3577_s2 + $0x20] sm:$0xff] }
  0x14   :  { %120 = vmatpush.msra.mxu0 %v61_v36  ;;  %161 = vmatpush.msra.mxu1 %v62_v37  ;;  %v42_v57 = vld [vmem:[%s3577_s2 + $0x28] sm:$0xff]  ;;  %v43_v58 = vld [vmem:[%s3577_s2 + $0x30] sm:$0xff]  ;;  %v44_v59 = vld [vmem:[%s3577_s2 + $0x38] sm:$0xff] }
  0x15   :  { %202 = vmatpush.msra.mxu2 %v63_v38  ;;  %243 = vmatpush.msra.mxu3 %v64_v39  ;;  %v37_v60 = vld [vmem:[%s3577_s2] sm:$0xff]  ;;  %v38_v61 = vld [vmem:[%s3577_s2 + $0x8] sm:$0xff]  ;;  %v39_v62 = vld [vmem:[%s3577_s2 + $0x10] sm:$0xff] }
  0x16   :  { %121 = vmatpush.msra.mxu0 %v57_v40  ;;  %162 = vmatpush.msra.mxu1 %v58_v41  ;;  %v40_v63 = vld [vmem:[%s3577_s2 + $0x18] sm:$0xff]  ;;  %v29_v0 = vld [vmem:[%s3578_s0] sm:$0xff]  ;;  %v2197_v2 = vld [vmem:[%s3579_s3 + $0x1e8] sm:$0xff] }
  0x17   :  { %203 = vmatpush.msra.mxu2 %v59_v42  ;;  %244 = vmatpush.msra.mxu3 %v60_v43  ;;  %v2192_v1 = vld [vmem:[%s3579_s3 + $0x1e0] sm:$0xff]  ;;  %v2202_v3 = vld [vmem:[%s3579_s3 + $0x1f8] sm:$0xff]  ;;  %v2207_v4 = vld [vmem:[%s3579_s3 + $0x1f0] sm:$0xff] }
  0x18   :  { %122 = vmatpush.msra.mxu0 %v53_v44  ;;  %163 = vmatpush.msra.mxu1 %v54_v45  ;;  %v2212_v5 = vld [vmem:[%s3579_s3 + $0x1c0] sm:$0xff]  ;;  %v2217_v6 = vld [vmem:[%s3579_s3 + $0x1c8] sm:$0xff]  ;;  %v2224_v7 = vld [vmem:[%s3579_s3 + $0x1d8] sm:$0xff] }
  0x19   :  { %204 = vmatpush.msra.mxu2 %v55_v46  ;;  %245 = vmatpush.msra.mxu3 %v56_v47  ;;  %v2229_v8 = vld [vmem:[%s3579_s3 + $0x1d0] sm:$0xff]  ;;  %v2235_v9 = vld [vmem:[%s3579_s3 + $0x1a0] sm:$0xff]  ;;  %v2240_v10 = vld [vmem:[%s3579_s3 + $0x1a8] sm:$0xff] }
  0x1a   :  { %123 = vmatpush.msra.mxu0 %v49_v48  ;;  %164 = vmatpush.msra.mxu1 %v50_v49  ;;  %v2248_v11 = vld [vmem:[%s3579_s3 + $0x1b8] sm:$0xff]  ;;  %v2253_v12 = vld [vmem:[%s3579_s3 + $0x1b0] sm:$0xff]  ;;  %v30_v13 = vld [vmem:[%s3578_s0 + $0x8] sm:$0xff] }
  0x1b   :  { %205 = vmatpush.msra.mxu2 %v51_v50  ;;  %246 = vmatpush.msra.mxu3 %v52_v51  ;;  %v2265_v14 = vld [vmem:[%s3579_s3 + $0x180] sm:$0xff]  ;;  %v2270_v15 = vld [vmem:[%s3579_s3 + $0x188] sm:$0xff]  ;;  %v2277_v16 = vld [vmem:[%s3579_s3 + $0x198] sm:$0xff] }
  0x1c   :  { %124 = vmatpush.msra.mxu0 %v45_v52  ;;  %165 = vmatpush.msra.mxu1 %v46_v53  ;;  %v2282_v17 = vld [vmem:[%s3579_s3 + $0x190] sm:$0xff]  ;;  %v2287_v18 = vld [vmem:[%s3579_s3 + $0x160] sm:$0xff]  ;;  %v2292_v19 = vld [vmem:[%s3579_s3 + $0x168] sm:$0xff] }
  0x1d   :  { %206 = vmatpush.msra.mxu2 %v47_v54  ;;  %247 = vmatpush.msra.mxu3 %v48_v55  ;;  %v2299_v20 = vld [vmem:[%s3579_s3 + $0x178] sm:$0xff]  ;;  %v2304_v21 = vld [vmem:[%s3579_s3 + $0x170] sm:$0xff]  ;;  %v2310_v22 = vld [vmem:[%s3579_s3 + $0x140] sm:$0xff] }
  0x1e   :  { %125 = vmatpush.msra.mxu0 %v41_v56  ;;  %166 = vmatpush.msra.mxu1 %v42_v57  ;;  %v2315_v23 = vld [vmem:[%s3579_s3 + $0x148] sm:$0xff]  ;;  %v2323_v24 = vld [vmem:[%s3579_s3 + $0x158] sm:$0xff]  ;;  %v2328_v25 = vld [vmem:[%s3579_s3 + $0x150] sm:$0xff] }
  0x1f   :  { %207 = vmatpush.msra.mxu2 %v43_v58  ;;  %248 = vmatpush.msra.mxu3 %v44_v59  ;;  %v31_v26 = vld [vmem:[%s3578_s0 + $0x10] sm:$0xff]  ;;  %v2340_v27 = vld [vmem:[%s3579_s3 + $0x120] sm:$0xff]  ;;  %v2345_v28 = vld [vmem:[%s3579_s3 + $0x128] sm:$0xff] }
  0x20   :  { %126 = vmatpush.msra.mxu0 %v37_v60  ;;  %167 = vmatpush.msra.mxu1 %v38_v61  ;;  %v2352_v29 = vld [vmem:[%s3579_s3 + $0x138] sm:$0xff]  ;;  %v2357_v30 = vld [vmem:[%s3579_s3 + $0x130] sm:$0xff]  ;;  %v2362_v31 = vld [vmem:[%s3579_s3 + $0x100] sm:$0xff] }
  0x21   :  { %208 = vmatpush.msra.mxu2 %v39_v62  ;;  %249 = vmatpush.msra.mxu3 %v40_v63  ;;  %v2367_v32 = vld [vmem:[%s3579_s3 + $0x108] sm:$0xff]  ;;  %v2374_v33 = vld [vmem:[%s3579_s3 + $0x118] sm:$0xff]  ;;  %v2379_v34 = vld [vmem:[%s3579_s3 + $0x110] sm:$0xff] }
  0x22   :  { %127 = vmatmul.f32.vlgmr.msra.gmra.mxu0 %v29_v0  ;;  %168 = vmatmul.f32.vlgmr.msra.gmra.mxu1 %v29_v0  ;;  %v2385_v35 = vld [vmem:[%s3579_s3 + $0xe0] sm:$0xff]  ;;  %v2390_v36 = vld [vmem:[%s3579_s3 + $0xe8] sm:$0xff]  ;;  %v2398_v37 = vld [vmem:[%s3579_s3 + $0xf8] sm:$0xff] }
  0x23   :  { %209 = vmatmul.f32.vlgmr.msra.gmra.mxu2 %v29_v0  ;;  %250 = vmatmul.f32.vlgmr.msra.gmra.mxu3 %v29_v0  ;;  %v2403_v38 = vld [vmem:[%s3579_s3 + $0xf0] sm:$0xff]  ;;  %v32_v39 = vld [vmem:[%s3578_s0 + $0x18] sm:$0xff]  ;;  %v2415_v40 = vld [vmem:[%s3579_s3 + $0xc0] sm:$0xff] }
  0x24   :  { %380 = vmatpush.msrb.mxu0 %v2192_v1  ;;  %400 = vmatpush.msrb.mxu1 %v2197_v2  ;;  %v2420_v41 = vld [vmem:[%s3579_s3 + $0xc8] sm:$0xff]  ;;  %v2427_v42 = vld [vmem:[%s3579_s3 + $0xd8] sm:$0xff]  ;;  %v2432_v43 = vld [vmem:[%s3579_s3 + $0xd0] sm:$0xff] }
  0x25   :  { %440 = vmatpush.msrb.mxu3 %v2202_v3  ;;  %420 = vmatpush.msrb.mxu2 %v2207_v4  ;;  %3676 = vst [vmem:[#allocation6_spill] sm:$0xff] %v2427_v42  ;;  %v2437_v44 = vld [vmem:[%s3579_s3 + $0xa0] sm:$0xff]  ;;  %v2442_v45 = vld [vmem:[%s3579_s3 + $0xa8] sm:$0xff]  ;;  %v2449_v46 = vld [vmem:[%s3579_s3 + $0xb8] sm:$0xff] }
  0x26   :  { %381 = vmatpush.msrb.mxu0 %v2212_v5  ;;  %401 = vmatpush.msrb.mxu1 %v2217_v6  ;;  %3677 = vst [vmem:[#allocation7_spill] sm:$0xff] %v2432_v43  ;;  %v2454_v47 = vld [vmem:[%s3579_s3 + $0xb0] sm:$0xff]  ;;  %v2460_v48 = vld [vmem:[%s3579_s3 + $0x80] sm:$0xff]  ;;  %v2465_v49 = vld [vmem:[%s3579_s3 + $0x88] sm:$0xff] }
  0x27   :  { %441 = vmatpush.msrb.mxu3 %v2224_v7  ;;  %421 = vmatpush.msrb.mxu2 %v2229_v8  ;;  %3678 = vst [vmem:[#allocation8_spill] sm:$0xff] %v2437_v44  ;;  %v2473_v50 = vld [vmem:[%s3579_s3 + $0x98] sm:$0xff]  ;;  %v2478_v51 = vld [vmem:[%s3579_s3 + $0x90] sm:$0xff]  ;;  %v33_v52 = vld [vmem:[%s3578_s0 + $0x20] sm:$0xff] }
  0x28   :  { %382 = vmatpush.msrb.mxu0 %v2235_v9  ;;  %402 = vmatpush.msrb.mxu1 %v2240_v10  ;;  %3679 = vst [vmem:[#allocation9_spill] sm:$0xff] %v2442_v45  ;;  %v2490_v53 = vld [vmem:[%s3579_s3 + $0x60] sm:$0xff]  ;;  %v2495_v54 = vld [vmem:[%s3579_s3 + $0x68] sm:$0xff]  ;;  %v2507_v56 = vld [vmem:[%s3579_s3 + $0x78] sm:$0xff] }
  0x29   :  { %442 = vmatpush.msrb.mxu3 %v2248_v11  ;;  %422 = vmatpush.msrb.mxu2 %v2253_v12  ;;  %3680 = vst [vmem:[#allocation10_spill] sm:$0xff] %v2449_v46  ;;  %v2502_v55 = vld [vmem:[%s3579_s3 + $0x40] sm:$0xff]  ;;  %v2512_v57 = vld [vmem:[%s3579_s3 + $0x70] sm:$0xff]  ;;  %v2517_v58 = vld [vmem:[%s3579_s3 + $0x48] sm:$0xff] }
  0x2a   :  { %130 = vmatmul.f32.gmra.mxu0 %v30_v13  ;;  %171 = vmatmul.f32.gmra.mxu1 %v30_v13  ;;  %3681 = vst [vmem:[#allocation11_spill] sm:$0xff] %v2454_v47  ;;  %v527_v59 = vld [vmem:[%s3580_s1] sm:$0xff]  ;;  %v2525_v60 = vld [vmem:[%s3580_s1 + $0x8] sm:$0xff]  ;;  %v2532_v61 = vld [vmem:[%s3579_s3 + $0x58] sm:$0xff] }
  0x2b   :  { %212 = vmatmul.f32.gmra.mxu2 %v30_v13  ;;  %253 = vmatmul.f32.gmra.mxu3 %v30_v13  ;;  %3682 = vst [vmem:[#allocation12_spill] sm:$0xff] %v2460_v48  ;;  %v2537_v62 = vld [vmem:[%s3579_s3 + $0x50] sm:$0xff]  ;;  %v2540_v63 = vadd.f32 %v2525_v60, %v527_v59  ;;  %v2546_v0 = vld [vmem:[%s3579_s3 + $0x20] sm:$0xff]  ;;  %v2551_v13 = vld [vmem:[%s3579_s3 + $0x28] sm:$0xff] }
  0x2c   :  { %383 = vmatpush.msrb.mxu0 %v2265_v14  ;;  %403 = vmatpush.msrb.mxu1 %v2270_v15  ;;  %3683 = vst [vmem:[#allocation13_spill] sm:$0xff] %v2465_v49 }
  0x2d   :  { %443 = vmatpush.msrb.mxu3 %v2277_v16  ;;  %423 = vmatpush.msrb.mxu2 %v2282_v17  ;;  %3684 = vst [vmem:[#allocation14_spill] sm:$0xff] %v2473_v50 }
  0x2e   :  { %384 = vmatpush.msrb.mxu0 %v2287_v18  ;;  %404 = vmatpush.msrb.mxu1 %v2292_v19  ;;  %3685 = vst [vmem:[#allocation15_spill] sm:$0xff] %v2478_v51 }
  0x2f   :  { %444 = vmatpush.msrb.mxu3 %v2299_v20  ;;  %424 = vmatpush.msrb.mxu2 %v2304_v21  ;;  %3686 = vst [vmem:[#allocation16_spill] sm:$0xff] %v2490_v53 }
  0x30   :  { %385 = vmatpush.msrb.mxu0 %v2310_v22  ;;  %405 = vmatpush.msrb.mxu1 %v2315_v23  ;;  %3687 = vst [vmem:[#allocation17_spill] sm:$0xff] %v2495_v54 }
  0x31   :  { %445 = vmatpush.msrb.mxu3 %v2323_v24  ;;  %425 = vmatpush.msrb.mxu2 %v2328_v25  ;;  %3688 = vst [vmem:[#allocation18_spill] sm:$0xff] %v2502_v55 }
  0x32   :  { %133 = vmatmul.f32.gmra.mxu0 %v31_v26  ;;  %174 = vmatmul.f32.gmra.mxu1 %v31_v26  ;;  %3689 = vst [vmem:[#allocation19_spill] sm:$0xff] %v2507_v56 }
  0x33   :  { %215 = vmatmul.f32.gmra.mxu2 %v31_v26  ;;  %256 = vmatmul.f32.gmra.mxu3 %v31_v26  ;;  %3690 = vst [vmem:[#allocation20_spill] sm:$0xff] %v2512_v57  ;;  %v2559_v26 = vld [vmem:[%s3579_s3 + $0x30] sm:$0xff] }
  0x34   :  { %386 = vmatpush.msrb.mxu0 %v2340_v27  ;;  %406 = vmatpush.msrb.mxu1 %v2345_v28  ;;  %3691 = vst [vmem:[#allocation21_spill] sm:$0xff] %v2517_v58 }
  0x35   :  { %446 = vmatpush.msrb.mxu3 %v2352_v29  ;;  %426 = vmatpush.msrb.mxu2 %v2357_v30  ;;  %3692 = vst [vmem:[#allocation22_spill] sm:$0xff] %v2525_v60  ;;  %v2581_v60 = vld [vmem:[%s3579_s3 + $0x8] sm:$0xff] }
  0x36   :  { %387 = vmatpush.msrb.mxu0 %v2362_v31  ;;  %407 = vmatpush.msrb.mxu1 %v2367_v32  ;;  %3693 = vst [vmem:[#allocation23_spill] sm:$0xff] %v2532_v61 }
  0x37   :  { %447 = vmatpush.msrb.mxu3 %v2374_v33  ;;  %427 = vmatpush.msrb.mxu2 %v2379_v34  ;;  %3694 = vst [vmem:[#allocation24_spill] sm:$0xff] %v2537_v62 }
  0x38   :  { %388 = vmatpush.msrb.mxu0 %v2385_v35  ;;  %408 = vmatpush.msrb.mxu1 %v2390_v36  ;;  %3695 = vst [vmem:[#allocation25_spill] sm:$0xff] %v2540_v63  ;;  %v2576_v63 = vld [vmem:[%s3579_s3] sm:$0xff] }
  0x39   :  { %448 = vmatpush.msrb.mxu3 %v2398_v37  ;;  %428 = vmatpush.msrb.mxu2 %v2403_v38  ;;  %3696 = vst [vmem:[#allocation26_spill] sm:$0xff] %v2546_v0 }
  0x3a   :  { %136 = vmatmul.f32.gmra.mxu0 %v32_v39  ;;  %177 = vmatmul.f32.gmra.mxu1 %v32_v39  ;;  %3697 = vst [vmem:[#allocation27_spill] sm:$0xff] %v2551_v13 }
  0x3b   :  { %218 = vmatmul.f32.gmra.mxu2 %v32_v39  ;;  %259 = vmatmul.f32.gmra.mxu3 %v32_v39  ;;  %3698 = vst [vmem:[#allocation28_spill] sm:$0xff] %v2559_v26  ;;  %v2564_v39 = vld [vmem:[%s3579_s3 + $0x38] sm:$0xff] }
  0x3c   :  { %389 = vmatpush.msrb.mxu0 %v2415_v40  ;;  %409 = vmatpush.msrb.mxu1 %v2420_v41  ;;  %3699 = vst [vmem:[#allocation29_spill] sm:$0xff] %v2564_v39 }
  0x3d   :  { %449 = vmatpush.msrb.mxu3 %v2427_v42  ;;  %429 = vmatpush.msrb.mxu2 %v2432_v43  ;;  %3700 = vst [vmem:[#allocation30_spill] sm:$0xff] %v2576_v63 }
  0x3e   :  { %390 = vmatpush.msrb.mxu0 %v2437_v44  ;;  %410 = vmatpush.msrb.mxu1 %v2442_v45  ;;  %3701 = vst [vmem:[#allocation31_spill] sm:$0xff] %v2581_v60 }
  0x3f   :  { %450 = vmatpush.msrb.mxu3 %v2449_v46  ;;  %430 = vmatpush.msrb.mxu2 %v2454_v47 }
  0x40   :  { %391 = vmatpush.msrb.mxu0 %v2460_v48  ;;  %411 = vmatpush.msrb.mxu1 %v2465_v49 }
  0x41   :  { %451 = vmatpush.msrb.mxu3 %v2473_v50  ;;  %431 = vmatpush.msrb.mxu2 %v2478_v51 }
  0x42   :  { %139 = vmatmul.f32.gmra.mxu0 %v33_v52  ;;  %180 = vmatmul.f32.gmra.mxu1 %v33_v52 }
  0x43   :  { %221 = vmatmul.f32.gmra.mxu2 %v33_v52  ;;  %262 = vmatmul.f32.gmra.mxu3 %v33_v52  ;;  %v34_v52 = vld [vmem:[%s3578_s0 + $0x28] sm:$0xff] }
  0x44   :  { %392 = vmatpush.msrb.mxu0 %v2490_v53  ;;  %412 = vmatpush.msrb.mxu1 %v2495_v54 }
  0x45   :  { %452 = vmatpush.msrb.mxu3 %v2507_v56  ;;  %432 = vmatpush.msrb.mxu2 %v2512_v57 }
  0x46   :  { %393 = vmatpush.msrb.mxu0 %v2502_v55  ;;  %413 = vmatpush.msrb.mxu1 %v2517_v58 }
  0x47   :  { %453 = vmatpush.msrb.mxu3 %v2532_v61  ;;  %433 = vmatpush.msrb.mxu2 %v2537_v62 }
  0x48   :  { %394 = vmatpush.msrb.mxu0 %v2546_v0  ;;  %414 = vmatpush.msrb.mxu1 %v2551_v13  ;;  %v2588_v13 = vld [vmem:[%s3579_s3 + $0x10] sm:$0xff]  ;;  %v2593_v0 = vld [vmem:[%s3579_s3 + $0x18] sm:$0xff] }
  0x49   :  { %434 = vmatpush.msrb.mxu2 %v2559_v26  ;;  %454 = vmatpush.msrb.mxu3 %v2564_v39  ;;  %3702 = vst [vmem:[#allocation32_spill] sm:$0xff] %v2588_v13  ;;  %v3593_v39 = vmov 0   ;;  %v35_v26 = vld [vmem:[%s3578_s0 + $0x30] sm:$0xff] }
  0x4a   :  { %142 = vmatmul.f32.gmra.mxu0 %v34_v52  ;;  %183 = vmatmul.f32.gmra.mxu1 %v34_v52  ;;  %3703 = vst [vmem:[#allocation33_spill] sm:$0xff] %v2593_v0 }
  0x4b   :  { %224 = vmatmul.f32.gmra.mxu2 %v34_v52  ;;  %265 = vmatmul.f32.gmra.mxu3 %v34_v52  ;;  %v3704_v52 = vld [vmem:[#allocation26_spill] sm:$0xff] }
  0x4c   :  { %395 = vmatpush.msrb.mxu0 %v2576_v63  ;;  %415 = vmatpush.msrb.mxu1 %v2581_v60 }
  0x4d   :  { %435 = vmatpush.msrb.mxu2 %v2588_v13  ;;  %455 = vmatpush.msrb.mxu3 %v2593_v0 }
  0x4e   :  { %1765 = vset.pattern.permute.xlu0 %v3593_v39  ;;  %543 = vmatpush.msra.mxu0 %v2192_v1  ;;  %v3707_v39 = vld [vmem:[#allocation29_spill] sm:$0xff] }
  0x4f   :  { %530 = vperm.xlu0 %1765, %v527_v59   ;;  %563 = vmatpush.msra.mxu1 %v2197_v2  ;;  %v36_v59 = vld [vmem:[%s3578_s0 + $0x38] sm:$0xff] }
  0x50   :  { %583 = vmatpush.msra.mxu2 %v2207_v4  ;;  %603 = vmatpush.msra.mxu3 %v2202_v3 }
  0x51   :  { %544 = vmatpush.msra.mxu0 %v2212_v5  ;;  %564 = vmatpush.msra.mxu1 %v2217_v6 }
  0x52   :  { %145 = vmatmul.f32.gmra.mxu0 %v35_v26  ;;  %186 = vmatmul.f32.gmra.mxu1 %v35_v26 }
  0x53   :  { %227 = vmatmul.f32.gmra.mxu2 %v35_v26  ;;  %268 = vmatmul.f32.gmra.mxu3 %v35_v26  ;;  %v3592_v26 = vmov 0.0  }
  0x54   :  { %584 = vmatpush.msra.mxu2 %v2229_v8  ;;  %604 = vmatpush.msra.mxu3 %v2224_v7 }
  0x55   :  { %545 = vmatpush.msra.mxu0 %v2235_v9  ;;  %565 = vmatpush.msra.mxu1 %v2240_v10 }
  0x56   :  { %585 = vmatpush.msra.mxu2 %v2253_v12  ;;  %605 = vmatpush.msra.mxu3 %v2248_v11 }
  0x57   :  { %546 = vmatpush.msra.mxu0 %v2265_v14  ;;  %566 = vmatpush.msra.mxu1 %v2270_v15 }
  0x58   :  { %586 = vmatpush.msra.mxu2 %v2282_v17  ;;  %606 = vmatpush.msra.mxu3 %v2277_v16 }
  0x59   :  { %547 = vmatpush.msra.mxu0 %v2287_v18  ;;  %567 = vmatpush.msra.mxu1 %v2292_v19 }
  0x5a   :  { %148 = vmatmul.f32.gmra.mxu0 %v36_v59  ;;  %189 = vmatmul.f32.gmra.mxu1 %v36_v59 }
  0x5b   :  { %230 = vmatmul.f32.gmra.mxu2 %v36_v59  ;;  %271 = vmatmul.f32.gmra.mxu3 %v36_v59  ;;  %v3705_v59 = vld [vmem:[#allocation27_spill] sm:$0xff] }
  0x5c   :  { %587 = vmatpush.msra.mxu2 %v2304_v21  ;;  %607 = vmatpush.msra.mxu3 %v2299_v20 }
  0x5d   :  { %548 = vmatpush.msra.mxu0 %v2310_v22  ;;  %568 = vmatpush.msra.mxu1 %v2315_v23 }
  0x5e   :  { %588 = vmatpush.msra.mxu2 %v2328_v25  ;;  %608 = vmatpush.msra.mxu3 %v2323_v24 }
  0x5f   :  { %549 = vmatpush.msra.mxu0 %v2340_v27  ;;  %569 = vmatpush.msra.mxu1 %v2345_v28 }
  0x60   :  { %589 = vmatpush.msra.mxu2 %v2357_v30  ;;  %609 = vmatpush.msra.mxu3 %v2352_v29 }
  0x61   :  { %550 = vmatpush.msra.mxu0 %v2362_v31  ;;  %570 = vmatpush.msra.mxu1 %v2367_v32 }
  0x62   :  { %396 = vmatmul.f32.vlgmr.msrb.gmra.mxu0 %v3592_v26  ;;  %416 = vmatmul.f32.vlgmr.msrb.gmra.mxu1 %v3592_v26 }
  0x63   :  { %436 = vmatmul.f32.vlgmr.msrb.gmra.mxu2 %v3592_v26  ;;  %456 = vmatmul.f32.vlgmr.msrb.gmra.mxu3 %v3592_v26  ;;  %v3706_v26 = vld [vmem:[#allocation28_spill] sm:$0xff] }
  0x64   :  { %590 = vmatpush.msra.mxu2 %v2379_v34  ;;  %610 = vmatpush.msra.mxu3 %v2374_v33 }
  0x65   :  { %551 = vmatpush.msra.mxu0 %v2385_v35  ;;  %571 = vmatpush.msra.mxu1 %v2390_v36 }
  0x66   :  { %591 = vmatpush.msra.mxu2 %v2403_v38  ;;  %611 = vmatpush.msra.mxu3 %v2398_v37 }
  0x67   :  { %552 = vmatpush.msra.mxu0 %v2415_v40  ;;  %572 = vmatpush.msra.mxu1 %v2420_v41 }
  0x68   :  { %592 = vmatpush.msra.mxu2 %v2432_v43  ;;  %612 = vmatpush.msra.mxu3 %v2427_v42 }
  0x69   :  { %553 = vmatpush.msra.mxu0 %v2437_v44  ;;  %573 = vmatpush.msra.mxu1 %v2442_v45 }
  0x6a   :  { %593 = vmatpush.msra.mxu2 %v2454_v47  ;;  %613 = vmatpush.msra.mxu3 %v2449_v46 }
  0x6b   :  { %554 = vmatpush.msra.mxu0 %v2460_v48  ;;  %574 = vmatpush.msra.mxu1 %v2465_v49 }
  0x6c   :  { %594 = vmatpush.msra.mxu2 %v2478_v51  ;;  %614 = vmatpush.msra.mxu3 %v2473_v50 }
  0x6d   :  { %555 = vmatpush.msra.mxu0 %v2490_v53  ;;  %575 = vmatpush.msra.mxu1 %v2495_v54 }
  0x6e   :  { %595 = vmatpush.msra.mxu2 %v2512_v57  ;;  %615 = vmatpush.msra.mxu3 %v2507_v56 }
  0x6f   :  { %556 = vmatpush.msra.mxu0 %v2502_v55  ;;  %576 = vmatpush.msra.mxu1 %v2517_v58  ;;  %v3708_v58 = vld [vmem:[#allocation22_spill] sm:$0xff] }
  0x70   :  { %596 = vmatpush.msra.mxu2 %v2537_v62  ;;  %616 = vmatpush.msra.mxu3 %v2532_v61 }
  0x71   :  { %557 = vmatpush.msra.mxu0 %v3704_v52  ;;  %577 = vmatpush.msra.mxu1 %v3705_v59 }
  0x72   :  { %597 = vmatpush.msra.mxu2 %v3706_v26  ;;  %617 = vmatpush.msra.mxu3 %v3707_v39 }
  0x73   :  { %558 = vmatpush.msra.mxu0 %v2576_v63  ;;  %578 = vmatpush.msra.mxu1 %v2581_v60 }
  0x74   :  { %598 = vmatpush.msra.mxu2 %v2588_v13  ;;  %618 = vmatpush.msra.mxu3 %v2593_v0 }
  0x75   :  { %694 = vperm.xlu0 %1765, %v3708_v58   ;;  %707 = vmatpush.msrb.mxu0 %v2192_v1  ;;  %v3709_v58 = vld [vmem:[#allocation21_spill] sm:$0xff] }
  0x76   :  { %727 = vmatpush.msrb.mxu1 %v2197_v2  ;;  %747 = vmatpush.msrb.mxu2 %v2207_v4 }
  0x77   :  { %767 = vmatpush.msrb.mxu3 %v2202_v3  ;;  %708 = vmatpush.msrb.mxu0 %v2212_v5 }
  0x78   :  { %728 = vmatpush.msrb.mxu1 %v2217_v6  ;;  %748 = vmatpush.msrb.mxu2 %v2229_v8 }
  0x79   :  { %768 = vmatpush.msrb.mxu3 %v2224_v7  ;;  %709 = vmatpush.msrb.mxu0 %v2235_v9 }
  0x7a   :  { %729 = vmatpush.msrb.mxu1 %v2240_v10  ;;  %749 = vmatpush.msrb.mxu2 %v2253_v12 }
  0x7b   :  { %769 = vmatpush.msrb.mxu3 %v2248_v11  ;;  %710 = vmatpush.msrb.mxu0 %v2265_v14 }
  0x7c   :  { %730 = vmatpush.msrb.mxu1 %v2270_v15  ;;  %750 = vmatpush.msrb.mxu2 %v2282_v17 }
  0x7d   :  { %770 = vmatpush.msrb.mxu3 %v2277_v16  ;;  %711 = vmatpush.msrb.mxu0 %v2287_v18 }
  0x7e   :  { %731 = vmatpush.msrb.mxu1 %v2292_v19  ;;  %751 = vmatpush.msrb.mxu2 %v2304_v21 }
  0x7f   :  { %771 = vmatpush.msrb.mxu3 %v2299_v20  ;;  %712 = vmatpush.msrb.mxu0 %v2310_v22 }
  0x80   :  { %732 = vmatpush.msrb.mxu1 %v2315_v23  ;;  %752 = vmatpush.msrb.mxu2 %v2328_v25 }
  0x81   :  { %772 = vmatpush.msrb.mxu3 %v2323_v24  ;;  %713 = vmatpush.msrb.mxu0 %v2340_v27 }
  0x82   :  { %733 = vmatpush.msrb.mxu1 %v2345_v28  ;;  %753 = vmatpush.msrb.mxu2 %v2357_v30 }
  0x83   :  { %773 = vmatpush.msrb.mxu3 %v2352_v29  ;;  %714 = vmatpush.msrb.mxu0 %v2362_v31 }
  0x84   :  { %734 = vmatpush.msrb.mxu1 %v2367_v32  ;;  %754 = vmatpush.msrb.mxu2 %v2379_v34 }
  0x85   :  { %774 = vmatpush.msrb.mxu3 %v2374_v33  ;;  %715 = vmatpush.msrb.mxu0 %v2385_v35 }
  0x86   :  { %735 = vmatpush.msrb.mxu1 %v2390_v36  ;;  %755 = vmatpush.msrb.mxu2 %v2403_v38 }
  0x87   :  { %775 = vmatpush.msrb.mxu3 %v2398_v37  ;;  %716 = vmatpush.msrb.mxu0 %v2415_v40 }
  0x88   :  { %736 = vmatpush.msrb.mxu1 %v2420_v41  ;;  %756 = vmatpush.msrb.mxu2 %v2432_v43 }
  0x89   :  { %776 = vmatpush.msrb.mxu3 %v2427_v42  ;;  %717 = vmatpush.msrb.mxu0 %v2437_v44 }
  0x8a   :  { %737 = vmatpush.msrb.mxu1 %v2442_v45  ;;  %757 = vmatpush.msrb.mxu2 %v2454_v47 }
  0x8b   :  { %777 = vmatpush.msrb.mxu3 %v2449_v46  ;;  %718 = vmatpush.msrb.mxu0 %v2460_v48 }
  0x8c   :  { %738 = vmatpush.msrb.mxu1 %v2465_v49  ;;  %758 = vmatpush.msrb.mxu2 %v2478_v51 }
  0x8d   :  { %778 = vmatpush.msrb.mxu3 %v2473_v50  ;;  %719 = vmatpush.msrb.mxu0 %v2490_v53 }
  0x8e   :  { %739 = vmatpush.msrb.mxu1 %v2495_v54  ;;  %759 = vmatpush.msrb.mxu2 %v2512_v57 }
  0x8f   :  { %779 = vmatpush.msrb.mxu3 %v2507_v56  ;;  %720 = vmatpush.msrb.mxu0 %v2502_v55 }
  0x90   :  { %740 = vmatpush.msrb.mxu1 %v3709_v58  ;;  %760 = vmatpush.msrb.mxu2 %v2537_v62  ;;  %v3710_v58 = vmov 0  }
  0x91   :  { %780 = vmatpush.msrb.mxu3 %v2532_v61  ;;  %721 = vmatpush.msrb.mxu0 %v3704_v52 }
  0x92   :  { %741 = vmatpush.msrb.mxu1 %v3705_v59  ;;  %761 = vmatpush.msrb.mxu2 %v3706_v26  ;;  %v101_v26 = vld [vmem:[%s3581_s4] sm:$0xf] }
  0x93   :  { %781 = vmatpush.msrb.mxu3 %v3707_v39  ;;  %722 = vmatpush.msrb.mxu0 %v2576_v63  ;;  %v103_v59 = vperm.slane %v101_v26, 0  ;;  %v104_v39 = vperm.slane %v101_v26, 1  ;;  %v2752_v56 = vperm.slane %v101_v26, 2 }
  0x94   :  { %742 = vmatpush.msrb.mxu1 %v2581_v60  ;;  %762 = vmatpush.msrb.mxu2 %v2588_v13 }
  0x95   :  { %782 = vmatpush.msrb.mxu3 %v2593_v0  ;;  %1766 = vset.pattern.permute.xlu1 %v3710_v58 }
  0x96   :  { %1767 = vset.pattern.permute.xlu2 %v3710_v58  ;;  %v106_v58 = vperm.slane %v101_v26, 3 }
  0x9f   :  { %v128_v61 = vpop.f32.mrf.mxu0  ;;  %v169_v52 = vpop.f32.mrf.mxu1 }
  0xa6   :  { %v2744_v62 = vpop.f32.mrf.mxu2  ;;  %v2746_v63 = vpop.f32.mrf.mxu3 }
  0xa7   :  { %v131_v60 = vpop.f32.mrf.mxu0  ;;  %v172_v13 = vpop.f32.mrf.mxu1 }
  0xa8   :  { %v2748_v55 = vadd.f32 %v131_v60, %v103_v59  ;;  %v2750_v0 = vadd.f32 %v172_v13, %v104_v39 }
  0xaa   :  { %3711 = vst [vmem:[#allocation22_spill] sm:$0xff] %v2748_v55 }
  0xab   :  { %3712 = vst [vmem:[#allocation34_spill] sm:$0xff] %v2750_v0 }
  0xae   :  { %v213_v57 = vpop.f32.mrf.mxu2  ;;  %v254_v54 = vpop.f32.mrf.mxu3 }
  0xaf   :  { %v2755_v53 = vadd.f32 %v213_v57, %v2752_v56  ;;  %v2757_v50 = vadd.f32 %v254_v54, %v106_v58  ;;  %v134_v51 = vpop.f32.mrf.mxu0  ;;  %v175_v49 = vpop.f32.mrf.mxu1 }
  0xb0   :  { %v2759_v48 = vadd.f32 %v134_v51, %v103_v59  ;;  %v2761_v46 = vadd.f32 %v175_v49, %v104_v39 }
  0xb1   :  { %3713 = vst [vmem:[#allocation35_spill] sm:$0xff] %v2755_v53 }
  0xb2   :  { %3714 = vst [vmem:[#allocation36_spill] sm:$0xff] %v2757_v50 }
  0xb3   :  { %3715 = vst [vmem:[#allocation37_spill] sm:$0xff] %v2759_v48 }
  0xb4   :  { %3716 = vst [vmem:[#allocation38_spill] sm:$0xff] %v2761_v46 }
  0xb6   :  { %v216_v60 = vpop.f32.mrf.mxu2  ;;  %v257_v55 = vpop.f32.mrf.mxu3 }
  0xb7   :  { %v2764_v13 = vadd.f32 %v216_v60, %v2752_v56  ;;  %v2766_v0 = vadd.f32 %v257_v55, %v106_v58  ;;  %v137_v26 = vpop.f32.mrf.mxu0  ;;  %v178_v47 = vpop.f32.mrf.mxu1 }
  0xb8   :  { %v2768_v45 = vadd.f32 %v137_v26, %v103_v59  ;;  %v2770_v57 = vadd.f32 %v178_v47, %v104_v39 }
  0xb9   :  { %3717 = vst [vmem:[#allocation39_spill] sm:$0xff] %v2764_v13 }
  0xba   :  { %3718 = vst [vmem:[#allocation40_spill] sm:$0xff] %v2766_v0 }
  0xbb   :  { %3719 = vst [vmem:[#allocation41_spill] sm:$0xff] %v2768_v45 }
  0xbc   :  { %3720 = vst [vmem:[#allocation42_spill] sm:$0xff] %v2770_v57 }
  0xbe   :  { %v219_v54 = vpop.f32.mrf.mxu2  ;;  %v260_v53 = vpop.f32.mrf.mxu3 }
  0xbf   :  { %v2773_v51 = vadd.f32 %v219_v54, %v2752_v56  ;;  %v2775_v49 = vadd.f32 %v260_v53, %v106_v58  ;;  %v140_v46 = vpop.f32.mrf.mxu0  ;;  %v181_v48 = vpop.f32.mrf.mxu1 }
  0xc0   :  { %v2777_v50 = vadd.f32 %v140_v46, %v103_v59  ;;  %v2779_v60 = vadd.f32 %v181_v48, %v104_v39 }
  0xc1   :  { %3721 = vst [vmem:[#allocation43_spill] sm:$0xff] %v2773_v51 }
  0xc2   :  { %3722 = vst [vmem:[#allocation44_spill] sm:$0xff] %v2775_v49 }
  0xc3   :  { %3723 = vst [vmem:[#allocation45_spill] sm:$0xff] %v2777_v50 }
  0xc4   :  { %3724 = vst [vmem:[#allocation46_spill] sm:$0xff] %v2779_v60 }
  0xc6   :  { %v222_v55 = vpop.f32.mrf.mxu2  ;;  %v263_v13 = vpop.f32.mrf.mxu3 }
  0xc7   :  { %v2782_v26 = vadd.f32 %v222_v55, %v2752_v56  ;;  %v2784_v47 = vadd.f32 %v263_v13, %v106_v58  ;;  %v143_v57 = vpop.f32.mrf.mxu0  ;;  %v184_v45 = vpop.f32.mrf.mxu1 }
  0xc8   :  { %v2786_v0 = vadd.f32 %v143_v57, %v103_v59  ;;  %v2788_v54 = vadd.f32 %v184_v45, %v104_v39 }
  0xc9   :  { %3725 = vst [vmem:[#allocation47_spill] sm:$0xff] %v2782_v26 }
  0xca   :  { %3726 = vst [vmem:[#allocation48_spill] sm:$0xff] %v2784_v47 }
  0xcb   :  { %3727 = vst [vmem:[#allocation49_spill] sm:$0xff] %v2786_v0 }
  0xcc   :  { %3728 = vst [vmem:[#allocation50_spill] sm:$0xff] %v2788_v54 }
  0xce   :  { %v225_v53 = vpop.f32.mrf.mxu2  ;;  %v266_v51 = vpop.f32.mrf.mxu3 }
  0xcf   :  { %v2791_v46 = vadd.f32 %v225_v53, %v2752_v56  ;;  %v2793_v48 = vadd.f32 %v266_v51, %v106_v58  ;;  %v146_v60 = vpop.f32.mrf.mxu0  ;;  %v187_v50 = vpop.f32.mrf.mxu1  ;;  %v129_v51 = vadd.f32 %v128_v61, %v103_v59 }
  0xd0   :  { %v2795_v49 = vadd.f32 %v146_v60, %v103_v59  ;;  %v2797_v55 = vadd.f32 %v187_v50, %v104_v39 }
  0xd1   :  { %3729 = vst [vmem:[#allocation51_spill] sm:$0xff] %v2791_v46  ;;  %v170_v46 = vadd.f32 %v169_v52, %v104_v39 }
  0xd2   :  { %3730 = vst [vmem:[#allocation52_spill] sm:$0xff] %v2793_v48 }
  0xd3   :  { %3731 = vst [vmem:[#allocation53_spill] sm:$0xff] %v2795_v49 }
  0xd4   :  { %3732 = vst [vmem:[#allocation54_spill] sm:$0xff] %v2797_v55 }
  0xd6   :  { %v228_v13 = vpop.f32.mrf.mxu2  ;;  %v269_v26 = vpop.f32.mrf.mxu3 }
  0xd7   :  { %v2800_v57 = vadd.f32 %v228_v13, %v2752_v56  ;;  %v2802_v45 = vadd.f32 %v269_v26, %v106_v58  ;;  %v149_v54 = vpop.f32.mrf.mxu0  ;;  %v190_v0 = vpop.f32.mrf.mxu1 }
  0xd8   :  { %v2804_v47 = vadd.f32 %v149_v54, %v103_v59  ;;  %v2806_v53 = vadd.f32 %v190_v0, %v104_v39  ;;  %v252_v54 = vadd.f32 %v2746_v63, %v106_v58 }
  0xd9   :  { %3733 = vst [vmem:[#allocation55_spill] sm:$0xff] %v2800_v57 }
  0xda   :  { %3734 = vst [vmem:[#allocation56_spill] sm:$0xff] %v2802_v45 }
  0xdb   :  { %3735 = vst [vmem:[#allocation57_spill] sm:$0xff] %v2804_v47 }
  0xdc   :  { %3736 = vst [vmem:[#allocation58_spill] sm:$0xff] %v2806_v53 }
  0xde   :  { %v231_v48 = vpop.f32.mrf.mxu2  ;;  %v272_v60 = vpop.f32.mrf.mxu3 }
  0xdf   :  { %v2809_v50 = vadd.f32 %v231_v48, %v2752_v56  ;;  %v2811_v55 = vadd.f32 %v272_v60, %v106_v58  ;;  %v397_v49 = vpop.f32.mrf.mxu0  ;;  %v417_v13 = vpop.f32.mrf.mxu1 }
  0xe0   :  { %v460_v57 = vadd.f32 %v397_v49, %v129_v51  ;;  %v461_v26 = vadd.f32 %v417_v13, %v170_v46  ;;  %v211_v49 = vadd.f32 %v2744_v62, %v2752_v56 }
  0xe1   :  { %3737 = vst [vmem:[#allocation59_spill] sm:$0xff] %v2809_v50 }
  0xe2   :  { %3738 = vst [vmem:[#allocation60_spill] sm:$0xff] %v2811_v55  ;;  %v1732_v45 = vmul.f32 -1.442695, %v460_v57  ;;  %v1733_v44 = vmul.f32 -1.442695, %v461_v26 }
  0xe4   :  { %1768 = vpow2.f32 %v1732_v45 }
  0xe5   :  { %1770 = vpow2.f32 %v1733_v44 }
  0xe6   :  { %v457_v0 = vpop.f32.mrf.mxu3  ;;  %v437_v60 = vpop.f32.mrf.mxu2 }
  0xe7   :  { %v463_v61 = vadd.f32 %v457_v0, %v252_v54  ;;  %v462_v45 = vadd.f32 %v437_v60, %v211_v49 }
  0xe9   :  { %v1734_v39 = vmul.f32 -1.442695, %v463_v61 }
  0xea   :  { %v1769_v52 = vpop.eup %1768 }
  0xeb   :  { %v1771_v59 = vpop.eup %1770  ;;  %v467_v53 = vadd.f32 1.0, %v1769_v52  ;;  %1772 = vpow2.f32 %v1734_v39 }
  0xec   :  { %v486_v48 = vadd.f32 1.0, %v1771_v59 }
  0xed   :  { %1774 = vrcp.f32 %v467_v53  ;;  %v479_v26 = vand.u32 2147483648, %v467_v53  ;;  %v477_v61 = vand.u32 2147483647, %v467_v53  ;;  %vm473_vm2 = vweird.f32 %v467_v53 }
  0xee   :  { %1776 = vrcp.f32 %v486_v48  ;;  %v498_v54 = vand.u32 2147483648, %v486_v48  ;;  %v496_v52 = vand.u32 2147483647, %v486_v48  ;;  %vm492_vm3 = vweird.f32 %v486_v48 }
  0xef   :  { %v480_v62 = vor.u32 1.1754944e-38, %v479_v26  ;;  %vm478_vm5 = vcmp.eq.f32.partialorder %v477_v61, 8.507059e+37 }
  0xf0   :  { %v499_v49 = vor.u32 1.1754944e-38, %v498_v54  ;;  %vm497_vm7 = vcmp.eq.f32.partialorder %v496_v52, 8.507059e+37  ;;  %v3768_v52 = vld [vmem:[#allocation25_spill] sm:$0xff] }
  0xf1   :  { %v1773_v50 = vpop.eup %1772 }
  0xf2   :  { %v506_v46 = vadd.f32 1.0, %v1773_v50 }
  0xf3   :  { %v1775_v57 = vpop.eup %1774 }
  0xf4   :  { %v1777_v63 = vpop.eup %1776  ;;  %v469_v44 = vmul.f32 %v1775_v57, %v467_v53  ;;  %1778 = vrcp.f32 %v506_v46  ;;  %vm474_vm0 = vweird.f32 %v1775_v57  ;;  %vm512_vm9 = vweird.f32 %v506_v46 }
  0xf5   :  { %v488_v58 = vmul.f32 %v1777_v63, %v486_v48  ;;  %1780 = vtanh.f32 %v462_v45  ;;  %vm493_vm1 = vweird.f32 %v1777_v63  ;;  %vm475_vm4 = vmor %vm473_vm2, %vm474_vm0  ;;  %v518_v48 = vand.u32 2147483648, %v506_v46 }
  0xf6   :  { %v470_v51 = vsub.f32 1.0, %v469_v44  ;;  %vm494_vm6 = vmor %vm492_vm3, %vm493_vm1 }
  0xf7   :  { %v489_v13 = vsub.f32 1.0, %v488_v58  ;;  %v519_v54 = vor.u32 1.1754944e-38, %v518_v48 }
  0xf8   :  { %v471_v0 = vmul.f32 %v1775_v57, %v470_v51 }
  0xf9   :  { %v490_v39 = vmul.f32 %v1777_v63, %v489_v13 }
  0xfa   :  { %v1779_v59 = vpop.eup %1778  ;;  %v472_v56 = vadd.f32 %v1775_v57, %v471_v0 }
  0xfb   :  { %v491_v50 = vadd.f32 %v1777_v63, %v490_v39  ;;  %v508_v60 = vmul.f32 %v1779_v59, %v506_v46  ;;  %v1781_v45 = vpop.eup %1780  ;;  %vm513_vm8 = vweird.f32 %v1779_v59 }
  0xfc   :  { %v476_v44 = vsel %vm475_vm4, %v1775_v57, %v472_v56  ;;  %v516_v57 = vand.u32 2147483647, %v506_v46  ;;  %vm514_vm10 = vmor %vm512_vm9, %vm513_vm8  ;;  %v1742_v46 = vld [vmem:[%s3580_s1 + $0x10] sm:$0xff] }
  0xfd   :  { %v481_v58 = vsel %vm478_vm5, %v480_v62, %v476_v44  ;;  %v495_v51 = vsel %vm494_vm6, %v1777_v63, %v491_v50  ;;  %v509_v55 = vsub.f32 1.0, %v508_v60  ;;  %858 = vperm.xlu1 %1766, %v1742_v46  }
  0xfe   :  { %v500_v13 = vsel %vm497_vm7, %v499_v49, %v495_v51  ;;  %v523_v47 = vmul.f32 %v1781_v45, %v481_v58  ;;  %vm517_vm11 = vcmp.eq.f32.partialorder %v516_v57, 8.507059e+37  ;;  %v3769_v49 = vld [vmem:[#allocation35_spill] sm:$0xff] }
  0xff   :  { %v522_v42 = vmul.f32 0.0, %v500_v13  ;;  %v510_v43 = vmul.f32 %v1779_v59, %v509_v55 }
 0x101   :  { %v2816_v0 = vadd.f32 %v523_v47, %v522_v42  ;;  %v511_v53 = vadd.f32 %v1779_v59, %v510_v43 }
 0x103   :  { %1782 = vtanh.f32 %v2816_v0  ;;  %v515_v26 = vsel %vm514_vm10, %v1779_v59, %v511_v53  ;;  %v2896_v59 = vadd.f32 %v1742_v46, %v3768_v52  ;;  %v2999_v46 = vld [vmem:[%s3579_s3 + $0x198] sm:$0xff]  ;;  %v3005_v52 = vld [vmem:[%s3579_s3 + $0x160] sm:$0xff] }
 0x104   :  { %v520_v61 = vsel %vm517_vm11, %v519_v54, %v515_v26 }
 0x109   :  { %v1783_v63 = vpop.eup %1782 }
 0x10a   :  { %v2819_v39 = vmul.f32 %v1783_v63, %v520_v61 }
 0x10c   :  { %559 = vmatmul.f32.vlgmr.msra.gmra.mxu0 %v2819_v39  ;;  %579 = vmatmul.f32.vlgmr.msra.gmra.mxu1 %v2819_v39 }
 0x10d   :  { %599 = vmatmul.f32.vlgmr.msra.gmra.mxu2 %v2819_v39  ;;  %619 = vmatmul.f32.vlgmr.msra.gmra.mxu3 %v2819_v39 }
 0x10e   :  { %871 = vmatpush.msra.mxu0 %v2192_v1  ;;  %891 = vmatpush.msra.mxu1 %v2197_v2  ;;  %v3739_v1 = vld [vmem:[#allocation7_spill] sm:$0xff]  ;;  %v3740_v2 = vld [vmem:[#allocation6_spill] sm:$0xff] }
 0x10f   :  { %911 = vmatpush.msra.mxu2 %v2207_v4  ;;  %931 = vmatpush.msra.mxu3 %v2202_v3  ;;  %v3741_v3 = vld [vmem:[#allocation8_spill] sm:$0xff]  ;;  %v3742_v4 = vld [vmem:[#allocation9_spill] sm:$0xff] }
 0x110   :  { %872 = vmatpush.msra.mxu0 %v2212_v5  ;;  %892 = vmatpush.msra.mxu1 %v2217_v6  ;;  %v3743_v5 = vld [vmem:[#allocation11_spill] sm:$0xff]  ;;  %v3744_v6 = vld [vmem:[#allocation10_spill] sm:$0xff] }
 0x111   :  { %912 = vmatpush.msra.mxu2 %v2229_v8  ;;  %932 = vmatpush.msra.mxu3 %v2224_v7  ;;  %v3745_v7 = vld [vmem:[#allocation12_spill] sm:$0xff]  ;;  %v3746_v8 = vld [vmem:[#allocation13_spill] sm:$0xff] }
 0x112   :  { %873 = vmatpush.msra.mxu0 %v2235_v9  ;;  %893 = vmatpush.msra.mxu1 %v2240_v10  ;;  %v3747_v9 = vld [vmem:[#allocation15_spill] sm:$0xff]  ;;  %v3748_v10 = vld [vmem:[#allocation14_spill] sm:$0xff] }
 0x113   :  { %913 = vmatpush.msra.mxu2 %v2253_v12  ;;  %933 = vmatpush.msra.mxu3 %v2248_v11  ;;  %v3749_v11 = vld [vmem:[#allocation16_spill] sm:$0xff]  ;;  %v3750_v12 = vld [vmem:[#allocation17_spill] sm:$0xff] }
 0x114   :  { %874 = vmatpush.msra.mxu0 %v2265_v14  ;;  %894 = vmatpush.msra.mxu1 %v2270_v15  ;;  %v3751_v14 = vld [vmem:[#allocation20_spill] sm:$0xff]  ;;  %v3752_v15 = vld [vmem:[#allocation19_spill] sm:$0xff] }
 0x115   :  { %914 = vmatpush.msra.mxu2 %v2282_v17  ;;  %934 = vmatpush.msra.mxu3 %v2277_v16  ;;  %v3753_v16 = vld [vmem:[#allocation18_spill] sm:$0xff]  ;;  %v3754_v17 = vld [vmem:[#allocation21_spill] sm:$0xff] }
 0x116   :  { %875 = vmatpush.msra.mxu0 %v2287_v18  ;;  %895 = vmatpush.msra.mxu1 %v2292_v19  ;;  %v3755_v18 = vld [vmem:[#allocation24_spill] sm:$0xff]  ;;  %v3756_v19 = vld [vmem:[#allocation23_spill] sm:$0xff] }
 0x117   :  { %915 = vmatpush.msra.mxu2 %v2304_v21  ;;  %935 = vmatpush.msra.mxu3 %v2299_v20  ;;  %v3757_v20 = vld [vmem:[#allocation26_spill] sm:$0xff]  ;;  %v3758_v21 = vld [vmem:[#allocation27_spill] sm:$0xff] }
 0x118   :  { %876 = vmatpush.msra.mxu0 %v2310_v22  ;;  %896 = vmatpush.msra.mxu1 %v2315_v23  ;;  %v3759_v22 = vld [vmem:[#allocation28_spill] sm:$0xff]  ;;  %v3760_v23 = vld [vmem:[#allocation29_spill] sm:$0xff] }
 0x119   :  { %916 = vmatpush.msra.mxu2 %v2328_v25  ;;  %936 = vmatpush.msra.mxu3 %v2323_v24  ;;  %v3761_v24 = vld [vmem:[#allocation30_spill] sm:$0xff]  ;;  %v3762_v25 = vld [vmem:[#allocation31_spill] sm:$0xff] }
 0x11a   :  { %877 = vmatpush.msra.mxu0 %v2340_v27  ;;  %897 = vmatpush.msra.mxu1 %v2345_v28  ;;  %v3763_v27 = vld [vmem:[#allocation32_spill] sm:$0xff]  ;;  %v3764_v28 = vld [vmem:[#allocation33_spill] sm:$0xff] }
 0x11b   :  { %917 = vmatpush.msra.mxu2 %v2357_v30  ;;  %937 = vmatpush.msra.mxu3 %v2352_v29 }
 0x11c   :  { %878 = vmatpush.msra.mxu0 %v2362_v31  ;;  %898 = vmatpush.msra.mxu1 %v2367_v32  ;;  %v3765_v31 = vld [vmem:[#allocation22_spill] sm:$0xff] }
 0x11d   :  { %918 = vmatpush.msra.mxu2 %v2379_v34  ;;  %938 = vmatpush.msra.mxu3 %v2374_v33  ;;  %v3766_v33 = vld [vmem:[#allocation34_spill] sm:$0xff] }
 0x11e   :  { %879 = vmatpush.msra.mxu0 %v2385_v35  ;;  %899 = vmatpush.msra.mxu1 %v2390_v36 }
 0x11f   :  { %919 = vmatpush.msra.mxu2 %v2403_v38  ;;  %939 = vmatpush.msra.mxu3 %v2398_v37  ;;  %v3767_v38 = vld [vmem:[#allocation36_spill] sm:$0xff] }
 0x120   :  { %880 = vmatpush.msra.mxu0 %v2415_v40  ;;  %900 = vmatpush.msra.mxu1 %v2420_v41 }
 0x121   :  { %920 = vmatpush.msra.mxu2 %v3739_v1  ;;  %940 = vmatpush.msra.mxu3 %v3740_v2 }
 0x122   :  { %881 = vmatpush.msra.mxu0 %v3741_v3  ;;  %901 = vmatpush.msra.mxu1 %v3742_v4 }
 0x123   :  { %921 = vmatpush.msra.mxu2 %v3743_v5  ;;  %941 = vmatpush.msra.mxu3 %v3744_v6 }
 0x124   :  { %882 = vmatpush.msra.mxu0 %v3745_v7  ;;  %902 = vmatpush.msra.mxu1 %v3746_v8 }
 0x125   :  { %922 = vmatpush.msra.mxu2 %v3747_v9  ;;  %942 = vmatpush.msra.mxu3 %v3748_v10 }
 0x126   :  { %883 = vmatpush.msra.mxu0 %v3749_v11  ;;  %903 = vmatpush.msra.mxu1 %v3750_v12 }
 0x127   :  { %923 = vmatpush.msra.mxu2 %v3751_v14  ;;  %943 = vmatpush.msra.mxu3 %v3752_v15 }
 0x128   :  { %884 = vmatpush.msra.mxu0 %v3753_v16  ;;  %904 = vmatpush.msra.mxu1 %v3754_v17  ;;  %v531_v17 = vpop.permute.xlu0 %530 }
 0x129   :  { %924 = vmatpush.msra.mxu2 %v3755_v18  ;;  %944 = vmatpush.msra.mxu3 %v3756_v19 }
 0x12a   :  { %885 = vmatpush.msra.mxu0 %v3757_v20  ;;  %905 = vmatpush.msra.mxu1 %v3758_v21 }
 0x12b   :  { %925 = vmatpush.msra.mxu2 %v3759_v22  ;;  %945 = vmatpush.msra.mxu3 %v3760_v23 }
 0x12c   :  { %886 = vmatpush.msra.mxu0 %v3761_v24  ;;  %906 = vmatpush.msra.mxu1 %v3762_v25 }
 0x12d   :  { %926 = vmatpush.msra.mxu2 %v3763_v27  ;;  %946 = vmatpush.msra.mxu3 %v3764_v28 }
 0x130   :  { %v695_v25 = vpop.permute.xlu0 %694 }
 0x189   :  { %v560_v29 = vpop.f32.mrf.mxu0  ;;  %v580_v30 = vpop.f32.mrf.mxu1 }
 0x18a   :  { %v623_v32 = vadd.f32 %v560_v29, %v3765_v31  ;;  %v624_v34 = vadd.f32 %v580_v30, %v3766_v33  ;;  %v2909_v31 = vld [vmem:[%s3579_s3 + $0x1e0] sm:$0xff]  ;;  %v2927_v33 = vld [vmem:[%s3579_s3 + $0x1f8] sm:$0xff] }
 0x18c   :  { %v1735_v35 = vmul.f32 -1.442695, %v623_v32  ;;  %v1736_v36 = vmul.f32 -1.442695, %v624_v34  ;;  %v2915_v32 = vld [vmem:[%s3579_s3 + $0x1e8] sm:$0xff]  ;;  %v2933_v34 = vld [vmem:[%s3579_s3 + $0x1c0] sm:$0xff] }
 0x18e   :  { %1784 = vpow2.f32 %v1735_v35  ;;  %v2939_v35 = vld [vmem:[%s3579_s3 + $0x1c8] sm:$0xff] }
 0x18f   :  { %1786 = vpow2.f32 %v1736_v36  ;;  %v2945_v36 = vld [vmem:[%s3579_s3 + $0x1d0] sm:$0xff] }
 0x190   :  { %v620_v37 = vpop.f32.mrf.mxu3  ;;  %v600_v56 = vpop.f32.mrf.mxu2 }
 0x191   :  { %v626_v40 = vadd.f32 %v620_v37, %v3767_v38  ;;  %v625_v44 = vadd.f32 %v600_v56, %v3769_v49  ;;  %v2951_v37 = vld [vmem:[%s3579_s3 + $0x1d8] sm:$0xff]  ;;  %v2957_v38 = vld [vmem:[%s3579_s3 + $0x1a0] sm:$0xff]  ;;  %v3011_v56 = vld [vmem:[%s3579_s3 + $0x168] sm:$0xff] }
 0x192   :  { %v3035_v49 = vld [vmem:[%s3579_s3 + $0x148] sm:$0xff] }
 0x193   :  { %v1737_v41 = vmul.f32 -1.442695, %v626_v40  ;;  %v2963_v40 = vld [vmem:[%s3579_s3 + $0x1a8] sm:$0xff] }
 0x194   :  { %v1785_v42 = vpop.eup %1784 }
 0x195   :  { %v1787_v43 = vpop.eup %1786  ;;  %v630_v47 = vadd.f32 1.0, %v1785_v42  ;;  %1788 = vpow2.f32 %v1737_v41  ;;  %v2969_v41 = vld [vmem:[%s3579_s3 + $0x1b0] sm:$0xff]  ;;  %v2975_v42 = vld [vmem:[%s3579_s3 + $0x1b8] sm:$0xff] }
 0x196   :  { %v649_v55 = vadd.f32 1.0, %v1787_v43  ;;  %v2981_v43 = vld [vmem:[%s3579_s3 + $0x180] sm:$0xff] }
 0x197   :  { %1790 = vrcp.f32 %v630_v47  ;;  %v642_v48 = vand.u32 2147483648, %v630_v47  ;;  %v640_v54 = vand.u32 2147483647, %v630_v47  ;;  %vm636_vm14 = vweird.f32 %v630_v47 }
 0x198   :  { %1792 = vrcp.f32 %v649_v55  ;;  %v661_v57 = vand.u32 2147483648, %v649_v55  ;;  %v659_v61 = vand.u32 2147483647, %v649_v55  ;;  %vm655_vm15 = vweird.f32 %v649_v55 }
 0x199   :  { %v643_v3 = vor.u32 1.1754944e-38, %v642_v48  ;;  %vm641_vm2 = vcmp.eq.f32.partialorder %v640_v54, 8.507059e+37  ;;  %v3077_v48 = vld [vmem:[%s3579_s3 + $0x100] sm:$0xff]  ;;  %v3095_v54 = vld [vmem:[%s3579_s3 + $0x118] sm:$0xff] }
 0x19a   :  { %v662_v6 = vor.u32 1.1754944e-38, %v661_v57  ;;  %vm660_vm3 = vcmp.eq.f32.partialorder %v659_v61, 8.507059e+37  ;;  %v3083_v57 = vld [vmem:[%s3579_s3 + $0x108] sm:$0xff] }
 0x19b   :  { %v1789_v62 = vpop.eup %1788  ;;  %v3107_v61 = vld [vmem:[%s3579_s3 + $0xe8] sm:$0xff] }
 0x19c   :  { %v669_v50 = vadd.f32 1.0, %v1789_v62  ;;  %v3017_v62 = vld [vmem:[%s3579_s3 + $0x170] sm:$0xff] }
 0x19d   :  { %v1791_v60 = vpop.eup %1790 }
 0x19e   :  { %v1793_v45 = vpop.eup %1792  ;;  %v632_v58 = vmul.f32 %v1791_v60, %v630_v47  ;;  %1794 = vrcp.f32 %v669_v50  ;;  %vm637_vm12 = vweird.f32 %v1791_v60  ;;  %v681_v20 = vand.u32 2147483648, %v669_v50  ;;  %v2987_v47 = vld [vmem:[%s3579_s3 + $0x188] sm:$0xff] }
 0x19f   :  { %v651_v51 = vmul.f32 %v1793_v45, %v649_v55  ;;  %1796 = vtanh.f32 %v625_v44  ;;  %vm656_vm13 = vweird.f32 %v1793_v45  ;;  %vm638_vm0 = vmor %vm636_vm14, %vm637_vm12  ;;  %vm675_vm5 = vweird.f32 %v669_v50  ;;  %v2993_v55 = vld [vmem:[%s3579_s3 + $0x190] sm:$0xff] }
 0x1a0   :  { %v633_v13 = vsub.f32 1.0, %v632_v58  ;;  %vm657_vm1 = vmor %vm655_vm15, %vm656_vm13  ;;  %v679_v21 = vand.u32 2147483647, %v669_v50  ;;  %v682_v23 = vor.u32 1.1754944e-38, %v681_v20  ;;  %v3041_v44 = vld [vmem:[%s3579_s3 + $0x150] sm:$0xff]  ;;  %v3053_v58 = vld [vmem:[%s3579_s3 + $0x120] sm:$0xff] }
 0x1a1   :  { %v652_v53 = vsub.f32 1.0, %v651_v51  ;;  %v3059_v51 = vld [vmem:[%s3579_s3 + $0x128] sm:$0xff]  ;;  %v3215_v20 = vld [vmem:[%s3579_s3 + $0x78] sm:$0xff] }
 0x1a2   :  { %v634_v26 = vmul.f32 %v1791_v60, %v633_v13  ;;  %vm680_vm7 = vcmp.eq.f32.partialorder %v679_v21, 8.507059e+37  ;;  %v3065_v13 = vld [vmem:[%s3579_s3 + $0x130] sm:$0xff]  ;;  %3784 = vst [vmem:[#allocation18_spill] sm:$0xff] %v3215_v20  ;;  %v3221_v21 = vld [vmem:[%s3579_s3 + $0x40] sm:$0xff] }
 0x1a3   :  { %v653_v63 = vmul.f32 %v1793_v45, %v652_v53  ;;  %v3071_v53 = vld [vmem:[%s3579_s3 + $0x138] sm:$0xff]  ;;  %3785 = vst [vmem:[#allocation21_spill] sm:$0xff] %v3221_v21 }
 0x1a4   :  { %v1795_v1 = vpop.eup %1794  ;;  %v635_v2 = vadd.f32 %v1791_v60, %v634_v26  ;;  %v3089_v26 = vld [vmem:[%s3579_s3 + $0x110] sm:$0xff] }
 0x1a5   :  { %v654_v4 = vadd.f32 %v1793_v45, %v653_v63  ;;  %v671_v5 = vmul.f32 %v1795_v1, %v669_v50  ;;  %v1797_v8 = vpop.eup %1796  ;;  %vm676_vm4 = vweird.f32 %v1795_v1  ;;  %v3023_v50 = vld [vmem:[%s3579_s3 + $0x178] sm:$0xff]  ;;  %v3101_v63 = vld [vmem:[%s3579_s3 + $0xe0] sm:$0xff] }
 0x1a6   :  { %v639_v7 = vsel %vm638_vm0, %v1791_v60, %v635_v2  ;;  %vm677_vm6 = vmor %vm675_vm5, %vm676_vm4  ;;  %v3029_v60 = vld [vmem:[%s3579_s3 + $0x140] sm:$0xff]  ;;  %v3119_v2 = vld [vmem:[%s3579_s3 + $0xf8] sm:$0xff] }
 0x1a7   :  { %v644_v9 = vsel %vm641_vm2, %v643_v3, %v639_v7  ;;  %v658_v10 = vsel %vm657_vm1, %v1793_v45, %v654_v4  ;;  %v672_v11 = vsub.f32 1.0, %v671_v5  ;;  %v3047_v45 = vld [vmem:[%s3579_s3 + $0x158] sm:$0xff]  ;;  %v3125_v3 = vld [vmem:[%s3579_s3 + $0xc0] sm:$0xff]  ;;  %v3131_v4 = vld [vmem:[%s3579_s3 + $0xc8] sm:$0xff] }
 0x1a8   :  { %v663_v12 = vsel %vm660_vm3, %v662_v6, %v658_v10  ;;  %v686_v14 = vmul.f32 %v1797_v8, %v644_v9  ;;  %3770 = vst [vmem:[#allocation7_spill] sm:$0xff] %v3131_v4  ;;  %v3137_v5 = vld [vmem:[%s3579_s3 + $0xd0] sm:$0xff]  ;;  %v3143_v6 = vld [vmem:[%s3579_s3 + $0xd8] sm:$0xff]  ;;  %v3149_v7 = vld [vmem:[%s3579_s3 + $0xa0] sm:$0xff] }
 0x1a9   :  { %v685_v15 = vmul.f32 %v663_v12, %v2816_v0  ;;  %v673_v16 = vmul.f32 %v1795_v1, %v672_v11  ;;  %v533_v0 = vmul.f32 %v531_v17, %v2819_v39  ;;  %v2921_v39 = vld [vmem:[%s3579_s3 + $0x1f0] sm:$0xff]  ;;  %3771 = vst [vmem:[#allocation6_spill] sm:$0xff] %v3137_v5  ;;  %v3155_v8 = vld [vmem:[%s3579_s3 + $0xa8] sm:$0xff]  ;;  %v3167_v10 = vld [vmem:[%s3579_s3 + $0xb8] sm:$0xff] }
 0x1aa   :  { %3772 = vst [vmem:[#allocation8_spill] sm:$0xff] %v3143_v6  ;;  %v3161_v9 = vld [vmem:[%s3579_s3 + $0xb0] sm:$0xff]  ;;  %v3173_v11 = vld [vmem:[%s3579_s3 + $0x80] sm:$0xff]  ;;  %v3179_v12 = vld [vmem:[%s3579_s3 + $0x88] sm:$0xff] }
 0x1ab   :  { %v2900_v18 = vadd.f32 %v686_v14, %v685_v15  ;;  %v674_v19 = vadd.f32 %v1795_v1, %v673_v16  ;;  %3773 = vst [vmem:[#allocation9_spill] sm:$0xff] %v3149_v7  ;;  %v3185_v14 = vld [vmem:[%s3579_s3 + $0x90] sm:$0xff]  ;;  %v3191_v15 = vld [vmem:[%s3579_s3 + $0x98] sm:$0xff]  ;;  %v3197_v16 = vld [vmem:[%s3579_s3 + $0x60] sm:$0xff] }
 0x1ac   :  { %3774 = vst [vmem:[#allocation11_spill] sm:$0xff] %v3155_v8  ;;  %v3203_v17 = vld [vmem:[%s3579_s3 + $0x68] sm:$0xff] }
 0x1ad   :  { %1798 = vtanh.f32 %v2900_v18  ;;  %v678_v22 = vsel %vm677_vm6, %v1795_v1, %v674_v19  ;;  %v3113_v1 = vld [vmem:[%s3579_s3 + $0xf0] sm:$0xff]  ;;  %3775 = vst [vmem:[#allocation10_spill] sm:$0xff] %v3161_v9 }
 0x1ae   :  { %v683_v27 = vsel %vm680_vm7, %v682_v23, %v678_v22  ;;  %3776 = vst [vmem:[#allocation12_spill] sm:$0xff] %v3167_v10  ;;  %v3209_v19 = vld [vmem:[%s3579_s3 + $0x70] sm:$0xff]  ;;  %v3227_v22 = vld [vmem:[%s3579_s3 + $0x48] sm:$0xff] }
 0x1af   :  { %3777 = vst [vmem:[#allocation13_spill] sm:$0xff] %v3173_v11  ;;  %v3233_v23 = vld [vmem:[%s3579_s3 + $0x50] sm:$0xff] }
 0x1b0   :  { %3778 = vst [vmem:[#allocation15_spill] sm:$0xff] %v3179_v12 }
 0x1b1   :  { %3779 = vst [vmem:[#allocation14_spill] sm:$0xff] %v3185_v14 }
 0x1b2   :  { %3780 = vst [vmem:[#allocation16_spill] sm:$0xff] %v3191_v15 }
 0x1b3   :  { %v1799_v24 = vpop.eup %1798  ;;  %3781 = vst [vmem:[#allocation17_spill] sm:$0xff] %v3197_v16 }
 0x1b4   :  { %v689_v28 = vmul.f32 %v1799_v24, %v683_v27  ;;  %3782 = vst [vmem:[#allocation20_spill] sm:$0xff] %v3203_v17  ;;  %v3239_v24 = vld [vmem:[%s3579_s3 + $0x58] sm:$0xff]  ;;  %v3251_v27 = vld [vmem:[%s3579_s3 + $0x28] sm:$0xff] }
 0x1b5   :  { %3783 = vst [vmem:[#allocation19_spill] sm:$0xff] %v3209_v19 }
 0x1b6   :  { %v697_v29 = vmul.f32 %v695_v25, %v689_v28  ;;  %723 = vmatmul.f32.vlgmr.msrb.gmra.mxu0 %v689_v28  ;;  %743 = vmatmul.f32.vlgmr.msrb.gmra.mxu1 %v689_v28  ;;  %3786 = vst [vmem:[#allocation24_spill] sm:$0xff] %v3227_v22  ;;  %v3245_v25 = vld [vmem:[%s3579_s3 + $0x20] sm:$0xff] }
 0x1b7   :  { %763 = vmatmul.f32.vlgmr.msrb.gmra.mxu2 %v689_v28  ;;  %783 = vmatmul.f32.vlgmr.msrb.gmra.mxu3 %v689_v28  ;;  %3787 = vst [vmem:[#allocation23_spill] sm:$0xff] %v3233_v23  ;;  %v3257_v28 = vld [vmem:[%s3579_s3 + $0x30] sm:$0xff] }
 0x1b8   :  { %v2904_v30 = vadd.f32 %v697_v29, %v533_v0  ;;  %1035 = vmatpush.msrb.mxu0 %v2909_v31  ;;  %1055 = vmatpush.msrb.mxu1 %v2915_v32  ;;  %3788 = vst [vmem:[#allocation26_spill] sm:$0xff] %v3239_v24  ;;  %v3263_v0 = vld [vmem:[%s3579_s3 + $0x38] sm:$0xff]  ;;  %v3269_v29 = vld [vmem:[%s3579_s3] sm:$0xff] }
 0x1b9   :  { %1075 = vmatpush.msrb.mxu2 %v2921_v39  ;;  %1095 = vmatpush.msrb.mxu3 %v2927_v33  ;;  %3789 = vst [vmem:[#allocation27_spill] sm:$0xff] %v3245_v25 }
 0x1ba   :  { %1036 = vmatpush.msrb.mxu0 %v2933_v34  ;;  %1056 = vmatpush.msrb.mxu1 %v2939_v35  ;;  %3790 = vst [vmem:[#allocation28_spill] sm:$0xff] %v3251_v27 }
 0x1bb   :  { %1076 = vmatpush.msrb.mxu2 %v2945_v36  ;;  %1096 = vmatpush.msrb.mxu3 %v2951_v37  ;;  %3791 = vst [vmem:[#allocation29_spill] sm:$0xff] %v3257_v28 }
 0x1bc   :  { %1037 = vmatpush.msrb.mxu0 %v2957_v38  ;;  %1057 = vmatpush.msrb.mxu1 %v2963_v40  ;;  %3792 = vst [vmem:[#allocation30_spill] sm:$0xff] %v3263_v0 }
 0x1bd   :  { %1077 = vmatpush.msrb.mxu2 %v2969_v41  ;;  %1097 = vmatpush.msrb.mxu3 %v2975_v42  ;;  %3793 = vst [vmem:[#allocation31_spill] sm:$0xff] %v3269_v29 }
 0x1be   :  { %1038 = vmatpush.msrb.mxu0 %v2981_v43  ;;  %1058 = vmatpush.msrb.mxu1 %v2987_v47 }
 0x1bf   :  { %1078 = vmatpush.msrb.mxu2 %v2993_v55  ;;  %1098 = vmatpush.msrb.mxu3 %v2999_v46 }
 0x1c0   :  { %1039 = vmatpush.msrb.mxu0 %v3005_v52  ;;  %1059 = vmatpush.msrb.mxu1 %v3011_v56 }
 0x1c1   :  { %1079 = vmatpush.msrb.mxu2 %v3017_v62  ;;  %1099 = vmatpush.msrb.mxu3 %v3023_v50 }
 0x1c2   :  { %1040 = vmatpush.msrb.mxu0 %v3029_v60  ;;  %1060 = vmatpush.msrb.mxu1 %v3035_v49 }
 0x1c3   :  { %1080 = vmatpush.msrb.mxu2 %v3041_v44  ;;  %1100 = vmatpush.msrb.mxu3 %v3047_v45 }
 0x1c4   :  { %1041 = vmatpush.msrb.mxu0 %v3053_v58  ;;  %1061 = vmatpush.msrb.mxu1 %v3059_v51 }
 0x1c5   :  { %1081 = vmatpush.msrb.mxu2 %v3065_v13  ;;  %1101 = vmatpush.msrb.mxu3 %v3071_v53 }
 0x1c6   :  { %1042 = vmatpush.msrb.mxu0 %v3077_v48  ;;  %1062 = vmatpush.msrb.mxu1 %v3083_v57 }
 0x1c7   :  { %1082 = vmatpush.msrb.mxu2 %v3089_v26  ;;  %1102 = vmatpush.msrb.mxu3 %v3095_v54 }
 0x1c8   :  { %1043 = vmatpush.msrb.mxu0 %v3101_v63  ;;  %1063 = vmatpush.msrb.mxu1 %v3107_v61 }
 0x1c9   :  { %1083 = vmatpush.msrb.mxu2 %v3113_v1  ;;  %1103 = vmatpush.msrb.mxu3 %v3119_v2 }
 0x1ca   :  { %1044 = vmatpush.msrb.mxu0 %v3125_v3  ;;  %1064 = vmatpush.msrb.mxu1 %v3131_v4 }
 0x1cb   :  { %1084 = vmatpush.msrb.mxu2 %v3137_v5  ;;  %1104 = vmatpush.msrb.mxu3 %v3143_v6 }
 0x1cc   :  { %1045 = vmatpush.msrb.mxu0 %v3149_v7  ;;  %1065 = vmatpush.msrb.mxu1 %v3155_v8 }
 0x1cd   :  { %1085 = vmatpush.msrb.mxu2 %v3161_v9  ;;  %1105 = vmatpush.msrb.mxu3 %v3167_v10 }
 0x1ce   :  { %1046 = vmatpush.msrb.mxu0 %v3173_v11  ;;  %1066 = vmatpush.msrb.mxu1 %v3179_v12 }
 0x1cf   :  { %1086 = vmatpush.msrb.mxu2 %v3185_v14  ;;  %1106 = vmatpush.msrb.mxu3 %v3191_v15 }
 0x1d0   :  { %1047 = vmatpush.msrb.mxu0 %v3197_v16  ;;  %1067 = vmatpush.msrb.mxu1 %v3203_v17  ;;  %v3799_v17 = vld [vmem:[#allocation40_spill] sm:$0xff] }
 0x1d1   :  { %1087 = vmatpush.msrb.mxu2 %v3209_v19  ;;  %1107 = vmatpush.msrb.mxu3 %v3215_v20 }
 0x1d2   :  { %1048 = vmatpush.msrb.mxu0 %v3221_v21  ;;  %1068 = vmatpush.msrb.mxu1 %v3227_v22  ;;  %v3798_v22 = vld [vmem:[#allocation38_spill] sm:$0xff] }
 0x1d3   :  { %1088 = vmatpush.msrb.mxu2 %v3233_v23  ;;  %1108 = vmatpush.msrb.mxu3 %v3239_v24  ;;  %v3797_v24 = vld [vmem:[#allocation37_spill] sm:$0xff] }
 0x1d4   :  { %1049 = vmatpush.msrb.mxu0 %v3245_v25  ;;  %1069 = vmatpush.msrb.mxu1 %v3251_v27  ;;  %v3275_v27 = vld [vmem:[%s3579_s3 + $0x8] sm:$0xff] }
 0x1d5   :  { %1089 = vmatpush.msrb.mxu2 %v3257_v28  ;;  %1109 = vmatpush.msrb.mxu3 %v3263_v0  ;;  %3794 = vst [vmem:[#allocation32_spill] sm:$0xff] %v3275_v27  ;;  %v3281_v28 = vld [vmem:[%s3579_s3 + $0x10] sm:$0xff]  ;;  %v3287_v0 = vld [vmem:[%s3579_s3 + $0x18] sm:$0xff] }
 0x1d6   :  { %1050 = vmatpush.msrb.mxu0 %v3269_v29  ;;  %1070 = vmatpush.msrb.mxu1 %v3275_v27  ;;  %3795 = vst [vmem:[#allocation33_spill] sm:$0xff] %v3281_v28 }
 0x1d7   :  { %1090 = vmatpush.msrb.mxu2 %v3281_v28  ;;  %3796 = vst [vmem:[#allocation22_spill] sm:$0xff] %v3287_v0  ;;  %1110 = vmatpush.msrb.mxu3 %v3287_v0 }
 0x233   :  { %v724_v29 = vpop.f32.mrf.mxu0  ;;  %v744_v25 = vpop.f32.mrf.mxu1 }
 0x234   :  { %v787_v23 = vadd.f32 %v724_v29, %v3797_v24  ;;  %v788_v27 = vadd.f32 %v744_v25, %v3798_v22  ;;  %v1746_v24 = vld [vmem:[%s3580_s1 + $0x18] sm:$0xff] }
 0x235   :  { %1022 = vperm.xlu1 %1766, %v1746_v24   ;;  %v3297_v22 = vadd.f32 %v1746_v24, %v2896_v59 }
 0x236   :  { %v1739_v21 = vmul.f32 -1.442695, %v787_v23  ;;  %v1740_v20 = vmul.f32 -1.442695, %v788_v27 }
 0x237   :  { %3800 = vst [vmem:[#allocation34_spill] sm:$0xff] %v3297_v22 }
 0x238   :  { %1800 = vpow2.f32 %v1739_v21 }
 0x239   :  { %1802 = vpow2.f32 %v1740_v20 }
 0x23a   :  { %v784_v19 = vpop.f32.mrf.mxu3  ;;  %v764_v20 = vpop.f32.mrf.mxu2 }
 0x23b   :  { %v790_v28 = vadd.f32 %v784_v19, %v3799_v17  ;;  %v3801_v19 = vld [vmem:[#allocation39_spill] sm:$0xff] }
 0x23c   :  { %v789_v25 = vadd.f32 %v764_v20, %v3801_v19 }
 0x23d   :  { %v1741_v16 = vmul.f32 -1.442695, %v790_v28 }
 0x23e   :  { %v1801_v15 = vpop.eup %1800 }
 0x23f   :  { %v1803_v14 = vpop.eup %1802  ;;  %v794_v12 = vadd.f32 1.0, %v1801_v15  ;;  %1804 = vpow2.f32 %v1741_v16 }
 0x240   :  { %v813_v11 = vadd.f32 1.0, %v1803_v14 }
 0x241   :  { %1806 = vrcp.f32 %v794_v12  ;;  %v806_v29 = vand.u32 2147483648, %v794_v12  ;;  %v804_v9 = vand.u32 2147483647, %v794_v12  ;;  %vm800_vm10 = vweird.f32 %v794_v12 }
 0x242   :  { %1808 = vrcp.f32 %v813_v11  ;;  %v825_v0 = vand.u32 2147483648, %v813_v11  ;;  %v823_v24 = vand.u32 2147483647, %v813_v11  ;;  %vm819_vm11 = vweird.f32 %v813_v11 }
 0x243   :  { %v807_v20 = vor.u32 1.1754944e-38, %v806_v29  ;;  %vm805_vm14 = vcmp.eq.f32.partialorder %v804_v9, 8.507059e+37 }
 0x244   :  { %vm824_vm15 = vcmp.eq.f32.partialorder %v823_v24, 8.507059e+37 }
 0x245   :  { %v1805_v21 = vpop.eup %1804 }
 0x246   :  { %v833_v23 = vadd.f32 1.0, %v1805_v21 }
 0x247   :  { %v1807_v17 = vpop.eup %1806 }
 0x248   :  { %v1809_v27 = vpop.eup %1808  ;;  %v796_v15 = vmul.f32 %v1807_v17, %v794_v12  ;;  %1810 = vrcp.f32 %v833_v23  ;;  %vm801_vm8 = vweird.f32 %v1807_v17  ;;  %v845_v29 = vand.u32 2147483648, %v833_v23 }
 0x249   :  { %v815_v14 = vmul.f32 %v1809_v27, %v813_v11  ;;  %1812 = vtanh.f32 %v789_v25  ;;  %vm820_vm9 = vweird.f32 %v1809_v27  ;;  %vm802_vm12 = vmor %vm800_vm10, %vm801_vm8  ;;  %vm839_vm1 = vweird.f32 %v833_v23 }
 0x24a   :  { %v797_v16 = vsub.f32 1.0, %v796_v15  ;;  %vm821_vm13 = vmor %vm819_vm11, %vm820_vm9  ;;  %v826_v15 = vor.u32 1.1754944e-38, %v825_v0  ;;  %v843_v0 = vand.u32 2147483647, %v833_v23 }
 0x24b   :  { %v816_v28 = vsub.f32 1.0, %v815_v14 }
 0x24c   :  { %v798_v10 = vmul.f32 %v1807_v17, %v797_v16  ;;  %vm844_vm3 = vcmp.eq.f32.partialorder %v843_v0, 8.507059e+37  ;;  %v3819_v0 = vld [vmem:[#allocation23_spill] sm:$0xff] }
 0x24d   :  { %v817_v59 = vmul.f32 %v1809_v27, %v816_v28 }
 0x24e   :  { %v1811_v22 = vpop.eup %1810  ;;  %v799_v21 = vadd.f32 %v1807_v17, %v798_v10 }
 0x24f   :  { %v818_v19 = vadd.f32 %v1809_v27, %v817_v59  ;;  %v835_v8 = vmul.f32 %v1811_v22, %v833_v23  ;;  %v1813_v25 = vpop.eup %1812  ;;  %vm840_vm0 = vweird.f32 %v1811_v22  ;;  %v3807_v23 = vld [vmem:[#allocation10_spill] sm:$0xff] }
 0x250   :  { %v803_v14 = vsel %vm802_vm12, %v1807_v17, %v799_v21  ;;  %vm841_vm2 = vmor %vm839_vm1, %vm840_vm0  ;;  %v846_v17 = vor.u32 1.1754944e-38, %v845_v29  ;;  %v3808_v21 = vld [vmem:[#allocation12_spill] sm:$0xff] }
 0x251   :  { %v808_v7 = vsel %vm805_vm14, %v807_v20, %v803_v14  ;;  %v822_v16 = vsel %vm821_vm13, %v1809_v27, %v818_v19  ;;  %v836_v6 = vsub.f32 1.0, %v835_v8  ;;  %v859_v8 = vpop.permute.xlu1 %858  ;;  %v3809_v20 = vld [vmem:[#allocation13_spill] sm:$0xff]  ;;  %v3810_v19 = vld [vmem:[#allocation15_spill] sm:$0xff]  ;;  %v3812_v14 = vld [vmem:[#allocation16_spill] sm:$0xff] }
 0x252   :  { %v827_v28 = vsel %vm824_vm15, %v826_v15, %v822_v16  ;;  %v850_v5 = vmul.f32 %v1813_v25, %v808_v7  ;;  %v3811_v15 = vld [vmem:[#allocation14_spill] sm:$0xff]  ;;  %v3813_v25 = vld [vmem:[#allocation17_spill] sm:$0xff]  ;;  %v3814_v16 = vld [vmem:[#allocation20_spill] sm:$0xff] }
 0x253   :  { %v849_v4 = vmul.f32 %v827_v28, %v2900_v18  ;;  %v837_v10 = vmul.f32 %v1811_v22, %v836_v6  ;;  %v3805_v6 = vld [vmem:[#allocation9_spill] sm:$0xff]  ;;  %v3815_v28 = vld [vmem:[#allocation19_spill] sm:$0xff]  ;;  %v3818_v29 = vld [vmem:[#allocation24_spill] sm:$0xff] }
 0x255   :  { %v3301_v12 = vadd.f32 %v850_v5, %v849_v4  ;;  %v838_v11 = vadd.f32 %v1811_v22, %v837_v10  ;;  %v3803_v4 = vld [vmem:[#allocation6_spill] sm:$0xff]  ;;  %v3804_v5 = vld [vmem:[#allocation8_spill] sm:$0xff] }
 0x256   :  { %v3816_v10 = vld [vmem:[#allocation18_spill] sm:$0xff] }
 0x257   :  { %1814 = vtanh.f32 %v3301_v12  ;;  %v842_v9 = vsel %vm841_vm2, %v1811_v22, %v838_v11  ;;  %v3806_v22 = vld [vmem:[#allocation11_spill] sm:$0xff]  ;;  %v3817_v11 = vld [vmem:[#allocation21_spill] sm:$0xff] }
 0x258   :  { %v847_v59 = vsel %vm844_vm3, %v846_v17, %v842_v9  ;;  %v3820_v9 = vld [vmem:[#allocation26_spill] sm:$0xff]  ;;  %v3821_v17 = vld [vmem:[#allocation27_spill] sm:$0xff] }
 0x25d   :  { %v1815_v27 = vpop.eup %1814 }
 0x25e   :  { %v853_v7 = vmul.f32 %v1815_v27, %v847_v59  ;;  %v3822_v27 = vld [vmem:[#allocation28_spill] sm:$0xff]  ;;  %v3824_v59 = vld [vmem:[#allocation30_spill] sm:$0xff] }
 0x260   :  { %v861_v24 = vmul.f32 %v859_v8, %v853_v7  ;;  %887 = vmatmul.f32.vlgmr.msra.gmra.mxu0 %v853_v7  ;;  %907 = vmatmul.f32.vlgmr.msra.gmra.mxu1 %v853_v7  ;;  %v3823_v8 = vld [vmem:[#allocation29_spill] sm:$0xff] }
 0x261   :  { %927 = vmatmul.f32.vlgmr.msra.gmra.mxu2 %v853_v7  ;;  %947 = vmatmul.f32.vlgmr.msra.gmra.mxu3 %v853_v7  ;;  %v3825_v7 = vld [vmem:[#allocation31_spill] sm:$0xff] }
 0x262   :  { %v3305_v18 = vadd.f32 %v861_v24, %v2904_v30  ;;  %1199 = vmatpush.msra.mxu0 %v2909_v31  ;;  %1219 = vmatpush.msra.mxu1 %v2915_v32  ;;  %v3802_v30 = vld [vmem:[#allocation7_spill] sm:$0xff]  ;;  %v3826_v24 = vld [vmem:[#allocation32_spill] sm:$0xff] }
 0x263   :  { %1239 = vmatpush.msra.mxu2 %v2921_v39  ;;  %1259 = vmatpush.msra.mxu3 %v2927_v33 }
 0x264   :  { %1200 = vmatpush.msra.mxu0 %v2933_v34  ;;  %1220 = vmatpush.msra.mxu1 %v2939_v35 }
 0x265   :  { %1240 = vmatpush.msra.mxu2 %v2945_v36  ;;  %1260 = vmatpush.msra.mxu3 %v2951_v37 }
 0x266   :  { %1201 = vmatpush.msra.mxu0 %v2957_v38  ;;  %1221 = vmatpush.msra.mxu1 %v2963_v40 }
 0x267   :  { %1241 = vmatpush.msra.mxu2 %v2969_v41  ;;  %1261 = vmatpush.msra.mxu3 %v2975_v42 }
 0x268   :  { %1202 = vmatpush.msra.mxu0 %v2981_v43  ;;  %1222 = vmatpush.msra.mxu1 %v2987_v47 }
 0x269   :  { %1242 = vmatpush.msra.mxu2 %v2993_v55  ;;  %1262 = vmatpush.msra.mxu3 %v2999_v46 }
 0x26a   :  { %1203 = vmatpush.msra.mxu0 %v3005_v52  ;;  %1223 = vmatpush.msra.mxu1 %v3011_v56 }
 0x26b   :  { %1243 = vmatpush.msra.mxu2 %v3017_v62  ;;  %1263 = vmatpush.msra.mxu3 %v3023_v50 }
 0x26c   :  { %1204 = vmatpush.msra.mxu0 %v3029_v60  ;;  %1224 = vmatpush.msra.mxu1 %v3035_v49 }
 0x26d   :  { %1244 = vmatpush.msra.mxu2 %v3041_v44  ;;  %1264 = vmatpush.msra.mxu3 %v3047_v45 }
 0x26e   :  { %1205 = vmatpush.msra.mxu0 %v3053_v58  ;;  %1225 = vmatpush.msra.mxu1 %v3059_v51 }
 0x26f   :  { %1245 = vmatpush.msra.mxu2 %v3065_v13  ;;  %1265 = vmatpush.msra.mxu3 %v3071_v53 }
 0x270   :  { %1206 = vmatpush.msra.mxu0 %v3077_v48  ;;  %1226 = vmatpush.msra.mxu1 %v3083_v57 }
 0x271   :  { %1246 = vmatpush.msra.mxu2 %v3089_v26  ;;  %1266 = vmatpush.msra.mxu3 %v3095_v54 }
 0x272   :  { %1207 = vmatpush.msra.mxu0 %v3101_v63  ;;  %1227 = vmatpush.msra.mxu1 %v3107_v61 }
 0x273   :  { %1247 = vmatpush.msra.mxu2 %v3113_v1  ;;  %1267 = vmatpush.msra.mxu3 %v3119_v2 }
 0x274   :  { %1208 = vmatpush.msra.mxu0 %v3125_v3  ;;  %1228 = vmatpush.msra.mxu1 %v3802_v30 }
 0x275   :  { %1248 = vmatpush.msra.mxu2 %v3803_v4  ;;  %1268 = vmatpush.msra.mxu3 %v3804_v5 }
 0x276   :  { %1209 = vmatpush.msra.mxu0 %v3805_v6  ;;  %1229 = vmatpush.msra.mxu1 %v3806_v22 }
 0x277   :  { %1249 = vmatpush.msra.mxu2 %v3807_v23  ;;  %1269 = vmatpush.msra.mxu3 %v3808_v21 }
 0x278   :  { %1210 = vmatpush.msra.mxu0 %v3809_v20  ;;  %1230 = vmatpush.msra.mxu1 %v3810_v19 }
 0x279   :  { %1250 = vmatpush.msra.mxu2 %v3811_v15  ;;  %1270 = vmatpush.msra.mxu3 %v3812_v14 }
 0x27a   :  { %1211 = vmatpush.msra.mxu0 %v3813_v25  ;;  %1231 = vmatpush.msra.mxu1 %v3814_v16  ;;  %v3830_v16 = vld [vmem:[#allocation42_spill] sm:$0xff] }
 0x27b   :  { %1251 = vmatpush.msra.mxu2 %v3815_v28  ;;  %1271 = vmatpush.msra.mxu3 %v3816_v10  ;;  %v3827_v10 = vld [vmem:[#allocation33_spill] sm:$0xff] }
 0x27c   :  { %1212 = vmatpush.msra.mxu0 %v3817_v11  ;;  %1232 = vmatpush.msra.mxu1 %v3818_v29  ;;  %v3828_v11 = vld [vmem:[#allocation22_spill] sm:$0xff]  ;;  %v3829_v28 = vld [vmem:[#allocation41_spill] sm:$0xff] }
 0x27d   :  { %1252 = vmatpush.msra.mxu2 %v3819_v0  ;;  %1272 = vmatpush.msra.mxu3 %v3820_v9 }
 0x27e   :  { %1213 = vmatpush.msra.mxu0 %v3821_v17  ;;  %1233 = vmatpush.msra.mxu1 %v3822_v27 }
 0x27f   :  { %1253 = vmatpush.msra.mxu2 %v3823_v8  ;;  %1273 = vmatpush.msra.mxu3 %v3824_v59  ;;  %v3831_v59 = vld [vmem:[#allocation44_spill] sm:$0xff] }
 0x280   :  { %1214 = vmatpush.msra.mxu0 %v3825_v7  ;;  %1234 = vmatpush.msra.mxu1 %v3826_v24 }
 0x281   :  { %1254 = vmatpush.msra.mxu2 %v3827_v10  ;;  %1274 = vmatpush.msra.mxu3 %v3828_v11 }
 0x2dd   :  { %v888_v29 = vpop.f32.mrf.mxu0  ;;  %v908_v0 = vpop.f32.mrf.mxu1 }
 0x2de   :  { %v951_v9 = vadd.f32 %v888_v29, %v3829_v28  ;;  %v952_v17 = vadd.f32 %v908_v0, %v3830_v16  ;;  %v1750_v28 = vld [vmem:[%s3580_s1 + $0x20] sm:$0xff]  ;;  %v3832_v16 = vld [vmem:[#allocation34_spill] sm:$0xff] }
 0x2df   :  { %1186 = vperm.xlu2 %1767, %v1750_v28   ;;  %v3378_v29 = vadd.f32 %v1750_v28, %v3832_v16 }
 0x2e0   :  { %v1743_v25 = vmul.f32 -1.442695, %v951_v9  ;;  %v1744_v27 = vmul.f32 -1.442695, %v952_v17 }
 0x2e1   :  { %3833 = vst [vmem:[#allocation36_spill] sm:$0xff] %v3378_v29 }
 0x2e2   :  { %1816 = vpow2.f32 %v1743_v25 }
 0x2e3   :  { %1818 = vpow2.f32 %v1744_v27 }
 0x2e4   :  { %v948_v8 = vpop.f32.mrf.mxu3  ;;  %v928_v25 = vpop.f32.mrf.mxu2 }
 0x2e5   :  { %v954_v14 = vadd.f32 %v948_v8, %v3831_v59 }
 0x2e7   :  { %v1745_v7 = vmul.f32 -1.442695, %v954_v14  ;;  %v3834_v14 = vld [vmem:[#allocation43_spill] sm:$0xff] }
 0x2e8   :  { %v1817_v15 = vpop.eup %1816  ;;  %v953_v27 = vadd.f32 %v928_v25, %v3834_v14 }
 0x2e9   :  { %v1819_v24 = vpop.eup %1818  ;;  %v958_v19 = vadd.f32 1.0, %v1817_v15  ;;  %1820 = vpow2.f32 %v1745_v7 }
 0x2ea   :  { %v977_v10 = vadd.f32 1.0, %v1819_v24 }
 0x2eb   :  { %1822 = vrcp.f32 %v958_v19  ;;  %v970_v11 = vand.u32 2147483648, %v958_v19  ;;  %v968_v23 = vand.u32 2147483647, %v958_v19  ;;  %vm964_vm6 = vweird.f32 %v958_v19 }
 0x2ec   :  { %1824 = vrcp.f32 %v977_v10  ;;  %v989_v20 = vand.u32 2147483648, %v977_v10  ;;  %v987_v16 = vand.u32 2147483647, %v977_v10  ;;  %vm983_vm7 = vweird.f32 %v977_v10 }
 0x2ed   :  { %v971_v25 = vor.u32 1.1754944e-38, %v970_v11  ;;  %vm969_vm10 = vcmp.eq.f32.partialorder %v968_v23, 8.507059e+37 }
 0x2ee   :  { %vm988_vm11 = vcmp.eq.f32.partialorder %v987_v16, 8.507059e+37 }
 0x2ef   :  { %v1821_v0 = vpop.eup %1820 }
 0x2f0   :  { %v997_v9 = vadd.f32 1.0, %v1821_v0 }
 0x2f1   :  { %v1823_v17 = vpop.eup %1822 }
 0x2f2   :  { %v1825_v8 = vpop.eup %1824  ;;  %v960_v15 = vmul.f32 %v1823_v17, %v958_v19  ;;  %1826 = vrcp.f32 %v997_v9  ;;  %vm965_vm4 = vweird.f32 %v1823_v17  ;;  %v1009_v11 = vand.u32 2147483648, %v997_v9 }
 0x2f3   :  { %v979_v59 = vmul.f32 %v1825_v8, %v977_v10  ;;  %1828 = vtanh.f32 %v953_v27  ;;  %vm984_vm5 = vweird.f32 %v1825_v8  ;;  %vm966_vm8 = vmor %vm964_vm6, %vm965_vm4  ;;  %vm1003_vm13 = vweird.f32 %v997_v9 }
 0x2f4   :  { %v961_v7 = vsub.f32 1.0, %v960_v15  ;;  %vm985_vm9 = vmor %vm983_vm7, %vm984_vm5  ;;  %v990_v15 = vor.u32 1.1754944e-38, %v989_v20  ;;  %v1007_v20 = vand.u32 2147483647, %v997_v9 }
 0x2f5   :  { %v980_v24 = vsub.f32 1.0, %v979_v59 }
 0x2f6   :  { %v962_v21 = vmul.f32 %v1823_v17, %v961_v7  ;;  %vm1008_vm15 = vcmp.eq.f32.partialorder %v1007_v20, 8.507059e+37  ;;  %v3852_v20 = vld [vmem:[#allocation23_spill] sm:$0xff] }
 0x2f7   :  { %v981_v28 = vmul.f32 %v1825_v8, %v980_v24 }
 0x2f8   :  { %v1827_v29 = vpop.eup %1826  ;;  %v963_v0 = vadd.f32 %v1823_v17, %v962_v21 }
 0x2f9   :  { %v982_v14 = vadd.f32 %v1825_v8, %v981_v28  ;;  %v999_v22 = vmul.f32 %v1827_v29, %v997_v9  ;;  %v1829_v27 = vpop.eup %1828  ;;  %vm1004_vm12 = vweird.f32 %v1827_v29  ;;  %v3840_v9 = vld [vmem:[#allocation10_spill] sm:$0xff] }
 0x2fa   :  { %v967_v59 = vsel %vm966_vm8, %v1823_v17, %v963_v0  ;;  %vm1005_vm14 = vmor %vm1003_vm13, %vm1004_vm12  ;;  %v1010_v17 = vor.u32 1.1754944e-38, %v1009_v11  ;;  %v3841_v0 = vld [vmem:[#allocation12_spill] sm:$0xff] }
 0x2fb   :  { %v972_v6 = vsel %vm969_vm10, %v971_v25, %v967_v59  ;;  %v986_v7 = vsel %vm985_vm9, %v1825_v8, %v982_v14  ;;  %v1000_v5 = vsub.f32 1.0, %v999_v22  ;;  %v1023_v22 = vpop.permute.xlu1 %1022  ;;  %v3842_v25 = vld [vmem:[#allocation13_spill] sm:$0xff]  ;;  %v3843_v14 = vld [vmem:[#allocation15_spill] sm:$0xff]  ;;  %v3845_v59 = vld [vmem:[#allocation16_spill] sm:$0xff] }
 0x2fc   :  { %v991_v24 = vsel %vm988_vm11, %v990_v15, %v986_v7  ;;  %v1014_v4 = vmul.f32 %v1829_v27, %v972_v6  ;;  %v3844_v15 = vld [vmem:[#allocation14_spill] sm:$0xff]  ;;  %v3846_v27 = vld [vmem:[#allocation17_spill] sm:$0xff]  ;;  %v3847_v7 = vld [vmem:[#allocation20_spill] sm:$0xff] }
 0x2fd   :  { %v1013_v30 = vmul.f32 %v991_v24, %v3301_v12  ;;  %v1001_v21 = vmul.f32 %v1827_v29, %v1000_v5  ;;  %v3838_v5 = vld [vmem:[#allocation9_spill] sm:$0xff]  ;;  %v3848_v24 = vld [vmem:[#allocation19_spill] sm:$0xff]  ;;  %v3851_v11 = vld [vmem:[#allocation24_spill] sm:$0xff] }
 0x2ff   :  { %v3382_v19 = vadd.f32 %v1014_v4, %v1013_v30  ;;  %v1002_v10 = vadd.f32 %v1827_v29, %v1001_v21  ;;  %v3836_v30 = vld [vmem:[#allocation6_spill] sm:$0xff]  ;;  %v3837_v4 = vld [vmem:[#allocation8_spill] sm:$0xff] }
 0x300   :  { %v3849_v21 = vld [vmem:[#allocation18_spill] sm:$0xff] }
 0x301   :  { %1830 = vtanh.f32 %v3382_v19  ;;  %v1006_v23 = vsel %vm1005_vm14, %v1827_v29, %v1002_v10  ;;  %v3839_v29 = vld [vmem:[#allocation11_spill] sm:$0xff]  ;;  %v3850_v10 = vld [vmem:[#allocation21_spill] sm:$0xff] }
 0x302   :  { %v1011_v28 = vsel %vm1008_vm15, %v1010_v17, %v1006_v23  ;;  %v3853_v23 = vld [vmem:[#allocation26_spill] sm:$0xff]  ;;  %v3854_v17 = vld [vmem:[#allocation27_spill] sm:$0xff] }
 0x307   :  { %v1831_v8 = vpop.eup %1830 }
 0x308   :  { %v1017_v6 = vmul.f32 %v1831_v8, %v1011_v28  ;;  %v3855_v8 = vld [vmem:[#allocation28_spill] sm:$0xff]  ;;  %v3857_v28 = vld [vmem:[#allocation30_spill] sm:$0xff] }
 0x30a   :  { %v1025_v16 = vmul.f32 %v1023_v22, %v1017_v6  ;;  %1051 = vmatmul.f32.vlgmr.msrb.gmra.mxu0 %v1017_v6  ;;  %1071 = vmatmul.f32.vlgmr.msrb.gmra.mxu1 %v1017_v6  ;;  %v3856_v22 = vld [vmem:[#allocation29_spill] sm:$0xff] }
 0x30b   :  { %1091 = vmatmul.f32.vlgmr.msrb.gmra.mxu2 %v1017_v6  ;;  %1111 = vmatmul.f32.vlgmr.msrb.gmra.mxu3 %v1017_v6  ;;  %v3858_v6 = vld [vmem:[#allocation31_spill] sm:$0xff] }
 0x30c   :  { %v3386_v12 = vadd.f32 %v1025_v16, %v3305_v18  ;;  %1363 = vmatpush.msrb.mxu0 %v2909_v31  ;;  %1383 = vmatpush.msrb.mxu1 %v2915_v32  ;;  %v3835_v18 = vld [vmem:[#allocation7_spill] sm:$0xff]  ;;  %v3859_v16 = vld [vmem:[#allocation32_spill] sm:$0xff] }
 0x30d   :  { %1403 = vmatpush.msrb.mxu2 %v2921_v39  ;;  %1423 = vmatpush.msrb.mxu3 %v2927_v33 }
 0x30e   :  { %1364 = vmatpush.msrb.mxu0 %v2933_v34  ;;  %1384 = vmatpush.msrb.mxu1 %v2939_v35 }
 0x30f   :  { %1404 = vmatpush.msrb.mxu2 %v2945_v36  ;;  %1424 = vmatpush.msrb.mxu3 %v2951_v37 }
 0x310   :  { %1365 = vmatpush.msrb.mxu0 %v2957_v38  ;;  %1385 = vmatpush.msrb.mxu1 %v2963_v40 }
 0x311   :  { %1405 = vmatpush.msrb.mxu2 %v2969_v41  ;;  %1425 = vmatpush.msrb.mxu3 %v2975_v42 }
 0x312   :  { %1366 = vmatpush.msrb.mxu0 %v2981_v43  ;;  %1386 = vmatpush.msrb.mxu1 %v2987_v47 }
 0x313   :  { %1406 = vmatpush.msrb.mxu2 %v2993_v55  ;;  %1426 = vmatpush.msrb.mxu3 %v2999_v46 }
 0x314   :  { %1367 = vmatpush.msrb.mxu0 %v3005_v52  ;;  %1387 = vmatpush.msrb.mxu1 %v3011_v56 }
 0x315   :  { %1407 = vmatpush.msrb.mxu2 %v3017_v62  ;;  %1427 = vmatpush.msrb.mxu3 %v3023_v50 }
 0x316   :  { %1368 = vmatpush.msrb.mxu0 %v3029_v60  ;;  %1388 = vmatpush.msrb.mxu1 %v3035_v49 }
 0x317   :  { %1408 = vmatpush.msrb.mxu2 %v3041_v44  ;;  %1428 = vmatpush.msrb.mxu3 %v3047_v45 }
 0x318   :  { %1369 = vmatpush.msrb.mxu0 %v3053_v58  ;;  %1389 = vmatpush.msrb.mxu1 %v3059_v51 }
 0x319   :  { %1409 = vmatpush.msrb.mxu2 %v3065_v13  ;;  %1429 = vmatpush.msrb.mxu3 %v3071_v53 }
 0x31a   :  { %1370 = vmatpush.msrb.mxu0 %v3077_v48  ;;  %1390 = vmatpush.msrb.mxu1 %v3083_v57 }
 0x31b   :  { %1410 = vmatpush.msrb.mxu2 %v3089_v26  ;;  %1430 = vmatpush.msrb.mxu3 %v3095_v54 }
 0x31c   :  { %1371 = vmatpush.msrb.mxu0 %v3101_v63  ;;  %1391 = vmatpush.msrb.mxu1 %v3107_v61 }
 0x31d   :  { %1411 = vmatpush.msrb.mxu2 %v3113_v1  ;;  %1431 = vmatpush.msrb.mxu3 %v3119_v2 }
 0x31e   :  { %1372 = vmatpush.msrb.mxu0 %v3125_v3  ;;  %1392 = vmatpush.msrb.mxu1 %v3835_v18 }
 0x31f   :  { %1412 = vmatpush.msrb.mxu2 %v3836_v30  ;;  %1432 = vmatpush.msrb.mxu3 %v3837_v4 }
 0x320   :  { %1373 = vmatpush.msrb.mxu0 %v3838_v5  ;;  %1393 = vmatpush.msrb.mxu1 %v3839_v29 }
 0x321   :  { %1413 = vmatpush.msrb.mxu2 %v3840_v9  ;;  %1433 = vmatpush.msrb.mxu3 %v3841_v0 }
 0x322   :  { %1374 = vmatpush.msrb.mxu0 %v3842_v25  ;;  %1394 = vmatpush.msrb.mxu1 %v3843_v14 }
 0x323   :  { %1414 = vmatpush.msrb.mxu2 %v3844_v15  ;;  %1434 = vmatpush.msrb.mxu3 %v3845_v59 }
 0x324   :  { %1375 = vmatpush.msrb.mxu0 %v3846_v27  ;;  %1395 = vmatpush.msrb.mxu1 %v3847_v7  ;;  %v3863_v7 = vld [vmem:[#allocation46_spill] sm:$0xff] }
 0x325   :  { %1415 = vmatpush.msrb.mxu2 %v3848_v24  ;;  %1435 = vmatpush.msrb.mxu3 %v3849_v21  ;;  %v3860_v21 = vld [vmem:[#allocation33_spill] sm:$0xff] }
 0x326   :  { %1376 = vmatpush.msrb.mxu0 %v3850_v10  ;;  %1396 = vmatpush.msrb.mxu1 %v3851_v11  ;;  %v3861_v10 = vld [vmem:[#allocation22_spill] sm:$0xff]  ;;  %v3862_v24 = vld [vmem:[#allocation45_spill] sm:$0xff] }
 0x327   :  { %1416 = vmatpush.msrb.mxu2 %v3852_v20  ;;  %1436 = vmatpush.msrb.mxu3 %v3853_v23 }
 0x328   :  { %1377 = vmatpush.msrb.mxu0 %v3854_v17  ;;  %1397 = vmatpush.msrb.mxu1 %v3855_v8 }
 0x329   :  { %1417 = vmatpush.msrb.mxu2 %v3856_v22  ;;  %1437 = vmatpush.msrb.mxu3 %v3857_v28  ;;  %v3864_v28 = vld [vmem:[#allocation48_spill] sm:$0xff] }
 0x32a   :  { %1378 = vmatpush.msrb.mxu0 %v3858_v6  ;;  %1398 = vmatpush.msrb.mxu1 %v3859_v16 }
 0x32b   :  { %1418 = vmatpush.msrb.mxu2 %v3860_v21  ;;  %1438 = vmatpush.msrb.mxu3 %v3861_v10 }
 0x387   :  { %v1052_v11 = vpop.f32.mrf.mxu0  ;;  %v1072_v20 = vpop.f32.mrf.mxu1 }
 0x388   :  { %v1115_v23 = vadd.f32 %v1052_v11, %v3862_v24  ;;  %v1116_v17 = vadd.f32 %v1072_v20, %v3863_v7  ;;  %v1754_v24 = vld [vmem:[%s3580_s1 + $0x28] sm:$0xff]  ;;  %v3865_v7 = vld [vmem:[#allocation36_spill] sm:$0xff] }
 0x389   :  { %1350 = vperm.xlu2 %1767, %v1754_v24   ;;  %v3459_v11 = vadd.f32 %v1754_v24, %v3865_v7 }
 0x38a   :  { %v1747_v27 = vmul.f32 -1.442695, %v1115_v23  ;;  %v1748_v8 = vmul.f32 -1.442695, %v1116_v17 }
 0x38b   :  { %3866 = vst [vmem:[#allocation25_spill] sm:$0xff] %v3459_v11 }
 0x38c   :  { %1832 = vpow2.f32 %v1747_v27 }
 0x38d   :  { %1834 = vpow2.f32 %v1748_v8 }
 0x38e   :  { %v1112_v22 = vpop.f32.mrf.mxu3  ;;  %v1092_v27 = vpop.f32.mrf.mxu2 }
 0x38f   :  { %v1118_v59 = vadd.f32 %v1112_v22, %v3864_v28 }
 0x391   :  { %v1749_v6 = vmul.f32 -1.442695, %v1118_v59  ;;  %v3867_v59 = vld [vmem:[#allocation47_spill] sm:$0xff] }
 0x392   :  { %v1833_v15 = vpop.eup %1832  ;;  %v1117_v8 = vadd.f32 %v1092_v27, %v3867_v59 }
 0x393   :  { %v1835_v16 = vpop.eup %1834  ;;  %v1122_v14 = vadd.f32 1.0, %v1833_v15  ;;  %1836 = vpow2.f32 %v1749_v6 }
 0x394   :  { %v1141_v21 = vadd.f32 1.0, %v1835_v16 }
 0x395   :  { %1838 = vrcp.f32 %v1122_v14  ;;  %v1134_v10 = vand.u32 2147483648, %v1122_v14  ;;  %v1132_v9 = vand.u32 2147483647, %v1122_v14  ;;  %vm1128_vm2 = vweird.f32 %v1122_v14 }
 0x396   :  { %1840 = vrcp.f32 %v1141_v21  ;;  %v1153_v25 = vand.u32 2147483648, %v1141_v21  ;;  %v1151_v7 = vand.u32 2147483647, %v1141_v21  ;;  %vm1147_vm3 = vweird.f32 %v1141_v21 }
 0x397   :  { %v1135_v27 = vor.u32 1.1754944e-38, %v1134_v10  ;;  %vm1133_vm6 = vcmp.eq.f32.partialorder %v1132_v9, 8.507059e+37 }
 0x398   :  { %vm1152_vm7 = vcmp.eq.f32.partialorder %v1151_v7, 8.507059e+37 }
 0x399   :  { %v1837_v20 = vpop.eup %1836 }
 0x39a   :  { %v1161_v23 = vadd.f32 1.0, %v1837_v20 }
 0x39b   :  { %v1839_v17 = vpop.eup %1838 }
 0x39c   :  { %v1841_v22 = vpop.eup %1840  ;;  %v1124_v15 = vmul.f32 %v1839_v17, %v1122_v14  ;;  %1842 = vrcp.f32 %v1161_v23  ;;  %vm1129_vm0 = vweird.f32 %v1839_v17  ;;  %v1173_v10 = vand.u32 2147483648, %v1161_v23 }
 0x39d   :  { %v1143_v28 = vmul.f32 %v1841_v22, %v1141_v21  ;;  %1844 = vtanh.f32 %v1117_v8  ;;  %vm1148_vm1 = vweird.f32 %v1841_v22  ;;  %vm1130_vm4 = vmor %vm1128_vm2, %vm1129_vm0  ;;  %vm1167_vm9 = vweird.f32 %v1161_v23 }
 0x39e   :  { %v1125_v6 = vsub.f32 1.0, %v1124_v15  ;;  %vm1149_vm5 = vmor %vm1147_vm3, %vm1148_vm1  ;;  %v1154_v15 = vor.u32 1.1754944e-38, %v1153_v25  ;;  %v1171_v25 = vand.u32 2147483647, %v1161_v23 }
 0x39f   :  { %v1144_v16 = vsub.f32 1.0, %v1143_v28 }
 0x3a0   :  { %v1126_v0 = vmul.f32 %v1839_v17, %v1125_v6  ;;  %vm1172_vm11 = vcmp.eq.f32.partialorder %v1171_v25, 8.507059e+37 }
 0x3a1   :  { %v1145_v24 = vmul.f32 %v1841_v22, %v1144_v16 }
 0x3a2   :  { %v1843_v11 = vpop.eup %1842  ;;  %v1127_v20 = vadd.f32 %v1839_v17, %v1126_v0 }
 0x3a3   :  { %v1146_v59 = vadd.f32 %v1841_v22, %v1145_v24  ;;  %v1163_v29 = vmul.f32 %v1843_v11, %v1161_v23  ;;  %v1845_v8 = vpop.eup %1844  ;;  %vm1168_vm8 = vweird.f32 %v1843_v11 }
 0x3a4   :  { %v1131_v28 = vsel %vm1130_vm4, %v1839_v17, %v1127_v20  ;;  %vm1169_vm10 = vmor %vm1167_vm9, %vm1168_vm8  ;;  %v1174_v17 = vor.u32 1.1754944e-38, %v1173_v10  ;;  %v1758_v20 = vld [vmem:[%s3580_s1 + $0x30] sm:$0xff]  ;;  %vm27_vm8 = vcmask 7168  }
 0x3a5   :  { %v1136_v5 = vsel %vm1133_vm6, %v1135_v27, %v1131_v28  ;;  %v1150_v6 = vsel %vm1149_vm5, %v1841_v22, %v1146_v59  ;;  %v1164_v4 = vsub.f32 1.0, %v1163_v29  ;;  %v1187_v29 = vpop.permute.xlu2 %1186  ;;  %1514 = vperm.xlu0 %1765, %v1758_v20   ;;  %v3898_v27 = vld [vmem:[#allocation25_spill] sm:$0xff] }
 0x3a6   :  { %v1155_v16 = vsel %vm1152_vm7, %v1154_v15, %v1150_v6  ;;  %v1178_v30 = vmul.f32 %v1845_v8, %v1136_v5  ;;  %v3540_v59 = vadd.f32 %v1758_v20, %v3898_v27  ;;  %v3903_v27 = vmov 0.0  }
 0x3a7   :  { %v1177_v18 = vmul.f32 %v1155_v16, %v3382_v19  ;;  %v1165_v0 = vmul.f32 %v1843_v11, %v1164_v4  ;;  %v3899_v16 = vld [vmem:[#allocation51_spill] sm:$0xff]  ;;  %28 = vst.msk [vmem:[#allocation5] sm:$0xff] %vm27_vm8, %v3903_v27  ;;  %v3906_v27 = vld [vmem:[#allocation58_spill] sm:$0xff] }
 0x3a9   :  { %v3463_v14 = vadd.f32 %v1178_v30, %v1177_v18  ;;  %v1166_v21 = vadd.f32 %v1843_v11, %v1165_v0 }
 0x3ab   :  { %1846 = vtanh.f32 %v3463_v14  ;;  %v1170_v9 = vsel %vm1169_vm10, %v1843_v11, %v1166_v21 }
 0x3ac   :  { %v1175_v24 = vsel %vm1172_vm11, %v1174_v17, %v1170_v9 }
 0x3b1   :  { %v1847_v22 = vpop.eup %1846 }
 0x3b2   :  { %v1181_v5 = vmul.f32 %v1847_v22, %v1175_v24 }
 0x3b4   :  { %v1189_v7 = vmul.f32 %v1187_v29, %v1181_v5  ;;  %1215 = vmatmul.f32.vlgmr.msra.gmra.mxu0 %v1181_v5  ;;  %1235 = vmatmul.f32.vlgmr.msra.gmra.mxu1 %v1181_v5 }
 0x3b5   :  { %1255 = vmatmul.f32.vlgmr.msra.gmra.mxu2 %v1181_v5  ;;  %1275 = vmatmul.f32.vlgmr.msra.gmra.mxu3 %v1181_v5 }
 0x3b6   :  { %v3467_v19 = vadd.f32 %v1189_v7, %v3386_v12  ;;  %1527 = vmatpush.msra.mxu0 %v2909_v31  ;;  %1547 = vmatpush.msra.mxu1 %v2915_v32  ;;  %v3868_v31 = vld [vmem:[#allocation7_spill] sm:$0xff]  ;;  %v3869_v32 = vld [vmem:[#allocation6_spill] sm:$0xff] }
 0x3b7   :  { %1567 = vmatpush.msra.mxu2 %v2921_v39  ;;  %1587 = vmatpush.msra.mxu3 %v2927_v33  ;;  %v3870_v39 = vld [vmem:[#allocation8_spill] sm:$0xff]  ;;  %v3871_v33 = vld [vmem:[#allocation9_spill] sm:$0xff] }
 0x3b8   :  { %1528 = vmatpush.msra.mxu0 %v2933_v34  ;;  %1548 = vmatpush.msra.mxu1 %v2939_v35  ;;  %v3872_v34 = vld [vmem:[#allocation11_spill] sm:$0xff]  ;;  %v3873_v35 = vld [vmem:[#allocation10_spill] sm:$0xff] }
 0x3b9   :  { %1568 = vmatpush.msra.mxu2 %v2945_v36  ;;  %1588 = vmatpush.msra.mxu3 %v2951_v37  ;;  %v3874_v36 = vld [vmem:[#allocation12_spill] sm:$0xff]  ;;  %v3875_v37 = vld [vmem:[#allocation13_spill] sm:$0xff] }
 0x3ba   :  { %1529 = vmatpush.msra.mxu0 %v2957_v38  ;;  %1549 = vmatpush.msra.mxu1 %v2963_v40  ;;  %v3876_v38 = vld [vmem:[#allocation15_spill] sm:$0xff]  ;;  %v3877_v40 = vld [vmem:[#allocation14_spill] sm:$0xff] }
 0x3bb   :  { %1569 = vmatpush.msra.mxu2 %v2969_v41  ;;  %1589 = vmatpush.msra.mxu3 %v2975_v42  ;;  %v3878_v41 = vld [vmem:[#allocation16_spill] sm:$0xff]  ;;  %v3879_v42 = vld [vmem:[#allocation17_spill] sm:$0xff] }
 0x3bc   :  { %1530 = vmatpush.msra.mxu0 %v2981_v43  ;;  %1550 = vmatpush.msra.mxu1 %v2987_v47  ;;  %v3880_v43 = vld [vmem:[#allocation20_spill] sm:$0xff]  ;;  %v3881_v47 = vld [vmem:[#allocation19_spill] sm:$0xff] }
 0x3bd   :  { %1570 = vmatpush.msra.mxu2 %v2993_v55  ;;  %1590 = vmatpush.msra.mxu3 %v2999_v46  ;;  %v3882_v55 = vld [vmem:[#allocation18_spill] sm:$0xff]  ;;  %v3883_v46 = vld [vmem:[#allocation21_spill] sm:$0xff] }
 0x3be   :  { %1531 = vmatpush.msra.mxu0 %v3005_v52  ;;  %1551 = vmatpush.msra.mxu1 %v3011_v56  ;;  %v3884_v52 = vld [vmem:[#allocation24_spill] sm:$0xff]  ;;  %v3885_v56 = vld [vmem:[#allocation23_spill] sm:$0xff] }
 0x3bf   :  { %1571 = vmatpush.msra.mxu2 %v3017_v62  ;;  %1591 = vmatpush.msra.mxu3 %v3023_v50  ;;  %v3886_v62 = vld [vmem:[#allocation26_spill] sm:$0xff]  ;;  %v3887_v50 = vld [vmem:[#allocation27_spill] sm:$0xff] }
 0x3c0   :  { %1532 = vmatpush.msra.mxu0 %v3029_v60  ;;  %1552 = vmatpush.msra.mxu1 %v3035_v49  ;;  %v3888_v60 = vld [vmem:[#allocation28_spill] sm:$0xff]  ;;  %v3889_v49 = vld [vmem:[#allocation29_spill] sm:$0xff] }
 0x3c1   :  { %1572 = vmatpush.msra.mxu2 %v3041_v44  ;;  %1592 = vmatpush.msra.mxu3 %v3047_v45  ;;  %v3890_v44 = vld [vmem:[#allocation30_spill] sm:$0xff]  ;;  %v3891_v45 = vld [vmem:[#allocation31_spill] sm:$0xff] }
 0x3c2   :  { %1533 = vmatpush.msra.mxu0 %v3053_v58  ;;  %1553 = vmatpush.msra.mxu1 %v3059_v51  ;;  %v3892_v58 = vld [vmem:[#allocation32_spill] sm:$0xff]  ;;  %v3893_v51 = vld [vmem:[#allocation33_spill] sm:$0xff] }
 0x3c3   :  { %1573 = vmatpush.msra.mxu2 %v3065_v13  ;;  %1593 = vmatpush.msra.mxu3 %v3071_v53  ;;  %v3894_v13 = vld [vmem:[#allocation22_spill] sm:$0xff] }
 0x3c4   :  { %1534 = vmatpush.msra.mxu0 %v3077_v48  ;;  %1554 = vmatpush.msra.mxu1 %v3083_v57  ;;  %v3895_v57 = vld [vmem:[#allocation49_spill] sm:$0xff] }
 0x3c5   :  { %1574 = vmatpush.msra.mxu2 %v3089_v26  ;;  %1594 = vmatpush.msra.mxu3 %v3095_v54  ;;  %v3896_v54 = vld [vmem:[#allocation50_spill] sm:$0xff] }
 0x3c6   :  { %1535 = vmatpush.msra.mxu0 %v3101_v63  ;;  %1555 = vmatpush.msra.mxu1 %v3107_v61 }
 0x3c7   :  { %1575 = vmatpush.msra.mxu2 %v3113_v1  ;;  %1595 = vmatpush.msra.mxu3 %v3119_v2 }
 0x3c8   :  { %1536 = vmatpush.msra.mxu0 %v3125_v3  ;;  %1556 = vmatpush.msra.mxu1 %v3868_v31  ;;  %v3897_v3 = vld [vmem:[#allocation52_spill] sm:$0xff] }
 0x3c9   :  { %1576 = vmatpush.msra.mxu2 %v3869_v32  ;;  %1596 = vmatpush.msra.mxu3 %v3870_v39 }
 0x3ca   :  { %1537 = vmatpush.msra.mxu0 %v3871_v33  ;;  %1557 = vmatpush.msra.mxu1 %v3872_v34 }
 0x3cb   :  { %1577 = vmatpush.msra.mxu2 %v3873_v35  ;;  %1597 = vmatpush.msra.mxu3 %v3874_v36 }
 0x3cc   :  { %1538 = vmatpush.msra.mxu0 %v3875_v37  ;;  %1558 = vmatpush.msra.mxu1 %v3876_v38 }
 0x3cd   :  { %1578 = vmatpush.msra.mxu2 %v3877_v40  ;;  %1598 = vmatpush.msra.mxu3 %v3878_v41 }
 0x3ce   :  { %1539 = vmatpush.msra.mxu0 %v3879_v42  ;;  %1559 = vmatpush.msra.mxu1 %v3880_v43 }
 0x3cf   :  { %1579 = vmatpush.msra.mxu2 %v3881_v47  ;;  %1599 = vmatpush.msra.mxu3 %v3882_v55 }
 0x3d0   :  { %1540 = vmatpush.msra.mxu0 %v3883_v46  ;;  %1560 = vmatpush.msra.mxu1 %v3884_v52 }
 0x3d1   :  { %1580 = vmatpush.msra.mxu2 %v3885_v56  ;;  %1600 = vmatpush.msra.mxu3 %v3886_v62 }
 0x3d2   :  { %1541 = vmatpush.msra.mxu0 %v3887_v50  ;;  %1561 = vmatpush.msra.mxu1 %v3888_v60 }
 0x3d3   :  { %1581 = vmatpush.msra.mxu2 %v3889_v49  ;;  %1601 = vmatpush.msra.mxu3 %v3890_v44 }
 0x3d4   :  { %1542 = vmatpush.msra.mxu0 %v3891_v45  ;;  %1562 = vmatpush.msra.mxu1 %v3892_v58 }
 0x3d5   :  { %1582 = vmatpush.msra.mxu2 %v3893_v51  ;;  %1602 = vmatpush.msra.mxu3 %v3894_v13 }
 0x3e3   :  { %v1351_v45 = vpop.permute.xlu2 %1350 }
 0x431   :  { %v1216_v53 = vpop.f32.mrf.mxu0  ;;  %v1236_v48 = vpop.f32.mrf.mxu1 }
 0x432   :  { %v1279_v26 = vadd.f32 %v1216_v53, %v3895_v57  ;;  %v1280_v63 = vadd.f32 %v1236_v48, %v3896_v54  ;;  %v3900_v57 = vld [vmem:[#allocation53_spill] sm:$0xff]  ;;  %v3901_v54 = vld [vmem:[#allocation54_spill] sm:$0xff] }
 0x434   :  { %v1751_v61 = vmul.f32 -1.442695, %v1279_v26  ;;  %v1752_v1 = vmul.f32 -1.442695, %v1280_v63 }
 0x436   :  { %1848 = vpow2.f32 %v1751_v61 }
 0x437   :  { %1850 = vpow2.f32 %v1752_v1 }
 0x438   :  { %v1276_v2 = vpop.f32.mrf.mxu3  ;;  %v1256_v15 = vpop.f32.mrf.mxu2 }
 0x439   :  { %v1282_v12 = vadd.f32 %v1276_v2, %v3897_v3  ;;  %v1281_v0 = vadd.f32 %v1256_v15, %v3899_v16  ;;  %v3902_v3 = vld [vmem:[#allocation56_spill] sm:$0xff] }
 0x43b   :  { %v1753_v18 = vmul.f32 -1.442695, %v1282_v12 }
 0x43c   :  { %v1849_v30 = vpop.eup %1848 }
 0x43d   :  { %v1851_v4 = vpop.eup %1850  ;;  %v1286_v11 = vadd.f32 1.0, %v1849_v30  ;;  %1852 = vpow2.f32 %v1753_v18 }
 0x43e   :  { %v1305_v23 = vadd.f32 1.0, %v1851_v4 }
 0x43f   :  { %1854 = vrcp.f32 %v1286_v11  ;;  %v1298_v22 = vand.u32 2147483648, %v1286_v11  ;;  %v1296_v5 = vand.u32 2147483647, %v1286_v11  ;;  %vm1292_vm14 = vweird.f32 %v1286_v11 }
 0x440   :  { %1856 = vrcp.f32 %v1305_v23  ;;  %v1317_v29 = vand.u32 2147483648, %v1305_v23  ;;  %v1315_v31 = vand.u32 2147483647, %v1305_v23  ;;  %vm1311_vm15 = vweird.f32 %v1305_v23 }
 0x441   :  { %v1299_v33 = vor.u32 1.1754944e-38, %v1298_v22  ;;  %vm1297_vm2 = vcmp.eq.f32.partialorder %v1296_v5, 8.507059e+37 }
 0x442   :  { %v1318_v36 = vor.u32 1.1754944e-38, %v1317_v29  ;;  %vm1316_vm3 = vcmp.eq.f32.partialorder %v1315_v31, 8.507059e+37 }
 0x443   :  { %v1853_v28 = vpop.eup %1852 }
 0x444   :  { %v1325_v8 = vadd.f32 1.0, %v1853_v28 }
 0x445   :  { %v1855_v6 = vpop.eup %1854 }
 0x446   :  { %v1857_v21 = vpop.eup %1856  ;;  %v1288_v10 = vmul.f32 %v1855_v6, %v1286_v11  ;;  %1858 = vrcp.f32 %v1325_v8  ;;  %vm1293_vm12 = vweird.f32 %v1855_v6  ;;  %v1337_v62 = vand.u32 2147483648, %v1325_v8 }
 0x447   :  { %v1307_v25 = vmul.f32 %v1857_v21, %v1305_v23  ;;  %1860 = vtanh.f32 %v1281_v0  ;;  %vm1312_vm13 = vweird.f32 %v1857_v21  ;;  %vm1294_vm0 = vmor %vm1292_vm14, %vm1293_vm12  ;;  %vm1331_vm5 = vweird.f32 %v1325_v8  ;;  %v1762_v23 = vld [vmem:[%s3580_s1 + $0x38] sm:$0xff] }
 0x448   :  { %v1289_v9 = vsub.f32 1.0, %v1288_v10  ;;  %vm1313_vm1 = vmor %vm1311_vm15, %vm1312_vm13  ;;  %v1335_v50 = vand.u32 2147483647, %v1325_v8  ;;  %v1338_v49 = vor.u32 1.1754944e-38, %v1337_v62  ;;  %1678 = vperm.xlu1 %1766, %v1762_v23   ;;  %v1683_v10 = vadd.f32 %v1762_v23, %v3540_v59  ;;  %v3905_v23 = vld [vmem:[#allocation57_spill] sm:$0xff] }
 0x449   :  { %v1308_v17 = vsub.f32 1.0, %v1307_v25 }
 0x44a   :  { %v1290_v24 = vmul.f32 %v1855_v6, %v1289_v9  ;;  %vm1336_vm7 = vcmp.eq.f32.partialorder %v1335_v50, 8.507059e+37 }
 0x44b   :  { %v1309_v7 = vmul.f32 %v1857_v21, %v1308_v17 }
 0x44c   :  { %v1859_v32 = vpop.eup %1858  ;;  %v1291_v39 = vadd.f32 %v1855_v6, %v1290_v24  ;;  %v1689_v24 = vld [vmem:[#allocation5] sm:$0xff] }
 0x44d   :  { %v1310_v34 = vadd.f32 %v1857_v21, %v1309_v7  ;;  %v1327_v35 = vmul.f32 %v1859_v32, %v1325_v8  ;;  %v1861_v38 = vpop.eup %1860  ;;  %vm1332_vm4 = vweird.f32 %v1859_v32  ;;  %v1690_v31 = vadd.f32 %v1689_v24, %v1683_v10 }
 0x44e   :  { %v1295_v37 = vsel %vm1294_vm0, %v1855_v6, %v1291_v39  ;;  %vm1333_vm6 = vmor %vm1331_vm5, %vm1332_vm4  ;;  %v3904_v6 = vld [vmem:[#allocation55_spill] sm:$0xff] }
 0x44f   :  { %v1300_v40 = vsel %vm1297_vm2, %v1299_v33, %v1295_v37  ;;  %v1314_v41 = vsel %vm1313_vm1, %v1857_v21, %v1310_v34  ;;  %v1328_v42 = vsub.f32 1.0, %v1327_v35  ;;  %1692 = vst.msk [vmem:[#allocation5] sm:$0xff] %vm27_vm8, %v1690_v31 }
 0x450   :  { %v1319_v43 = vsel %vm1316_vm3, %v1318_v36, %v1314_v41  ;;  %v1342_v47 = vmul.f32 %v1861_v38, %v1300_v40 }
 0x451   :  { %v1341_v55 = vmul.f32 %v1319_v43, %v3463_v14  ;;  %v1329_v46 = vmul.f32 %v1859_v32, %v1328_v42 }
 0x453   :  { %v3544_v52 = vadd.f32 %v1342_v47, %v1341_v55  ;;  %v1330_v56 = vadd.f32 %v1859_v32, %v1329_v46 }
 0x455   :  { %1862 = vtanh.f32 %v3544_v52  ;;  %v1334_v60 = vsel %vm1333_vm6, %v1859_v32, %v1330_v56 }
 0x456   :  { %v1339_v58 = vsel %vm1336_vm7, %v1338_v49, %v1334_v60  ;;  %v1696_v50 = vld [vmem:[#allocation5] sm:$0xff] }
 0x457   :  { %v1697_v49 = vmax.f32 %v1696_v50, 1e-08 }
 0x459   :  { %vm1703_vm5 = vweird.f32 %v1697_v49 }
 0x45b   :  { %v1863_v44 = vpop.eup %1862 }
 0x45c   :  { %v1345_v51 = vmul.f32 %v1863_v44, %v1339_v58 }
 0x45e   :  { %v1353_v13 = vmul.f32 %v1351_v45, %v1345_v51  ;;  %1379 = vmatmul.f32.vlgmr.msrb.gmra.mxu0 %v1345_v51  ;;  %1399 = vmatmul.f32.vlgmr.msrb.gmra.mxu1 %v1345_v51 }
 0x45f   :  { %1419 = vmatmul.f32.vlgmr.msrb.gmra.mxu2 %v1345_v51  ;;  %1439 = vmatmul.f32.vlgmr.msrb.gmra.mxu3 %v1345_v51 }
 0x460   :  { %v3548_v14 = vadd.f32 %v1353_v13, %v3467_v19 }
 0x4db   :  { %v1380_v53 = vpop.f32.mrf.mxu0  ;;  %v1400_v48 = vpop.f32.mrf.mxu1 }
 0x4dc   :  { %v1443_v26 = vadd.f32 %v1380_v53, %v3900_v57  ;;  %v1444_v63 = vadd.f32 %v1400_v48, %v3901_v54  ;;  %v1515_v53 = vpop.permute.xlu0 %1514 }
 0x4de   :  { %v1755_v61 = vmul.f32 -1.442695, %v1443_v26  ;;  %v1756_v1 = vmul.f32 -1.442695, %v1444_v63  ;;  %v1709_v63 = vand.u32 2147483648, %v1697_v49 }
 0x4e0   :  { %1864 = vpow2.f32 %v1755_v61 }
 0x4e1   :  { %1866 = vpow2.f32 %v1756_v1  ;;  %v1707_v1 = vand.u32 2147483647, %v1697_v49 }
 0x4e2   :  { %v1440_v2 = vpop.f32.mrf.mxu3  ;;  %v1420_v20 = vpop.f32.mrf.mxu2 }
 0x4e3   :  { %v1446_v12 = vadd.f32 %v1440_v2, %v3902_v3  ;;  %v1445_v16 = vadd.f32 %v1420_v20, %v3904_v6  ;;  %vm1708_vm8 = vcmp.eq.f32.partialorder %v1707_v1, 8.507059e+37  ;;  %v3907_v6 = vld [vmem:[#allocation60_spill] sm:$0xff] }
 0x4e5   :  { %v1757_v18 = vmul.f32 -1.442695, %v1446_v12  ;;  %v1710_v12 = vor.u32 1.1754944e-38, %v1709_v63 }
 0x4e6   :  { %v1865_v30 = vpop.eup %1864 }
 0x4e7   :  { %v1867_v4 = vpop.eup %1866  ;;  %v1450_v11 = vadd.f32 1.0, %v1865_v30  ;;  %1868 = vpow2.f32 %v1757_v18 }
 0x4e8   :  { %v1469_v19 = vadd.f32 1.0, %v1867_v4 }
 0x4e9   :  { %1870 = vrcp.f32 %v1450_v11  ;;  %v1460_v22 = vand.u32 2147483647, %v1450_v11  ;;  %v1462_v29 = vand.u32 2147483648, %v1450_v11  ;;  %vm1456_vm11 = vweird.f32 %v1450_v11 }
 0x4ea   :  { %1872 = vrcp.f32 %v1469_v19  ;;  %v1481_v5 = vand.u32 2147483648, %v1469_v19  ;;  %v1479_v39 = vand.u32 2147483647, %v1469_v19  ;;  %vm1475_vm12 = vweird.f32 %v1469_v19 }
 0x4eb   :  { %v1463_v59 = vor.u32 1.1754944e-38, %v1462_v29  ;;  %vm1461_vm15 = vcmp.eq.f32.partialorder %v1460_v22, 8.507059e+37 }
 0x4ec   :  { %v1482_v37 = vor.u32 1.1754944e-38, %v1481_v5  ;;  %vm1480_vm0 = vcmp.eq.f32.partialorder %v1479_v39, 8.507059e+37  ;;  %v3908_v5 = vld [vmem:[#allocation59_spill] sm:$0xff] }
 0x4ed   :  { %v1869_v15 = vpop.eup %1868 }
 0x4ee   :  { %v1489_v28 = vadd.f32 1.0, %v1869_v15 }
 0x4ef   :  { %v1871_v8 = vpop.eup %1870 }
 0x4f0   :  { %v1873_v0 = vpop.eup %1872  ;;  %v1452_v21 = vmul.f32 %v1871_v8, %v1450_v11  ;;  %1874 = vrcp.f32 %v1489_v28  ;;  %vm1457_vm9 = vweird.f32 %v1871_v8  ;;  %v1501_v44 = vand.u32 2147483648, %v1489_v28 }
 0x4f1   :  { %v1471_v25 = vmul.f32 %v1873_v0, %v1469_v19  ;;  %1876 = vtanh.f32 %v1445_v16  ;;  %vm1476_vm10 = vweird.f32 %v1873_v0  ;;  %vm1458_vm13 = vmor %vm1456_vm11, %vm1457_vm9  ;;  %vm1495_vm2 = vweird.f32 %v1489_v28 }
 0x4f2   :  { %v1453_v9 = vsub.f32 1.0, %v1452_v21  ;;  %vm1477_vm14 = vmor %vm1475_vm12, %vm1476_vm10  ;;  %v1499_v45 = vand.u32 2147483647, %v1489_v28  ;;  %v1502_v51 = vor.u32 1.1754944e-38, %v1501_v44 }
 0x4f3   :  { %v1472_v17 = vsub.f32 1.0, %v1471_v25 }
 0x4f4   :  { %v1454_v7 = vmul.f32 %v1871_v8, %v1453_v9  ;;  %vm1500_vm4 = vcmp.eq.f32.partialorder %v1499_v45, 8.507059e+37 }
 0x4f5   :  { %v1473_v32 = vmul.f32 %v1873_v0, %v1472_v17 }
 0x4f6   :  { %v1875_v33 = vpop.eup %1874  ;;  %v1455_v34 = vadd.f32 %v1871_v8, %v1454_v7 }
 0x4f7   :  { %v1474_v35 = vadd.f32 %v1873_v0, %v1473_v32  ;;  %v1491_v36 = vmul.f32 %v1875_v33, %v1489_v28  ;;  %v1877_v40 = vpop.eup %1876  ;;  %vm1496_vm1 = vweird.f32 %v1875_v33 }
 0x4f8   :  { %v1459_v38 = vsel %vm1458_vm13, %v1871_v8, %v1455_v34  ;;  %vm1497_vm3 = vmor %vm1495_vm2, %vm1496_vm1 }
 0x4f9   :  { %v1464_v41 = vsel %vm1461_vm15, %v1463_v59, %v1459_v38  ;;  %v1478_v42 = vsel %vm1477_vm14, %v1873_v0, %v1474_v35  ;;  %v1492_v43 = vsub.f32 1.0, %v1491_v36 }
 0x4fa   :  { %v1483_v47 = vsel %vm1480_vm0, %v1482_v37, %v1478_v42  ;;  %v1506_v55 = vmul.f32 %v1877_v40, %v1464_v41 }
 0x4fb   :  { %v1505_v46 = vmul.f32 %v1483_v47, %v3544_v52  ;;  %v1493_v56 = vmul.f32 %v1875_v33, %v1492_v43 }
 0x4fd   :  { %v3562_v62 = vadd.f32 %v1506_v55, %v1505_v46  ;;  %v1494_v60 = vadd.f32 %v1875_v33, %v1493_v56 }
 0x4ff   :  { %1878 = vtanh.f32 %v3562_v62  ;;  %v1498_v58 = vsel %vm1497_vm3, %v1875_v33, %v1494_v60 }
 0x500   :  { %1880 = vrcp.f32 %v1697_v49  ;;  %v1503_v52 = vsel %vm1500_vm4, %v1502_v51, %v1498_v58 }
 0x505   :  { %v1879_v13 = vpop.eup %1878 }
 0x506   :  { %v1881_v48 = vpop.eup %1880  ;;  %v1509_v57 = vmul.f32 %v1879_v13, %v1503_v52 }
 0x507   :  { %v1699_v26 = vmul.f32 %v1881_v48, %v1697_v49  ;;  %vm1704_vm6 = vweird.f32 %v1881_v48 }
 0x508   :  { %v1517_v54 = vmul.f32 %v1515_v53, %v1509_v57  ;;  %1543 = vmatmul.f32.vlgmr.msra.gmra.mxu0 %v1509_v57  ;;  %1563 = vmatmul.f32.vlgmr.msra.gmra.mxu1 %v1509_v57  ;;  %vm1705_vm7 = vmor %vm1703_vm5, %vm1704_vm6 }
 0x509   :  { %1583 = vmatmul.f32.vlgmr.msra.gmra.mxu2 %v1509_v57  ;;  %1603 = vmatmul.f32.vlgmr.msra.gmra.mxu3 %v1509_v57  ;;  %v1700_v61 = vsub.f32 1.0, %v1699_v26 }
 0x50a   :  { %v3566_v2 = vadd.f32 %v1517_v54, %v3548_v14 }
 0x50b   :  { %v1701_v3 = vmul.f32 %v1881_v48, %v1700_v61 }
 0x50d   :  { %v1702_v18 = vadd.f32 %v1881_v48, %v1701_v3  ;;  %v1679_v3 = vpop.permute.xlu1 %1678 }
 0x50f   :  { %v1706_v30 = vsel %vm1705_vm7, %v1881_v48, %v1702_v18 }
 0x510   :  { %v1711_v4 = vsel %vm1708_vm8, %v1710_v12, %v1706_v30 }
 0x511   :  { %1716 = vperm.xlu2 %1767, %v1711_v4  }
 0x56b   :  { %v1717_v30 = vpop.permute.xlu2 %1716 }
 0x585   :  { %v1544_v11 = vpop.f32.mrf.mxu0  ;;  %v1564_v19 = vpop.f32.mrf.mxu1 }
 0x586   :  { %v1607_v20 = vadd.f32 %v1544_v11, %v3905_v23  ;;  %v1608_v15 = vadd.f32 %v1564_v19, %v3906_v27 }
 0x588   :  { %v1759_v28 = vmul.f32 -1.442695, %v1607_v20  ;;  %v1760_v8 = vmul.f32 -1.442695, %v1608_v15 }
 0x58a   :  { %1882 = vpow2.f32 %v1759_v28 }
 0x58b   :  { %1884 = vpow2.f32 %v1760_v8 }
 0x58c   :  { %v1604_v14 = vpop.f32.mrf.mxu3  ;;  %v1584_v17 = vpop.f32.mrf.mxu2 }
 0x58d   :  { %v1610_v16 = vadd.f32 %v1604_v14, %v3907_v6  ;;  %v1609_v7 = vadd.f32 %v1584_v17, %v3908_v5 }
 0x58f   :  { %v1761_v0 = vmul.f32 -1.442695, %v1610_v16 }
 0x590   :  { %v1883_v21 = vpop.eup %1882 }
 0x591   :  { %v1885_v10 = vpop.eup %1884  ;;  %v1614_v25 = vadd.f32 1.0, %v1883_v21  ;;  %1886 = vpow2.f32 %v1761_v0 }
 0x592   :  { %v1633_v9 = vadd.f32 1.0, %v1885_v10 }
 0x593   :  { %1888 = vrcp.f32 %v1614_v25  ;;  %v1626_v59 = vand.u32 2147483648, %v1614_v25  ;;  %v1624_v37 = vand.u32 2147483647, %v1614_v25  ;;  %vm1620_vm11 = vweird.f32 %v1614_v25 }
 0x594   :  { %1890 = vrcp.f32 %v1633_v9  ;;  %v1645_v35 = vand.u32 2147483648, %v1633_v9  ;;  %v1643_v40 = vand.u32 2147483647, %v1633_v9  ;;  %vm1639_vm12 = vweird.f32 %v1633_v9 }
 0x595   :  { %v1627_v43 = vor.u32 1.1754944e-38, %v1626_v59  ;;  %vm1625_vm15 = vcmp.eq.f32.partialorder %v1624_v37, 8.507059e+37 }
 0x596   :  { %v1646_v46 = vor.u32 1.1754944e-38, %v1645_v35  ;;  %vm1644_vm0 = vcmp.eq.f32.partialorder %v1643_v40, 8.507059e+37 }
 0x597   :  { %v1887_v22 = vpop.eup %1886 }
 0x598   :  { %v1653_v29 = vadd.f32 1.0, %v1887_v22 }
 0x599   :  { %v1889_v24 = vpop.eup %1888 }
 0x59a   :  { %v1891_v31 = vpop.eup %1890  ;;  %v1616_v32 = vmul.f32 %v1889_v24, %v1614_v25  ;;  %1892 = vrcp.f32 %v1653_v29  ;;  %vm1621_vm9 = vweird.f32 %v1889_v24  ;;  %v1665_v48 = vand.u32 2147483648, %v1653_v29 }
 0x59b   :  { %v1635_v39 = vmul.f32 %v1891_v31, %v1633_v9  ;;  %1894 = vtanh.f32 %v1609_v7  ;;  %vm1640_vm10 = vweird.f32 %v1891_v31  ;;  %vm1622_vm13 = vmor %vm1620_vm11, %vm1621_vm9  ;;  %vm1659_vm2 = vweird.f32 %v1653_v29 }
 0x59c   :  { %v1617_v33 = vsub.f32 1.0, %v1616_v32  ;;  %vm1641_vm14 = vmor %vm1639_vm12, %vm1640_vm10  ;;  %v1663_v57 = vand.u32 2147483647, %v1653_v29  ;;  %v1666_v54 = vor.u32 1.1754944e-38, %v1665_v48 }
 0x59d   :  { %v1636_v34 = vsub.f32 1.0, %v1635_v39 }
 0x59e   :  { %v1618_v36 = vmul.f32 %v1889_v24, %v1617_v33  ;;  %vm1664_vm4 = vcmp.eq.f32.partialorder %v1663_v57, 8.507059e+37 }
 0x59f   :  { %v1637_v38 = vmul.f32 %v1891_v31, %v1636_v34 }
 0x5a0   :  { %v1893_v41 = vpop.eup %1892  ;;  %v1619_v42 = vadd.f32 %v1889_v24, %v1618_v36 }
 0x5a1   :  { %v1638_v47 = vadd.f32 %v1891_v31, %v1637_v38  ;;  %v1655_v55 = vmul.f32 %v1893_v41, %v1653_v29  ;;  %v1895_v50 = vpop.eup %1894  ;;  %vm1660_vm1 = vweird.f32 %v1893_v41 }
 0x5a2   :  { %v1623_v56 = vsel %vm1622_vm13, %v1889_v24, %v1619_v42  ;;  %vm1661_vm3 = vmor %vm1659_vm2, %vm1660_vm1 }
 0x5a3   :  { %v1628_v60 = vsel %vm1625_vm15, %v1627_v43, %v1623_v56  ;;  %v1642_v49 = vsel %vm1641_vm14, %v1891_v31, %v1638_v47  ;;  %v1656_v44 = vsub.f32 1.0, %v1655_v55 }
 0x5a4   :  { %v1670_v45 = vmul.f32 %v1895_v50, %v1628_v60  ;;  %v1647_v58 = vsel %vm1644_vm0, %v1646_v46, %v1642_v49 }
 0x5a5   :  { %v1657_v51 = vmul.f32 %v1893_v41, %v1656_v44  ;;  %v1669_v13 = vmul.f32 %v1647_v58, %v3562_v62 }
 0x5a7   :  { %v1671_v53 = vadd.f32 %v1670_v45, %v1669_v13  ;;  %v1658_v52 = vadd.f32 %v1893_v41, %v1657_v51 }
 0x5a9   :  { %1896 = vtanh.f32 %v1671_v53  ;;  %v1662_v26 = vsel %vm1661_vm3, %v1893_v41, %v1658_v52 }
 0x5aa   :  { %v1667_v61 = vsel %vm1664_vm4, %v1666_v54, %v1662_v26 }
 0x5af   :  { %v1897_v63 = vpop.eup %1896 }
 0x5b0   :  { %v1673_v1 = vmul.f32 %v1897_v63, %v1667_v61 }
 0x5b2   :  { %v1681_v12 = vmul.f32 %v1679_v3, %v1673_v1 }
 0x5b4   :  { %v1682_v18 = vadd.f32 %v1681_v12, %v3566_v2 }
 0x5b6   :  { %v1719_v62 = vmul.f32 %v1717_v30, %v1682_v18 }
 0x5b8   :  { %1720 = vst [vmem:[%s3582_s5] sm:$0xff] %v1719_v62 }

</bundles_post_ra>
